<compile_context>
chip_gen: v6e
topology: v6e:2x2x1
jax: 0.10.0
libtpu: 0.0.40
codegen_flags: <defaults>
</compile_context>

<pallas_src>
import functools
import math

import numpy as np
import jax
import jax.numpy as jnp
from jax import lax
from jax.experimental import pallas as pl
from jax.experimental.pallas import tpu as pltpu

CTC_LOSS_THRESHOLD = 10000
LN_EPS = 1e-12          # espnet LayerNorm eps
TILE_M = 256            # row tile for the M-tiled kernels
_VMEM_LIMIT = 32 * 1024 * 1024   # fits the v7x scoped budget; also valid on v5e/v6e


def _mosaic_params(n_axes=1):
    return pltpu.CompilerParams(dimension_semantics=("parallel",) * n_axes,
                                vmem_limit_bytes=_VMEM_LIMIT)


def _ln(x, g, b):
    mean = jnp.mean(x, axis=-1, keepdims=True)
    var = jnp.mean(jnp.square(x - mean), axis=-1, keepdims=True)
    return (x - mean) * lax.rsqrt(var + LN_EPS) * g + b


# ----------------------------------------------------------------------------
# Pallas kernels
# ----------------------------------------------------------------------------
def _linear_kernel(x_ref, w_ref, b_ref, o_ref, *, activation):
    x = x_ref[...].astype(jnp.bfloat16)
    acc = jnp.dot(x, w_ref[...], preferred_element_type=jnp.float32) + b_ref[...]
    if activation == "relu":
        acc = jnp.maximum(acc, 0.0)
    o_ref[...] = acc


def pallas_linear(x, w, b, activation=None):
    """y = x @ w + b (optional ReLU). M-tiled, bf16 operands, f32 accumulation."""
    orig = x.shape
    K = orig[-1]
    N = w.shape[1]
    x2 = x.reshape(-1, K)
    M = x2.shape[0]
    tm = M if M <= TILE_M else TILE_M
    out = pl.pallas_call(
        functools.partial(_linear_kernel, activation=activation),
        out_shape=jax.ShapeDtypeStruct((M, N), jnp.float32),
        grid=(pl.cdiv(M, tm),),
        in_specs=[
            pl.BlockSpec((tm, K), lambda i: (i, 0)),
            pl.BlockSpec((K, N), lambda i: (0, 0)),
            pl.BlockSpec((1, N), lambda i: (0, 0)),
        ],
        out_specs=pl.BlockSpec((tm, N), lambda i: (i, 0)),
        compiler_params=_mosaic_params(1),
    )(x2, w.astype(jnp.bfloat16), b.reshape(1, N).astype(jnp.float32))
    return out.reshape(orig[:-1] + (N,))


def _layernorm_kernel(x_ref, g_ref, b_ref, o_ref):
    o_ref[...] = _ln(x_ref[...].astype(jnp.float32), g_ref[...], b_ref[...])


def pallas_layernorm(x, gamma, beta):
    shape = x.shape
    D = shape[-1]
    x2 = x.reshape(-1, D)
    M = x2.shape[0]
    tm = M if M <= TILE_M else TILE_M
    out = pl.pallas_call(
        _layernorm_kernel,
        out_shape=jax.ShapeDtypeStruct((M, D), jnp.float32),
        grid=(pl.cdiv(M, tm),),
        in_specs=[pl.BlockSpec((tm, D), lambda i: (i, 0)),
                  pl.BlockSpec((1, D), lambda i: (0, 0)),
                  pl.BlockSpec((1, D), lambda i: (0, 0))],
        out_specs=pl.BlockSpec((tm, D), lambda i: (i, 0)),
        compiler_params=_mosaic_params(1),
    )(x2, gamma.reshape(1, D), beta.reshape(1, D))
    return out.reshape(shape)


def _ln_linear_kernel(x_ref, g_ref, b_ref, w_ref, wb_ref, o_ref):
    xn = _ln(x_ref[...].astype(jnp.float32), g_ref[...], b_ref[...])
    o_ref[...] = jnp.dot(xn.astype(jnp.bfloat16), w_ref[...],
                         preferred_element_type=jnp.float32) + wb_ref[...]


def pallas_ln_linear(x, gamma, beta, w, b):
    """Fused LayerNorm + linear (decoder after-norm + output projection)."""
    # TODO(synk): for a real vocabulary, pad the projection N to a multiple of 128 for
    # lane-dense stores and slice back outside the kernel.
    shape = x.shape
    D = shape[-1]
    N = w.shape[1]
    x2 = x.reshape(-1, D)
    M = x2.shape[0]
    tm = M if M <= TILE_M else TILE_M
    out = pl.pallas_call(
        _ln_linear_kernel,
        out_shape=jax.ShapeDtypeStruct((M, N), jnp.float32),
        grid=(pl.cdiv(M, tm),),
        in_specs=[pl.BlockSpec((tm, D), lambda i: (i, 0)),
                  pl.BlockSpec((1, D), lambda i: (0, 0)),
                  pl.BlockSpec((1, D), lambda i: (0, 0)),
                  pl.BlockSpec((D, N), lambda i: (0, 0)),
                  pl.BlockSpec((1, N), lambda i: (0, 0))],
        out_specs=pl.BlockSpec((tm, N), lambda i: (i, 0)),
        compiler_params=_mosaic_params(1),
    )(x2, gamma.reshape(1, D), beta.reshape(1, D),
      w.astype(jnp.bfloat16), b.reshape(1, N))
    return out.reshape(shape[:-1] + (N,))


def _ffn_kernel(x_ref, g_ref, b_ref, w1_ref, b1_ref, w2_ref, b2_ref, o_ref):
    x = x_ref[...].astype(jnp.float32)
    xn = _ln(x, g_ref[...], b_ref[...])
    h = jnp.dot(xn.astype(jnp.bfloat16), w1_ref[...],
                preferred_element_type=jnp.float32) + b1_ref[...]
    h = jnp.maximum(h, 0.0)
    y = jnp.dot(h.astype(jnp.bfloat16), w2_ref[...],
                preferred_element_type=jnp.float32) + b2_ref[...]
    o_ref[...] = x + y


def pallas_ffn_block(x, gamma, beta, w1, b1, w2, b2):
    """residual + FF(LN(x)): fused LayerNorm + linear/ReLU/linear + residual, M-tiled."""
    B, T, D = x.shape
    E = w1.shape[1]
    x2 = x.reshape(-1, D)
    M = x2.shape[0]
    tm = M if M <= TILE_M else TILE_M
    out = pl.pallas_call(
        _ffn_kernel,
        out_shape=jax.ShapeDtypeStruct((M, D), jnp.float32),
        grid=(pl.cdiv(M, tm),),
        in_specs=[pl.BlockSpec((tm, D), lambda i: (i, 0)),
                  pl.BlockSpec((1, D), lambda i: (0, 0)),
                  pl.BlockSpec((1, D), lambda i: (0, 0)),
                  pl.BlockSpec((D, E), lambda i: (0, 0)),
                  pl.BlockSpec((1, E), lambda i: (0, 0)),
                  pl.BlockSpec((E, D), lambda i: (0, 0)),
                  pl.BlockSpec((1, D), lambda i: (0, 0))],
        out_specs=pl.BlockSpec((tm, D), lambda i: (i, 0)),
        compiler_params=_mosaic_params(1),
    )(x2, gamma.reshape(1, D), beta.reshape(1, D),
      w1.astype(jnp.bfloat16), b1.reshape(1, E),
      w2.astype(jnp.bfloat16), b2.reshape(1, D))
    return out.reshape(B, T, D)


def _mha_block_kernel(klen_ref, xq_ref, kv_ref, g_ref, b_ref,
                      wq_ref, bq_ref, wk_ref, bk_ref, wv_ref, bv_ref,
                      wo_ref, bo_ref, o_ref, *, H, scale, causal, self_attn):
    """Per-batch fused: LN(q-side) + per-head QKV + masked softmax + context + out-proj + residual."""
    bidx = pl.program_id(0)
    x = xq_ref[0].astype(jnp.float32)                        # (Tq, D)
    xn = _ln(x, g_ref[...], b_ref[...])
    if self_attn:
        mem = xn                                             # k/v = LN(x), same as espnet
    else:
        mem = kv_ref[0].astype(jnp.float32)                  # raw encoder memory
    xq_b = xn.astype(jnp.bfloat16)
    mem_b = mem.astype(jnp.bfloat16)
    Tq = x.shape[0]
    Tk = mem.shape[0]

    klen = klen_ref[bidx]
    kidx = lax.broadcasted_iota(jnp.int32, (Tq, Tk), 1)
    mask = kidx < klen
    if causal:
        qidx = lax.broadcasted_iota(jnp.int32, (Tq, Tk), 0)
        mask = jnp.logical_and(mask, kidx <= qidx)
    neg = jnp.float32(jnp.finfo(jnp.float32).min)

    acc = x + bo_ref[...]                                    # residual + output-proj bias
    for h in range(H):
        q = jnp.dot(xq_b, wq_ref[h], preferred_element_type=jnp.float32) + bq_ref[h]
        k = jnp.dot(mem_b, wk_ref[h], preferred_element_type=jnp.float32) + bk_ref[h]
        v = jnp.dot(mem_b, wv_ref[h], preferred_element_type=jnp.float32) + bv_ref[h]
        s = lax.dot_general(q.astype(jnp.bfloat16), k.astype(jnp.bfloat16),
                            (((1,), (1,)), ((), ())),
                            preferred_element_type=jnp.float32) * scale
        s = jnp.where(mask, s, neg)                          # fill / softmax kept in f32
        mrow = jnp.max(s, axis=-1, keepdims=True)
        e = jnp.exp(s - mrow)
        denom = jnp.sum(e, axis=-1, keepdims=True)
        attn = e * pl.reciprocal(denom, approx=True)
        attn = jnp.where(mask, attn, 0.0)                    # espnet masks again after softmax
        ctx = jnp.dot(attn.astype(jnp.bfloat16), v.astype(jnp.bfloat16),
                      preferred_element_type=jnp.float32)    # (Tq, dk)
        # concat over heads + Wo == sum_h ctx_h @ Wo[h*dk:(h+1)*dk, :]  -> lane-dense (Tq, D)
        acc = acc + jnp.dot(ctx.astype(jnp.bfloat16), wo_ref[h],
                            preferred_element_type=jnp.float32)
    o_ref[0] = acc


def pallas_mha_block(x, mem, klen, attn_p, ln_g, ln_b, H, *, causal, self_attn):
    """x: (B,Tq,D) query-side input (also residual); mem: (B,Tk,D); klen: (B,) int32 key lengths."""
    B, Tq, D = x.shape
    Tk = mem.shape[1]
    dk = D // H
    scale = 1.0 / math.sqrt(dk)
    bf = jnp.bfloat16
    wq = attn_p["wq"].reshape(D, H, dk).transpose(1, 0, 2).astype(bf)   # (H, D, dk)
    wk = attn_p["wk"].reshape(D, H, dk).transpose(1, 0, 2).astype(bf)
    wv = attn_p["wv"].reshape(D, H, dk).transpose(1, 0, 2).astype(bf)
    wo = attn_p["wo"].reshape(H, dk, D).astype(bf)                      # (H, dk, D)
    bq = attn_p["bq"].reshape(H, 1, dk)
    bk = attn_p["bk"].reshape(H, 1, dk)
    bv = attn_p["bv"].reshape(H, 1, dk)
    bo = attn_p["bo"].reshape(1, D)

    grid_spec = pltpu.PrefetchScalarGridSpec(
        num_scalar_prefetch=1,
        grid=(B,),
        in_specs=[
            pl.BlockSpec((1, Tq, D), lambda b, *_: (b, 0, 0)),
            pl.BlockSpec((1, Tk, D), lambda b, *_: (b, 0, 0)),
            pl.BlockSpec((1, D), lambda b, *_: (0, 0)),
            pl.BlockSpec((1, D), lambda b, *_: (0, 0)),
            pl.BlockSpec((H, D, dk), lambda b, *_: (0, 0, 0)),
            pl.BlockSpec((H, 1, dk), lambda b, *_: (0, 0, 0)),
            pl.BlockSpec((H, D, dk), lambda b, *_: (0, 0, 0)),
            pl.BlockSpec((H, 1, dk), lambda b, *_: (0, 0, 0)),
            pl.BlockSpec((H, D, dk), lambda b, *_: (0, 0, 0)),
            pl.BlockSpec((H, 1, dk), lambda b, *_: (0, 0, 0)),
            pl.BlockSpec((H, dk, D), lambda b, *_: (0, 0, 0)),
            pl.BlockSpec((1, D), lambda b, *_: (0, 0)),
        ],
        out_specs=pl.BlockSpec((1, Tq, D), lambda b, *_: (b, 0, 0)),
    )
    return pl.pallas_call(
        functools.partial(_mha_block_kernel, H=H, scale=scale,
                          causal=causal, self_attn=self_attn),
        out_shape=jax.ShapeDtypeStruct((B, Tq, D), jnp.float32),
        grid_spec=grid_spec,
        compiler_params=_mosaic_params(1),
    )(klen.astype(jnp.int32), x, mem, ln_g.reshape(1, D), ln_b.reshape(1, D),
      wq, bq, wk, bk, wv, bv, wo, bo)


def _lsm_loss_kernel(logits_ref, tgt_ref, o_ref, *, conf, smooth, ignore_id):
    x = logits_ref[...].astype(jnp.float32)                  # (Nr, V)
    tgt = tgt_ref[...]                                       # (Nr, 1) int32
    mrow = jnp.max(x, axis=-1, keepdims=True)
    lse = jnp.log(jnp.sum(jnp.exp(x - mrow), axis=-1, keepdims=True)) + mrow
    logp = x - lse
    vidx = lax.broadcasted_iota(jnp.int32, x.shape, 1)
    t = jnp.where(vidx == tgt, conf, smooth).astype(jnp.float32)   # true_dist built in-kernel
    valid = (tgt != ignore_id).astype(jnp.float32)                 # (Nr, 1)
    tlogt = jnp.where(t > 0.0, t * jnp.log(jnp.maximum(t, 1e-30)), 0.0)   # xlogy-safe
    kl = (tlogt - t * logp) * valid
    denom = jnp.maximum(jnp.sum(valid, keepdims=True), 1.0)
    o_ref[...] = jnp.sum(kl, keepdims=True) / denom


def pallas_lsm_loss(logits, tgt, lsm_weight, ignore_id):
    """Label-smoothing KL loss, normalized by #non-ignored tokens (normalize_length=True)."""
    Nr, V = logits.shape
    conf = 1.0 - lsm_weight
    smooth = lsm_weight / (V - 1)
    out = pl.pallas_call(
        functools.partial(_lsm_loss_kernel, conf=conf, smooth=smooth, ignore_id=ignore_id),
        out_shape=jax.ShapeDtypeStruct((1, 1), jnp.float32),
        grid=(1,),
        in_specs=[pl.BlockSpec((Nr, V), lambda i: (0, 0)),
                  pl.BlockSpec((Nr, 1), lambda i: (0, 0))],
        out_specs=pl.BlockSpec((1, 1), lambda i: (0, 0)),
        compiler_params=pltpu.CompilerParams(vmem_limit_bytes=_VMEM_LIMIT),
    )(logits, tgt)
    return out[0, 0]


# ----------------------------------------------------------------------------
# Model glue (plain JAX under jit): im2col, positional encoding, layer wiring
# ----------------------------------------------------------------------------
def im2col_3x3_s2(x):
    """x: (B, C, H, W) -> patches (B, Ho, Wo, C*9), flatten order (in_c, kh, kw)."""
    B, C, H, W = x.shape
    Ho = (H - 3) // 2 + 1
    Wo = (W - 3) // 2 + 1
    cols = []
    for ic in range(C):
        for i in range(3):
            for j in range(3):
                cols.append(x[:, ic, i:i + 2 * (Ho - 1) + 1:2, j:j + 2 * (Wo - 1) + 1:2])
    return jnp.stack(cols, axis=-1)


def positional_encoding(T, d):
    pos = np.arange(T, dtype=np.float32)[:, None]
    div = np.exp(np.arange(0, d, 2, dtype=np.float32) * -(math.log(10000.0) / d))
    pe = np.zeros((T, d), np.float32)
    pe[:, 0::2] = np.sin(pos * div)
    pe[:, 1::2] = np.cos(pos * div)
    return jnp.asarray(pe)


def encoder_forward(params, xs_pad, ilens, H):
    """Conv2dSubsampling (two 3x3/stride-2 convs + ReLU + Linear + PosEnc) + blocks + after-norm."""
    B, T, F = xs_pad.shape
    x = xs_pad[:, None, :, :]                                # NCHW (B,1,T,F), like PyTorch
    p1 = im2col_3x3_s2(x)                                    # (B,T1,F1,9)
    C = params["conv1_w"].shape[0]
    c1 = pallas_linear(p1, params["conv1_w"].reshape(C, -1).T, params["conv1_b"],
                       activation="relu")                    # (B,T1,F1,C)
    c1 = c1.transpose(0, 3, 1, 2)                            # (B,C,T1,F1)
    p2 = im2col_3x3_s2(c1)                                   # (B,T2,F2,C*9)
    c2 = pallas_linear(p2, params["conv2_w"].reshape(C, -1).T, params["conv2_b"],
                       activation="relu")                    # (B,T2,F2,C)
    B_, T2, F2, C_ = c2.shape
    c2 = c2.transpose(0, 1, 3, 2).reshape(B_, T2, C_ * F2)   # x.transpose(1,2).view(b,t,c*f)
    x = pallas_linear(c2, params["embed_w"], params["embed_b"])
    D = x.shape[-1]
    x = x * math.sqrt(D) + positional_encoding(T2, D)[None]
    # src_mask[:, :, :-2:2][:, :, :-2:2] keeps original frames 0,4,8,...  -> key lengths only
    hs_klen = jnp.sum((4 * jnp.arange(T2))[None, :] < ilens[:, None], axis=1).astype(jnp.int32)
    for lp in params["enc_layers"]:
        x = pallas_mha_block(x, x, hs_klen, lp["self_attn"], lp["ln1_g"], lp["ln1_b"],
                             H, causal=False, self_attn=True)
        x = pallas_ffn_block(x, lp["ln2_g"], lp["ln2_b"],
                             lp["ff_w1"], lp["ff_b1"], lp["ff_w2"], lp["ff_b2"])
    x = pallas_layernorm(x, params["enc_after_g"], params["enc_after_b"])
    return x, hs_klen


def decoder_forward(params, ys_in, ys_klen, hs, hs_klen, H):
    emb = params["dec_embed"][ys_in]                         # embedding gather (glue)
    D = emb.shape[-1]
    x = emb * math.sqrt(D) + positional_encoding(emb.shape[1], D)[None]
    for lp in params["dec_layers"]:
        x = pallas_mha_block(x, x, ys_klen, lp["self_attn"], lp["ln1_g"], lp["ln1_b"],
                             H, causal=True, self_attn=True)
        x = pallas_mha_block(x, hs, hs_klen, lp["src_attn"], lp["ln2_g"], lp["ln2_b"],
                             H, causal=False, self_attn=False)
        x = pallas_ffn_block(x, lp["ln3_g"], lp["ln3_b"],
                             lp["ff_w1"], lp["ff_b1"], lp["ff_w2"], lp["ff_b2"])
    return pallas_ln_linear(x, params["dec_after_g"], params["dec_after_b"],
                            params["out_w"], params["out_b"])


@functools.partial(jax.jit, static_argnames=("aheads", "odim", "lsm_weight", "ignore_id"))
def _e2e_device_forward(params, xs_pad, ilens, ys_in, ys_out,
                        aheads, odim, lsm_weight, ignore_id):
    hs_pad, hs_klen = encoder_forward(params, xs_pad, ilens, aheads)
    ys_klen = jnp.sum(ys_in != ignore_id, axis=1).astype(jnp.int32)    # target_mask lengths
    pred = decoder_forward(params, ys_in, ys_klen, hs_pad, hs_klen, aheads)   # (B,L,odim)

    logits = pred.reshape(-1, odim)
    tgt = ys_out.reshape(-1, 1).astype(jnp.int32)
    loss_att = pallas_lsm_loss(logits, tgt, lsm_weight, ignore_id)

    # th_accuracy (glue)
    tgt_flat = ys_out.reshape(-1)
    valid = tgt_flat != ignore_id
    pred_ids = jnp.argmax(logits, axis=-1).astype(tgt_flat.dtype)
    correct = jnp.sum(jnp.where(valid, pred_ids == tgt_flat, False))
    acc = correct.astype(jnp.float32) / jnp.maximum(jnp.sum(valid), 1).astype(jnp.float32)
    return loss_att, acc


def add_sos_eos_np(ys_pad, sos, eos, ignore_id):
    B = ys_pad.shape[0]
    ys = [y[y != ignore_id] for y in ys_pad]
    maxL = max(len(y) for y in ys) + 1
    ys_in = np.full((B, maxL), eos, np.int32)
    ys_out = np.full((B, maxL), ignore_id, np.int32)
    for b, y in enumerate(ys):
        ys_in[b, 0] = sos
        ys_in[b, 1:1 + len(y)] = y
        ys_out[b, :len(y)] = y
        ys_out[b, len(y)] = eos
    return ys_in, ys_out


def e2e_forward(params, xs_pad, ilens, ys_pad, *, odim, aheads,
                ignore_id=-1, lsm_weight=0.1, mtlalpha=0.0):
    """Mirror of E2E.forward for the mtlalpha=0.0 / non-streaming configuration."""
    ilens = np.asarray(ilens)
    Tmax = int(np.max(ilens))
    xs_pad = jnp.asarray(xs_pad)[:, :Tmax]
    sos = eos = odim - 1
    ys_in, ys_out = add_sos_eos_np(np.asarray(ys_pad), sos, eos, ignore_id)

    loss_att, acc = _e2e_device_forward(
        params, xs_pad, jnp.asarray(ilens.astype(np.int32)),
        jnp.asarray(ys_in), jnp.asarray(ys_out),
        aheads=aheads, odim=odim, lsm_weight=float(lsm_weight), ignore_id=int(ignore_id))

    # ---- CTC branch: mtlalpha == 0.0 -> disabled (self.ctc is None in the module) ----
    # TODO(synk): CTC forward-backward loss (mtlalpha > 0 path) not implemented in Pallas.
    loss_ctc = 0.0
    cer_ctc = 0.0
    alpha = mtlalpha
    if alpha == 0.0:
        loss = loss_att
        loss_ctc_data = 0.0
    else:  # not exercised in this script
        loss = alpha * loss_ctc + (1 - alpha) * loss_att
        loss_ctc_data = float(loss_ctc)

    loss_att_host, loss_host, acc_host = jax.device_get((loss_att, loss, acc))
    loss_data = float(loss_host)
    if not (loss_data < CTC_LOSS_THRESHOLD and not math.isnan(loss_data)):
        pass  # module only logs a warning; same tuple is returned either way
    return (loss, loss_data, loss_ctc_data, float(loss_att_host),
            float(acc_host), float(cer_ctc))


# ----------------------------------------------------------------------------
# Deterministic parameter init (shapes follow the module's __init__)
# ----------------------------------------------------------------------------
def _dense(key, shape, scale=0.1):
    return jax.random.normal(key, shape, jnp.float32) * scale


def _init_attn(key, D):
    ks = jax.random.split(key, 4)
    z = jnp.zeros((D,), jnp.float32)
    return {"wq": _dense(ks[0], (D, D)), "bq": z, "wk": _dense(ks[1], (D, D)), "bk": z,
            "wv": _dense(ks[2], (D, D)), "bv": z, "wo": _dense(ks[3], (D, D)), "bo": z}


def init_params(key, idim, odim, adim, eunits, elayers, dunits, dlayers):
    keys = iter(jax.random.split(key, 64))
    F2 = ((idim - 1) // 2 - 1) // 2
    p = {
        "conv1_w": _dense(next(keys), (adim, 1, 3, 3)),
        "conv1_b": jnp.zeros((adim,), jnp.float32),
        "conv2_w": _dense(next(keys), (adim, adim, 3, 3), scale=0.05),
        "conv2_b": jnp.zeros((adim,), jnp.float32),
        "embed_w": _dense(next(keys), (adim * F2, adim)),
        "embed_b": jnp.zeros((adim,), jnp.float32),
        "enc_after_g": jnp.ones((adim,), jnp.float32),
        "enc_after_b": jnp.zeros((adim,), jnp.float32),
        "dec_embed": _dense(next(keys), (odim, adim)),
        "dec_after_g": jnp.ones((adim,), jnp.float32),
        "dec_after_b": jnp.zeros((adim,), jnp.float32),
        "out_w": _dense(next(keys), (adim, odim)),
        "out_b": jnp.zeros((odim,), jnp.float32),
    }
    enc_layers = []
    for _ in range(elayers):
        enc_layers.append({
            "self_attn": _init_attn(next(keys), adim),
            "ln1_g": jnp.ones((adim,), jnp.float32), "ln1_b": jnp.zeros((adim,), jnp.float32),
            "ln2_g": jnp.ones((adim,), jnp.float32), "ln2_b": jnp.zeros((adim,), jnp.float32),
            "ff_w1": _dense(next(keys), (adim, eunits)), "ff_b1": jnp.zeros((eunits,), jnp.float32),
            "ff_w2": _dense(next(keys), (eunits, adim)), "ff_b2": jnp.zeros((adim,), jnp.float32),
        })
    p["enc_layers"] = enc_layers
    dec_layers = []
    for _ in range(dlayers):
        dec_layers.append({
            "self_attn": _init_attn(next(keys), adim),
            "src_attn": _init_attn(next(keys), adim),
            "ln1_g": jnp.ones((adim,), jnp.float32), "ln1_b": jnp.zeros((adim,), jnp.float32),
            "ln2_g": jnp.ones((adim,), jnp.float32), "ln2_b": jnp.zeros((adim,), jnp.float32),
            "ln3_g": jnp.ones((adim,), jnp.float32), "ln3_b": jnp.zeros((adim,), jnp.float32),
            "ff_w1": _dense(next(keys), (adim, dunits)), "ff_b1": jnp.zeros((dunits,), jnp.float32),
            "ff_w2": _dense(next(keys), (dunits, adim)), "ff_b2": jnp.zeros((adim,), jnp.float32),
        })
    p["dec_layers"] = dec_layers
    return p


# ----------------------------------------------------------------------------
if __name__ == "__main__":
    B, Tmax, idim = 2, 16, 16
    odim = 11
    adim, aheads = 32, 4
    eunits, elayers = 48, 2
    dunits, dlayers = 48, 1

    key = jax.random.PRNGKey(0)
    kp, kx = jax.random.split(key)
    params = init_params(kp, idim, odim, adim, eunits, elayers, dunits, dlayers)

    xs_pad = jax.random.normal(kx, (B, Tmax, idim), jnp.float32)
    ilens = np.array([16, 12], np.int32)
    ys_pad = np.array([[1, 2, 3, 4, 5],
                       [6, 7, 8, -1, -1]], np.int32)

    outs = e2e_forward(params, xs_pad, ilens, ys_pad, odim=odim, aheads=aheads,
                       ignore_id=-1, lsm_weight=0.1, mtlalpha=0.0)
    jax.block_until_ready(outs[0])
    assert np.isfinite(outs[1])
    print("KERNEL_OK")
</pallas_src>

<mosaic_0001>
module attributes {stable_mosaic.version = 11 : i64} {
  func.func @_mha_block_kernel(%arg0: i32, %arg1: memref<2xi32, #tpu.memory_space<smem>>, %arg2: memref<1x6x32xf32, #tpu.memory_space<vmem>>, %arg3: memref<1x6x32xf32, #tpu.memory_space<vmem>>, %arg4: memref<1x32xf32, #tpu.memory_space<vmem>>, %arg5: memref<1x32xf32, #tpu.memory_space<vmem>>, %arg6: memref<4x32x8xbf16, #tpu.memory_space<vmem>>, %arg7: memref<4x1x8xf32, #tpu.memory_space<vmem>>, %arg8: memref<4x32x8xbf16, #tpu.memory_space<vmem>>, %arg9: memref<4x1x8xf32, #tpu.memory_space<vmem>>, %arg10: memref<4x32x8xbf16, #tpu.memory_space<vmem>>, %arg11: memref<4x1x8xf32, #tpu.memory_space<vmem>>, %arg12: memref<4x8x32xbf16, #tpu.memory_space<vmem>>, %arg13: memref<1x32xf32, #tpu.memory_space<vmem>>, %arg14: memref<1x6x32xf32, #tpu.memory_space<vmem>>) attributes {dimension_semantics = [#tpu.dimension_semantics<parallel>], iteration_bounds = array<i64: 2>, scalar_prefetch = 1 : i64, scratch_operands = 0 : i64, tpu.core_type = #tpu.core_type<tc>, window_params = [{transform_indices = @transform_0, window_bounds = array<i64: 1, 6, 32>}, {transform_indices = @transform_1, window_bounds = array<i64: 1, 6, 32>}, {pipeline_mode = #tpu.pipeline_mode<synchronous>, transform_indices = @transform_2, window_bounds = array<i64: 1, 32>}, {pipeline_mode = #tpu.pipeline_mode<synchronous>, transform_indices = @transform_3, window_bounds = array<i64: 1, 32>}, {pipeline_mode = #tpu.pipeline_mode<synchronous>, transform_indices = @transform_4, window_bounds = array<i64: 4, 32, 8>}, {pipeline_mode = #tpu.pipeline_mode<synchronous>, transform_indices = @transform_5, window_bounds = array<i64: 4, 1, 8>}, {pipeline_mode = #tpu.pipeline_mode<synchronous>, transform_indices = @transform_6, window_bounds = array<i64: 4, 32, 8>}, {pipeline_mode = #tpu.pipeline_mode<synchronous>, transform_indices = @transform_7, window_bounds = array<i64: 4, 1, 8>}, {pipeline_mode = #tpu.pipeline_mode<synchronous>, transform_indices = @transform_8, window_bounds = array<i64: 4, 32, 8>}, {pipeline_mode = #tpu.pipeline_mode<synchronous>, transform_indices = @transform_9, window_bounds = array<i64: 4, 1, 8>}, {pipeline_mode = #tpu.pipeline_mode<synchronous>, transform_indices = @transform_10, window_bounds = array<i64: 4, 8, 32>}, {pipeline_mode = #tpu.pipeline_mode<synchronous>, transform_indices = @transform_11, window_bounds = array<i64: 1, 32>}, {transform_indices = @transform_12, window_bounds = array<i64: 1, 6, 32>}]} {
    %c0 = arith.constant 0 : index
    %c0_0 = arith.constant 0 : index
    %c0_1 = arith.constant 0 : index
    %0 = vector.load %arg2[%c0, %c0_0, %c0_1] : memref<1x6x32xf32, #tpu.memory_space<vmem>>, vector<1x6x32xf32>
    %1 = vector.shape_cast %0 : vector<1x6x32xf32> to vector<6x32xf32>
    %c0_2 = arith.constant 0 : index
    %c0_3 = arith.constant 0 : index
    %2 = vector.load %arg4[%c0_2, %c0_3] : memref<1x32xf32, #tpu.memory_space<vmem>>, vector<1x32xf32>
    %c0_4 = arith.constant 0 : index
    %c0_5 = arith.constant 0 : index
    %3 = vector.load %arg5[%c0_4, %c0_5] : memref<1x32xf32, #tpu.memory_space<vmem>>, vector<1x32xf32>
    %cst = arith.constant dense<0.000000e+00> : vector<6xf32>
    %4 = vector.multi_reduction <add>, %1, %cst [1] : vector<6x32xf32> to vector<6xf32>
    %5 = vector.shape_cast %4 : vector<6xf32> to vector<6x1xf32>
    %cst_6 = arith.constant 3.200000e+01 : f32
    %6 = vector.broadcast %cst_6 : f32 to vector<6x1xf32>
    %7 = arith.divf %5, %6 : vector<6x1xf32>
    %8 = vector.broadcast %7 : vector<6x1xf32> to vector<6x32xf32>
    %9 = arith.subf %1, %8 : vector<6x32xf32>
    %10 = arith.mulf %9, %9 : vector<6x32xf32>
    %cst_7 = arith.constant dense<0.000000e+00> : vector<6xf32>
    %11 = vector.multi_reduction <add>, %10, %cst_7 [1] : vector<6x32xf32> to vector<6xf32>
    %12 = vector.shape_cast %11 : vector<6xf32> to vector<6x1xf32>
    %cst_8 = arith.constant 3.200000e+01 : f32
    %13 = vector.broadcast %cst_8 : f32 to vector<6x1xf32>
    %14 = arith.divf %12, %13 : vector<6x1xf32>
    %15 = vector.broadcast %7 : vector<6x1xf32> to vector<6x32xf32>
    %16 = arith.subf %1, %15 : vector<6x32xf32>
    %cst_9 = arith.constant 9.99999996E-13 : f32
    %17 = vector.broadcast %cst_9 : f32 to vector<6x1xf32>
    %18 = arith.addf %14, %17 : vector<6x1xf32>
    %19 = math.rsqrt %18 : vector<6x1xf32>
    %20 = vector.broadcast %19 : vector<6x1xf32> to vector<6x32xf32>
    %21 = arith.mulf %16, %20 : vector<6x32xf32>
    %22 = vector.broadcast %2 : vector<1x32xf32> to vector<6x32xf32>
    %23 = arith.mulf %21, %22 : vector<6x32xf32>
    %24 = vector.broadcast %3 : vector<1x32xf32> to vector<6x32xf32>
    %25 = arith.addf %23, %24 : vector<6x32xf32>
    %26 = arith.truncf %25 : vector<6x32xf32> to vector<6x32xbf16>
    %27 = arith.truncf %25 : vector<6x32xf32> to vector<6x32xbf16>
    %28 = arith.index_cast %arg0 : i32 to index
    %29 = memref.load %arg1[%28] : memref<2xi32, #tpu.memory_space<smem>>
    %30 = tpu.iota {dimensions = array<i32: 1>} : vector<6x6xi32>
    %31 = vector.broadcast %29 : i32 to vector<6x6xi32>
    %32 = arith.cmpi slt, %30, %31 : vector<6x6xi32>
    %33 = tpu.iota {dimensions = array<i32: 0>} : vector<6x6xi32>
    %34 = arith.cmpi sle, %30, %33 : vector<6x6xi32>
    %35 = arith.andi %32, %34 : vector<6x6xi1>
    %c0_10 = arith.constant 0 : index
    %c0_11 = arith.constant 0 : index
    %36 = vector.load %arg13[%c0_10, %c0_11] : memref<1x32xf32, #tpu.memory_space<vmem>>, vector<1x32xf32>
    %37 = vector.broadcast %36 : vector<1x32xf32> to vector<6x32xf32>
    %38 = arith.addf %1, %37 : vector<6x32xf32>
    %c0_12 = arith.constant 0 : index
    %c0_13 = arith.constant 0 : index
    %c0_14 = arith.constant 0 : index
    %39 = vector.load %arg6[%c0_12, %c0_13, %c0_14] : memref<4x32x8xbf16, #tpu.memory_space<vmem>>, vector<1x32x8xbf16>
    %40 = vector.shape_cast %39 : vector<1x32x8xbf16> to vector<32x8xbf16>
    %cst_15 = arith.constant dense<0.000000e+00> : vector<6x8xf32>
    %41 = tpu.matmul %26, %40, %cst_15 {dimension_numbers = #tpu.dot_dimension_numbers<[1], [0], [0], [1], [0, 0, 1, 1], [], []>} : vector<6x32xbf16>, vector<32x8xbf16>, vector<6x8xf32> -> vector<6x8xf32>
    %c0_16 = arith.constant 0 : index
    %c0_17 = arith.constant 0 : index
    %c0_18 = arith.constant 0 : index
    %42 = vector.load %arg7[%c0_16, %c0_17, %c0_18] : memref<4x1x8xf32, #tpu.memory_space<vmem>>, vector<1x1x8xf32>
    %43 = vector.shape_cast %42 : vector<1x1x8xf32> to vector<1x8xf32>
    %44 = vector.broadcast %43 : vector<1x8xf32> to vector<6x8xf32>
    %45 = arith.addf %41, %44 : vector<6x8xf32>
    %c0_19 = arith.constant 0 : index
    %c0_20 = arith.constant 0 : index
    %c0_21 = arith.constant 0 : index
    %46 = vector.load %arg8[%c0_19, %c0_20, %c0_21] : memref<4x32x8xbf16, #tpu.memory_space<vmem>>, vector<1x32x8xbf16>
    %47 = vector.shape_cast %46 : vector<1x32x8xbf16> to vector<32x8xbf16>
    %cst_22 = arith.constant dense<0.000000e+00> : vector<6x8xf32>
    %48 = tpu.matmul %27, %47, %cst_22 {dimension_numbers = #tpu.dot_dimension_numbers<[1], [0], [0], [1], [0, 0, 1, 1], [], []>} : vector<6x32xbf16>, vector<32x8xbf16>, vector<6x8xf32> -> vector<6x8xf32>
    %c0_23 = arith.constant 0 : index
    %c0_24 = arith.constant 0 : index
    %c0_25 = arith.constant 0 : index
    %49 = vector.load %arg9[%c0_23, %c0_24, %c0_25] : memref<4x1x8xf32, #tpu.memory_space<vmem>>, vector<1x1x8xf32>
    %50 = vector.shape_cast %49 : vector<1x1x8xf32> to vector<1x8xf32>
    %51 = vector.broadcast %50 : vector<1x8xf32> to vector<6x8xf32>
    %52 = arith.addf %48, %51 : vector<6x8xf32>
    %c0_26 = arith.constant 0 : index
    %c0_27 = arith.constant 0 : index
    %c0_28 = arith.constant 0 : index
    %53 = vector.load %arg10[%c0_26, %c0_27, %c0_28] : memref<4x32x8xbf16, #tpu.memory_space<vmem>>, vector<1x32x8xbf16>
    %54 = vector.shape_cast %53 : vector<1x32x8xbf16> to vector<32x8xbf16>
    %cst_29 = arith.constant dense<0.000000e+00> : vector<6x8xf32>
    %55 = tpu.matmul %27, %54, %cst_29 {dimension_numbers = #tpu.dot_dimension_numbers<[1], [0], [0], [1], [0, 0, 1, 1], [], []>} : vector<6x32xbf16>, vector<32x8xbf16>, vector<6x8xf32> -> vector<6x8xf32>
    %c0_30 = arith.constant 0 : index
    %c0_31 = arith.constant 0 : index
    %c0_32 = arith.constant 0 : index
    %56 = vector.load %arg11[%c0_30, %c0_31, %c0_32] : memref<4x1x8xf32, #tpu.memory_space<vmem>>, vector<1x1x8xf32>
    %57 = vector.shape_cast %56 : vector<1x1x8xf32> to vector<1x8xf32>
    %58 = vector.broadcast %57 : vector<1x8xf32> to vector<6x8xf32>
    %59 = arith.addf %55, %58 : vector<6x8xf32>
    %60 = arith.truncf %45 : vector<6x8xf32> to vector<6x8xbf16>
    %61 = arith.truncf %52 : vector<6x8xf32> to vector<6x8xbf16>
    %cst_33 = arith.constant dense<0.000000e+00> : vector<6x6xf32>
    %62 = tpu.matmul %60, %61, %cst_33 {dimension_numbers = #tpu.dot_dimension_numbers<[1], [1], [0], [0], [0, 0, 1, 0], [], []>} : vector<6x8xbf16>, vector<6x8xbf16>, vector<6x6xf32> -> vector<6x6xf32>
    %cst_34 = arith.constant 0.353553385 : f32
    %63 = vector.broadcast %cst_34 : f32 to vector<6x6xf32>
    %64 = arith.mulf %62, %63 : vector<6x6xf32>
    %cst_35 = arith.constant -3.40282347E+38 : f32
    %65 = vector.broadcast %cst_35 : f32 to vector<6x6xf32>
    %66 = arith.select %35, %64, %65 : vector<6x6xi1>, vector<6x6xf32>
    %cst_36 = arith.constant dense<0xFF800000> : vector<6xf32>
    %67 = vector.multi_reduction <maximumf>, %66, %cst_36 [1] : vector<6x6xf32> to vector<6xf32>
    %68 = vector.shape_cast %67 : vector<6xf32> to vector<6x1xf32>
    %69 = vector.broadcast %68 : vector<6x1xf32> to vector<6x6xf32>
    %70 = arith.subf %66, %69 : vector<6x6xf32>
    %71 = math.exp %70 : vector<6x6xf32>
    %cst_37 = arith.constant dense<0.000000e+00> : vector<6xf32>
    %72 = vector.multi_reduction <add>, %71, %cst_37 [1] : vector<6x6xf32> to vector<6xf32>
    %73 = vector.shape_cast %72 : vector<6xf32> to vector<6x1xf32>
    %74 = tpu.reciprocal %73 {approx = true} : vector<6x1xf32> -> vector<6x1xf32>
    %75 = vector.broadcast %74 : vector<6x1xf32> to vector<6x6xf32>
    %76 = arith.mulf %71, %75 : vector<6x6xf32>
    %cst_38 = arith.constant 0.000000e+00 : f32
    %77 = vector.broadcast %cst_38 : f32 to vector<6x6xf32>
    %78 = arith.select %35, %76, %77 : vector<6x6xi1>, vector<6x6xf32>
    %79 = arith.truncf %78 : vector<6x6xf32> to vector<6x6xbf16>
    %80 = arith.truncf %59 : vector<6x8xf32> to vector<6x8xbf16>
    %cst_39 = arith.constant dense<0.000000e+00> : vector<6x8xf32>
    %81 = tpu.matmul %79, %80, %cst_39 {dimension_numbers = #tpu.dot_dimension_numbers<[1], [0], [0], [1], [0, 0, 1, 1], [], []>} : vector<6x6xbf16>, vector<6x8xbf16>, vector<6x8xf32> -> vector<6x8xf32>
    %82 = arith.truncf %81 : vector<6x8xf32> to vector<6x8xbf16>
    %c0_40 = arith.constant 0 : index
    %c0_41 = arith.constant 0 : index
    %c0_42 = arith.constant 0 : index
    %83 = vector.load %arg12[%c0_40, %c0_41, %c0_42] : memref<4x8x32xbf16, #tpu.memory_space<vmem>>, vector<1x8x32xbf16>
    %84 = vector.shape_cast %83 : vector<1x8x32xbf16> to vector<8x32xbf16>
    %cst_43 = arith.constant dense<0.000000e+00> : vector<6x32xf32>
    %85 = tpu.matmul %82, %84, %cst_43 {dimension_numbers = #tpu.dot_dimension_numbers<[1], [0], [0], [1], [0, 0, 1, 1], [], []>} : vector<6x8xbf16>, vector<8x32xbf16>, vector<6x32xf32> -> vector<6x32xf32>
    %86 = arith.addf %38, %85 : vector<6x32xf32>
    %c1 = arith.constant 1 : index
    %c0_44 = arith.constant 0 : index
    %c0_45 = arith.constant 0 : index
    %87 = vector.load %arg6[%c1, %c0_44, %c0_45] : memref<4x32x8xbf16, #tpu.memory_space<vmem>>, vector<1x32x8xbf16>
    %88 = vector.shape_cast %87 : vector<1x32x8xbf16> to vector<32x8xbf16>
    %cst_46 = arith.constant dense<0.000000e+00> : vector<6x8xf32>
    %89 = tpu.matmul %26, %88, %cst_46 {dimension_numbers = #tpu.dot_dimension_numbers<[1], [0], [0], [1], [0, 0, 1, 1], [], []>} : vector<6x32xbf16>, vector<32x8xbf16>, vector<6x8xf32> -> vector<6x8xf32>
    %c1_47 = arith.constant 1 : index
    %c0_48 = arith.constant 0 : index
    %c0_49 = arith.constant 0 : index
    %90 = vector.load %arg7[%c1_47, %c0_48, %c0_49] : memref<4x1x8xf32, #tpu.memory_space<vmem>>, vector<1x1x8xf32>
    %91 = vector.shape_cast %90 : vector<1x1x8xf32> to vector<1x8xf32>
    %92 = vector.broadcast %91 : vector<1x8xf32> to vector<6x8xf32>
    %93 = arith.addf %89, %92 : vector<6x8xf32>
    %c1_50 = arith.constant 1 : index
    %c0_51 = arith.constant 0 : index
    %c0_52 = arith.constant 0 : index
    %94 = vector.load %arg8[%c1_50, %c0_51, %c0_52] : memref<4x32x8xbf16, #tpu.memory_space<vmem>>, vector<1x32x8xbf16>
    %95 = vector.shape_cast %94 : vector<1x32x8xbf16> to vector<32x8xbf16>
    %cst_53 = arith.constant dense<0.000000e+00> : vector<6x8xf32>
    %96 = tpu.matmul %27, %95, %cst_53 {dimension_numbers = #tpu.dot_dimension_numbers<[1], [0], [0], [1], [0, 0, 1, 1], [], []>} : vector<6x32xbf16>, vector<32x8xbf16>, vector<6x8xf32> -> vector<6x8xf32>
    %c1_54 = arith.constant 1 : index
    %c0_55 = arith.constant 0 : index
    %c0_56 = arith.constant 0 : index
    %97 = vector.load %arg9[%c1_54, %c0_55, %c0_56] : memref<4x1x8xf32, #tpu.memory_space<vmem>>, vector<1x1x8xf32>
    %98 = vector.shape_cast %97 : vector<1x1x8xf32> to vector<1x8xf32>
    %99 = vector.broadcast %98 : vector<1x8xf32> to vector<6x8xf32>
    %100 = arith.addf %96, %99 : vector<6x8xf32>
    %c1_57 = arith.constant 1 : index
    %c0_58 = arith.constant 0 : index
    %c0_59 = arith.constant 0 : index
    %101 = vector.load %arg10[%c1_57, %c0_58, %c0_59] : memref<4x32x8xbf16, #tpu.memory_space<vmem>>, vector<1x32x8xbf16>
    %102 = vector.shape_cast %101 : vector<1x32x8xbf16> to vector<32x8xbf16>
    %cst_60 = arith.constant dense<0.000000e+00> : vector<6x8xf32>
    %103 = tpu.matmul %27, %102, %cst_60 {dimension_numbers = #tpu.dot_dimension_numbers<[1], [0], [0], [1], [0, 0, 1, 1], [], []>} : vector<6x32xbf16>, vector<32x8xbf16>, vector<6x8xf32> -> vector<6x8xf32>
    %c1_61 = arith.constant 1 : index
    %c0_62 = arith.constant 0 : index
    %c0_63 = arith.constant 0 : index
    %104 = vector.load %arg11[%c1_61, %c0_62, %c0_63] : memref<4x1x8xf32, #tpu.memory_space<vmem>>, vector<1x1x8xf32>
    %105 = vector.shape_cast %104 : vector<1x1x8xf32> to vector<1x8xf32>
    %106 = vector.broadcast %105 : vector<1x8xf32> to vector<6x8xf32>
    %107 = arith.addf %103, %106 : vector<6x8xf32>
    %108 = arith.truncf %93 : vector<6x8xf32> to vector<6x8xbf16>
    %109 = arith.truncf %100 : vector<6x8xf32> to vector<6x8xbf16>
    %cst_64 = arith.constant dense<0.000000e+00> : vector<6x6xf32>
    %110 = tpu.matmul %108, %109, %cst_64 {dimension_numbers = #tpu.dot_dimension_numbers<[1], [1], [0], [0], [0, 0, 1, 0], [], []>} : vector<6x8xbf16>, vector<6x8xbf16>, vector<6x6xf32> -> vector<6x6xf32>
    %cst_65 = arith.constant 0.353553385 : f32
    %111 = vector.broadcast %cst_65 : f32 to vector<6x6xf32>
    %112 = arith.mulf %110, %111 : vector<6x6xf32>
    %cst_66 = arith.constant -3.40282347E+38 : f32
    %113 = vector.broadcast %cst_66 : f32 to vector<6x6xf32>
    %114 = arith.select %35, %112, %113 : vector<6x6xi1>, vector<6x6xf32>
    %cst_67 = arith.constant dense<0xFF800000> : vector<6xf32>
    %115 = vector.multi_reduction <maximumf>, %114, %cst_67 [1] : vector<6x6xf32> to vector<6xf32>
    %116 = vector.shape_cast %115 : vector<6xf32> to vector<6x1xf32>
    %117 = vector.broadcast %116 : vector<6x1xf32> to vector<6x6xf32>
    %118 = arith.subf %114, %117 : vector<6x6xf32>
    %119 = math.exp %118 : vector<6x6xf32>
    %cst_68 = arith.constant dense<0.000000e+00> : vector<6xf32>
    %120 = vector.multi_reduction <add>, %119, %cst_68 [1] : vector<6x6xf32> to vector<6xf32>
    %121 = vector.shape_cast %120 : vector<6xf32> to vector<6x1xf32>
    %122 = tpu.reciprocal %121 {approx = true} : vector<6x1xf32> -> vector<6x1xf32>
    %123 = vector.broadcast %122 : vector<6x1xf32> to vector<6x6xf32>
    %124 = arith.mulf %119, %123 : vector<6x6xf32>
    %cst_69 = arith.constant 0.000000e+00 : f32
    %125 = vector.broadcast %cst_69 : f32 to vector<6x6xf32>
    %126 = arith.select %35, %124, %125 : vector<6x6xi1>, vector<6x6xf32>
    %127 = arith.truncf %126 : vector<6x6xf32> to vector<6x6xbf16>
    %128 = arith.truncf %107 : vector<6x8xf32> to vector<6x8xbf16>
    %cst_70 = arith.constant dense<0.000000e+00> : vector<6x8xf32>
    %129 = tpu.matmul %127, %128, %cst_70 {dimension_numbers = #tpu.dot_dimension_numbers<[1], [0], [0], [1], [0, 0, 1, 1], [], []>} : vector<6x6xbf16>, vector<6x8xbf16>, vector<6x8xf32> -> vector<6x8xf32>
    %130 = arith.truncf %129 : vector<6x8xf32> to vector<6x8xbf16>
    %c1_71 = arith.constant 1 : index
    %c0_72 = arith.constant 0 : index
    %c0_73 = arith.constant 0 : index
    %131 = vector.load %arg12[%c1_71, %c0_72, %c0_73] : memref<4x8x32xbf16, #tpu.memory_space<vmem>>, vector<1x8x32xbf16>
    %132 = vector.shape_cast %131 : vector<1x8x32xbf16> to vector<8x32xbf16>
    %cst_74 = arith.constant dense<0.000000e+00> : vector<6x32xf32>
    %133 = tpu.matmul %130, %132, %cst_74 {dimension_numbers = #tpu.dot_dimension_numbers<[1], [0], [0], [1], [0, 0, 1, 1], [], []>} : vector<6x8xbf16>, vector<8x32xbf16>, vector<6x32xf32> -> vector<6x32xf32>
    %134 = arith.addf %86, %133 : vector<6x32xf32>
    %c2 = arith.constant 2 : index
    %c0_75 = arith.constant 0 : index
    %c0_76 = arith.constant 0 : index
    %135 = vector.load %arg6[%c2, %c0_75, %c0_76] : memref<4x32x8xbf16, #tpu.memory_space<vmem>>, vector<1x32x8xbf16>
    %136 = vector.shape_cast %135 : vector<1x32x8xbf16> to vector<32x8xbf16>
    %cst_77 = arith.constant dense<0.000000e+00> : vector<6x8xf32>
    %137 = tpu.matmul %26, %136, %cst_77 {dimension_numbers = #tpu.dot_dimension_numbers<[1], [0], [0], [1], [0, 0, 1, 1], [], []>} : vector<6x32xbf16>, vector<32x8xbf16>, vector<6x8xf32> -> vector<6x8xf32>
    %c2_78 = arith.constant 2 : index
    %c0_79 = arith.constant 0 : index
    %c0_80 = arith.constant 0 : index
    %138 = vector.load %arg7[%c2_78, %c0_79, %c0_80] : memref<4x1x8xf32, #tpu.memory_space<vmem>>, vector<1x1x8xf32>
    %139 = vector.shape_cast %138 : vector<1x1x8xf32> to vector<1x8xf32>
    %140 = vector.broadcast %139 : vector<1x8xf32> to vector<6x8xf32>
    %141 = arith.addf %137, %140 : vector<6x8xf32>
    %c2_81 = arith.constant 2 : index
    %c0_82 = arith.constant 0 : index
    %c0_83 = arith.constant 0 : index
    %142 = vector.load %arg8[%c2_81, %c0_82, %c0_83] : memref<4x32x8xbf16, #tpu.memory_space<vmem>>, vector<1x32x8xbf16>
    %143 = vector.shape_cast %142 : vector<1x32x8xbf16> to vector<32x8xbf16>
    %cst_84 = arith.constant dense<0.000000e+00> : vector<6x8xf32>
    %144 = tpu.matmul %27, %143, %cst_84 {dimension_numbers = #tpu.dot_dimension_numbers<[1], [0], [0], [1], [0, 0, 1, 1], [], []>} : vector<6x32xbf16>, vector<32x8xbf16>, vector<6x8xf32> -> vector<6x8xf32>
    %c2_85 = arith.constant 2 : index
    %c0_86 = arith.constant 0 : index
    %c0_87 = arith.constant 0 : index
    %145 = vector.load %arg9[%c2_85, %c0_86, %c0_87] : memref<4x1x8xf32, #tpu.memory_space<vmem>>, vector<1x1x8xf32>
    %146 = vector.shape_cast %145 : vector<1x1x8xf32> to vector<1x8xf32>
    %147 = vector.broadcast %146 : vector<1x8xf32> to vector<6x8xf32>
    %148 = arith.addf %144, %147 : vector<6x8xf32>
    %c2_88 = arith.constant 2 : index
    %c0_89 = arith.constant 0 : index
    %c0_90 = arith.constant 0 : index
    %149 = vector.load %arg10[%c2_88, %c0_89, %c0_90] : memref<4x32x8xbf16, #tpu.memory_space<vmem>>, vector<1x32x8xbf16>
    %150 = vector.shape_cast %149 : vector<1x32x8xbf16> to vector<32x8xbf16>
    %cst_91 = arith.constant dense<0.000000e+00> : vector<6x8xf32>
    %151 = tpu.matmul %27, %150, %cst_91 {dimension_numbers = #tpu.dot_dimension_numbers<[1], [0], [0], [1], [0, 0, 1, 1], [], []>} : vector<6x32xbf16>, vector<32x8xbf16>, vector<6x8xf32> -> vector<6x8xf32>
    %c2_92 = arith.constant 2 : index
    %c0_93 = arith.constant 0 : index
    %c0_94 = arith.constant 0 : index
    %152 = vector.load %arg11[%c2_92, %c0_93, %c0_94] : memref<4x1x8xf32, #tpu.memory_space<vmem>>, vector<1x1x8xf32>
    %153 = vector.shape_cast %152 : vector<1x1x8xf32> to vector<1x8xf32>
    %154 = vector.broadcast %153 : vector<1x8xf32> to vector<6x8xf32>
    %155 = arith.addf %151, %154 : vector<6x8xf32>
    %156 = arith.truncf %141 : vector<6x8xf32> to vector<6x8xbf16>
    %157 = arith.truncf %148 : vector<6x8xf32> to vector<6x8xbf16>
    %cst_95 = arith.constant dense<0.000000e+00> : vector<6x6xf32>
    %158 = tpu.matmul %156, %157, %cst_95 {dimension_numbers = #tpu.dot_dimension_numbers<[1], [1], [0], [0], [0, 0, 1, 0], [], []>} : vector<6x8xbf16>, vector<6x8xbf16>, vector<6x6xf32> -> vector<6x6xf32>
    %cst_96 = arith.constant 0.353553385 : f32
    %159 = vector.broadcast %cst_96 : f32 to vector<6x6xf32>
    %160 = arith.mulf %158, %159 : vector<6x6xf32>
    %cst_97 = arith.constant -3.40282347E+38 : f32
    %161 = vector.broadcast %cst_97 : f32 to vector<6x6xf32>
    %162 = arith.select %35, %160, %161 : vector<6x6xi1>, vector<6x6xf32>
    %cst_98 = arith.constant dense<0xFF800000> : vector<6xf32>
    %163 = vector.multi_reduction <maximumf>, %162, %cst_98 [1] : vector<6x6xf32> to vector<6xf32>
    %164 = vector.shape_cast %163 : vector<6xf32> to vector<6x1xf32>
    %165 = vector.broadcast %164 : vector<6x1xf32> to vector<6x6xf32>
    %166 = arith.subf %162, %165 : vector<6x6xf32>
    %167 = math.exp %166 : vector<6x6xf32>
    %cst_99 = arith.constant dense<0.000000e+00> : vector<6xf32>
    %168 = vector.multi_reduction <add>, %167, %cst_99 [1] : vector<6x6xf32> to vector<6xf32>
    %169 = vector.shape_cast %168 : vector<6xf32> to vector<6x1xf32>
    %170 = tpu.reciprocal %169 {approx = true} : vector<6x1xf32> -> vector<6x1xf32>
    %171 = vector.broadcast %170 : vector<6x1xf32> to vector<6x6xf32>
    %172 = arith.mulf %167, %171 : vector<6x6xf32>
    %cst_100 = arith.constant 0.000000e+00 : f32
    %173 = vector.broadcast %cst_100 : f32 to vector<6x6xf32>
    %174 = arith.select %35, %172, %173 : vector<6x6xi1>, vector<6x6xf32>
    %175 = arith.truncf %174 : vector<6x6xf32> to vector<6x6xbf16>
    %176 = arith.truncf %155 : vector<6x8xf32> to vector<6x8xbf16>
    %cst_101 = arith.constant dense<0.000000e+00> : vector<6x8xf32>
    %177 = tpu.matmul %175, %176, %cst_101 {dimension_numbers = #tpu.dot_dimension_numbers<[1], [0], [0], [1], [0, 0, 1, 1], [], []>} : vector<6x6xbf16>, vector<6x8xbf16>, vector<6x8xf32> -> vector<6x8xf32>
    %178 = arith.truncf %177 : vector<6x8xf32> to vector<6x8xbf16>
    %c2_102 = arith.constant 2 : index
    %c0_103 = arith.constant 0 : index
    %c0_104 = arith.constant 0 : index
    %179 = vector.load %arg12[%c2_102, %c0_103, %c0_104] : memref<4x8x32xbf16, #tpu.memory_space<vmem>>, vector<1x8x32xbf16>
    %180 = vector.shape_cast %179 : vector<1x8x32xbf16> to vector<8x32xbf16>
    %cst_105 = arith.constant dense<0.000000e+00> : vector<6x32xf32>
    %181 = tpu.matmul %178, %180, %cst_105 {dimension_numbers = #tpu.dot_dimension_numbers<[1], [0], [0], [1], [0, 0, 1, 1], [], []>} : vector<6x8xbf16>, vector<8x32xbf16>, vector<6x32xf32> -> vector<6x32xf32>
    %182 = arith.addf %134, %181 : vector<6x32xf32>
    %c3 = arith.constant 3 : index
    %c0_106 = arith.constant 0 : index
    %c0_107 = arith.constant 0 : index
    %183 = vector.load %arg6[%c3, %c0_106, %c0_107] : memref<4x32x8xbf16, #tpu.memory_space<vmem>>, vector<1x32x8xbf16>
    %184 = vector.shape_cast %183 : vector<1x32x8xbf16> to vector<32x8xbf16>
    %cst_108 = arith.constant dense<0.000000e+00> : vector<6x8xf32>
    %185 = tpu.matmul %26, %184, %cst_108 {dimension_numbers = #tpu.dot_dimension_numbers<[1], [0], [0], [1], [0, 0, 1, 1], [], []>} : vector<6x32xbf16>, vector<32x8xbf16>, vector<6x8xf32> -> vector<6x8xf32>
    %c3_109 = arith.constant 3 : index
    %c0_110 = arith.constant 0 : index
    %c0_111 = arith.constant 0 : index
    %186 = vector.load %arg7[%c3_109, %c0_110, %c0_111] : memref<4x1x8xf32, #tpu.memory_space<vmem>>, vector<1x1x8xf32>
    %187 = vector.shape_cast %186 : vector<1x1x8xf32> to vector<1x8xf32>
    %188 = vector.broadcast %187 : vector<1x8xf32> to vector<6x8xf32>
    %189 = arith.addf %185, %188 : vector<6x8xf32>
    %c3_112 = arith.constant 3 : index
    %c0_113 = arith.constant 0 : index
    %c0_114 = arith.constant 0 : index
    %190 = vector.load %arg8[%c3_112, %c0_113, %c0_114] : memref<4x32x8xbf16, #tpu.memory_space<vmem>>, vector<1x32x8xbf16>
    %191 = vector.shape_cast %190 : vector<1x32x8xbf16> to vector<32x8xbf16>
    %cst_115 = arith.constant dense<0.000000e+00> : vector<6x8xf32>
    %192 = tpu.matmul %27, %191, %cst_115 {dimension_numbers = #tpu.dot_dimension_numbers<[1], [0], [0], [1], [0, 0, 1, 1], [], []>} : vector<6x32xbf16>, vector<32x8xbf16>, vector<6x8xf32> -> vector<6x8xf32>
    %c3_116 = arith.constant 3 : index
    %c0_117 = arith.constant 0 : index
    %c0_118 = arith.constant 0 : index
    %193 = vector.load %arg9[%c3_116, %c0_117, %c0_118] : memref<4x1x8xf32, #tpu.memory_space<vmem>>, vector<1x1x8xf32>
    %194 = vector.shape_cast %193 : vector<1x1x8xf32> to vector<1x8xf32>
    %195 = vector.broadcast %194 : vector<1x8xf32> to vector<6x8xf32>
    %196 = arith.addf %192, %195 : vector<6x8xf32>
    %c3_119 = arith.constant 3 : index
    %c0_120 = arith.constant 0 : index
    %c0_121 = arith.constant 0 : index
    %197 = vector.load %arg10[%c3_119, %c0_120, %c0_121] : memref<4x32x8xbf16, #tpu.memory_space<vmem>>, vector<1x32x8xbf16>
    %198 = vector.shape_cast %197 : vector<1x32x8xbf16> to vector<32x8xbf16>
    %cst_122 = arith.constant dense<0.000000e+00> : vector<6x8xf32>
    %199 = tpu.matmul %27, %198, %cst_122 {dimension_numbers = #tpu.dot_dimension_numbers<[1], [0], [0], [1], [0, 0, 1, 1], [], []>} : vector<6x32xbf16>, vector<32x8xbf16>, vector<6x8xf32> -> vector<6x8xf32>
    %c3_123 = arith.constant 3 : index
    %c0_124 = arith.constant 0 : index
    %c0_125 = arith.constant 0 : index
    %200 = vector.load %arg11[%c3_123, %c0_124, %c0_125] : memref<4x1x8xf32, #tpu.memory_space<vmem>>, vector<1x1x8xf32>
    %201 = vector.shape_cast %200 : vector<1x1x8xf32> to vector<1x8xf32>
    %202 = vector.broadcast %201 : vector<1x8xf32> to vector<6x8xf32>
    %203 = arith.addf %199, %202 : vector<6x8xf32>
    %204 = arith.truncf %189 : vector<6x8xf32> to vector<6x8xbf16>
    %205 = arith.truncf %196 : vector<6x8xf32> to vector<6x8xbf16>
    %cst_126 = arith.constant dense<0.000000e+00> : vector<6x6xf32>
    %206 = tpu.matmul %204, %205, %cst_126 {dimension_numbers = #tpu.dot_dimension_numbers<[1], [1], [0], [0], [0, 0, 1, 0], [], []>} : vector<6x8xbf16>, vector<6x8xbf16>, vector<6x6xf32> -> vector<6x6xf32>
    %cst_127 = arith.constant 0.353553385 : f32
    %207 = vector.broadcast %cst_127 : f32 to vector<6x6xf32>
    %208 = arith.mulf %206, %207 : vector<6x6xf32>
    %cst_128 = arith.constant -3.40282347E+38 : f32
    %209 = vector.broadcast %cst_128 : f32 to vector<6x6xf32>
    %210 = arith.select %35, %208, %209 : vector<6x6xi1>, vector<6x6xf32>
    %cst_129 = arith.constant dense<0xFF800000> : vector<6xf32>
    %211 = vector.multi_reduction <maximumf>, %210, %cst_129 [1] : vector<6x6xf32> to vector<6xf32>
    %212 = vector.shape_cast %211 : vector<6xf32> to vector<6x1xf32>
    %213 = vector.broadcast %212 : vector<6x1xf32> to vector<6x6xf32>
    %214 = arith.subf %210, %213 : vector<6x6xf32>
    %215 = math.exp %214 : vector<6x6xf32>
    %cst_130 = arith.constant dense<0.000000e+00> : vector<6xf32>
    %216 = vector.multi_reduction <add>, %215, %cst_130 [1] : vector<6x6xf32> to vector<6xf32>
    %217 = vector.shape_cast %216 : vector<6xf32> to vector<6x1xf32>
    %218 = tpu.reciprocal %217 {approx = true} : vector<6x1xf32> -> vector<6x1xf32>
    %219 = vector.broadcast %218 : vector<6x1xf32> to vector<6x6xf32>
    %220 = arith.mulf %215, %219 : vector<6x6xf32>
    %cst_131 = arith.constant 0.000000e+00 : f32
    %221 = vector.broadcast %cst_131 : f32 to vector<6x6xf32>
    %222 = arith.select %35, %220, %221 : vector<6x6xi1>, vector<6x6xf32>
    %223 = arith.truncf %222 : vector<6x6xf32> to vector<6x6xbf16>
    %224 = arith.truncf %203 : vector<6x8xf32> to vector<6x8xbf16>
    %cst_132 = arith.constant dense<0.000000e+00> : vector<6x8xf32>
    %225 = tpu.matmul %223, %224, %cst_132 {dimension_numbers = #tpu.dot_dimension_numbers<[1], [0], [0], [1], [0, 0, 1, 1], [], []>} : vector<6x6xbf16>, vector<6x8xbf16>, vector<6x8xf32> -> vector<6x8xf32>
    %226 = arith.truncf %225 : vector<6x8xf32> to vector<6x8xbf16>
    %c3_133 = arith.constant 3 : index
    %c0_134 = arith.constant 0 : index
    %c0_135 = arith.constant 0 : index
    %227 = vector.load %arg12[%c3_133, %c0_134, %c0_135] : memref<4x8x32xbf16, #tpu.memory_space<vmem>>, vector<1x8x32xbf16>
    %228 = vector.shape_cast %227 : vector<1x8x32xbf16> to vector<8x32xbf16>
    %cst_136 = arith.constant dense<0.000000e+00> : vector<6x32xf32>
    %229 = tpu.matmul %226, %228, %cst_136 {dimension_numbers = #tpu.dot_dimension_numbers<[1], [0], [0], [1], [0, 0, 1, 1], [], []>} : vector<6x8xbf16>, vector<8x32xbf16>, vector<6x32xf32> -> vector<6x32xf32>
    %230 = arith.addf %182, %229 : vector<6x32xf32>
    %c0_137 = arith.constant 0 : index
    %c0_138 = arith.constant 0 : index
    %c0_139 = arith.constant 0 : index
    %231 = vector.load %arg14[%c0_137, %c0_138, %c0_139] : memref<1x6x32xf32, #tpu.memory_space<vmem>>, vector<1x6x32xf32>
    %232 = vector.shape_cast %231 : vector<1x6x32xf32> to vector<6x32xf32>
    %233 = vector.shape_cast %230 : vector<6x32xf32> to vector<1x6x32xf32>
    tpu.vector_store %arg14[%c0_137, %c0_138, %c0_139], %233 {strides = array<i32>} : memref<1x6x32xf32, #tpu.memory_space<vmem>>, vector<1x6x32xf32>,
    return
  }
  func.func @transform_0(%arg0: i32, %arg1: memref<2xi32, #tpu.memory_space<smem>>) -> (i32, i32, i32) {
    %c0_i32 = arith.constant 0 : i32
    %c0_i32_0 = arith.constant 0 : i32
    %c0_i32_1 = arith.constant 0 : i32
    return %arg0, %c0_i32, %c0_i32_0 : i32, i32, i32
  }
  func.func @transform_1(%arg0: i32, %arg1: memref<2xi32, #tpu.memory_space<smem>>) -> (i32, i32, i32) {
    %c0_i32 = arith.constant 0 : i32
    %c0_i32_0 = arith.constant 0 : i32
    %c0_i32_1 = arith.constant 0 : i32
    return %arg0, %c0_i32, %c0_i32_0 : i32, i32, i32
  }
  func.func @transform_2(%arg0: i32, %arg1: memref<2xi32, #tpu.memory_space<smem>>) -> (i32, i32) {
    %c0_i32 = arith.constant 0 : i32
    %c0_i32_0 = arith.constant 0 : i32
    %c0_i32_1 = arith.constant 0 : i32
    return %c0_i32, %c0_i32_0 : i32, i32
  }
  func.func @transform_3(%arg0: i32, %arg1: memref<2xi32, #tpu.memory_space<smem>>) -> (i32, i32) {
    %c0_i32 = arith.constant 0 : i32
    %c0_i32_0 = arith.constant 0 : i32
    %c0_i32_1 = arith.constant 0 : i32
    return %c0_i32, %c0_i32_0 : i32, i32
  }
  func.func @transform_4(%arg0: i32, %arg1: memref<2xi32, #tpu.memory_space<smem>>) -> (i32, i32, i32) {
    %c0_i32 = arith.constant 0 : i32
    %c0_i32_0 = arith.constant 0 : i32
    %c0_i32_1 = arith.constant 0 : i32
    %c0_i32_2 = arith.constant 0 : i32
    return %c0_i32, %c0_i32_0, %c0_i32_1 : i32, i32, i32
  }
  func.func @transform_5(%arg0: i32, %arg1: memref<2xi32, #tpu.memory_space<smem>>) -> (i32, i32, i32) {
    %c0_i32 = arith.constant 0 : i32
    %c0_i32_0 = arith.constant 0 : i32
    %c0_i32_1 = arith.constant 0 : i32
    %c0_i32_2 = arith.constant 0 : i32
    return %c0_i32, %c0_i32_0, %c0_i32_1 : i32, i32, i32
  }
  func.func @transform_6(%arg0: i32, %arg1: memref<2xi32, #tpu.memory_space<smem>>) -> (i32, i32, i32) {
    %c0_i32 = arith.constant 0 : i32
    %c0_i32_0 = arith.constant 0 : i32
    %c0_i32_1 = arith.constant 0 : i32
    %c0_i32_2 = arith.constant 0 : i32
    return %c0_i32, %c0_i32_0, %c0_i32_1 : i32, i32, i32
  }
  func.func @transform_7(%arg0: i32, %arg1: memref<2xi32, #tpu.memory_space<smem>>) -> (i32, i32, i32) {
    %c0_i32 = arith.constant 0 : i32
    %c0_i32_0 = arith.constant 0 : i32
    %c0_i32_1 = arith.constant 0 : i32
    %c0_i32_2 = arith.constant 0 : i32
    return %c0_i32, %c0_i32_0, %c0_i32_1 : i32, i32, i32
  }
  func.func @transform_8(%arg0: i32, %arg1: memref<2xi32, #tpu.memory_space<smem>>) -> (i32, i32, i32) {
    %c0_i32 = arith.constant 0 : i32
    %c0_i32_0 = arith.constant 0 : i32
    %c0_i32_1 = arith.constant 0 : i32
    %c0_i32_2 = arith.constant 0 : i32
    return %c0_i32, %c0_i32_0, %c0_i32_1 : i32, i32, i32
  }
  func.func @transform_9(%arg0: i32, %arg1: memref<2xi32, #tpu.memory_space<smem>>) -> (i32, i32, i32) {
    %c0_i32 = arith.constant 0 : i32
    %c0_i32_0 = arith.constant 0 : i32
    %c0_i32_1 = arith.constant 0 : i32
    %c0_i32_2 = arith.constant 0 : i32
    return %c0_i32, %c0_i32_0, %c0_i32_1 : i32, i32, i32
  }
  func.func @transform_10(%arg0: i32, %arg1: memref<2xi32, #tpu.memory_space<smem>>) -> (i32, i32, i32) {
    %c0_i32 = arith.constant 0 : i32
    %c0_i32_0 = arith.constant 0 : i32
    %c0_i32_1 = arith.constant 0 : i32
    %c0_i32_2 = arith.constant 0 : i32
    return %c0_i32, %c0_i32_0, %c0_i32_1 : i32, i32, i32
  }
  func.func @transform_11(%arg0: i32, %arg1: memref<2xi32, #tpu.memory_space<smem>>) -> (i32, i32) {
    %c0_i32 = arith.constant 0 : i32
    %c0_i32_0 = arith.constant 0 : i32
    %c0_i32_1 = arith.constant 0 : i32
    return %c0_i32, %c0_i32_0 : i32, i32
  }
  func.func @transform_12(%arg0: i32, %arg1: memref<2xi32, #tpu.memory_space<smem>>) -> (i32, i32, i32) {
    %c0_i32 = arith.constant 0 : i32
    %c0_i32_0 = arith.constant 0 : i32
    %c0_i32_1 = arith.constant 0 : i32
    return %arg0, %c0_i32, %c0_i32_0 : i32, i32, i32
  }
}

module attributes {stable_mosaic.version = 11 : i64} {
  func.func @_linear_kernel(%arg0: i32, %arg1: memref<98x9xf32, #tpu.memory_space<vmem>>, %arg2: memref<9x32xbf16, #tpu.memory_space<vmem>>, %arg3: memref<1x32xf32, #tpu.memory_space<vmem>>, %arg4: memref<98x32xf32, #tpu.memory_space<vmem>>) attributes {dimension_semantics = [#tpu.dimension_semantics<parallel>], iteration_bounds = array<i64: 1>, scalar_prefetch = 0 : i64, scratch_operands = 0 : i64, tpu.core_type = #tpu.core_type<tc>, window_params = [{transform_indices = @transform_0, window_bounds = array<i64: 98, 9>}, {pipeline_mode = #tpu.pipeline_mode<synchronous>, transform_indices = @transform_1, window_bounds = array<i64: 9, 32>}, {pipeline_mode = #tpu.pipeline_mode<synchronous>, transform_indices = @transform_2, window_bounds = array<i64: 1, 32>}, {transform_indices = @transform_3, window_bounds = array<i64: 98, 32>}]} {
    %c0 = arith.constant 0 : index
    %c0_0 = arith.constant 0 : index
    %0 = vector.load %arg1[%c0, %c0_0] : memref<98x9xf32, #tpu.memory_space<vmem>>, vector<98x9xf32>
    %1 = arith.truncf %0 : vector<98x9xf32> to vector<98x9xbf16>
    %c0_1 = arith.constant 0 : index
    %c0_2 = arith.constant 0 : index
    %2 = vector.load %arg2[%c0_1, %c0_2] : memref<9x32xbf16, #tpu.memory_space<vmem>>, vector<9x32xbf16>
    %cst = arith.constant dense<0.000000e+00> : vector<98x32xf32>
    %3 = tpu.matmul %1, %2, %cst {dimension_numbers = #tpu.dot_dimension_numbers<[1], [0], [0], [1], [0, 0, 1, 1], [], []>} : vector<98x9xbf16>, vector<9x32xbf16>, vector<98x32xf32> -> vector<98x32xf32>
    %c0_3 = arith.constant 0 : index
    %c0_4 = arith.constant 0 : index
    %4 = vector.load %arg3[%c0_3, %c0_4] : memref<1x32xf32, #tpu.memory_space<vmem>>, vector<1x32xf32>
    %5 = vector.broadcast %4 : vector<1x32xf32> to vector<98x32xf32>
    %6 = arith.addf %3, %5 : vector<98x32xf32>
    %cst_5 = arith.constant 0.000000e+00 : f32
    %7 = vector.broadcast %cst_5 : f32 to vector<98x32xf32>
    %8 = arith.maximumf %6, %7 : vector<98x32xf32>
    %c0_6 = arith.constant 0 : index
    %c0_7 = arith.constant 0 : index
    %9 = vector.load %arg4[%c0_6, %c0_7] : memref<98x32xf32, #tpu.memory_space<vmem>>, vector<98x32xf32>
    tpu.vector_store %arg4[%c0_6, %c0_7], %8 {strides = array<i32>} : memref<98x32xf32, #tpu.memory_space<vmem>>, vector<98x32xf32>,
    return
  }
  func.func @transform_0(%arg0: i32) -> (i32, i32) {
    %c0_i32 = arith.constant 0 : i32
    %c0_i32_0 = arith.constant 0 : i32
    return %arg0, %c0_i32 : i32, i32
  }
  func.func @transform_1(%arg0: i32) -> (i32, i32) {
    %c0_i32 = arith.constant 0 : i32
    %c0_i32_0 = arith.constant 0 : i32
    %c0_i32_1 = arith.constant 0 : i32
    return %c0_i32, %c0_i32_0 : i32, i32
  }
  func.func @transform_2(%arg0: i32) -> (i32, i32) {
    %c0_i32 = arith.constant 0 : i32
    %c0_i32_0 = arith.constant 0 : i32
    %c0_i32_1 = arith.constant 0 : i32
    return %c0_i32, %c0_i32_0 : i32, i32
  }
  func.func @transform_3(%arg0: i32) -> (i32, i32) {
    %c0_i32 = arith.constant 0 : i32
    %c0_i32_0 = arith.constant 0 : i32
    return %arg0, %c0_i32 : i32, i32
  }
}

module attributes {stable_mosaic.version = 11 : i64} {
  func.func @_linear_kernel(%arg0: i32, %arg1: memref<18x288xf32, #tpu.memory_space<vmem>>, %arg2: memref<288x32xbf16, #tpu.memory_space<vmem>>, %arg3: memref<1x32xf32, #tpu.memory_space<vmem>>, %arg4: memref<18x32xf32, #tpu.memory_space<vmem>>) attributes {dimension_semantics = [#tpu.dimension_semantics<parallel>], iteration_bounds = array<i64: 1>, scalar_prefetch = 0 : i64, scratch_operands = 0 : i64, tpu.core_type = #tpu.core_type<tc>, window_params = [{transform_indices = @transform_0, window_bounds = array<i64: 18, 288>}, {pipeline_mode = #tpu.pipeline_mode<synchronous>, transform_indices = @transform_1, window_bounds = array<i64: 288, 32>}, {pipeline_mode = #tpu.pipeline_mode<synchronous>, transform_indices = @transform_2, window_bounds = array<i64: 1, 32>}, {transform_indices = @transform_3, window_bounds = array<i64: 18, 32>}]} {
    %c0 = arith.constant 0 : index
    %c0_0 = arith.constant 0 : index
    %0 = vector.load %arg1[%c0, %c0_0] : memref<18x288xf32, #tpu.memory_space<vmem>>, vector<18x288xf32>
    %1 = arith.truncf %0 : vector<18x288xf32> to vector<18x288xbf16>
    %c0_1 = arith.constant 0 : index
    %c0_2 = arith.constant 0 : index
    %2 = vector.load %arg2[%c0_1, %c0_2] : memref<288x32xbf16, #tpu.memory_space<vmem>>, vector<288x32xbf16>
    %cst = arith.constant dense<0.000000e+00> : vector<18x32xf32>
    %3 = tpu.matmul %1, %2, %cst {dimension_numbers = #tpu.dot_dimension_numbers<[1], [0], [0], [1], [0, 0, 1, 1], [], []>} : vector<18x288xbf16>, vector<288x32xbf16>, vector<18x32xf32> -> vector<18x32xf32>
    %c0_3 = arith.constant 0 : index
    %c0_4 = arith.constant 0 : index
    %4 = vector.load %arg3[%c0_3, %c0_4] : memref<1x32xf32, #tpu.memory_space<vmem>>, vector<1x32xf32>
    %5 = vector.broadcast %4 : vector<1x32xf32> to vector<18x32xf32>
    %6 = arith.addf %3, %5 : vector<18x32xf32>
    %cst_5 = arith.constant 0.000000e+00 : f32
    %7 = vector.broadcast %cst_5 : f32 to vector<18x32xf32>
    %8 = arith.maximumf %6, %7 : vector<18x32xf32>
    %c0_6 = arith.constant 0 : index
    %c0_7 = arith.constant 0 : index
    %9 = vector.load %arg4[%c0_6, %c0_7] : memref<18x32xf32, #tpu.memory_space<vmem>>, vector<18x32xf32>
    tpu.vector_store %arg4[%c0_6, %c0_7], %8 {strides = array<i32>} : memref<18x32xf32, #tpu.memory_space<vmem>>, vector<18x32xf32>,
    return
  }
  func.func @transform_0(%arg0: i32) -> (i32, i32) {
    %c0_i32 = arith.constant 0 : i32
    %c0_i32_0 = arith.constant 0 : i32
    return %arg0, %c0_i32 : i32, i32
  }
  func.func @transform_1(%arg0: i32) -> (i32, i32) {
    %c0_i32 = arith.constant 0 : i32
    %c0_i32_0 = arith.constant 0 : i32
    %c0_i32_1 = arith.constant 0 : i32
    return %c0_i32, %c0_i32_0 : i32, i32
  }
  func.func @transform_2(%arg0: i32) -> (i32, i32) {
    %c0_i32 = arith.constant 0 : i32
    %c0_i32_0 = arith.constant 0 : i32
    %c0_i32_1 = arith.constant 0 : i32
    return %c0_i32, %c0_i32_0 : i32, i32
  }
  func.func @transform_3(%arg0: i32) -> (i32, i32) {
    %c0_i32 = arith.constant 0 : i32
    %c0_i32_0 = arith.constant 0 : i32
    return %arg0, %c0_i32 : i32, i32
  }
}

module attributes {stable_mosaic.version = 11 : i64} {
  func.func @_linear_kernel(%arg0: i32, %arg1: memref<6x96xf32, #tpu.memory_space<vmem>>, %arg2: memref<96x32xbf16, #tpu.memory_space<vmem>>, %arg3: memref<1x32xf32, #tpu.memory_space<vmem>>, %arg4: memref<6x32xf32, #tpu.memory_space<vmem>>) attributes {dimension_semantics = [#tpu.dimension_semantics<parallel>], iteration_bounds = array<i64: 1>, scalar_prefetch = 0 : i64, scratch_operands = 0 : i64, tpu.core_type = #tpu.core_type<tc>, window_params = [{transform_indices = @transform_0, window_bounds = array<i64: 6, 96>}, {pipeline_mode = #tpu.pipeline_mode<synchronous>, transform_indices = @transform_1, window_bounds = array<i64: 96, 32>}, {pipeline_mode = #tpu.pipeline_mode<synchronous>, transform_indices = @transform_2, window_bounds = array<i64: 1, 32>}, {transform_indices = @transform_3, window_bounds = array<i64: 6, 32>}]} {
    %c0 = arith.constant 0 : index
    %c0_0 = arith.constant 0 : index
    %0 = vector.load %arg1[%c0, %c0_0] : memref<6x96xf32, #tpu.memory_space<vmem>>, vector<6x96xf32>
    %1 = arith.truncf %0 : vector<6x96xf32> to vector<6x96xbf16>
    %c0_1 = arith.constant 0 : index
    %c0_2 = arith.constant 0 : index
    %2 = vector.load %arg2[%c0_1, %c0_2] : memref<96x32xbf16, #tpu.memory_space<vmem>>, vector<96x32xbf16>
    %cst = arith.constant dense<0.000000e+00> : vector<6x32xf32>
    %3 = tpu.matmul %1, %2, %cst {dimension_numbers = #tpu.dot_dimension_numbers<[1], [0], [0], [1], [0, 0, 1, 1], [], []>} : vector<6x96xbf16>, vector<96x32xbf16>, vector<6x32xf32> -> vector<6x32xf32>
    %c0_3 = arith.constant 0 : index
    %c0_4 = arith.constant 0 : index
    %4 = vector.load %arg3[%c0_3, %c0_4] : memref<1x32xf32, #tpu.memory_space<vmem>>, vector<1x32xf32>
    %5 = vector.broadcast %4 : vector<1x32xf32> to vector<6x32xf32>
    %6 = arith.addf %3, %5 : vector<6x32xf32>
    %c0_5 = arith.constant 0 : index
    %c0_6 = arith.constant 0 : index
    %7 = vector.load %arg4[%c0_5, %c0_6] : memref<6x32xf32, #tpu.memory_space<vmem>>, vector<6x32xf32>
    tpu.vector_store %arg4[%c0_5, %c0_6], %6 {strides = array<i32>} : memref<6x32xf32, #tpu.memory_space<vmem>>, vector<6x32xf32>,
    return
  }
  func.func @transform_0(%arg0: i32) -> (i32, i32) {
    %c0_i32 = arith.constant 0 : i32
    %c0_i32_0 = arith.constant 0 : i32
    return %arg0, %c0_i32 : i32, i32
  }
  func.func @transform_1(%arg0: i32) -> (i32, i32) {
    %c0_i32 = arith.constant 0 : i32
    %c0_i32_0 = arith.constant 0 : i32
    %c0_i32_1 = arith.constant 0 : i32
    return %c0_i32, %c0_i32_0 : i32, i32
  }
  func.func @transform_2(%arg0: i32) -> (i32, i32) {
    %c0_i32 = arith.constant 0 : i32
    %c0_i32_0 = arith.constant 0 : i32
    %c0_i32_1 = arith.constant 0 : i32
    return %c0_i32, %c0_i32_0 : i32, i32
  }
  func.func @transform_3(%arg0: i32) -> (i32, i32) {
    %c0_i32 = arith.constant 0 : i32
    %c0_i32_0 = arith.constant 0 : i32
    return %arg0, %c0_i32 : i32, i32
  }
}

module attributes {stable_mosaic.version = 11 : i64} {
  func.func @_ffn_kernel(%arg0: i32, %arg1: memref<6x32xf32, #tpu.memory_space<vmem>>, %arg2: memref<1x32xf32, #tpu.memory_space<vmem>>, %arg3: memref<1x32xf32, #tpu.memory_space<vmem>>, %arg4: memref<32x48xbf16, #tpu.memory_space<vmem>>, %arg5: memref<1x48xf32, #tpu.memory_space<vmem>>, %arg6: memref<48x32xbf16, #tpu.memory_space<vmem>>, %arg7: memref<1x32xf32, #tpu.memory_space<vmem>>, %arg8: memref<6x32xf32, #tpu.memory_space<vmem>>) attributes {dimension_semantics = [#tpu.dimension_semantics<parallel>], iteration_bounds = array<i64: 1>, scalar_prefetch = 0 : i64, scratch_operands = 0 : i64, tpu.core_type = #tpu.core_type<tc>, window_params = [{transform_indices = @transform_0, window_bounds = array<i64: 6, 32>}, {pipeline_mode = #tpu.pipeline_mode<synchronous>, transform_indices = @transform_1, window_bounds = array<i64: 1, 32>}, {pipeline_mode = #tpu.pipeline_mode<synchronous>, transform_indices = @transform_2, window_bounds = array<i64: 1, 32>}, {pipeline_mode = #tpu.pipeline_mode<synchronous>, transform_indices = @transform_3, window_bounds = array<i64: 32, 48>}, {pipeline_mode = #tpu.pipeline_mode<synchronous>, transform_indices = @transform_4, window_bounds = array<i64: 1, 48>}, {pipeline_mode = #tpu.pipeline_mode<synchronous>, transform_indices = @transform_5, window_bounds = array<i64: 48, 32>}, {pipeline_mode = #tpu.pipeline_mode<synchronous>, transform_indices = @transform_6, window_bounds = array<i64: 1, 32>}, {transform_indices = @transform_7, window_bounds = array<i64: 6, 32>}]} {
    %c0 = arith.constant 0 : index
    %c0_0 = arith.constant 0 : index
    %0 = vector.load %arg1[%c0, %c0_0] : memref<6x32xf32, #tpu.memory_space<vmem>>, vector<6x32xf32>
    %c0_1 = arith.constant 0 : index
    %c0_2 = arith.constant 0 : index
    %1 = vector.load %arg2[%c0_1, %c0_2] : memref<1x32xf32, #tpu.memory_space<vmem>>, vector<1x32xf32>
    %c0_3 = arith.constant 0 : index
    %c0_4 = arith.constant 0 : index
    %2 = vector.load %arg3[%c0_3, %c0_4] : memref<1x32xf32, #tpu.memory_space<vmem>>, vector<1x32xf32>
    %cst = arith.constant dense<0.000000e+00> : vector<6xf32>
    %3 = vector.multi_reduction <add>, %0, %cst [1] : vector<6x32xf32> to vector<6xf32>
    %4 = vector.shape_cast %3 : vector<6xf32> to vector<6x1xf32>
    %cst_5 = arith.constant 3.200000e+01 : f32
    %5 = vector.broadcast %cst_5 : f32 to vector<6x1xf32>
    %6 = arith.divf %4, %5 : vector<6x1xf32>
    %7 = vector.broadcast %6 : vector<6x1xf32> to vector<6x32xf32>
    %8 = arith.subf %0, %7 : vector<6x32xf32>
    %9 = arith.mulf %8, %8 : vector<6x32xf32>
    %cst_6 = arith.constant dense<0.000000e+00> : vector<6xf32>
    %10 = vector.multi_reduction <add>, %9, %cst_6 [1] : vector<6x32xf32> to vector<6xf32>
    %11 = vector.shape_cast %10 : vector<6xf32> to vector<6x1xf32>
    %cst_7 = arith.constant 3.200000e+01 : f32
    %12 = vector.broadcast %cst_7 : f32 to vector<6x1xf32>
    %13 = arith.divf %11, %12 : vector<6x1xf32>
    %14 = vector.broadcast %6 : vector<6x1xf32> to vector<6x32xf32>
    %15 = arith.subf %0, %14 : vector<6x32xf32>
    %cst_8 = arith.constant 9.99999996E-13 : f32
    %16 = vector.broadcast %cst_8 : f32 to vector<6x1xf32>
    %17 = arith.addf %13, %16 : vector<6x1xf32>
    %18 = math.rsqrt %17 : vector<6x1xf32>
    %19 = vector.broadcast %18 : vector<6x1xf32> to vector<6x32xf32>
    %20 = arith.mulf %15, %19 : vector<6x32xf32>
    %21 = vector.broadcast %1 : vector<1x32xf32> to vector<6x32xf32>
    %22 = arith.mulf %20, %21 : vector<6x32xf32>
    %23 = vector.broadcast %2 : vector<1x32xf32> to vector<6x32xf32>
    %24 = arith.addf %22, %23 : vector<6x32xf32>
    %25 = arith.truncf %24 : vector<6x32xf32> to vector<6x32xbf16>
    %c0_9 = arith.constant 0 : index
    %c0_10 = arith.constant 0 : index
    %26 = vector.load %arg4[%c0_9, %c0_10] : memref<32x48xbf16, #tpu.memory_space<vmem>>, vector<32x48xbf16>
    %cst_11 = arith.constant dense<0.000000e+00> : vector<6x48xf32>
    %27 = tpu.matmul %25, %26, %cst_11 {dimension_numbers = #tpu.dot_dimension_numbers<[1], [0], [0], [1], [0, 0, 1, 1], [], []>} : vector<6x32xbf16>, vector<32x48xbf16>, vector<6x48xf32> -> vector<6x48xf32>
    %c0_12 = arith.constant 0 : index
    %c0_13 = arith.constant 0 : index
    %28 = vector.load %arg5[%c0_12, %c0_13] : memref<1x48xf32, #tpu.memory_space<vmem>>, vector<1x48xf32>
    %29 = vector.broadcast %28 : vector<1x48xf32> to vector<6x48xf32>
    %30 = arith.addf %27, %29 : vector<6x48xf32>
    %cst_14 = arith.constant 0.000000e+00 : f32
    %31 = vector.broadcast %cst_14 : f32 to vector<6x48xf32>
    %32 = arith.maximumf %30, %31 : vector<6x48xf32>
    %33 = arith.truncf %32 : vector<6x48xf32> to vector<6x48xbf16>
    %c0_15 = arith.constant 0 : index
    %c0_16 = arith.constant 0 : index
    %34 = vector.load %arg6[%c0_15, %c0_16] : memref<48x32xbf16, #tpu.memory_space<vmem>>, vector<48x32xbf16>
    %cst_17 = arith.constant dense<0.000000e+00> : vector<6x32xf32>
    %35 = tpu.matmul %33, %34, %cst_17 {dimension_numbers = #tpu.dot_dimension_numbers<[1], [0], [0], [1], [0, 0, 1, 1], [], []>} : vector<6x48xbf16>, vector<48x32xbf16>, vector<6x32xf32> -> vector<6x32xf32>
    %c0_18 = arith.constant 0 : index
    %c0_19 = arith.constant 0 : index
    %36 = vector.load %arg7[%c0_18, %c0_19] : memref<1x32xf32, #tpu.memory_space<vmem>>, vector<1x32xf32>
    %37 = vector.broadcast %36 : vector<1x32xf32> to vector<6x32xf32>
    %38 = arith.addf %35, %37 : vector<6x32xf32>
    %39 = arith.addf %0, %38 : vector<6x32xf32>
    %c0_20 = arith.constant 0 : index
    %c0_21 = arith.constant 0 : index
    %40 = vector.load %arg8[%c0_20, %c0_21] : memref<6x32xf32, #tpu.memory_space<vmem>>, vector<6x32xf32>
    tpu.vector_store %arg8[%c0_20, %c0_21], %39 {strides = array<i32>} : memref<6x32xf32, #tpu.memory_space<vmem>>, vector<6x32xf32>,
    return
  }
  func.func @transform_0(%arg0: i32) -> (i32, i32) {
    %c0_i32 = arith.constant 0 : i32
    %c0_i32_0 = arith.constant 0 : i32
    return %arg0, %c0_i32 : i32, i32
  }
  func.func @transform_1(%arg0: i32) -> (i32, i32) {
    %c0_i32 = arith.constant 0 : i32
    %c0_i32_0 = arith.constant 0 : i32
    %c0_i32_1 = arith.constant 0 : i32
    return %c0_i32, %c0_i32_0 : i32, i32
  }
  func.func @transform_2(%arg0: i32) -> (i32, i32) {
    %c0_i32 = arith.constant 0 : i32
    %c0_i32_0 = arith.constant 0 : i32
    %c0_i32_1 = arith.constant 0 : i32
    return %c0_i32, %c0_i32_0 : i32, i32
  }
  func.func @transform_3(%arg0: i32) -> (i32, i32) {
    %c0_i32 = arith.constant 0 : i32
    %c0_i32_0 = arith.constant 0 : i32
    %c0_i32_1 = arith.constant 0 : i32
    return %c0_i32, %c0_i32_0 : i32, i32
  }
  func.func @transform_4(%arg0: i32) -> (i32, i32) {
    %c0_i32 = arith.constant 0 : i32
    %c0_i32_0 = arith.constant 0 : i32
    %c0_i32_1 = arith.constant 0 : i32
    return %c0_i32, %c0_i32_0 : i32, i32
  }
  func.func @transform_5(%arg0: i32) -> (i32, i32) {
    %c0_i32 = arith.constant 0 : i32
    %c0_i32_0 = arith.constant 0 : i32
    %c0_i32_1 = arith.constant 0 : i32
    return %c0_i32, %c0_i32_0 : i32, i32
  }
  func.func @transform_6(%arg0: i32) -> (i32, i32) {
    %c0_i32 = arith.constant 0 : i32
    %c0_i32_0 = arith.constant 0 : i32
    %c0_i32_1 = arith.constant 0 : i32
    return %c0_i32, %c0_i32_0 : i32, i32
  }
  func.func @transform_7(%arg0: i32) -> (i32, i32) {
    %c0_i32 = arith.constant 0 : i32
    %c0_i32_0 = arith.constant 0 : i32
    return %arg0, %c0_i32 : i32, i32
  }
}

module attributes {stable_mosaic.version = 11 : i64} {
  func.func @_mha_block_kernel(%arg0: i32, %arg1: memref<2xi32, #tpu.memory_space<smem>>, %arg2: memref<1x3x32xf32, #tpu.memory_space<vmem>>, %arg3: memref<1x3x32xf32, #tpu.memory_space<vmem>>, %arg4: memref<1x32xf32, #tpu.memory_space<vmem>>, %arg5: memref<1x32xf32, #tpu.memory_space<vmem>>, %arg6: memref<4x32x8xbf16, #tpu.memory_space<vmem>>, %arg7: memref<4x1x8xf32, #tpu.memory_space<vmem>>, %arg8: memref<4x32x8xbf16, #tpu.memory_space<vmem>>, %arg9: memref<4x1x8xf32, #tpu.memory_space<vmem>>, %arg10: memref<4x32x8xbf16, #tpu.memory_space<vmem>>, %arg11: memref<4x1x8xf32, #tpu.memory_space<vmem>>, %arg12: memref<4x8x32xbf16, #tpu.memory_space<vmem>>, %arg13: memref<1x32xf32, #tpu.memory_space<vmem>>, %arg14: memref<1x3x32xf32, #tpu.memory_space<vmem>>) attributes {dimension_semantics = [#tpu.dimension_semantics<parallel>], iteration_bounds = array<i64: 2>, scalar_prefetch = 1 : i64, scratch_operands = 0 : i64, tpu.core_type = #tpu.core_type<tc>, window_params = [{transform_indices = @transform_0, window_bounds = array<i64: 1, 3, 32>}, {transform_indices = @transform_1, window_bounds = array<i64: 1, 3, 32>}, {pipeline_mode = #tpu.pipeline_mode<synchronous>, transform_indices = @transform_2, window_bounds = array<i64: 1, 32>}, {pipeline_mode = #tpu.pipeline_mode<synchronous>, transform_indices = @transform_3, window_bounds = array<i64: 1, 32>}, {pipeline_mode = #tpu.pipeline_mode<synchronous>, transform_indices = @transform_4, window_bounds = array<i64: 4, 32, 8>}, {pipeline_mode = #tpu.pipeline_mode<synchronous>, transform_indices = @transform_5, window_bounds = array<i64: 4, 1, 8>}, {pipeline_mode = #tpu.pipeline_mode<synchronous>, transform_indices = @transform_6, window_bounds = array<i64: 4, 32, 8>}, {pipeline_mode = #tpu.pipeline_mode<synchronous>, transform_indices = @transform_7, window_bounds = array<i64: 4, 1, 8>}, {pipeline_mode = #tpu.pipeline_mode<synchronous>, transform_indices = @transform_8, window_bounds = array<i64: 4, 32, 8>}, {pipeline_mode = #tpu.pipeline_mode<synchronous>, transform_indices = @transform_9, window_bounds = array<i64: 4, 1, 8>}, {pipeline_mode = #tpu.pipeline_mode<synchronous>, transform_indices = @transform_10, window_bounds = array<i64: 4, 8, 32>}, {pipeline_mode = #tpu.pipeline_mode<synchronous>, transform_indices = @transform_11, window_bounds = array<i64: 1, 32>}, {transform_indices = @transform_12, window_bounds = array<i64: 1, 3, 32>}]} {
    %c0 = arith.constant 0 : index
    %c0_0 = arith.constant 0 : index
    %c0_1 = arith.constant 0 : index
    %0 = vector.load %arg2[%c0, %c0_0, %c0_1] : memref<1x3x32xf32, #tpu.memory_space<vmem>>, vector<1x3x32xf32>
    %1 = vector.shape_cast %0 : vector<1x3x32xf32> to vector<3x32xf32>
    %c0_2 = arith.constant 0 : index
    %c0_3 = arith.constant 0 : index
    %2 = vector.load %arg4[%c0_2, %c0_3] : memref<1x32xf32, #tpu.memory_space<vmem>>, vector<1x32xf32>
    %c0_4 = arith.constant 0 : index
    %c0_5 = arith.constant 0 : index
    %3 = vector.load %arg5[%c0_4, %c0_5] : memref<1x32xf32, #tpu.memory_space<vmem>>, vector<1x32xf32>
    %cst = arith.constant dense<0.000000e+00> : vector<3xf32>
    %4 = vector.multi_reduction <add>, %1, %cst [1] : vector<3x32xf32> to vector<3xf32>
    %5 = vector.shape_cast %4 : vector<3xf32> to vector<3x1xf32>
    %cst_6 = arith.constant 3.200000e+01 : f32
    %6 = vector.broadcast %cst_6 : f32 to vector<3x1xf32>
    %7 = arith.divf %5, %6 : vector<3x1xf32>
    %8 = vector.broadcast %7 : vector<3x1xf32> to vector<3x32xf32>
    %9 = arith.subf %1, %8 : vector<3x32xf32>
    %10 = arith.mulf %9, %9 : vector<3x32xf32>
    %cst_7 = arith.constant dense<0.000000e+00> : vector<3xf32>
    %11 = vector.multi_reduction <add>, %10, %cst_7 [1] : vector<3x32xf32> to vector<3xf32>
    %12 = vector.shape_cast %11 : vector<3xf32> to vector<3x1xf32>
    %cst_8 = arith.constant 3.200000e+01 : f32
    %13 = vector.broadcast %cst_8 : f32 to vector<3x1xf32>
    %14 = arith.divf %12, %13 : vector<3x1xf32>
    %15 = vector.broadcast %7 : vector<3x1xf32> to vector<3x32xf32>
    %16 = arith.subf %1, %15 : vector<3x32xf32>
    %cst_9 = arith.constant 9.99999996E-13 : f32
    %17 = vector.broadcast %cst_9 : f32 to vector<3x1xf32>
    %18 = arith.addf %14, %17 : vector<3x1xf32>
    %19 = math.rsqrt %18 : vector<3x1xf32>
    %20 = vector.broadcast %19 : vector<3x1xf32> to vector<3x32xf32>
    %21 = arith.mulf %16, %20 : vector<3x32xf32>
    %22 = vector.broadcast %2 : vector<1x32xf32> to vector<3x32xf32>
    %23 = arith.mulf %21, %22 : vector<3x32xf32>
    %24 = vector.broadcast %3 : vector<1x32xf32> to vector<3x32xf32>
    %25 = arith.addf %23, %24 : vector<3x32xf32>
    %26 = arith.truncf %25 : vector<3x32xf32> to vector<3x32xbf16>
    %27 = arith.truncf %25 : vector<3x32xf32> to vector<3x32xbf16>
    %28 = arith.index_cast %arg0 : i32 to index
    %29 = memref.load %arg1[%28] : memref<2xi32, #tpu.memory_space<smem>>
    %30 = tpu.iota {dimensions = array<i32: 1>} : vector<3x3xi32>
    %31 = vector.broadcast %29 : i32 to vector<3x3xi32>
    %32 = arith.cmpi slt, %30, %31 : vector<3x3xi32>
    %c0_10 = arith.constant 0 : index
    %c0_11 = arith.constant 0 : index
    %33 = vector.load %arg13[%c0_10, %c0_11] : memref<1x32xf32, #tpu.memory_space<vmem>>, vector<1x32xf32>
    %34 = vector.broadcast %33 : vector<1x32xf32> to vector<3x32xf32>
    %35 = arith.addf %1, %34 : vector<3x32xf32>
    %c0_12 = arith.constant 0 : index
    %c0_13 = arith.constant 0 : index
    %c0_14 = arith.constant 0 : index
    %36 = vector.load %arg6[%c0_12, %c0_13, %c0_14] : memref<4x32x8xbf16, #tpu.memory_space<vmem>>, vector<1x32x8xbf16>
    %37 = vector.shape_cast %36 : vector<1x32x8xbf16> to vector<32x8xbf16>
    %cst_15 = arith.constant dense<0.000000e+00> : vector<3x8xf32>
    %38 = tpu.matmul %26, %37, %cst_15 {dimension_numbers = #tpu.dot_dimension_numbers<[1], [0], [0], [1], [0, 0, 1, 1], [], []>} : vector<3x32xbf16>, vector<32x8xbf16>, vector<3x8xf32> -> vector<3x8xf32>
    %c0_16 = arith.constant 0 : index
    %c0_17 = arith.constant 0 : index
    %c0_18 = arith.constant 0 : index
    %39 = vector.load %arg7[%c0_16, %c0_17, %c0_18] : memref<4x1x8xf32, #tpu.memory_space<vmem>>, vector<1x1x8xf32>
    %40 = vector.shape_cast %39 : vector<1x1x8xf32> to vector<1x8xf32>
    %41 = vector.broadcast %40 : vector<1x8xf32> to vector<3x8xf32>
    %42 = arith.addf %38, %41 : vector<3x8xf32>
    %c0_19 = arith.constant 0 : index
    %c0_20 = arith.constant 0 : index
    %c0_21 = arith.constant 0 : index
    %43 = vector.load %arg8[%c0_19, %c0_20, %c0_21] : memref<4x32x8xbf16, #tpu.memory_space<vmem>>, vector<1x32x8xbf16>
    %44 = vector.shape_cast %43 : vector<1x32x8xbf16> to vector<32x8xbf16>
    %cst_22 = arith.constant dense<0.000000e+00> : vector<3x8xf32>
    %45 = tpu.matmul %27, %44, %cst_22 {dimension_numbers = #tpu.dot_dimension_numbers<[1], [0], [0], [1], [0, 0, 1, 1], [], []>} : vector<3x32xbf16>, vector<32x8xbf16>, vector<3x8xf32> -> vector<3x8xf32>
    %c0_23 = arith.constant 0 : index
    %c0_24 = arith.constant 0 : index
    %c0_25 = arith.constant 0 : index
    %46 = vector.load %arg9[%c0_23, %c0_24, %c0_25] : memref<4x1x8xf32, #tpu.memory_space<vmem>>, vector<1x1x8xf32>
    %47 = vector.shape_cast %46 : vector<1x1x8xf32> to vector<1x8xf32>
    %48 = vector.broadcast %47 : vector<1x8xf32> to vector<3x8xf32>
    %49 = arith.addf %45, %48 : vector<3x8xf32>
    %c0_26 = arith.constant 0 : index
    %c0_27 = arith.constant 0 : index
    %c0_28 = arith.constant 0 : index
    %50 = vector.load %arg10[%c0_26, %c0_27, %c0_28] : memref<4x32x8xbf16, #tpu.memory_space<vmem>>, vector<1x32x8xbf16>
    %51 = vector.shape_cast %50 : vector<1x32x8xbf16> to vector<32x8xbf16>
    %cst_29 = arith.constant dense<0.000000e+00> : vector<3x8xf32>
    %52 = tpu.matmul %27, %51, %cst_29 {dimension_numbers = #tpu.dot_dimension_numbers<[1], [0], [0], [1], [0, 0, 1, 1], [], []>} : vector<3x32xbf16>, vector<32x8xbf16>, vector<3x8xf32> -> vector<3x8xf32>
    %c0_30 = arith.constant 0 : index
    %c0_31 = arith.constant 0 : index
    %c0_32 = arith.constant 0 : index
    %53 = vector.load %arg11[%c0_30, %c0_31, %c0_32] : memref<4x1x8xf32, #tpu.memory_space<vmem>>, vector<1x1x8xf32>
    %54 = vector.shape_cast %53 : vector<1x1x8xf32> to vector<1x8xf32>
    %55 = vector.broadcast %54 : vector<1x8xf32> to vector<3x8xf32>
    %56 = arith.addf %52, %55 : vector<3x8xf32>
    %57 = arith.truncf %42 : vector<3x8xf32> to vector<3x8xbf16>
    %58 = arith.truncf %49 : vector<3x8xf32> to vector<3x8xbf16>
    %cst_33 = arith.constant dense<0.000000e+00> : vector<3x3xf32>
    %59 = tpu.matmul %57, %58, %cst_33 {dimension_numbers = #tpu.dot_dimension_numbers<[1], [1], [0], [0], [0, 0, 1, 0], [], []>} : vector<3x8xbf16>, vector<3x8xbf16>, vector<3x3xf32> -> vector<3x3xf32>
    %cst_34 = arith.constant 0.353553385 : f32
    %60 = vector.broadcast %cst_34 : f32 to vector<3x3xf32>
    %61 = arith.mulf %59, %60 : vector<3x3xf32>
    %cst_35 = arith.constant -3.40282347E+38 : f32
    %62 = vector.broadcast %cst_35 : f32 to vector<3x3xf32>
    %63 = arith.select %32, %61, %62 : vector<3x3xi1>, vector<3x3xf32>
    %cst_36 = arith.constant dense<0xFF800000> : vector<3xf32>
    %64 = vector.multi_reduction <maximumf>, %63, %cst_36 [1] : vector<3x3xf32> to vector<3xf32>
    %65 = vector.shape_cast %64 : vector<3xf32> to vector<3x1xf32>
    %66 = vector.broadcast %65 : vector<3x1xf32> to vector<3x3xf32>
    %67 = arith.subf %63, %66 : vector<3x3xf32>
    %68 = math.exp %67 : vector<3x3xf32>
    %cst_37 = arith.constant dense<0.000000e+00> : vector<3xf32>
    %69 = vector.multi_reduction <add>, %68, %cst_37 [1] : vector<3x3xf32> to vector<3xf32>
    %70 = vector.shape_cast %69 : vector<3xf32> to vector<3x1xf32>
    %71 = tpu.reciprocal %70 {approx = true} : vector<3x1xf32> -> vector<3x1xf32>
    %72 = vector.broadcast %71 : vector<3x1xf32> to vector<3x3xf32>
    %73 = arith.mulf %68, %72 : vector<3x3xf32>
    %cst_38 = arith.constant 0.000000e+00 : f32
    %74 = vector.broadcast %cst_38 : f32 to vector<3x3xf32>
    %75 = arith.select %32, %73, %74 : vector<3x3xi1>, vector<3x3xf32>
    %76 = arith.truncf %75 : vector<3x3xf32> to vector<3x3xbf16>
    %77 = arith.truncf %56 : vector<3x8xf32> to vector<3x8xbf16>
    %cst_39 = arith.constant dense<0.000000e+00> : vector<3x8xf32>
    %78 = tpu.matmul %76, %77, %cst_39 {dimension_numbers = #tpu.dot_dimension_numbers<[1], [0], [0], [1], [0, 0, 1, 1], [], []>} : vector<3x3xbf16>, vector<3x8xbf16>, vector<3x8xf32> -> vector<3x8xf32>
    %79 = arith.truncf %78 : vector<3x8xf32> to vector<3x8xbf16>
    %c0_40 = arith.constant 0 : index
    %c0_41 = arith.constant 0 : index
    %c0_42 = arith.constant 0 : index
    %80 = vector.load %arg12[%c0_40, %c0_41, %c0_42] : memref<4x8x32xbf16, #tpu.memory_space<vmem>>, vector<1x8x32xbf16>
    %81 = vector.shape_cast %80 : vector<1x8x32xbf16> to vector<8x32xbf16>
    %cst_43 = arith.constant dense<0.000000e+00> : vector<3x32xf32>
    %82 = tpu.matmul %79, %81, %cst_43 {dimension_numbers = #tpu.dot_dimension_numbers<[1], [0], [0], [1], [0, 0, 1, 1], [], []>} : vector<3x8xbf16>, vector<8x32xbf16>, vector<3x32xf32> -> vector<3x32xf32>
    %83 = arith.addf %35, %82 : vector<3x32xf32>
    %c1 = arith.constant 1 : index
    %c0_44 = arith.constant 0 : index
    %c0_45 = arith.constant 0 : index
    %84 = vector.load %arg6[%c1, %c0_44, %c0_45] : memref<4x32x8xbf16, #tpu.memory_space<vmem>>, vector<1x32x8xbf16>
    %85 = vector.shape_cast %84 : vector<1x32x8xbf16> to vector<32x8xbf16>
    %cst_46 = arith.constant dense<0.000000e+00> : vector<3x8xf32>
    %86 = tpu.matmul %26, %85, %cst_46 {dimension_numbers = #tpu.dot_dimension_numbers<[1], [0], [0], [1], [0, 0, 1, 1], [], []>} : vector<3x32xbf16>, vector<32x8xbf16>, vector<3x8xf32> -> vector<3x8xf32>
    %c1_47 = arith.constant 1 : index
    %c0_48 = arith.constant 0 : index
    %c0_49 = arith.constant 0 : index
    %87 = vector.load %arg7[%c1_47, %c0_48, %c0_49] : memref<4x1x8xf32, #tpu.memory_space<vmem>>, vector<1x1x8xf32>
    %88 = vector.shape_cast %87 : vector<1x1x8xf32> to vector<1x8xf32>
    %89 = vector.broadcast %88 : vector<1x8xf32> to vector<3x8xf32>
    %90 = arith.addf %86, %89 : vector<3x8xf32>
    %c1_50 = arith.constant 1 : index
    %c0_51 = arith.constant 0 : index
    %c0_52 = arith.constant 0 : index
    %91 = vector.load %arg8[%c1_50, %c0_51, %c0_52] : memref<4x32x8xbf16, #tpu.memory_space<vmem>>, vector<1x32x8xbf16>
    %92 = vector.shape_cast %91 : vector<1x32x8xbf16> to vector<32x8xbf16>
    %cst_53 = arith.constant dense<0.000000e+00> : vector<3x8xf32>
    %93 = tpu.matmul %27, %92, %cst_53 {dimension_numbers = #tpu.dot_dimension_numbers<[1], [0], [0], [1], [0, 0, 1, 1], [], []>} : vector<3x32xbf16>, vector<32x8xbf16>, vector<3x8xf32> -> vector<3x8xf32>
    %c1_54 = arith.constant 1 : index
    %c0_55 = arith.constant 0 : index
    %c0_56 = arith.constant 0 : index
    %94 = vector.load %arg9[%c1_54, %c0_55, %c0_56] : memref<4x1x8xf32, #tpu.memory_space<vmem>>, vector<1x1x8xf32>
    %95 = vector.shape_cast %94 : vector<1x1x8xf32> to vector<1x8xf32>
    %96 = vector.broadcast %95 : vector<1x8xf32> to vector<3x8xf32>
    %97 = arith.addf %93, %96 : vector<3x8xf32>
    %c1_57 = arith.constant 1 : index
    %c0_58 = arith.constant 0 : index
    %c0_59 = arith.constant 0 : index
    %98 = vector.load %arg10[%c1_57, %c0_58, %c0_59] : memref<4x32x8xbf16, #tpu.memory_space<vmem>>, vector<1x32x8xbf16>
    %99 = vector.shape_cast %98 : vector<1x32x8xbf16> to vector<32x8xbf16>
    %cst_60 = arith.constant dense<0.000000e+00> : vector<3x8xf32>
    %100 = tpu.matmul %27, %99, %cst_60 {dimension_numbers = #tpu.dot_dimension_numbers<[1], [0], [0], [1], [0, 0, 1, 1], [], []>} : vector<3x32xbf16>, vector<32x8xbf16>, vector<3x8xf32> -> vector<3x8xf32>
    %c1_61 = arith.constant 1 : index
    %c0_62 = arith.constant 0 : index
    %c0_63 = arith.constant 0 : index
    %101 = vector.load %arg11[%c1_61, %c0_62, %c0_63] : memref<4x1x8xf32, #tpu.memory_space<vmem>>, vector<1x1x8xf32>
    %102 = vector.shape_cast %101 : vector<1x1x8xf32> to vector<1x8xf32>
    %103 = vector.broadcast %102 : vector<1x8xf32> to vector<3x8xf32>
    %104 = arith.addf %100, %103 : vector<3x8xf32>
    %105 = arith.truncf %90 : vector<3x8xf32> to vector<3x8xbf16>
    %106 = arith.truncf %97 : vector<3x8xf32> to vector<3x8xbf16>
    %cst_64 = arith.constant dense<0.000000e+00> : vector<3x3xf32>
    %107 = tpu.matmul %105, %106, %cst_64 {dimension_numbers = #tpu.dot_dimension_numbers<[1], [1], [0], [0], [0, 0, 1, 0], [], []>} : vector<3x8xbf16>, vector<3x8xbf16>, vector<3x3xf32> -> vector<3x3xf32>
    %cst_65 = arith.constant 0.353553385 : f32
    %108 = vector.broadcast %cst_65 : f32 to vector<3x3xf32>
    %109 = arith.mulf %107, %108 : vector<3x3xf32>
    %cst_66 = arith.constant -3.40282347E+38 : f32
    %110 = vector.broadcast %cst_66 : f32 to vector<3x3xf32>
    %111 = arith.select %32, %109, %110 : vector<3x3xi1>, vector<3x3xf32>
    %cst_67 = arith.constant dense<0xFF800000> : vector<3xf32>
    %112 = vector.multi_reduction <maximumf>, %111, %cst_67 [1] : vector<3x3xf32> to vector<3xf32>
    %113 = vector.shape_cast %112 : vector<3xf32> to vector<3x1xf32>
    %114 = vector.broadcast %113 : vector<3x1xf32> to vector<3x3xf32>
    %115 = arith.subf %111, %114 : vector<3x3xf32>
    %116 = math.exp %115 : vector<3x3xf32>
    %cst_68 = arith.constant dense<0.000000e+00> : vector<3xf32>
    %117 = vector.multi_reduction <add>, %116, %cst_68 [1] : vector<3x3xf32> to vector<3xf32>
    %118 = vector.shape_cast %117 : vector<3xf32> to vector<3x1xf32>
    %119 = tpu.reciprocal %118 {approx = true} : vector<3x1xf32> -> vector<3x1xf32>
    %120 = vector.broadcast %119 : vector<3x1xf32> to vector<3x3xf32>
    %121 = arith.mulf %116, %120 : vector<3x3xf32>
    %cst_69 = arith.constant 0.000000e+00 : f32
    %122 = vector.broadcast %cst_69 : f32 to vector<3x3xf32>
    %123 = arith.select %32, %121, %122 : vector<3x3xi1>, vector<3x3xf32>
    %124 = arith.truncf %123 : vector<3x3xf32> to vector<3x3xbf16>
    %125 = arith.truncf %104 : vector<3x8xf32> to vector<3x8xbf16>
    %cst_70 = arith.constant dense<0.000000e+00> : vector<3x8xf32>
    %126 = tpu.matmul %124, %125, %cst_70 {dimension_numbers = #tpu.dot_dimension_numbers<[1], [0], [0], [1], [0, 0, 1, 1], [], []>} : vector<3x3xbf16>, vector<3x8xbf16>, vector<3x8xf32> -> vector<3x8xf32>
    %127 = arith.truncf %126 : vector<3x8xf32> to vector<3x8xbf16>
    %c1_71 = arith.constant 1 : index
    %c0_72 = arith.constant 0 : index
    %c0_73 = arith.constant 0 : index
    %128 = vector.load %arg12[%c1_71, %c0_72, %c0_73] : memref<4x8x32xbf16, #tpu.memory_space<vmem>>, vector<1x8x32xbf16>
    %129 = vector.shape_cast %128 : vector<1x8x32xbf16> to vector<8x32xbf16>
    %cst_74 = arith.constant dense<0.000000e+00> : vector<3x32xf32>
    %130 = tpu.matmul %127, %129, %cst_74 {dimension_numbers = #tpu.dot_dimension_numbers<[1], [0], [0], [1], [0, 0, 1, 1], [], []>} : vector<3x8xbf16>, vector<8x32xbf16>, vector<3x32xf32> -> vector<3x32xf32>
    %131 = arith.addf %83, %130 : vector<3x32xf32>
    %c2 = arith.constant 2 : index
    %c0_75 = arith.constant 0 : index
    %c0_76 = arith.constant 0 : index
    %132 = vector.load %arg6[%c2, %c0_75, %c0_76] : memref<4x32x8xbf16, #tpu.memory_space<vmem>>, vector<1x32x8xbf16>
    %133 = vector.shape_cast %132 : vector<1x32x8xbf16> to vector<32x8xbf16>
    %cst_77 = arith.constant dense<0.000000e+00> : vector<3x8xf32>
    %134 = tpu.matmul %26, %133, %cst_77 {dimension_numbers = #tpu.dot_dimension_numbers<[1], [0], [0], [1], [0, 0, 1, 1], [], []>} : vector<3x32xbf16>, vector<32x8xbf16>, vector<3x8xf32> -> vector<3x8xf32>
    %c2_78 = arith.constant 2 : index
    %c0_79 = arith.constant 0 : index
    %c0_80 = arith.constant 0 : index
    %135 = vector.load %arg7[%c2_78, %c0_79, %c0_80] : memref<4x1x8xf32, #tpu.memory_space<vmem>>, vector<1x1x8xf32>
    %136 = vector.shape_cast %135 : vector<1x1x8xf32> to vector<1x8xf32>
    %137 = vector.broadcast %136 : vector<1x8xf32> to vector<3x8xf32>
    %138 = arith.addf %134, %137 : vector<3x8xf32>
    %c2_81 = arith.constant 2 : index
    %c0_82 = arith.constant 0 : index
    %c0_83 = arith.constant 0 : index
    %139 = vector.load %arg8[%c2_81, %c0_82, %c0_83] : memref<4x32x8xbf16, #tpu.memory_space<vmem>>, vector<1x32x8xbf16>
    %140 = vector.shape_cast %139 : vector<1x32x8xbf16> to vector<32x8xbf16>
    %cst_84 = arith.constant dense<0.000000e+00> : vector<3x8xf32>
    %141 = tpu.matmul %27, %140, %cst_84 {dimension_numbers = #tpu.dot_dimension_numbers<[1], [0], [0], [1], [0, 0, 1, 1], [], []>} : vector<3x32xbf16>, vector<32x8xbf16>, vector<3x8xf32> -> vector<3x8xf32>
    %c2_85 = arith.constant 2 : index
    %c0_86 = arith.constant 0 : index
    %c0_87 = arith.constant 0 : index
    %142 = vector.load %arg9[%c2_85, %c0_86, %c0_87] : memref<4x1x8xf32, #tpu.memory_space<vmem>>, vector<1x1x8xf32>
    %143 = vector.shape_cast %142 : vector<1x1x8xf32> to vector<1x8xf32>
    %144 = vector.broadcast %143 : vector<1x8xf32> to vector<3x8xf32>
    %145 = arith.addf %141, %144 : vector<3x8xf32>
    %c2_88 = arith.constant 2 : index
    %c0_89 = arith.constant 0 : index
    %c0_90 = arith.constant 0 : index
    %146 = vector.load %arg10[%c2_88, %c0_89, %c0_90] : memref<4x32x8xbf16, #tpu.memory_space<vmem>>, vector<1x32x8xbf16>
    %147 = vector.shape_cast %146 : vector<1x32x8xbf16> to vector<32x8xbf16>
    %cst_91 = arith.constant dense<0.000000e+00> : vector<3x8xf32>
    %148 = tpu.matmul %27, %147, %cst_91 {dimension_numbers = #tpu.dot_dimension_numbers<[1], [0], [0], [1], [0, 0, 1, 1], [], []>} : vector<3x32xbf16>, vector<32x8xbf16>, vector<3x8xf32> -> vector<3x8xf32>
    %c2_92 = arith.constant 2 : index
    %c0_93 = arith.constant 0 : index
    %c0_94 = arith.constant 0 : index
    %149 = vector.load %arg11[%c2_92, %c0_93, %c0_94] : memref<4x1x8xf32, #tpu.memory_space<vmem>>, vector<1x1x8xf32>
    %150 = vector.shape_cast %149 : vector<1x1x8xf32> to vector<1x8xf32>
    %151 = vector.broadcast %150 : vector<1x8xf32> to vector<3x8xf32>
    %152 = arith.addf %148, %151 : vector<3x8xf32>
    %153 = arith.truncf %138 : vector<3x8xf32> to vector<3x8xbf16>
    %154 = arith.truncf %145 : vector<3x8xf32> to vector<3x8xbf16>
    %cst_95 = arith.constant dense<0.000000e+00> : vector<3x3xf32>
    %155 = tpu.matmul %153, %154, %cst_95 {dimension_numbers = #tpu.dot_dimension_numbers<[1], [1], [0], [0], [0, 0, 1, 0], [], []>} : vector<3x8xbf16>, vector<3x8xbf16>, vector<3x3xf32> -> vector<3x3xf32>
    %cst_96 = arith.constant 0.353553385 : f32
    %156 = vector.broadcast %cst_96 : f32 to vector<3x3xf32>
    %157 = arith.mulf %155, %156 : vector<3x3xf32>
    %cst_97 = arith.constant -3.40282347E+38 : f32
    %158 = vector.broadcast %cst_97 : f32 to vector<3x3xf32>
    %159 = arith.select %32, %157, %158 : vector<3x3xi1>, vector<3x3xf32>
    %cst_98 = arith.constant dense<0xFF800000> : vector<3xf32>
    %160 = vector.multi_reduction <maximumf>, %159, %cst_98 [1] : vector<3x3xf32> to vector<3xf32>
    %161 = vector.shape_cast %160 : vector<3xf32> to vector<3x1xf32>
    %162 = vector.broadcast %161 : vector<3x1xf32> to vector<3x3xf32>
    %163 = arith.subf %159, %162 : vector<3x3xf32>
    %164 = math.exp %163 : vector<3x3xf32>
    %cst_99 = arith.constant dense<0.000000e+00> : vector<3xf32>
    %165 = vector.multi_reduction <add>, %164, %cst_99 [1] : vector<3x3xf32> to vector<3xf32>
    %166 = vector.shape_cast %165 : vector<3xf32> to vector<3x1xf32>
    %167 = tpu.reciprocal %166 {approx = true} : vector<3x1xf32> -> vector<3x1xf32>
    %168 = vector.broadcast %167 : vector<3x1xf32> to vector<3x3xf32>
    %169 = arith.mulf %164, %168 : vector<3x3xf32>
    %cst_100 = arith.constant 0.000000e+00 : f32
    %170 = vector.broadcast %cst_100 : f32 to vector<3x3xf32>
    %171 = arith.select %32, %169, %170 : vector<3x3xi1>, vector<3x3xf32>
    %172 = arith.truncf %171 : vector<3x3xf32> to vector<3x3xbf16>
    %173 = arith.truncf %152 : vector<3x8xf32> to vector<3x8xbf16>
    %cst_101 = arith.constant dense<0.000000e+00> : vector<3x8xf32>
    %174 = tpu.matmul %172, %173, %cst_101 {dimension_numbers = #tpu.dot_dimension_numbers<[1], [0], [0], [1], [0, 0, 1, 1], [], []>} : vector<3x3xbf16>, vector<3x8xbf16>, vector<3x8xf32> -> vector<3x8xf32>
    %175 = arith.truncf %174 : vector<3x8xf32> to vector<3x8xbf16>
    %c2_102 = arith.constant 2 : index
    %c0_103 = arith.constant 0 : index
    %c0_104 = arith.constant 0 : index
    %176 = vector.load %arg12[%c2_102, %c0_103, %c0_104] : memref<4x8x32xbf16, #tpu.memory_space<vmem>>, vector<1x8x32xbf16>
    %177 = vector.shape_cast %176 : vector<1x8x32xbf16> to vector<8x32xbf16>
    %cst_105 = arith.constant dense<0.000000e+00> : vector<3x32xf32>
    %178 = tpu.matmul %175, %177, %cst_105 {dimension_numbers = #tpu.dot_dimension_numbers<[1], [0], [0], [1], [0, 0, 1, 1], [], []>} : vector<3x8xbf16>, vector<8x32xbf16>, vector<3x32xf32> -> vector<3x32xf32>
    %179 = arith.addf %131, %178 : vector<3x32xf32>
    %c3 = arith.constant 3 : index
    %c0_106 = arith.constant 0 : index
    %c0_107 = arith.constant 0 : index
    %180 = vector.load %arg6[%c3, %c0_106, %c0_107] : memref<4x32x8xbf16, #tpu.memory_space<vmem>>, vector<1x32x8xbf16>
    %181 = vector.shape_cast %180 : vector<1x32x8xbf16> to vector<32x8xbf16>
    %cst_108 = arith.constant dense<0.000000e+00> : vector<3x8xf32>
    %182 = tpu.matmul %26, %181, %cst_108 {dimension_numbers = #tpu.dot_dimension_numbers<[1], [0], [0], [1], [0, 0, 1, 1], [], []>} : vector<3x32xbf16>, vector<32x8xbf16>, vector<3x8xf32> -> vector<3x8xf32>
    %c3_109 = arith.constant 3 : index
    %c0_110 = arith.constant 0 : index
    %c0_111 = arith.constant 0 : index
    %183 = vector.load %arg7[%c3_109, %c0_110, %c0_111] : memref<4x1x8xf32, #tpu.memory_space<vmem>>, vector<1x1x8xf32>
    %184 = vector.shape_cast %183 : vector<1x1x8xf32> to vector<1x8xf32>
    %185 = vector.broadcast %184 : vector<1x8xf32> to vector<3x8xf32>
    %186 = arith.addf %182, %185 : vector<3x8xf32>
    %c3_112 = arith.constant 3 : index
    %c0_113 = arith.constant 0 : index
    %c0_114 = arith.constant 0 : index
    %187 = vector.load %arg8[%c3_112, %c0_113, %c0_114] : memref<4x32x8xbf16, #tpu.memory_space<vmem>>, vector<1x32x8xbf16>
    %188 = vector.shape_cast %187 : vector<1x32x8xbf16> to vector<32x8xbf16>
    %cst_115 = arith.constant dense<0.000000e+00> : vector<3x8xf32>
    %189 = tpu.matmul %27, %188, %cst_115 {dimension_numbers = #tpu.dot_dimension_numbers<[1], [0], [0], [1], [0, 0, 1, 1], [], []>} : vector<3x32xbf16>, vector<32x8xbf16>, vector<3x8xf32> -> vector<3x8xf32>
    %c3_116 = arith.constant 3 : index
    %c0_117 = arith.constant 0 : index
    %c0_118 = arith.constant 0 : index
    %190 = vector.load %arg9[%c3_116, %c0_117, %c0_118] : memref<4x1x8xf32, #tpu.memory_space<vmem>>, vector<1x1x8xf32>
    %191 = vector.shape_cast %190 : vector<1x1x8xf32> to vector<1x8xf32>
    %192 = vector.broadcast %191 : vector<1x8xf32> to vector<3x8xf32>
    %193 = arith.addf %189, %192 : vector<3x8xf32>
    %c3_119 = arith.constant 3 : index
    %c0_120 = arith.constant 0 : index
    %c0_121 = arith.constant 0 : index
    %194 = vector.load %arg10[%c3_119, %c0_120, %c0_121] : memref<4x32x8xbf16, #tpu.memory_space<vmem>>, vector<1x32x8xbf16>
    %195 = vector.shape_cast %194 : vector<1x32x8xbf16> to vector<32x8xbf16>
    %cst_122 = arith.constant dense<0.000000e+00> : vector<3x8xf32>
    %196 = tpu.matmul %27, %195, %cst_122 {dimension_numbers = #tpu.dot_dimension_numbers<[1], [0], [0], [1], [0, 0, 1, 1], [], []>} : vector<3x32xbf16>, vector<32x8xbf16>, vector<3x8xf32> -> vector<3x8xf32>
    %c3_123 = arith.constant 3 : index
    %c0_124 = arith.constant 0 : index
    %c0_125 = arith.constant 0 : index
    %197 = vector.load %arg11[%c3_123, %c0_124, %c0_125] : memref<4x1x8xf32, #tpu.memory_space<vmem>>, vector<1x1x8xf32>
    %198 = vector.shape_cast %197 : vector<1x1x8xf32> to vector<1x8xf32>
    %199 = vector.broadcast %198 : vector<1x8xf32> to vector<3x8xf32>
    %200 = arith.addf %196, %199 : vector<3x8xf32>
    %201 = arith.truncf %186 : vector<3x8xf32> to vector<3x8xbf16>
    %202 = arith.truncf %193 : vector<3x8xf32> to vector<3x8xbf16>
    %cst_126 = arith.constant dense<0.000000e+00> : vector<3x3xf32>
    %203 = tpu.matmul %201, %202, %cst_126 {dimension_numbers = #tpu.dot_dimension_numbers<[1], [1], [0], [0], [0, 0, 1, 0], [], []>} : vector<3x8xbf16>, vector<3x8xbf16>, vector<3x3xf32> -> vector<3x3xf32>
    %cst_127 = arith.constant 0.353553385 : f32
    %204 = vector.broadcast %cst_127 : f32 to vector<3x3xf32>
    %205 = arith.mulf %203, %204 : vector<3x3xf32>
    %cst_128 = arith.constant -3.40282347E+38 : f32
    %206 = vector.broadcast %cst_128 : f32 to vector<3x3xf32>
    %207 = arith.select %32, %205, %206 : vector<3x3xi1>, vector<3x3xf32>
    %cst_129 = arith.constant dense<0xFF800000> : vector<3xf32>
    %208 = vector.multi_reduction <maximumf>, %207, %cst_129 [1] : vector<3x3xf32> to vector<3xf32>
    %209 = vector.shape_cast %208 : vector<3xf32> to vector<3x1xf32>
    %210 = vector.broadcast %209 : vector<3x1xf32> to vector<3x3xf32>
    %211 = arith.subf %207, %210 : vector<3x3xf32>
    %212 = math.exp %211 : vector<3x3xf32>
    %cst_130 = arith.constant dense<0.000000e+00> : vector<3xf32>
    %213 = vector.multi_reduction <add>, %212, %cst_130 [1] : vector<3x3xf32> to vector<3xf32>
    %214 = vector.shape_cast %213 : vector<3xf32> to vector<3x1xf32>
    %215 = tpu.reciprocal %214 {approx = true} : vector<3x1xf32> -> vector<3x1xf32>
    %216 = vector.broadcast %215 : vector<3x1xf32> to vector<3x3xf32>
    %217 = arith.mulf %212, %216 : vector<3x3xf32>
    %cst_131 = arith.constant 0.000000e+00 : f32
    %218 = vector.broadcast %cst_131 : f32 to vector<3x3xf32>
    %219 = arith.select %32, %217, %218 : vector<3x3xi1>, vector<3x3xf32>
    %220 = arith.truncf %219 : vector<3x3xf32> to vector<3x3xbf16>
    %221 = arith.truncf %200 : vector<3x8xf32> to vector<3x8xbf16>
    %cst_132 = arith.constant dense<0.000000e+00> : vector<3x8xf32>
    %222 = tpu.matmul %220, %221, %cst_132 {dimension_numbers = #tpu.dot_dimension_numbers<[1], [0], [0], [1], [0, 0, 1, 1], [], []>} : vector<3x3xbf16>, vector<3x8xbf16>, vector<3x8xf32> -> vector<3x8xf32>
    %223 = arith.truncf %222 : vector<3x8xf32> to vector<3x8xbf16>
    %c3_133 = arith.constant 3 : index
    %c0_134 = arith.constant 0 : index
    %c0_135 = arith.constant 0 : index
    %224 = vector.load %arg12[%c3_133, %c0_134, %c0_135] : memref<4x8x32xbf16, #tpu.memory_space<vmem>>, vector<1x8x32xbf16>
    %225 = vector.shape_cast %224 : vector<1x8x32xbf16> to vector<8x32xbf16>
    %cst_136 = arith.constant dense<0.000000e+00> : vector<3x32xf32>
    %226 = tpu.matmul %223, %225, %cst_136 {dimension_numbers = #tpu.dot_dimension_numbers<[1], [0], [0], [1], [0, 0, 1, 1], [], []>} : vector<3x8xbf16>, vector<8x32xbf16>, vector<3x32xf32> -> vector<3x32xf32>
    %227 = arith.addf %179, %226 : vector<3x32xf32>
    %c0_137 = arith.constant 0 : index
    %c0_138 = arith.constant 0 : index
    %c0_139 = arith.constant 0 : index
    %228 = vector.load %arg14[%c0_137, %c0_138, %c0_139] : memref<1x3x32xf32, #tpu.memory_space<vmem>>, vector<1x3x32xf32>
    %229 = vector.shape_cast %228 : vector<1x3x32xf32> to vector<3x32xf32>
    %230 = vector.shape_cast %227 : vector<3x32xf32> to vector<1x3x32xf32>
    tpu.vector_store %arg14[%c0_137, %c0_138, %c0_139], %230 {strides = array<i32>} : memref<1x3x32xf32, #tpu.memory_space<vmem>>, vector<1x3x32xf32>,
    return
  }
  func.func @transform_0(%arg0: i32, %arg1: memref<2xi32, #tpu.memory_space<smem>>) -> (i32, i32, i32) {
    %c0_i32 = arith.constant 0 : i32
    %c0_i32_0 = arith.constant 0 : i32
    %c0_i32_1 = arith.constant 0 : i32
    return %arg0, %c0_i32, %c0_i32_0 : i32, i32, i32
  }
  func.func @transform_1(%arg0: i32, %arg1: memref<2xi32, #tpu.memory_space<smem>>) -> (i32, i32, i32) {
    %c0_i32 = arith.constant 0 : i32
    %c0_i32_0 = arith.constant 0 : i32
    %c0_i32_1 = arith.constant 0 : i32
    return %arg0, %c0_i32, %c0_i32_0 : i32, i32, i32
  }
  func.func @transform_2(%arg0: i32, %arg1: memref<2xi32, #tpu.memory_space<smem>>) -> (i32, i32) {
    %c0_i32 = arith.constant 0 : i32
    %c0_i32_0 = arith.constant 0 : i32
    %c0_i32_1 = arith.constant 0 : i32
    return %c0_i32, %c0_i32_0 : i32, i32
  }
  func.func @transform_3(%arg0: i32, %arg1: memref<2xi32, #tpu.memory_space<smem>>) -> (i32, i32) {
    %c0_i32 = arith.constant 0 : i32
    %c0_i32_0 = arith.constant 0 : i32
    %c0_i32_1 = arith.constant 0 : i32
    return %c0_i32, %c0_i32_0 : i32, i32
  }
  func.func @transform_4(%arg0: i32, %arg1: memref<2xi32, #tpu.memory_space<smem>>) -> (i32, i32, i32) {
    %c0_i32 = arith.constant 0 : i32
    %c0_i32_0 = arith.constant 0 : i32
    %c0_i32_1 = arith.constant 0 : i32
    %c0_i32_2 = arith.constant 0 : i32
    return %c0_i32, %c0_i32_0, %c0_i32_1 : i32, i32, i32
  }
  func.func @transform_5(%arg0: i32, %arg1: memref<2xi32, #tpu.memory_space<smem>>) -> (i32, i32, i32) {
    %c0_i32 = arith.constant 0 : i32
    %c0_i32_0 = arith.constant 0 : i32
    %c0_i32_1 = arith.constant 0 : i32
    %c0_i32_2 = arith.constant 0 : i32
    return %c0_i32, %c0_i32_0, %c0_i32_1 : i32, i32, i32
  }
  func.func @transform_6(%arg0: i32, %arg1: memref<2xi32, #tpu.memory_space<smem>>) -> (i32, i32, i32) {
    %c0_i32 = arith.constant 0 : i32
    %c0_i32_0 = arith.constant 0 : i32
    %c0_i32_1 = arith.constant 0 : i32
    %c0_i32_2 = arith.constant 0 : i32
    return %c0_i32, %c0_i32_0, %c0_i32_1 : i32, i32, i32
  }
  func.func @transform_7(%arg0: i32, %arg1: memref<2xi32, #tpu.memory_space<smem>>) -> (i32, i32, i32) {
    %c0_i32 = arith.constant 0 : i32
    %c0_i32_0 = arith.constant 0 : i32
    %c0_i32_1 = arith.constant 0 : i32
    %c0_i32_2 = arith.constant 0 : i32
    return %c0_i32, %c0_i32_0, %c0_i32_1 : i32, i32, i32
  }
  func.func @transform_8(%arg0: i32, %arg1: memref<2xi32, #tpu.memory_space<smem>>) -> (i32, i32, i32) {
    %c0_i32 = arith.constant 0 : i32
    %c0_i32_0 = arith.constant 0 : i32
    %c0_i32_1 = arith.constant 0 : i32
    %c0_i32_2 = arith.constant 0 : i32
    return %c0_i32, %c0_i32_0, %c0_i32_1 : i32, i32, i32
  }
  func.func @transform_9(%arg0: i32, %arg1: memref<2xi32, #tpu.memory_space<smem>>) -> (i32, i32, i32) {
    %c0_i32 = arith.constant 0 : i32
    %c0_i32_0 = arith.constant 0 : i32
    %c0_i32_1 = arith.constant 0 : i32
    %c0_i32_2 = arith.constant 0 : i32
    return %c0_i32, %c0_i32_0, %c0_i32_1 : i32, i32, i32
  }
  func.func @transform_10(%arg0: i32, %arg1: memref<2xi32, #tpu.memory_space<smem>>) -> (i32, i32, i32) {
    %c0_i32 = arith.constant 0 : i32
    %c0_i32_0 = arith.constant 0 : i32
    %c0_i32_1 = arith.constant 0 : i32
    %c0_i32_2 = arith.constant 0 : i32
    return %c0_i32, %c0_i32_0, %c0_i32_1 : i32, i32, i32
  }
  func.func @transform_11(%arg0: i32, %arg1: memref<2xi32, #tpu.memory_space<smem>>) -> (i32, i32) {
    %c0_i32 = arith.constant 0 : i32
    %c0_i32_0 = arith.constant 0 : i32
    %c0_i32_1 = arith.constant 0 : i32
    return %c0_i32, %c0_i32_0 : i32, i32
  }
  func.func @transform_12(%arg0: i32, %arg1: memref<2xi32, #tpu.memory_space<smem>>) -> (i32, i32, i32) {
    %c0_i32 = arith.constant 0 : i32
    %c0_i32_0 = arith.constant 0 : i32
    %c0_i32_1 = arith.constant 0 : i32
    return %arg0, %c0_i32, %c0_i32_0 : i32, i32, i32
  }
}

module attributes {stable_mosaic.version = 11 : i64} {
  func.func @_layernorm_kernel(%arg0: i32, %arg1: memref<6x32xf32, #tpu.memory_space<vmem>>, %arg2: memref<1x32xf32, #tpu.memory_space<vmem>>, %arg3: memref<1x32xf32, #tpu.memory_space<vmem>>, %arg4: memref<6x32xf32, #tpu.memory_space<vmem>>) attributes {dimension_semantics = [#tpu.dimension_semantics<parallel>], iteration_bounds = array<i64: 1>, scalar_prefetch = 0 : i64, scratch_operands = 0 : i64, tpu.core_type = #tpu.core_type<tc>, window_params = [{transform_indices = @transform_0, window_bounds = array<i64: 6, 32>}, {pipeline_mode = #tpu.pipeline_mode<synchronous>, transform_indices = @transform_1, window_bounds = array<i64: 1, 32>}, {pipeline_mode = #tpu.pipeline_mode<synchronous>, transform_indices = @transform_2, window_bounds = array<i64: 1, 32>}, {transform_indices = @transform_3, window_bounds = array<i64: 6, 32>}]} {
    %c0 = arith.constant 0 : index
    %c0_0 = arith.constant 0 : index
    %0 = vector.load %arg1[%c0, %c0_0] : memref<6x32xf32, #tpu.memory_space<vmem>>, vector<6x32xf32>
    %c0_1 = arith.constant 0 : index
    %c0_2 = arith.constant 0 : index
    %1 = vector.load %arg2[%c0_1, %c0_2] : memref<1x32xf32, #tpu.memory_space<vmem>>, vector<1x32xf32>
    %c0_3 = arith.constant 0 : index
    %c0_4 = arith.constant 0 : index
    %2 = vector.load %arg3[%c0_3, %c0_4] : memref<1x32xf32, #tpu.memory_space<vmem>>, vector<1x32xf32>
    %cst = arith.constant dense<0.000000e+00> : vector<6xf32>
    %3 = vector.multi_reduction <add>, %0, %cst [1] : vector<6x32xf32> to vector<6xf32>
    %4 = vector.shape_cast %3 : vector<6xf32> to vector<6x1xf32>
    %cst_5 = arith.constant 3.200000e+01 : f32
    %5 = vector.broadcast %cst_5 : f32 to vector<6x1xf32>
    %6 = arith.divf %4, %5 : vector<6x1xf32>
    %7 = vector.broadcast %6 : vector<6x1xf32> to vector<6x32xf32>
    %8 = arith.subf %0, %7 : vector<6x32xf32>
    %9 = arith.mulf %8, %8 : vector<6x32xf32>
    %cst_6 = arith.constant dense<0.000000e+00> : vector<6xf32>
    %10 = vector.multi_reduction <add>, %9, %cst_6 [1] : vector<6x32xf32> to vector<6xf32>
    %11 = vector.shape_cast %10 : vector<6xf32> to vector<6x1xf32>
    %cst_7 = arith.constant 3.200000e+01 : f32
    %12 = vector.broadcast %cst_7 : f32 to vector<6x1xf32>
    %13 = arith.divf %11, %12 : vector<6x1xf32>
    %14 = vector.broadcast %6 : vector<6x1xf32> to vector<6x32xf32>
    %15 = arith.subf %0, %14 : vector<6x32xf32>
    %cst_8 = arith.constant 9.99999996E-13 : f32
    %16 = vector.broadcast %cst_8 : f32 to vector<6x1xf32>
    %17 = arith.addf %13, %16 : vector<6x1xf32>
    %18 = math.rsqrt %17 : vector<6x1xf32>
    %19 = vector.broadcast %18 : vector<6x1xf32> to vector<6x32xf32>
    %20 = arith.mulf %15, %19 : vector<6x32xf32>
    %21 = vector.broadcast %1 : vector<1x32xf32> to vector<6x32xf32>
    %22 = arith.mulf %20, %21 : vector<6x32xf32>
    %23 = vector.broadcast %2 : vector<1x32xf32> to vector<6x32xf32>
    %24 = arith.addf %22, %23 : vector<6x32xf32>
    %c0_9 = arith.constant 0 : index
    %c0_10 = arith.constant 0 : index
    %25 = vector.load %arg4[%c0_9, %c0_10] : memref<6x32xf32, #tpu.memory_space<vmem>>, vector<6x32xf32>
    tpu.vector_store %arg4[%c0_9, %c0_10], %24 {strides = array<i32>} : memref<6x32xf32, #tpu.memory_space<vmem>>, vector<6x32xf32>,
    return
  }
  func.func @transform_0(%arg0: i32) -> (i32, i32) {
    %c0_i32 = arith.constant 0 : i32
    %c0_i32_0 = arith.constant 0 : i32
    return %arg0, %c0_i32 : i32, i32
  }
  func.func @transform_1(%arg0: i32) -> (i32, i32) {
    %c0_i32 = arith.constant 0 : i32
    %c0_i32_0 = arith.constant 0 : i32
    %c0_i32_1 = arith.constant 0 : i32
    return %c0_i32, %c0_i32_0 : i32, i32
  }
  func.func @transform_2(%arg0: i32) -> (i32, i32) {
    %c0_i32 = arith.constant 0 : i32
    %c0_i32_0 = arith.constant 0 : i32
    %c0_i32_1 = arith.constant 0 : i32
    return %c0_i32, %c0_i32_0 : i32, i32
  }
  func.func @transform_3(%arg0: i32) -> (i32, i32) {
    %c0_i32 = arith.constant 0 : i32
    %c0_i32_0 = arith.constant 0 : i32
    return %arg0, %c0_i32 : i32, i32
  }
}

module attributes {stable_mosaic.version = 11 : i64} {
  func.func @_mha_block_kernel(%arg0: i32, %arg1: memref<2xi32, #tpu.memory_space<smem>>, %arg2: memref<1x6x32xf32, #tpu.memory_space<vmem>>, %arg3: memref<1x3x32xf32, #tpu.memory_space<vmem>>, %arg4: memref<1x32xf32, #tpu.memory_space<vmem>>, %arg5: memref<1x32xf32, #tpu.memory_space<vmem>>, %arg6: memref<4x32x8xbf16, #tpu.memory_space<vmem>>, %arg7: memref<4x1x8xf32, #tpu.memory_space<vmem>>, %arg8: memref<4x32x8xbf16, #tpu.memory_space<vmem>>, %arg9: memref<4x1x8xf32, #tpu.memory_space<vmem>>, %arg10: memref<4x32x8xbf16, #tpu.memory_space<vmem>>, %arg11: memref<4x1x8xf32, #tpu.memory_space<vmem>>, %arg12: memref<4x8x32xbf16, #tpu.memory_space<vmem>>, %arg13: memref<1x32xf32, #tpu.memory_space<vmem>>, %arg14: memref<1x6x32xf32, #tpu.memory_space<vmem>>) attributes {dimension_semantics = [#tpu.dimension_semantics<parallel>], iteration_bounds = array<i64: 2>, scalar_prefetch = 1 : i64, scratch_operands = 0 : i64, tpu.core_type = #tpu.core_type<tc>, window_params = [{transform_indices = @transform_0, window_bounds = array<i64: 1, 6, 32>}, {transform_indices = @transform_1, window_bounds = array<i64: 1, 3, 32>}, {pipeline_mode = #tpu.pipeline_mode<synchronous>, transform_indices = @transform_2, window_bounds = array<i64: 1, 32>}, {pipeline_mode = #tpu.pipeline_mode<synchronous>, transform_indices = @transform_3, window_bounds = array<i64: 1, 32>}, {pipeline_mode = #tpu.pipeline_mode<synchronous>, transform_indices = @transform_4, window_bounds = array<i64: 4, 32, 8>}, {pipeline_mode = #tpu.pipeline_mode<synchronous>, transform_indices = @transform_5, window_bounds = array<i64: 4, 1, 8>}, {pipeline_mode = #tpu.pipeline_mode<synchronous>, transform_indices = @transform_6, window_bounds = array<i64: 4, 32, 8>}, {pipeline_mode = #tpu.pipeline_mode<synchronous>, transform_indices = @transform_7, window_bounds = array<i64: 4, 1, 8>}, {pipeline_mode = #tpu.pipeline_mode<synchronous>, transform_indices = @transform_8, window_bounds = array<i64: 4, 32, 8>}, {pipeline_mode = #tpu.pipeline_mode<synchronous>, transform_indices = @transform_9, window_bounds = array<i64: 4, 1, 8>}, {pipeline_mode = #tpu.pipeline_mode<synchronous>, transform_indices = @transform_10, window_bounds = array<i64: 4, 8, 32>}, {pipeline_mode = #tpu.pipeline_mode<synchronous>, transform_indices = @transform_11, window_bounds = array<i64: 1, 32>}, {transform_indices = @transform_12, window_bounds = array<i64: 1, 6, 32>}]} {
    %c0 = arith.constant 0 : index
    %c0_0 = arith.constant 0 : index
    %c0_1 = arith.constant 0 : index
    %0 = vector.load %arg2[%c0, %c0_0, %c0_1] : memref<1x6x32xf32, #tpu.memory_space<vmem>>, vector<1x6x32xf32>
    %1 = vector.shape_cast %0 : vector<1x6x32xf32> to vector<6x32xf32>
    %c0_2 = arith.constant 0 : index
    %c0_3 = arith.constant 0 : index
    %2 = vector.load %arg4[%c0_2, %c0_3] : memref<1x32xf32, #tpu.memory_space<vmem>>, vector<1x32xf32>
    %c0_4 = arith.constant 0 : index
    %c0_5 = arith.constant 0 : index
    %3 = vector.load %arg5[%c0_4, %c0_5] : memref<1x32xf32, #tpu.memory_space<vmem>>, vector<1x32xf32>
    %cst = arith.constant dense<0.000000e+00> : vector<6xf32>
    %4 = vector.multi_reduction <add>, %1, %cst [1] : vector<6x32xf32> to vector<6xf32>
    %5 = vector.shape_cast %4 : vector<6xf32> to vector<6x1xf32>
    %cst_6 = arith.constant 3.200000e+01 : f32
    %6 = vector.broadcast %cst_6 : f32 to vector<6x1xf32>
    %7 = arith.divf %5, %6 : vector<6x1xf32>
    %8 = vector.broadcast %7 : vector<6x1xf32> to vector<6x32xf32>
    %9 = arith.subf %1, %8 : vector<6x32xf32>
    %10 = arith.mulf %9, %9 : vector<6x32xf32>
    %cst_7 = arith.constant dense<0.000000e+00> : vector<6xf32>
    %11 = vector.multi_reduction <add>, %10, %cst_7 [1] : vector<6x32xf32> to vector<6xf32>
    %12 = vector.shape_cast %11 : vector<6xf32> to vector<6x1xf32>
    %cst_8 = arith.constant 3.200000e+01 : f32
    %13 = vector.broadcast %cst_8 : f32 to vector<6x1xf32>
    %14 = arith.divf %12, %13 : vector<6x1xf32>
    %15 = vector.broadcast %7 : vector<6x1xf32> to vector<6x32xf32>
    %16 = arith.subf %1, %15 : vector<6x32xf32>
    %cst_9 = arith.constant 9.99999996E-13 : f32
    %17 = vector.broadcast %cst_9 : f32 to vector<6x1xf32>
    %18 = arith.addf %14, %17 : vector<6x1xf32>
    %19 = math.rsqrt %18 : vector<6x1xf32>
    %20 = vector.broadcast %19 : vector<6x1xf32> to vector<6x32xf32>
    %21 = arith.mulf %16, %20 : vector<6x32xf32>
    %22 = vector.broadcast %2 : vector<1x32xf32> to vector<6x32xf32>
    %23 = arith.mulf %21, %22 : vector<6x32xf32>
    %24 = vector.broadcast %3 : vector<1x32xf32> to vector<6x32xf32>
    %25 = arith.addf %23, %24 : vector<6x32xf32>
    %c0_10 = arith.constant 0 : index
    %c0_11 = arith.constant 0 : index
    %c0_12 = arith.constant 0 : index
    %26 = vector.load %arg3[%c0_10, %c0_11, %c0_12] : memref<1x3x32xf32, #tpu.memory_space<vmem>>, vector<1x3x32xf32>
    %27 = vector.shape_cast %26 : vector<1x3x32xf32> to vector<3x32xf32>
    %28 = arith.truncf %25 : vector<6x32xf32> to vector<6x32xbf16>
    %29 = arith.truncf %27 : vector<3x32xf32> to vector<3x32xbf16>
    %30 = arith.index_cast %arg0 : i32 to index
    %31 = memref.load %arg1[%30] : memref<2xi32, #tpu.memory_space<smem>>
    %32 = tpu.iota {dimensions = array<i32: 1>} : vector<6x3xi32>
    %33 = vector.broadcast %31 : i32 to vector<6x3xi32>
    %34 = arith.cmpi slt, %32, %33 : vector<6x3xi32>
    %c0_13 = arith.constant 0 : index
    %c0_14 = arith.constant 0 : index
    %35 = vector.load %arg13[%c0_13, %c0_14] : memref<1x32xf32, #tpu.memory_space<vmem>>, vector<1x32xf32>
    %36 = vector.broadcast %35 : vector<1x32xf32> to vector<6x32xf32>
    %37 = arith.addf %1, %36 : vector<6x32xf32>
    %c0_15 = arith.constant 0 : index
    %c0_16 = arith.constant 0 : index
    %c0_17 = arith.constant 0 : index
    %38 = vector.load %arg6[%c0_15, %c0_16, %c0_17] : memref<4x32x8xbf16, #tpu.memory_space<vmem>>, vector<1x32x8xbf16>
    %39 = vector.shape_cast %38 : vector<1x32x8xbf16> to vector<32x8xbf16>
    %cst_18 = arith.constant dense<0.000000e+00> : vector<6x8xf32>
    %40 = tpu.matmul %28, %39, %cst_18 {dimension_numbers = #tpu.dot_dimension_numbers<[1], [0], [0], [1], [0, 0, 1, 1], [], []>} : vector<6x32xbf16>, vector<32x8xbf16>, vector<6x8xf32> -> vector<6x8xf32>
    %c0_19 = arith.constant 0 : index
    %c0_20 = arith.constant 0 : index
    %c0_21 = arith.constant 0 : index
    %41 = vector.load %arg7[%c0_19, %c0_20, %c0_21] : memref<4x1x8xf32, #tpu.memory_space<vmem>>, vector<1x1x8xf32>
    %42 = vector.shape_cast %41 : vector<1x1x8xf32> to vector<1x8xf32>
    %43 = vector.broadcast %42 : vector<1x8xf32> to vector<6x8xf32>
    %44 = arith.addf %40, %43 : vector<6x8xf32>
    %c0_22 = arith.constant 0 : index
    %c0_23 = arith.constant 0 : index
    %c0_24 = arith.constant 0 : index
    %45 = vector.load %arg8[%c0_22, %c0_23, %c0_24] : memref<4x32x8xbf16, #tpu.memory_space<vmem>>, vector<1x32x8xbf16>
    %46 = vector.shape_cast %45 : vector<1x32x8xbf16> to vector<32x8xbf16>
    %cst_25 = arith.constant dense<0.000000e+00> : vector<3x8xf32>
    %47 = tpu.matmul %29, %46, %cst_25 {dimension_numbers = #tpu.dot_dimension_numbers<[1], [0], [0], [1], [0, 0, 1, 1], [], []>} : vector<3x32xbf16>, vector<32x8xbf16>, vector<3x8xf32> -> vector<3x8xf32>
    %c0_26 = arith.constant 0 : index
    %c0_27 = arith.constant 0 : index
    %c0_28 = arith.constant 0 : index
    %48 = vector.load %arg9[%c0_26, %c0_27, %c0_28] : memref<4x1x8xf32, #tpu.memory_space<vmem>>, vector<1x1x8xf32>
    %49 = vector.shape_cast %48 : vector<1x1x8xf32> to vector<1x8xf32>
    %50 = vector.broadcast %49 : vector<1x8xf32> to vector<3x8xf32>
    %51 = arith.addf %47, %50 : vector<3x8xf32>
    %c0_29 = arith.constant 0 : index
    %c0_30 = arith.constant 0 : index
    %c0_31 = arith.constant 0 : index
    %52 = vector.load %arg10[%c0_29, %c0_30, %c0_31] : memref<4x32x8xbf16, #tpu.memory_space<vmem>>, vector<1x32x8xbf16>
    %53 = vector.shape_cast %52 : vector<1x32x8xbf16> to vector<32x8xbf16>
    %cst_32 = arith.constant dense<0.000000e+00> : vector<3x8xf32>
    %54 = tpu.matmul %29, %53, %cst_32 {dimension_numbers = #tpu.dot_dimension_numbers<[1], [0], [0], [1], [0, 0, 1, 1], [], []>} : vector<3x32xbf16>, vector<32x8xbf16>, vector<3x8xf32> -> vector<3x8xf32>
    %c0_33 = arith.constant 0 : index
    %c0_34 = arith.constant 0 : index
    %c0_35 = arith.constant 0 : index
    %55 = vector.load %arg11[%c0_33, %c0_34, %c0_35] : memref<4x1x8xf32, #tpu.memory_space<vmem>>, vector<1x1x8xf32>
    %56 = vector.shape_cast %55 : vector<1x1x8xf32> to vector<1x8xf32>
    %57 = vector.broadcast %56 : vector<1x8xf32> to vector<3x8xf32>
    %58 = arith.addf %54, %57 : vector<3x8xf32>
    %59 = arith.truncf %44 : vector<6x8xf32> to vector<6x8xbf16>
    %60 = arith.truncf %51 : vector<3x8xf32> to vector<3x8xbf16>
    %cst_36 = arith.constant dense<0.000000e+00> : vector<6x3xf32>
    %61 = tpu.matmul %59, %60, %cst_36 {dimension_numbers = #tpu.dot_dimension_numbers<[1], [1], [0], [0], [0, 0, 1, 0], [], []>} : vector<6x8xbf16>, vector<3x8xbf16>, vector<6x3xf32> -> vector<6x3xf32>
    %cst_37 = arith.constant 0.353553385 : f32
    %62 = vector.broadcast %cst_37 : f32 to vector<6x3xf32>
    %63 = arith.mulf %61, %62 : vector<6x3xf32>
    %cst_38 = arith.constant -3.40282347E+38 : f32
    %64 = vector.broadcast %cst_38 : f32 to vector<6x3xf32>
    %65 = arith.select %34, %63, %64 : vector<6x3xi1>, vector<6x3xf32>
    %cst_39 = arith.constant dense<0xFF800000> : vector<6xf32>
    %66 = vector.multi_reduction <maximumf>, %65, %cst_39 [1] : vector<6x3xf32> to vector<6xf32>
    %67 = vector.shape_cast %66 : vector<6xf32> to vector<6x1xf32>
    %68 = vector.broadcast %67 : vector<6x1xf32> to vector<6x3xf32>
    %69 = arith.subf %65, %68 : vector<6x3xf32>
    %70 = math.exp %69 : vector<6x3xf32>
    %cst_40 = arith.constant dense<0.000000e+00> : vector<6xf32>
    %71 = vector.multi_reduction <add>, %70, %cst_40 [1] : vector<6x3xf32> to vector<6xf32>
    %72 = vector.shape_cast %71 : vector<6xf32> to vector<6x1xf32>
    %73 = tpu.reciprocal %72 {approx = true} : vector<6x1xf32> -> vector<6x1xf32>
    %74 = vector.broadcast %73 : vector<6x1xf32> to vector<6x3xf32>
    %75 = arith.mulf %70, %74 : vector<6x3xf32>
    %cst_41 = arith.constant 0.000000e+00 : f32
    %76 = vector.broadcast %cst_41 : f32 to vector<6x3xf32>
    %77 = arith.select %34, %75, %76 : vector<6x3xi1>, vector<6x3xf32>
    %78 = arith.truncf %77 : vector<6x3xf32> to vector<6x3xbf16>
    %79 = arith.truncf %58 : vector<3x8xf32> to vector<3x8xbf16>
    %cst_42 = arith.constant dense<0.000000e+00> : vector<6x8xf32>
    %80 = tpu.matmul %78, %79, %cst_42 {dimension_numbers = #tpu.dot_dimension_numbers<[1], [0], [0], [1], [0, 0, 1, 1], [], []>} : vector<6x3xbf16>, vector<3x8xbf16>, vector<6x8xf32> -> vector<6x8xf32>
    %81 = arith.truncf %80 : vector<6x8xf32> to vector<6x8xbf16>
    %c0_43 = arith.constant 0 : index
    %c0_44 = arith.constant 0 : index
    %c0_45 = arith.constant 0 : index
    %82 = vector.load %arg12[%c0_43, %c0_44, %c0_45] : memref<4x8x32xbf16, #tpu.memory_space<vmem>>, vector<1x8x32xbf16>
    %83 = vector.shape_cast %82 : vector<1x8x32xbf16> to vector<8x32xbf16>
    %cst_46 = arith.constant dense<0.000000e+00> : vector<6x32xf32>
    %84 = tpu.matmul %81, %83, %cst_46 {dimension_numbers = #tpu.dot_dimension_numbers<[1], [0], [0], [1], [0, 0, 1, 1], [], []>} : vector<6x8xbf16>, vector<8x32xbf16>, vector<6x32xf32> -> vector<6x32xf32>
    %85 = arith.addf %37, %84 : vector<6x32xf32>
    %c1 = arith.constant 1 : index
    %c0_47 = arith.constant 0 : index
    %c0_48 = arith.constant 0 : index
    %86 = vector.load %arg6[%c1, %c0_47, %c0_48] : memref<4x32x8xbf16, #tpu.memory_space<vmem>>, vector<1x32x8xbf16>
    %87 = vector.shape_cast %86 : vector<1x32x8xbf16> to vector<32x8xbf16>
    %cst_49 = arith.constant dense<0.000000e+00> : vector<6x8xf32>
    %88 = tpu.matmul %28, %87, %cst_49 {dimension_numbers = #tpu.dot_dimension_numbers<[1], [0], [0], [1], [0, 0, 1, 1], [], []>} : vector<6x32xbf16>, vector<32x8xbf16>, vector<6x8xf32> -> vector<6x8xf32>
    %c1_50 = arith.constant 1 : index
    %c0_51 = arith.constant 0 : index
    %c0_52 = arith.constant 0 : index
    %89 = vector.load %arg7[%c1_50, %c0_51, %c0_52] : memref<4x1x8xf32, #tpu.memory_space<vmem>>, vector<1x1x8xf32>
    %90 = vector.shape_cast %89 : vector<1x1x8xf32> to vector<1x8xf32>
    %91 = vector.broadcast %90 : vector<1x8xf32> to vector<6x8xf32>
    %92 = arith.addf %88, %91 : vector<6x8xf32>
    %c1_53 = arith.constant 1 : index
    %c0_54 = arith.constant 0 : index
    %c0_55 = arith.constant 0 : index
    %93 = vector.load %arg8[%c1_53, %c0_54, %c0_55] : memref<4x32x8xbf16, #tpu.memory_space<vmem>>, vector<1x32x8xbf16>
    %94 = vector.shape_cast %93 : vector<1x32x8xbf16> to vector<32x8xbf16>
    %cst_56 = arith.constant dense<0.000000e+00> : vector<3x8xf32>
    %95 = tpu.matmul %29, %94, %cst_56 {dimension_numbers = #tpu.dot_dimension_numbers<[1], [0], [0], [1], [0, 0, 1, 1], [], []>} : vector<3x32xbf16>, vector<32x8xbf16>, vector<3x8xf32> -> vector<3x8xf32>
    %c1_57 = arith.constant 1 : index
    %c0_58 = arith.constant 0 : index
    %c0_59 = arith.constant 0 : index
    %96 = vector.load %arg9[%c1_57, %c0_58, %c0_59] : memref<4x1x8xf32, #tpu.memory_space<vmem>>, vector<1x1x8xf32>
    %97 = vector.shape_cast %96 : vector<1x1x8xf32> to vector<1x8xf32>
    %98 = vector.broadcast %97 : vector<1x8xf32> to vector<3x8xf32>
    %99 = arith.addf %95, %98 : vector<3x8xf32>
    %c1_60 = arith.constant 1 : index
    %c0_61 = arith.constant 0 : index
    %c0_62 = arith.constant 0 : index
    %100 = vector.load %arg10[%c1_60, %c0_61, %c0_62] : memref<4x32x8xbf16, #tpu.memory_space<vmem>>, vector<1x32x8xbf16>
    %101 = vector.shape_cast %100 : vector<1x32x8xbf16> to vector<32x8xbf16>
    %cst_63 = arith.constant dense<0.000000e+00> : vector<3x8xf32>
    %102 = tpu.matmul %29, %101, %cst_63 {dimension_numbers = #tpu.dot_dimension_numbers<[1], [0], [0], [1], [0, 0, 1, 1], [], []>} : vector<3x32xbf16>, vector<32x8xbf16>, vector<3x8xf32> -> vector<3x8xf32>
    %c1_64 = arith.constant 1 : index
    %c0_65 = arith.constant 0 : index
    %c0_66 = arith.constant 0 : index
    %103 = vector.load %arg11[%c1_64, %c0_65, %c0_66] : memref<4x1x8xf32, #tpu.memory_space<vmem>>, vector<1x1x8xf32>
    %104 = vector.shape_cast %103 : vector<1x1x8xf32> to vector<1x8xf32>
    %105 = vector.broadcast %104 : vector<1x8xf32> to vector<3x8xf32>
    %106 = arith.addf %102, %105 : vector<3x8xf32>
    %107 = arith.truncf %92 : vector<6x8xf32> to vector<6x8xbf16>
    %108 = arith.truncf %99 : vector<3x8xf32> to vector<3x8xbf16>
    %cst_67 = arith.constant dense<0.000000e+00> : vector<6x3xf32>
    %109 = tpu.matmul %107, %108, %cst_67 {dimension_numbers = #tpu.dot_dimension_numbers<[1], [1], [0], [0], [0, 0, 1, 0], [], []>} : vector<6x8xbf16>, vector<3x8xbf16>, vector<6x3xf32> -> vector<6x3xf32>
    %cst_68 = arith.constant 0.353553385 : f32
    %110 = vector.broadcast %cst_68 : f32 to vector<6x3xf32>
    %111 = arith.mulf %109, %110 : vector<6x3xf32>
    %cst_69 = arith.constant -3.40282347E+38 : f32
    %112 = vector.broadcast %cst_69 : f32 to vector<6x3xf32>
    %113 = arith.select %34, %111, %112 : vector<6x3xi1>, vector<6x3xf32>
    %cst_70 = arith.constant dense<0xFF800000> : vector<6xf32>
    %114 = vector.multi_reduction <maximumf>, %113, %cst_70 [1] : vector<6x3xf32> to vector<6xf32>
    %115 = vector.shape_cast %114 : vector<6xf32> to vector<6x1xf32>
    %116 = vector.broadcast %115 : vector<6x1xf32> to vector<6x3xf32>
    %117 = arith.subf %113, %116 : vector<6x3xf32>
    %118 = math.exp %117 : vector<6x3xf32>
    %cst_71 = arith.constant dense<0.000000e+00> : vector<6xf32>
    %119 = vector.multi_reduction <add>, %118, %cst_71 [1] : vector<6x3xf32> to vector<6xf32>
    %120 = vector.shape_cast %119 : vector<6xf32> to vector<6x1xf32>
    %121 = tpu.reciprocal %120 {approx = true} : vector<6x1xf32> -> vector<6x1xf32>
    %122 = vector.broadcast %121 : vector<6x1xf32> to vector<6x3xf32>
    %123 = arith.mulf %118, %122 : vector<6x3xf32>
    %cst_72 = arith.constant 0.000000e+00 : f32
    %124 = vector.broadcast %cst_72 : f32 to vector<6x3xf32>
    %125 = arith.select %34, %123, %124 : vector<6x3xi1>, vector<6x3xf32>
    %126 = arith.truncf %125 : vector<6x3xf32> to vector<6x3xbf16>
    %127 = arith.truncf %106 : vector<3x8xf32> to vector<3x8xbf16>
    %cst_73 = arith.constant dense<0.000000e+00> : vector<6x8xf32>
    %128 = tpu.matmul %126, %127, %cst_73 {dimension_numbers = #tpu.dot_dimension_numbers<[1], [0], [0], [1], [0, 0, 1, 1], [], []>} : vector<6x3xbf16>, vector<3x8xbf16>, vector<6x8xf32> -> vector<6x8xf32>
    %129 = arith.truncf %128 : vector<6x8xf32> to vector<6x8xbf16>
    %c1_74 = arith.constant 1 : index
    %c0_75 = arith.constant 0 : index
    %c0_76 = arith.constant 0 : index
    %130 = vector.load %arg12[%c1_74, %c0_75, %c0_76] : memref<4x8x32xbf16, #tpu.memory_space<vmem>>, vector<1x8x32xbf16>
    %131 = vector.shape_cast %130 : vector<1x8x32xbf16> to vector<8x32xbf16>
    %cst_77 = arith.constant dense<0.000000e+00> : vector<6x32xf32>
    %132 = tpu.matmul %129, %131, %cst_77 {dimension_numbers = #tpu.dot_dimension_numbers<[1], [0], [0], [1], [0, 0, 1, 1], [], []>} : vector<6x8xbf16>, vector<8x32xbf16>, vector<6x32xf32> -> vector<6x32xf32>
    %133 = arith.addf %85, %132 : vector<6x32xf32>
    %c2 = arith.constant 2 : index
    %c0_78 = arith.constant 0 : index
    %c0_79 = arith.constant 0 : index
    %134 = vector.load %arg6[%c2, %c0_78, %c0_79] : memref<4x32x8xbf16, #tpu.memory_space<vmem>>, vector<1x32x8xbf16>
    %135 = vector.shape_cast %134 : vector<1x32x8xbf16> to vector<32x8xbf16>
    %cst_80 = arith.constant dense<0.000000e+00> : vector<6x8xf32>
    %136 = tpu.matmul %28, %135, %cst_80 {dimension_numbers = #tpu.dot_dimension_numbers<[1], [0], [0], [1], [0, 0, 1, 1], [], []>} : vector<6x32xbf16>, vector<32x8xbf16>, vector<6x8xf32> -> vector<6x8xf32>
    %c2_81 = arith.constant 2 : index
    %c0_82 = arith.constant 0 : index
    %c0_83 = arith.constant 0 : index
    %137 = vector.load %arg7[%c2_81, %c0_82, %c0_83] : memref<4x1x8xf32, #tpu.memory_space<vmem>>, vector<1x1x8xf32>
    %138 = vector.shape_cast %137 : vector<1x1x8xf32> to vector<1x8xf32>
    %139 = vector.broadcast %138 : vector<1x8xf32> to vector<6x8xf32>
    %140 = arith.addf %136, %139 : vector<6x8xf32>
    %c2_84 = arith.constant 2 : index
    %c0_85 = arith.constant 0 : index
    %c0_86 = arith.constant 0 : index
    %141 = vector.load %arg8[%c2_84, %c0_85, %c0_86] : memref<4x32x8xbf16, #tpu.memory_space<vmem>>, vector<1x32x8xbf16>
    %142 = vector.shape_cast %141 : vector<1x32x8xbf16> to vector<32x8xbf16>
    %cst_87 = arith.constant dense<0.000000e+00> : vector<3x8xf32>
    %143 = tpu.matmul %29, %142, %cst_87 {dimension_numbers = #tpu.dot_dimension_numbers<[1], [0], [0], [1], [0, 0, 1, 1], [], []>} : vector<3x32xbf16>, vector<32x8xbf16>, vector<3x8xf32> -> vector<3x8xf32>
    %c2_88 = arith.constant 2 : index
    %c0_89 = arith.constant 0 : index
    %c0_90 = arith.constant 0 : index
    %144 = vector.load %arg9[%c2_88, %c0_89, %c0_90] : memref<4x1x8xf32, #tpu.memory_space<vmem>>, vector<1x1x8xf32>
    %145 = vector.shape_cast %144 : vector<1x1x8xf32> to vector<1x8xf32>
    %146 = vector.broadcast %145 : vector<1x8xf32> to vector<3x8xf32>
    %147 = arith.addf %143, %146 : vector<3x8xf32>
    %c2_91 = arith.constant 2 : index
    %c0_92 = arith.constant 0 : index
    %c0_93 = arith.constant 0 : index
    %148 = vector.load %arg10[%c2_91, %c0_92, %c0_93] : memref<4x32x8xbf16, #tpu.memory_space<vmem>>, vector<1x32x8xbf16>
    %149 = vector.shape_cast %148 : vector<1x32x8xbf16> to vector<32x8xbf16>
    %cst_94 = arith.constant dense<0.000000e+00> : vector<3x8xf32>
    %150 = tpu.matmul %29, %149, %cst_94 {dimension_numbers = #tpu.dot_dimension_numbers<[1], [0], [0], [1], [0, 0, 1, 1], [], []>} : vector<3x32xbf16>, vector<32x8xbf16>, vector<3x8xf32> -> vector<3x8xf32>
    %c2_95 = arith.constant 2 : index
    %c0_96 = arith.constant 0 : index
    %c0_97 = arith.constant 0 : index
    %151 = vector.load %arg11[%c2_95, %c0_96, %c0_97] : memref<4x1x8xf32, #tpu.memory_space<vmem>>, vector<1x1x8xf32>
    %152 = vector.shape_cast %151 : vector<1x1x8xf32> to vector<1x8xf32>
    %153 = vector.broadcast %152 : vector<1x8xf32> to vector<3x8xf32>
    %154 = arith.addf %150, %153 : vector<3x8xf32>
    %155 = arith.truncf %140 : vector<6x8xf32> to vector<6x8xbf16>
    %156 = arith.truncf %147 : vector<3x8xf32> to vector<3x8xbf16>
    %cst_98 = arith.constant dense<0.000000e+00> : vector<6x3xf32>
    %157 = tpu.matmul %155, %156, %cst_98 {dimension_numbers = #tpu.dot_dimension_numbers<[1], [1], [0], [0], [0, 0, 1, 0], [], []>} : vector<6x8xbf16>, vector<3x8xbf16>, vector<6x3xf32> -> vector<6x3xf32>
    %cst_99 = arith.constant 0.353553385 : f32
    %158 = vector.broadcast %cst_99 : f32 to vector<6x3xf32>
    %159 = arith.mulf %157, %158 : vector<6x3xf32>
    %cst_100 = arith.constant -3.40282347E+38 : f32
    %160 = vector.broadcast %cst_100 : f32 to vector<6x3xf32>
    %161 = arith.select %34, %159, %160 : vector<6x3xi1>, vector<6x3xf32>
    %cst_101 = arith.constant dense<0xFF800000> : vector<6xf32>
    %162 = vector.multi_reduction <maximumf>, %161, %cst_101 [1] : vector<6x3xf32> to vector<6xf32>
    %163 = vector.shape_cast %162 : vector<6xf32> to vector<6x1xf32>
    %164 = vector.broadcast %163 : vector<6x1xf32> to vector<6x3xf32>
    %165 = arith.subf %161, %164 : vector<6x3xf32>
    %166 = math.exp %165 : vector<6x3xf32>
    %cst_102 = arith.constant dense<0.000000e+00> : vector<6xf32>
    %167 = vector.multi_reduction <add>, %166, %cst_102 [1] : vector<6x3xf32> to vector<6xf32>
    %168 = vector.shape_cast %167 : vector<6xf32> to vector<6x1xf32>
    %169 = tpu.reciprocal %168 {approx = true} : vector<6x1xf32> -> vector<6x1xf32>
    %170 = vector.broadcast %169 : vector<6x1xf32> to vector<6x3xf32>
    %171 = arith.mulf %166, %170 : vector<6x3xf32>
    %cst_103 = arith.constant 0.000000e+00 : f32
    %172 = vector.broadcast %cst_103 : f32 to vector<6x3xf32>
    %173 = arith.select %34, %171, %172 : vector<6x3xi1>, vector<6x3xf32>
    %174 = arith.truncf %173 : vector<6x3xf32> to vector<6x3xbf16>
    %175 = arith.truncf %154 : vector<3x8xf32> to vector<3x8xbf16>
    %cst_104 = arith.constant dense<0.000000e+00> : vector<6x8xf32>
    %176 = tpu.matmul %174, %175, %cst_104 {dimension_numbers = #tpu.dot_dimension_numbers<[1], [0], [0], [1], [0, 0, 1, 1], [], []>} : vector<6x3xbf16>, vector<3x8xbf16>, vector<6x8xf32> -> vector<6x8xf32>
    %177 = arith.truncf %176 : vector<6x8xf32> to vector<6x8xbf16>
    %c2_105 = arith.constant 2 : index
    %c0_106 = arith.constant 0 : index
    %c0_107 = arith.constant 0 : index
    %178 = vector.load %arg12[%c2_105, %c0_106, %c0_107] : memref<4x8x32xbf16, #tpu.memory_space<vmem>>, vector<1x8x32xbf16>
    %179 = vector.shape_cast %178 : vector<1x8x32xbf16> to vector<8x32xbf16>
    %cst_108 = arith.constant dense<0.000000e+00> : vector<6x32xf32>
    %180 = tpu.matmul %177, %179, %cst_108 {dimension_numbers = #tpu.dot_dimension_numbers<[1], [0], [0], [1], [0, 0, 1, 1], [], []>} : vector<6x8xbf16>, vector<8x32xbf16>, vector<6x32xf32> -> vector<6x32xf32>
    %181 = arith.addf %133, %180 : vector<6x32xf32>
    %c3 = arith.constant 3 : index
    %c0_109 = arith.constant 0 : index
    %c0_110 = arith.constant 0 : index
    %182 = vector.load %arg6[%c3, %c0_109, %c0_110] : memref<4x32x8xbf16, #tpu.memory_space<vmem>>, vector<1x32x8xbf16>
    %183 = vector.shape_cast %182 : vector<1x32x8xbf16> to vector<32x8xbf16>
    %cst_111 = arith.constant dense<0.000000e+00> : vector<6x8xf32>
    %184 = tpu.matmul %28, %183, %cst_111 {dimension_numbers = #tpu.dot_dimension_numbers<[1], [0], [0], [1], [0, 0, 1, 1], [], []>} : vector<6x32xbf16>, vector<32x8xbf16>, vector<6x8xf32> -> vector<6x8xf32>
    %c3_112 = arith.constant 3 : index
    %c0_113 = arith.constant 0 : index
    %c0_114 = arith.constant 0 : index
    %185 = vector.load %arg7[%c3_112, %c0_113, %c0_114] : memref<4x1x8xf32, #tpu.memory_space<vmem>>, vector<1x1x8xf32>
    %186 = vector.shape_cast %185 : vector<1x1x8xf32> to vector<1x8xf32>
    %187 = vector.broadcast %186 : vector<1x8xf32> to vector<6x8xf32>
    %188 = arith.addf %184, %187 : vector<6x8xf32>
    %c3_115 = arith.constant 3 : index
    %c0_116 = arith.constant 0 : index
    %c0_117 = arith.constant 0 : index
    %189 = vector.load %arg8[%c3_115, %c0_116, %c0_117] : memref<4x32x8xbf16, #tpu.memory_space<vmem>>, vector<1x32x8xbf16>
    %190 = vector.shape_cast %189 : vector<1x32x8xbf16> to vector<32x8xbf16>
    %cst_118 = arith.constant dense<0.000000e+00> : vector<3x8xf32>
    %191 = tpu.matmul %29, %190, %cst_118 {dimension_numbers = #tpu.dot_dimension_numbers<[1], [0], [0], [1], [0, 0, 1, 1], [], []>} : vector<3x32xbf16>, vector<32x8xbf16>, vector<3x8xf32> -> vector<3x8xf32>
    %c3_119 = arith.constant 3 : index
    %c0_120 = arith.constant 0 : index
    %c0_121 = arith.constant 0 : index
    %192 = vector.load %arg9[%c3_119, %c0_120, %c0_121] : memref<4x1x8xf32, #tpu.memory_space<vmem>>, vector<1x1x8xf32>
    %193 = vector.shape_cast %192 : vector<1x1x8xf32> to vector<1x8xf32>
    %194 = vector.broadcast %193 : vector<1x8xf32> to vector<3x8xf32>
    %195 = arith.addf %191, %194 : vector<3x8xf32>
    %c3_122 = arith.constant 3 : index
    %c0_123 = arith.constant 0 : index
    %c0_124 = arith.constant 0 : index
    %196 = vector.load %arg10[%c3_122, %c0_123, %c0_124] : memref<4x32x8xbf16, #tpu.memory_space<vmem>>, vector<1x32x8xbf16>
    %197 = vector.shape_cast %196 : vector<1x32x8xbf16> to vector<32x8xbf16>
    %cst_125 = arith.constant dense<0.000000e+00> : vector<3x8xf32>
    %198 = tpu.matmul %29, %197, %cst_125 {dimension_numbers = #tpu.dot_dimension_numbers<[1], [0], [0], [1], [0, 0, 1, 1], [], []>} : vector<3x32xbf16>, vector<32x8xbf16>, vector<3x8xf32> -> vector<3x8xf32>
    %c3_126 = arith.constant 3 : index
    %c0_127 = arith.constant 0 : index
    %c0_128 = arith.constant 0 : index
    %199 = vector.load %arg11[%c3_126, %c0_127, %c0_128] : memref<4x1x8xf32, #tpu.memory_space<vmem>>, vector<1x1x8xf32>
    %200 = vector.shape_cast %199 : vector<1x1x8xf32> to vector<1x8xf32>
    %201 = vector.broadcast %200 : vector<1x8xf32> to vector<3x8xf32>
    %202 = arith.addf %198, %201 : vector<3x8xf32>
    %203 = arith.truncf %188 : vector<6x8xf32> to vector<6x8xbf16>
    %204 = arith.truncf %195 : vector<3x8xf32> to vector<3x8xbf16>
    %cst_129 = arith.constant dense<0.000000e+00> : vector<6x3xf32>
    %205 = tpu.matmul %203, %204, %cst_129 {dimension_numbers = #tpu.dot_dimension_numbers<[1], [1], [0], [0], [0, 0, 1, 0], [], []>} : vector<6x8xbf16>, vector<3x8xbf16>, vector<6x3xf32> -> vector<6x3xf32>
    %cst_130 = arith.constant 0.353553385 : f32
    %206 = vector.broadcast %cst_130 : f32 to vector<6x3xf32>
    %207 = arith.mulf %205, %206 : vector<6x3xf32>
    %cst_131 = arith.constant -3.40282347E+38 : f32
    %208 = vector.broadcast %cst_131 : f32 to vector<6x3xf32>
    %209 = arith.select %34, %207, %208 : vector<6x3xi1>, vector<6x3xf32>
    %cst_132 = arith.constant dense<0xFF800000> : vector<6xf32>
    %210 = vector.multi_reduction <maximumf>, %209, %cst_132 [1] : vector<6x3xf32> to vector<6xf32>
    %211 = vector.shape_cast %210 : vector<6xf32> to vector<6x1xf32>
    %212 = vector.broadcast %211 : vector<6x1xf32> to vector<6x3xf32>
    %213 = arith.subf %209, %212 : vector<6x3xf32>
    %214 = math.exp %213 : vector<6x3xf32>
    %cst_133 = arith.constant dense<0.000000e+00> : vector<6xf32>
    %215 = vector.multi_reduction <add>, %214, %cst_133 [1] : vector<6x3xf32> to vector<6xf32>
    %216 = vector.shape_cast %215 : vector<6xf32> to vector<6x1xf32>
    %217 = tpu.reciprocal %216 {approx = true} : vector<6x1xf32> -> vector<6x1xf32>
    %218 = vector.broadcast %217 : vector<6x1xf32> to vector<6x3xf32>
    %219 = arith.mulf %214, %218 : vector<6x3xf32>
    %cst_134 = arith.constant 0.000000e+00 : f32
    %220 = vector.broadcast %cst_134 : f32 to vector<6x3xf32>
    %221 = arith.select %34, %219, %220 : vector<6x3xi1>, vector<6x3xf32>
    %222 = arith.truncf %221 : vector<6x3xf32> to vector<6x3xbf16>
    %223 = arith.truncf %202 : vector<3x8xf32> to vector<3x8xbf16>
    %cst_135 = arith.constant dense<0.000000e+00> : vector<6x8xf32>
    %224 = tpu.matmul %222, %223, %cst_135 {dimension_numbers = #tpu.dot_dimension_numbers<[1], [0], [0], [1], [0, 0, 1, 1], [], []>} : vector<6x3xbf16>, vector<3x8xbf16>, vector<6x8xf32> -> vector<6x8xf32>
    %225 = arith.truncf %224 : vector<6x8xf32> to vector<6x8xbf16>
    %c3_136 = arith.constant 3 : index
    %c0_137 = arith.constant 0 : index
    %c0_138 = arith.constant 0 : index
    %226 = vector.load %arg12[%c3_136, %c0_137, %c0_138] : memref<4x8x32xbf16, #tpu.memory_space<vmem>>, vector<1x8x32xbf16>
    %227 = vector.shape_cast %226 : vector<1x8x32xbf16> to vector<8x32xbf16>
    %cst_139 = arith.constant dense<0.000000e+00> : vector<6x32xf32>
    %228 = tpu.matmul %225, %227, %cst_139 {dimension_numbers = #tpu.dot_dimension_numbers<[1], [0], [0], [1], [0, 0, 1, 1], [], []>} : vector<6x8xbf16>, vector<8x32xbf16>, vector<6x32xf32> -> vector<6x32xf32>
    %229 = arith.addf %181, %228 : vector<6x32xf32>
    %c0_140 = arith.constant 0 : index
    %c0_141 = arith.constant 0 : index
    %c0_142 = arith.constant 0 : index
    %230 = vector.load %arg14[%c0_140, %c0_141, %c0_142] : memref<1x6x32xf32, #tpu.memory_space<vmem>>, vector<1x6x32xf32>
    %231 = vector.shape_cast %230 : vector<1x6x32xf32> to vector<6x32xf32>
    %232 = vector.shape_cast %229 : vector<6x32xf32> to vector<1x6x32xf32>
    tpu.vector_store %arg14[%c0_140, %c0_141, %c0_142], %232 {strides = array<i32>} : memref<1x6x32xf32, #tpu.memory_space<vmem>>, vector<1x6x32xf32>,
    return
  }
  func.func @transform_0(%arg0: i32, %arg1: memref<2xi32, #tpu.memory_space<smem>>) -> (i32, i32, i32) {
    %c0_i32 = arith.constant 0 : i32
    %c0_i32_0 = arith.constant 0 : i32
    %c0_i32_1 = arith.constant 0 : i32
    return %arg0, %c0_i32, %c0_i32_0 : i32, i32, i32
  }
  func.func @transform_1(%arg0: i32, %arg1: memref<2xi32, #tpu.memory_space<smem>>) -> (i32, i32, i32) {
    %c0_i32 = arith.constant 0 : i32
    %c0_i32_0 = arith.constant 0 : i32
    %c0_i32_1 = arith.constant 0 : i32
    return %arg0, %c0_i32, %c0_i32_0 : i32, i32, i32
  }
  func.func @transform_2(%arg0: i32, %arg1: memref<2xi32, #tpu.memory_space<smem>>) -> (i32, i32) {
    %c0_i32 = arith.constant 0 : i32
    %c0_i32_0 = arith.constant 0 : i32
    %c0_i32_1 = arith.constant 0 : i32
    return %c0_i32, %c0_i32_0 : i32, i32
  }
  func.func @transform_3(%arg0: i32, %arg1: memref<2xi32, #tpu.memory_space<smem>>) -> (i32, i32) {
    %c0_i32 = arith.constant 0 : i32
    %c0_i32_0 = arith.constant 0 : i32
    %c0_i32_1 = arith.constant 0 : i32
    return %c0_i32, %c0_i32_0 : i32, i32
  }
  func.func @transform_4(%arg0: i32, %arg1: memref<2xi32, #tpu.memory_space<smem>>) -> (i32, i32, i32) {
    %c0_i32 = arith.constant 0 : i32
    %c0_i32_0 = arith.constant 0 : i32
    %c0_i32_1 = arith.constant 0 : i32
    %c0_i32_2 = arith.constant 0 : i32
    return %c0_i32, %c0_i32_0, %c0_i32_1 : i32, i32, i32
  }
  func.func @transform_5(%arg0: i32, %arg1: memref<2xi32, #tpu.memory_space<smem>>) -> (i32, i32, i32) {
    %c0_i32 = arith.constant 0 : i32
    %c0_i32_0 = arith.constant 0 : i32
    %c0_i32_1 = arith.constant 0 : i32
    %c0_i32_2 = arith.constant 0 : i32
    return %c0_i32, %c0_i32_0, %c0_i32_1 : i32, i32, i32
  }
  func.func @transform_6(%arg0: i32, %arg1: memref<2xi32, #tpu.memory_space<smem>>) -> (i32, i32, i32) {
    %c0_i32 = arith.constant 0 : i32
    %c0_i32_0 = arith.constant 0 : i32
    %c0_i32_1 = arith.constant 0 : i32
    %c0_i32_2 = arith.constant 0 : i32
    return %c0_i32, %c0_i32_0, %c0_i32_1 : i32, i32, i32
  }
  func.func @transform_7(%arg0: i32, %arg1: memref<2xi32, #tpu.memory_space<smem>>) -> (i32, i32, i32) {
    %c0_i32 = arith.constant 0 : i32
    %c0_i32_0 = arith.constant 0 : i32
    %c0_i32_1 = arith.constant 0 : i32
    %c0_i32_2 = arith.constant 0 : i32
    return %c0_i32, %c0_i32_0, %c0_i32_1 : i32, i32, i32
  }
  func.func @transform_8(%arg0: i32, %arg1: memref<2xi32, #tpu.memory_space<smem>>) -> (i32, i32, i32) {
    %c0_i32 = arith.constant 0 : i32
    %c0_i32_0 = arith.constant 0 : i32
    %c0_i32_1 = arith.constant 0 : i32
    %c0_i32_2 = arith.constant 0 : i32
    return %c0_i32, %c0_i32_0, %c0_i32_1 : i32, i32, i32
  }
  func.func @transform_9(%arg0: i32, %arg1: memref<2xi32, #tpu.memory_space<smem>>) -> (i32, i32, i32) {
    %c0_i32 = arith.constant 0 : i32
    %c0_i32_0 = arith.constant 0 : i32
    %c0_i32_1 = arith.constant 0 : i32
    %c0_i32_2 = arith.constant 0 : i32
    return %c0_i32, %c0_i32_0, %c0_i32_1 : i32, i32, i32
  }
  func.func @transform_10(%arg0: i32, %arg1: memref<2xi32, #tpu.memory_space<smem>>) -> (i32, i32, i32) {
    %c0_i32 = arith.constant 0 : i32
    %c0_i32_0 = arith.constant 0 : i32
    %c0_i32_1 = arith.constant 0 : i32
    %c0_i32_2 = arith.constant 0 : i32
    return %c0_i32, %c0_i32_0, %c0_i32_1 : i32, i32, i32
  }
  func.func @transform_11(%arg0: i32, %arg1: memref<2xi32, #tpu.memory_space<smem>>) -> (i32, i32) {
    %c0_i32 = arith.constant 0 : i32
    %c0_i32_0 = arith.constant 0 : i32
    %c0_i32_1 = arith.constant 0 : i32
    return %c0_i32, %c0_i32_0 : i32, i32
  }
  func.func @transform_12(%arg0: i32, %arg1: memref<2xi32, #tpu.memory_space<smem>>) -> (i32, i32, i32) {
    %c0_i32 = arith.constant 0 : i32
    %c0_i32_0 = arith.constant 0 : i32
    %c0_i32_1 = arith.constant 0 : i32
    return %arg0, %c0_i32, %c0_i32_0 : i32, i32, i32
  }
}

module attributes {stable_mosaic.version = 11 : i64} {
  func.func @_ffn_kernel(%arg0: i32, %arg1: memref<12x32xf32, #tpu.memory_space<vmem>>, %arg2: memref<1x32xf32, #tpu.memory_space<vmem>>, %arg3: memref<1x32xf32, #tpu.memory_space<vmem>>, %arg4: memref<32x48xbf16, #tpu.memory_space<vmem>>, %arg5: memref<1x48xf32, #tpu.memory_space<vmem>>, %arg6: memref<48x32xbf16, #tpu.memory_space<vmem>>, %arg7: memref<1x32xf32, #tpu.memory_space<vmem>>, %arg8: memref<12x32xf32, #tpu.memory_space<vmem>>) attributes {dimension_semantics = [#tpu.dimension_semantics<parallel>], iteration_bounds = array<i64: 1>, scalar_prefetch = 0 : i64, scratch_operands = 0 : i64, tpu.core_type = #tpu.core_type<tc>, window_params = [{transform_indices = @transform_0, window_bounds = array<i64: 12, 32>}, {pipeline_mode = #tpu.pipeline_mode<synchronous>, transform_indices = @transform_1, window_bounds = array<i64: 1, 32>}, {pipeline_mode = #tpu.pipeline_mode<synchronous>, transform_indices = @transform_2, window_bounds = array<i64: 1, 32>}, {pipeline_mode = #tpu.pipeline_mode<synchronous>, transform_indices = @transform_3, window_bounds = array<i64: 32, 48>}, {pipeline_mode = #tpu.pipeline_mode<synchronous>, transform_indices = @transform_4, window_bounds = array<i64: 1, 48>}, {pipeline_mode = #tpu.pipeline_mode<synchronous>, transform_indices = @transform_5, window_bounds = array<i64: 48, 32>}, {pipeline_mode = #tpu.pipeline_mode<synchronous>, transform_indices = @transform_6, window_bounds = array<i64: 1, 32>}, {transform_indices = @transform_7, window_bounds = array<i64: 12, 32>}]} {
    %c0 = arith.constant 0 : index
    %c0_0 = arith.constant 0 : index
    %0 = vector.load %arg1[%c0, %c0_0] : memref<12x32xf32, #tpu.memory_space<vmem>>, vector<12x32xf32>
    %c0_1 = arith.constant 0 : index
    %c0_2 = arith.constant 0 : index
    %1 = vector.load %arg2[%c0_1, %c0_2] : memref<1x32xf32, #tpu.memory_space<vmem>>, vector<1x32xf32>
    %c0_3 = arith.constant 0 : index
    %c0_4 = arith.constant 0 : index
    %2 = vector.load %arg3[%c0_3, %c0_4] : memref<1x32xf32, #tpu.memory_space<vmem>>, vector<1x32xf32>
    %cst = arith.constant dense<0.000000e+00> : vector<12xf32>
    %3 = vector.multi_reduction <add>, %0, %cst [1] : vector<12x32xf32> to vector<12xf32>
    %4 = vector.shape_cast %3 : vector<12xf32> to vector<12x1xf32>
    %cst_5 = arith.constant 3.200000e+01 : f32
    %5 = vector.broadcast %cst_5 : f32 to vector<12x1xf32>
    %6 = arith.divf %4, %5 : vector<12x1xf32>
    %7 = vector.broadcast %6 : vector<12x1xf32> to vector<12x32xf32>
    %8 = arith.subf %0, %7 : vector<12x32xf32>
    %9 = arith.mulf %8, %8 : vector<12x32xf32>
    %cst_6 = arith.constant dense<0.000000e+00> : vector<12xf32>
    %10 = vector.multi_reduction <add>, %9, %cst_6 [1] : vector<12x32xf32> to vector<12xf32>
    %11 = vector.shape_cast %10 : vector<12xf32> to vector<12x1xf32>
    %cst_7 = arith.constant 3.200000e+01 : f32
    %12 = vector.broadcast %cst_7 : f32 to vector<12x1xf32>
    %13 = arith.divf %11, %12 : vector<12x1xf32>
    %14 = vector.broadcast %6 : vector<12x1xf32> to vector<12x32xf32>
    %15 = arith.subf %0, %14 : vector<12x32xf32>
    %cst_8 = arith.constant 9.99999996E-13 : f32
    %16 = vector.broadcast %cst_8 : f32 to vector<12x1xf32>
    %17 = arith.addf %13, %16 : vector<12x1xf32>
    %18 = math.rsqrt %17 : vector<12x1xf32>
    %19 = vector.broadcast %18 : vector<12x1xf32> to vector<12x32xf32>
    %20 = arith.mulf %15, %19 : vector<12x32xf32>
    %21 = vector.broadcast %1 : vector<1x32xf32> to vector<12x32xf32>
    %22 = arith.mulf %20, %21 : vector<12x32xf32>
    %23 = vector.broadcast %2 : vector<1x32xf32> to vector<12x32xf32>
    %24 = arith.addf %22, %23 : vector<12x32xf32>
    %25 = arith.truncf %24 : vector<12x32xf32> to vector<12x32xbf16>
    %c0_9 = arith.constant 0 : index
    %c0_10 = arith.constant 0 : index
    %26 = vector.load %arg4[%c0_9, %c0_10] : memref<32x48xbf16, #tpu.memory_space<vmem>>, vector<32x48xbf16>
    %cst_11 = arith.constant dense<0.000000e+00> : vector<12x48xf32>
    %27 = tpu.matmul %25, %26, %cst_11 {dimension_numbers = #tpu.dot_dimension_numbers<[1], [0], [0], [1], [0, 0, 1, 1], [], []>} : vector<12x32xbf16>, vector<32x48xbf16>, vector<12x48xf32> -> vector<12x48xf32>
    %c0_12 = arith.constant 0 : index
    %c0_13 = arith.constant 0 : index
    %28 = vector.load %arg5[%c0_12, %c0_13] : memref<1x48xf32, #tpu.memory_space<vmem>>, vector<1x48xf32>
    %29 = vector.broadcast %28 : vector<1x48xf32> to vector<12x48xf32>
    %30 = arith.addf %27, %29 : vector<12x48xf32>
    %cst_14 = arith.constant 0.000000e+00 : f32
    %31 = vector.broadcast %cst_14 : f32 to vector<12x48xf32>
    %32 = arith.maximumf %30, %31 : vector<12x48xf32>
    %33 = arith.truncf %32 : vector<12x48xf32> to vector<12x48xbf16>
    %c0_15 = arith.constant 0 : index
    %c0_16 = arith.constant 0 : index
    %34 = vector.load %arg6[%c0_15, %c0_16] : memref<48x32xbf16, #tpu.memory_space<vmem>>, vector<48x32xbf16>
    %cst_17 = arith.constant dense<0.000000e+00> : vector<12x32xf32>
    %35 = tpu.matmul %33, %34, %cst_17 {dimension_numbers = #tpu.dot_dimension_numbers<[1], [0], [0], [1], [0, 0, 1, 1], [], []>} : vector<12x48xbf16>, vector<48x32xbf16>, vector<12x32xf32> -> vector<12x32xf32>
    %c0_18 = arith.constant 0 : index
    %c0_19 = arith.constant 0 : index
    %36 = vector.load %arg7[%c0_18, %c0_19] : memref<1x32xf32, #tpu.memory_space<vmem>>, vector<1x32xf32>
    %37 = vector.broadcast %36 : vector<1x32xf32> to vector<12x32xf32>
    %38 = arith.addf %35, %37 : vector<12x32xf32>
    %39 = arith.addf %0, %38 : vector<12x32xf32>
    %c0_20 = arith.constant 0 : index
    %c0_21 = arith.constant 0 : index
    %40 = vector.load %arg8[%c0_20, %c0_21] : memref<12x32xf32, #tpu.memory_space<vmem>>, vector<12x32xf32>
    tpu.vector_store %arg8[%c0_20, %c0_21], %39 {strides = array<i32>} : memref<12x32xf32, #tpu.memory_space<vmem>>, vector<12x32xf32>,
    return
  }
  func.func @transform_0(%arg0: i32) -> (i32, i32) {
    %c0_i32 = arith.constant 0 : i32
    %c0_i32_0 = arith.constant 0 : i32
    return %arg0, %c0_i32 : i32, i32
  }
  func.func @transform_1(%arg0: i32) -> (i32, i32) {
    %c0_i32 = arith.constant 0 : i32
    %c0_i32_0 = arith.constant 0 : i32
    %c0_i32_1 = arith.constant 0 : i32
    return %c0_i32, %c0_i32_0 : i32, i32
  }
  func.func @transform_2(%arg0: i32) -> (i32, i32) {
    %c0_i32 = arith.constant 0 : i32
    %c0_i32_0 = arith.constant 0 : i32
    %c0_i32_1 = arith.constant 0 : i32
    return %c0_i32, %c0_i32_0 : i32, i32
  }
  func.func @transform_3(%arg0: i32) -> (i32, i32) {
    %c0_i32 = arith.constant 0 : i32
    %c0_i32_0 = arith.constant 0 : i32
    %c0_i32_1 = arith.constant 0 : i32
    return %c0_i32, %c0_i32_0 : i32, i32
  }
  func.func @transform_4(%arg0: i32) -> (i32, i32) {
    %c0_i32 = arith.constant 0 : i32
    %c0_i32_0 = arith.constant 0 : i32
    %c0_i32_1 = arith.constant 0 : i32
    return %c0_i32, %c0_i32_0 : i32, i32
  }
  func.func @transform_5(%arg0: i32) -> (i32, i32) {
    %c0_i32 = arith.constant 0 : i32
    %c0_i32_0 = arith.constant 0 : i32
    %c0_i32_1 = arith.constant 0 : i32
    return %c0_i32, %c0_i32_0 : i32, i32
  }
  func.func @transform_6(%arg0: i32) -> (i32, i32) {
    %c0_i32 = arith.constant 0 : i32
    %c0_i32_0 = arith.constant 0 : i32
    %c0_i32_1 = arith.constant 0 : i32
    return %c0_i32, %c0_i32_0 : i32, i32
  }
  func.func @transform_7(%arg0: i32) -> (i32, i32) {
    %c0_i32 = arith.constant 0 : i32
    %c0_i32_0 = arith.constant 0 : i32
    return %arg0, %c0_i32 : i32, i32
  }
}

module attributes {stable_mosaic.version = 11 : i64} {
  func.func @_ln_linear_kernel(%arg0: i32, %arg1: memref<12x32xf32, #tpu.memory_space<vmem>>, %arg2: memref<1x32xf32, #tpu.memory_space<vmem>>, %arg3: memref<1x32xf32, #tpu.memory_space<vmem>>, %arg4: memref<32x11xbf16, #tpu.memory_space<vmem>>, %arg5: memref<1x11xf32, #tpu.memory_space<vmem>>, %arg6: memref<12x11xf32, #tpu.memory_space<vmem>>) attributes {dimension_semantics = [#tpu.dimension_semantics<parallel>], iteration_bounds = array<i64: 1>, scalar_prefetch = 0 : i64, scratch_operands = 0 : i64, tpu.core_type = #tpu.core_type<tc>, window_params = [{transform_indices = @transform_0, window_bounds = array<i64: 12, 32>}, {pipeline_mode = #tpu.pipeline_mode<synchronous>, transform_indices = @transform_1, window_bounds = array<i64: 1, 32>}, {pipeline_mode = #tpu.pipeline_mode<synchronous>, transform_indices = @transform_2, window_bounds = array<i64: 1, 32>}, {pipeline_mode = #tpu.pipeline_mode<synchronous>, transform_indices = @transform_3, window_bounds = array<i64: 32, 11>}, {pipeline_mode = #tpu.pipeline_mode<synchronous>, transform_indices = @transform_4, window_bounds = array<i64: 1, 11>}, {transform_indices = @transform_5, window_bounds = array<i64: 12, 11>}]} {
    %c0 = arith.constant 0 : index
    %c0_0 = arith.constant 0 : index
    %0 = vector.load %arg1[%c0, %c0_0] : memref<12x32xf32, #tpu.memory_space<vmem>>, vector<12x32xf32>
    %c0_1 = arith.constant 0 : index
    %c0_2 = arith.constant 0 : index
    %1 = vector.load %arg2[%c0_1, %c0_2] : memref<1x32xf32, #tpu.memory_space<vmem>>, vector<1x32xf32>
    %c0_3 = arith.constant 0 : index
    %c0_4 = arith.constant 0 : index
    %2 = vector.load %arg3[%c0_3, %c0_4] : memref<1x32xf32, #tpu.memory_space<vmem>>, vector<1x32xf32>
    %cst = arith.constant dense<0.000000e+00> : vector<12xf32>
    %3 = vector.multi_reduction <add>, %0, %cst [1] : vector<12x32xf32> to vector<12xf32>
    %4 = vector.shape_cast %3 : vector<12xf32> to vector<12x1xf32>
    %cst_5 = arith.constant 3.200000e+01 : f32
    %5 = vector.broadcast %cst_5 : f32 to vector<12x1xf32>
    %6 = arith.divf %4, %5 : vector<12x1xf32>
    %7 = vector.broadcast %6 : vector<12x1xf32> to vector<12x32xf32>
    %8 = arith.subf %0, %7 : vector<12x32xf32>
    %9 = arith.mulf %8, %8 : vector<12x32xf32>
    %cst_6 = arith.constant dense<0.000000e+00> : vector<12xf32>
    %10 = vector.multi_reduction <add>, %9, %cst_6 [1] : vector<12x32xf32> to vector<12xf32>
    %11 = vector.shape_cast %10 : vector<12xf32> to vector<12x1xf32>
    %cst_7 = arith.constant 3.200000e+01 : f32
    %12 = vector.broadcast %cst_7 : f32 to vector<12x1xf32>
    %13 = arith.divf %11, %12 : vector<12x1xf32>
    %14 = vector.broadcast %6 : vector<12x1xf32> to vector<12x32xf32>
    %15 = arith.subf %0, %14 : vector<12x32xf32>
    %cst_8 = arith.constant 9.99999996E-13 : f32
    %16 = vector.broadcast %cst_8 : f32 to vector<12x1xf32>
    %17 = arith.addf %13, %16 : vector<12x1xf32>
    %18 = math.rsqrt %17 : vector<12x1xf32>
    %19 = vector.broadcast %18 : vector<12x1xf32> to vector<12x32xf32>
    %20 = arith.mulf %15, %19 : vector<12x32xf32>
    %21 = vector.broadcast %1 : vector<1x32xf32> to vector<12x32xf32>
    %22 = arith.mulf %20, %21 : vector<12x32xf32>
    %23 = vector.broadcast %2 : vector<1x32xf32> to vector<12x32xf32>
    %24 = arith.addf %22, %23 : vector<12x32xf32>
    %25 = arith.truncf %24 : vector<12x32xf32> to vector<12x32xbf16>
    %c0_9 = arith.constant 0 : index
    %c0_10 = arith.constant 0 : index
    %26 = vector.load %arg4[%c0_9, %c0_10] : memref<32x11xbf16, #tpu.memory_space<vmem>>, vector<32x11xbf16>
    %cst_11 = arith.constant dense<0.000000e+00> : vector<12x11xf32>
    %27 = tpu.matmul %25, %26, %cst_11 {dimension_numbers = #tpu.dot_dimension_numbers<[1], [0], [0], [1], [0, 0, 1, 1], [], []>} : vector<12x32xbf16>, vector<32x11xbf16>, vector<12x11xf32> -> vector<12x11xf32>
    %c0_12 = arith.constant 0 : index
    %c0_13 = arith.constant 0 : index
    %28 = vector.load %arg5[%c0_12, %c0_13] : memref<1x11xf32, #tpu.memory_space<vmem>>, vector<1x11xf32>
    %29 = vector.broadcast %28 : vector<1x11xf32> to vector<12x11xf32>
    %30 = arith.addf %27, %29 : vector<12x11xf32>
    %c0_14 = arith.constant 0 : index
    %c0_15 = arith.constant 0 : index
    %31 = vector.load %arg6[%c0_14, %c0_15] : memref<12x11xf32, #tpu.memory_space<vmem>>, vector<12x11xf32>
    tpu.vector_store %arg6[%c0_14, %c0_15], %30 {strides = array<i32>} : memref<12x11xf32, #tpu.memory_space<vmem>>, vector<12x11xf32>,
    return
  }
  func.func @transform_0(%arg0: i32) -> (i32, i32) {
    %c0_i32 = arith.constant 0 : i32
    %c0_i32_0 = arith.constant 0 : i32
    return %arg0, %c0_i32 : i32, i32
  }
  func.func @transform_1(%arg0: i32) -> (i32, i32) {
    %c0_i32 = arith.constant 0 : i32
    %c0_i32_0 = arith.constant 0 : i32
    %c0_i32_1 = arith.constant 0 : i32
    return %c0_i32, %c0_i32_0 : i32, i32
  }
  func.func @transform_2(%arg0: i32) -> (i32, i32) {
    %c0_i32 = arith.constant 0 : i32
    %c0_i32_0 = arith.constant 0 : i32
    %c0_i32_1 = arith.constant 0 : i32
    return %c0_i32, %c0_i32_0 : i32, i32
  }
  func.func @transform_3(%arg0: i32) -> (i32, i32) {
    %c0_i32 = arith.constant 0 : i32
    %c0_i32_0 = arith.constant 0 : i32
    %c0_i32_1 = arith.constant 0 : i32
    return %c0_i32, %c0_i32_0 : i32, i32
  }
  func.func @transform_4(%arg0: i32) -> (i32, i32) {
    %c0_i32 = arith.constant 0 : i32
    %c0_i32_0 = arith.constant 0 : i32
    %c0_i32_1 = arith.constant 0 : i32
    return %c0_i32, %c0_i32_0 : i32, i32
  }
  func.func @transform_5(%arg0: i32) -> (i32, i32) {
    %c0_i32 = arith.constant 0 : i32
    %c0_i32_0 = arith.constant 0 : i32
    return %arg0, %c0_i32 : i32, i32
  }
}

module attributes {stable_mosaic.version = 11 : i64} {
  func.func @_lsm_loss_kernel(%arg0: i32, %arg1: memref<12x11xf32, #tpu.memory_space<vmem>>, %arg2: memref<12x1xi32, #tpu.memory_space<vmem>>, %arg3: memref<1x1xf32, #tpu.memory_space<vmem>>) attributes {dimension_semantics = [#tpu.dimension_semantics<arbitrary>], iteration_bounds = array<i64: 1>, scalar_prefetch = 0 : i64, scratch_operands = 0 : i64, tpu.core_type = #tpu.core_type<tc>, window_params = [{pipeline_mode = #tpu.pipeline_mode<synchronous>, transform_indices = @transform_0, window_bounds = array<i64: 12, 11>}, {pipeline_mode = #tpu.pipeline_mode<synchronous>, transform_indices = @transform_1, window_bounds = array<i64: 12, 1>}, {pipeline_mode = #tpu.pipeline_mode<synchronous>, transform_indices = @transform_2, window_bounds = array<i64: 1, 1>}]} {
    %c0 = arith.constant 0 : index
    %c0_0 = arith.constant 0 : index
    %0 = vector.load %arg1[%c0, %c0_0] : memref<12x11xf32, #tpu.memory_space<vmem>>, vector<12x11xf32>
    %c0_1 = arith.constant 0 : index
    %c0_2 = arith.constant 0 : index
    %1 = vector.load %arg2[%c0_1, %c0_2] : memref<12x1xi32, #tpu.memory_space<vmem>>, vector<12x1xi32>
    %cst = arith.constant dense<0xFF800000> : vector<12xf32>
    %2 = vector.multi_reduction <maximumf>, %0, %cst [1] : vector<12x11xf32> to vector<12xf32>
    %3 = vector.shape_cast %2 : vector<12xf32> to vector<12x1xf32>
    %4 = vector.broadcast %3 : vector<12x1xf32> to vector<12x11xf32>
    %5 = arith.subf %0, %4 : vector<12x11xf32>
    %6 = math.exp %5 : vector<12x11xf32>
    %cst_3 = arith.constant dense<0.000000e+00> : vector<12xf32>
    %7 = vector.multi_reduction <add>, %6, %cst_3 [1] : vector<12x11xf32> to vector<12xf32>
    %8 = vector.shape_cast %7 : vector<12xf32> to vector<12x1xf32>
    %9 = math.log %8 : vector<12x1xf32>
    %10 = arith.addf %9, %3 : vector<12x1xf32>
    %11 = vector.broadcast %10 : vector<12x1xf32> to vector<12x11xf32>
    %12 = arith.subf %0, %11 : vector<12x11xf32>
    %13 = tpu.iota {dimensions = array<i32: 1>} : vector<12x11xi32>
    %14 = vector.broadcast %1 : vector<12x1xi32> to vector<12x11xi32>
    %15 = arith.cmpi eq, %13, %14 : vector<12x11xi32>
    %cst_4 = arith.constant 0.899999976 : f32
    %cst_5 = arith.constant 0.00999999977 : f32
    %16 = vector.broadcast %cst_4 : f32 to vector<12x11xf32>
    %17 = vector.broadcast %cst_5 : f32 to vector<12x11xf32>
    %18 = arith.select %15, %16, %17 : vector<12x11xi1>, vector<12x11xf32>
    %c-1_i32 = arith.constant -1 : i32
    %19 = vector.broadcast %c-1_i32 : i32 to vector<12x1xi32>
    %20 = arith.cmpi ne, %1, %19 : vector<12x1xi32>
    %21 = arith.extui %20 : vector<12x1xi1> to vector<12x1xi32>
    %22 = arith.sitofp %21 : vector<12x1xi32> to vector<12x1xf32>
    %cst_6 = arith.constant 0.000000e+00 : f32
    %23 = vector.broadcast %cst_6 : f32 to vector<12x11xf32>
    %24 = arith.cmpf ogt, %18, %23 : vector<12x11xf32>
    %cst_7 = arith.constant 1.000000e-30 : f32
    %25 = vector.broadcast %cst_7 : f32 to vector<12x11xf32>
    %26 = arith.maximumf %18, %25 : vector<12x11xf32>
    %27 = math.log %26 : vector<12x11xf32>
    %28 = arith.mulf %18, %27 : vector<12x11xf32>
    %cst_8 = arith.constant 0.000000e+00 : f32
    %29 = vector.broadcast %cst_8 : f32 to vector<12x11xf32>
    %30 = arith.select %24, %28, %29 : vector<12x11xi1>, vector<12x11xf32>
    %31 = arith.mulf %18, %12 : vector<12x11xf32>
    %32 = arith.subf %30, %31 : vector<12x11xf32>
    %33 = vector.broadcast %22 : vector<12x1xf32> to vector<12x11xf32>
    %34 = arith.mulf %32, %33 : vector<12x11xf32>
    %35 = vector.shape_cast %22 : vector<12x1xf32> to vector<1x12x1xf32>
    %cst_9 = arith.constant dense<0.000000e+00> : vector<1xf32>
    %36 = vector.multi_reduction <add>, %35, %cst_9 [1, 2] : vector<1x12x1xf32> to vector<1xf32>
    %37 = vector.shape_cast %36 : vector<1xf32> to vector<1x1x1xf32>
    %38 = vector.extract %37[0, 0, 0] : f32 from vector<1x1x1xf32>
    %39 = vector.broadcast %38 : f32 to vector<1x1xf32>
    %cst_10 = arith.constant 1.000000e+00 : f32
    %40 = vector.broadcast %cst_10 : f32 to vector<1x1xf32>
    %41 = arith.maximumf %39, %40 : vector<1x1xf32>
    %42 = vector.shape_cast %34 : vector<12x11xf32> to vector<1x12x11xf32>
    %cst_11 = arith.constant dense<0.000000e+00> : vector<1xf32>
    %43 = vector.multi_reduction <add>, %42, %cst_11 [1, 2] : vector<1x12x11xf32> to vector<1xf32>
    %44 = vector.shape_cast %43 : vector<1xf32> to vector<1x1x1xf32>
    %45 = vector.extract %44[0, 0, 0] : f32 from vector<1x1x1xf32>
    %46 = vector.broadcast %45 : f32 to vector<1x1xf32>
    %47 = arith.divf %46, %41 : vector<1x1xf32>
    %c0_12 = arith.constant 0 : index
    %c0_13 = arith.constant 0 : index
    %48 = vector.load %arg3[%c0_12, %c0_13] : memref<1x1xf32, #tpu.memory_space<vmem>>, vector<1x1xf32>
    tpu.vector_store %arg3[%c0_12, %c0_13], %47 {strides = array<i32>} : memref<1x1xf32, #tpu.memory_space<vmem>>, vector<1x1xf32>,
    return
  }
  func.func @transform_0(%arg0: i32) -> (i32, i32) {
    %c0_i32 = arith.constant 0 : i32
    %c0_i32_0 = arith.constant 0 : i32
    %c0_i32_1 = arith.constant 0 : i32
    return %c0_i32, %c0_i32_0 : i32, i32
  }
  func.func @transform_1(%arg0: i32) -> (i32, i32) {
    %c0_i32 = arith.constant 0 : i32
    %c0_i32_0 = arith.constant 0 : i32
    %c0_i32_1 = arith.constant 0 : i32
    return %c0_i32, %c0_i32_0 : i32, i32
  }
  func.func @transform_2(%arg0: i32) -> (i32, i32) {
    %c0_i32 = arith.constant 0 : i32
    %c0_i32_0 = arith.constant 0 : i32
    %c0_i32_1 = arith.constant 0 : i32
    return %c0_i32, %c0_i32_0 : i32, i32
  }
}

</mosaic_0001>

<bundles_post_ra>
// kernel: _e2e_device_forward.13
= control target key start
LH: loop header
LB: loop body
LE: loop exit
PB: predicated region body
PF: predicated region fallthrough
CT: control target
= control target key end

     0   :  { %vm71_vm0 = vcmask 1043456   ;;  %vm72_vm1 = vcmask 1044480   ;;  %v251_v0 = vmov 0.0   ;;  %v252_v2 = vmov 65535   ;;  %s399_s1 = inlined_call_operand.vmem [shape: bf16[9,32], index: 1, kind: input, shape index: {}]   ;;  %s400_s0 = inlined_call_operand.vmem [shape: f32[98,9], index: 0, kind: input, shape index: {}]   ;;  %s401_s2 = inlined_call_operand.vmem [shape: f32[1,32], index: 2, kind: input, shape index: {}]   ;;  %s402_s3 = inlined_call_operand.vmem [shape: f32[98,32], index: 3, kind: output, shape index: {}]  }
   0x1   :  { %215 = vmatprep.subr.bf16.mxu0 %v251_v0  ;;  %v250_v1 = vld [vmem:[%s399_s1] sm:$0x1f]   ;;  %245 = vmatprep.subr.bf16.mxu1 %v251_v0  ;;  %v73_v3 = vsel %vm71_vm0, 4294967295, %v252_v2  ;;  %v16_v5 = vld [vmem:[%s400_s0 + $0x8] sm:$0xff]  ;;  %vm253_vm2 = vmmov 0   ;;  %vm49_vm3 = vcmask 72704  }
   0x2   :  { %v15_v4 = vld [vmem:[%s400_s0] sm:$0xff]  ;;  %v74_v7 = vsel %vm72_vm1, %v73_v3, 0  ;;  %217 = vmatprep.mubr.msk.bf16.mxu0 %vm253_vm2, %v251_v0  ;;  %233 = vmatprep.mubr.msk.bf16.mxu1 %vm253_vm2, %v251_v0  ;;  %v24_v8 = vld [vmem:[%s400_s0 + $0x48] sm:$0xff]  ;;  %v17_v12 = vld [vmem:[%s400_s0 + $0x10] sm:$0xff]  ;;  %vm179_vm4 = vcmask 261120   ;;  %vm192_vm5 = vcmask 254976  }
   0x3   :  { %v23_v6 = vld [vmem:[%s400_s0 + $0x40] sm:$0xff]  ;;  %v76_v9 = vand.u32 %v250_v1, %v74_v7  ;;  %v28_v10 = vpack.c.bf16 %v16_v5, %v15_v4  ;;  %v18_v13 = vld [vmem:[%s400_s0 + $0x18] sm:$0xff]  ;;  %v25_v14 = vld [vmem:[%s400_s0 + $0x50] sm:$0xff] }
   0x4   :  { %v32_v11 = vpack.c.bf16 %v24_v8, %v23_v6  ;;  %v26_v15 = vld [vmem:[%s400_s0 + $0x58] sm:$0xff]  ;;  %v29_v16 = vpack.c.bf16 %v18_v13, %v17_v12  ;;  %v19_v18 = vld [vmem:[%s400_s0 + $0x20] sm:$0xff]  ;;  %v20_v19 = vld [vmem:[%s400_s0 + $0x28] sm:$0xff] }
   0x5   :  { %216 = vmatpush3.bf16.msra.mxu0 %v76_v9  ;;  %246 = vmatpush3.bf16.msra.mxu1 %v76_v9  ;;  %v33_v17 = vpack.c.bf16 %v26_v15, %v25_v14  ;;  %v27_v20 = vld [vmem:[%s400_s0 + $0x60] sm:$0x3]  ;;  %v30_v21 = vpack.c.bf16 %v20_v19, %v19_v18  ;;  %v21_v23 = vld [vmem:[%s400_s0 + $0x30] sm:$0xff]  ;;  %v22_v24 = vld [vmem:[%s400_s0 + $0x38] sm:$0xff] }
   0x6   :  { %v34_v22 = vpack.c.bf16 %v27_v20, %v27_v20  ;;  %v31_v25 = vpack.c.bf16 %v22_v24, %v21_v23  ;;  %v333_v26 = vld [vmem:[%s401_s2] ss:$0 sm:$0xff] }
   0x8   :  { %218 = vmatmul.mubr.msk.bf16.vlgmr.msra.gmra.mxu0 %vm49_vm3, %v28_v10  ;;  %234 = vmatmul.mubr.msk.bf16.vlgmr.msra.gmra.mxu1 %vm49_vm3, %v32_v11 }
   0x9   :  { %221 = vmatprep.mubr.msk.bf16.mxu0 %vm253_vm2, %v251_v0  ;;  %237 = vmatprep.mubr.msk.bf16.mxu1 %vm253_vm2, %v251_v0 }
  0x10   :  { %222 = vmatmul.mubr.msk.bf16.gmra.mxu0 %vm49_vm3, %v29_v16  ;;  %238 = vmatmul.mubr.msk.bf16.gmra.mxu1 %vm49_vm3, %v33_v17 }
  0x11   :  { %225 = vmatprep.mubr.msk.bf16.mxu0 %vm253_vm2, %v251_v0  ;;  %241 = vmatprep.mubr.msk.bf16.mxu1 %vm253_vm2, %v251_v0 }
  0x18   :  { %226 = vmatmul.mubr.msk.bf16.gmra.mxu0 %vm49_vm3, %v30_v21  ;;  %242 = vmatmul.mubr.msk.bf16.gmra.mxu1 %vm49_vm3, %v34_v22 }
  0x19   :  { %229 = vmatprep.mubr.msk.bf16.mxu0 %vm253_vm2, %v251_v0 }
  0x20   :  { %230 = vmatmul.mubr.msk.bf16.gmra.mxu0 %vm49_vm3, %v31_v25 }
  0xc8   :  { %v112_v27 = vpop.f32.mrf.mxu0  ;;  %v144_v28 = vpop.f32.mrf.mxu1 }
  0xc9   :  { %v113_v29 = vadd.f32 %v333_v26, %v112_v27  ;;  %v145_v30 = vadd.f32 %v333_v26, %v144_v28 }
  0xca   :  { %v219_v31 = vpop.f32.mrf.mxu0  ;;  %v235_v32 = vpop.f32.mrf.mxu1 }
  0xcb   :  { %v166_v33 = vmax.f32 %v113_v29, 0.0  ;;  %v174_v34 = vmax.f32 %v145_v30, 0.0 }
  0xcc   :  { %v115_v35 = vpop.f32.mrf.mxu0  ;;  %v147_v36 = vpop.f32.mrf.mxu1 }
  0xcd   :  { %180 = vst.msk [vmem:[%s402_s3] sm:$0xff] %vm179_vm4, %v166_v33  ;;  %v116_v37 = vadd.f32 %v333_v26, %v115_v35  ;;  %188 = vst.msk [vmem:[%s402_s3 + $0x40] sm:$0xff] %vm179_vm4, %v174_v34  ;;  %v148_v38 = vadd.f32 %v333_v26, %v147_v36 }
  0xce   :  { %v220_v39 = vpop.f32.mrf.mxu0  ;;  %v236_v40 = vpop.f32.mrf.mxu1 }
  0xcf   :  { %v167_v41 = vmax.f32 %v116_v37, 0.0  ;;  %v175_v42 = vmax.f32 %v148_v38, 0.0 }
  0xd0   :  { %v120_v43 = vpop.f32.mrf.mxu0  ;;  %v152_v44 = vpop.f32.mrf.mxu1 }
  0xd1   :  { %181 = vst.msk [vmem:[%s402_s3 + $0x8] sm:$0xff] %vm179_vm4, %v167_v41  ;;  %v121_v45 = vadd.f32 %v333_v26, %v120_v43  ;;  %189 = vst.msk [vmem:[%s402_s3 + $0x48] sm:$0xff] %vm179_vm4, %v175_v42  ;;  %v153_v46 = vadd.f32 %v333_v26, %v152_v44 }
  0xd2   :  { %v223_v47 = vpop.f32.mrf.mxu0  ;;  %v239_v48 = vpop.f32.mrf.mxu1 }
  0xd3   :  { %v168_v49 = vmax.f32 %v121_v45, 0.0  ;;  %v176_v50 = vmax.f32 %v153_v46, 0.0 }
  0xd4   :  { %v123_v51 = vpop.f32.mrf.mxu0  ;;  %v155_v52 = vpop.f32.mrf.mxu1 }
  0xd5   :  { %182 = vst.msk [vmem:[%s402_s3 + $0x10] sm:$0xff] %vm179_vm4, %v168_v49  ;;  %v124_v53 = vadd.f32 %v333_v26, %v123_v51  ;;  %190 = vst.msk [vmem:[%s402_s3 + $0x50] sm:$0xff] %vm179_vm4, %v176_v50  ;;  %v156_v54 = vadd.f32 %v333_v26, %v155_v52 }
  0xd6   :  { %v224_v55 = vpop.f32.mrf.mxu0  ;;  %v240_v56 = vpop.f32.mrf.mxu1 }
  0xd7   :  { %v169_v57 = vmax.f32 %v124_v53, 0.0  ;;  %v177_v58 = vmax.f32 %v156_v54, 0.0 }
  0xd8   :  { %v128_v59 = vpop.f32.mrf.mxu0  ;;  %v160_v60 = vpop.f32.mrf.mxu1 }
  0xd9   :  { %183 = vst.msk [vmem:[%s402_s3 + $0x18] sm:$0xff] %vm179_vm4, %v169_v57  ;;  %v129_v61 = vadd.f32 %v333_v26, %v128_v59  ;;  %191 = vst.msk [vmem:[%s402_s3 + $0x58] sm:$0xff] %vm179_vm4, %v177_v58  ;;  %v161_v62 = vadd.f32 %v333_v26, %v160_v60 }
  0xda   :  { %v227_v63 = vpop.f32.mrf.mxu0  ;;  %v243_v0 = vpop.f32.mrf.mxu1 }
  0xdb   :  { %v170_v1 = vmax.f32 %v129_v61, 0.0  ;;  %v178_v2 = vmax.f32 %v161_v62, 0.0 }
  0xdc   :  { %v131_v3 = vpop.f32.mrf.mxu0  ;;  %v163_v4 = vpop.f32.mrf.mxu1 }
  0xdd   :  { %184 = vst.msk [vmem:[%s402_s3 + $0x20] sm:$0xff] %vm179_vm4, %v170_v1  ;;  %v132_v5 = vadd.f32 %v333_v26, %v131_v3 }
  0xde   :  { %193 = vst.msk [vmem:[%s402_s3 + $0x60] sm:$0x3] %vm192_vm5, %v178_v2  ;;  %v228_v6 = vpop.f32.mrf.mxu0  ;;  %v244_v7 = vpop.f32.mrf.mxu1 }
  0xdf   :  { %v171_v8 = vmax.f32 %v132_v5, 0.0 }
  0xe0   :  { %v136_v9 = vpop.f32.mrf.mxu0 }
  0xe1   :  { %185 = vst.msk [vmem:[%s402_s3 + $0x28] sm:$0xff] %vm179_vm4, %v171_v8  ;;  %v137_v10 = vadd.f32 %v333_v26, %v136_v9 }
  0xe2   :  { %v231_v11 = vpop.f32.mrf.mxu0 }
  0xe3   :  { %v172_v12 = vmax.f32 %v137_v10, 0.0 }
  0xe4   :  { %v139_v13 = vpop.f32.mrf.mxu0 }
  0xe5   :  { %186 = vst.msk [vmem:[%s402_s3 + $0x30] sm:$0xff] %vm179_vm4, %v172_v12  ;;  %v140_v14 = vadd.f32 %v333_v26, %v139_v13 }
  0xe6   :  { %v232_v15 = vpop.f32.mrf.mxu0 }
  0xe7   :  { %v173_v16 = vmax.f32 %v140_v14, 0.0 }
  0xe9   :  { %187 = vst.msk [vmem:[%s402_s3 + $0x38] sm:$0xff] %vm179_vm4, %v173_v16 }

// kernel: _e2e_device_forward.21
= control target key start
LH: loop header
LB: loop body
LE: loop exit
PB: predicated region body
PF: predicated region fallthrough
CT: control target
= control target key end

     0   :  { %s2805_s0 = inlined_call_operand.vmem [shape: s32[2], index: 0, kind: input, shape index: {}]   ;;  %s2806_s1 = inlined_call_operand.vmem [shape: f32[2,6,32], index: 1, kind: input, shape index: {}, may-alias: {1,2}]   ;;  %s2807_s2 = inlined_call_operand.vmem [shape: f32[2,6,32], index: 2, kind: input, shape index: {}, may-alias: {1,2}]   ;;  %s2808_s3 = inlined_call_operand.vmem [shape: f32[1,32], index: 3, kind: input, shape index: {}]   ;;  %s2809_s4 = inlined_call_operand.vmem [shape: f32[1,32], index: 4, kind: input, shape index: {}]   ;;  %s2810_s5 = inlined_call_operand.vmem [shape: bf16[4,32,8], index: 5, kind: input, shape index: {}]   ;;  %s2811_s6 = inlined_call_operand.vmem [shape: f32[4,1,8], index: 6, kind: input, shape index: {}]   ;;  %s2812_s7 = inlined_call_operand.vmem [shape: bf16[4,32,8], index: 7, kind: input, shape index: {}]   ;;  %s2813_s8 = inlined_call_operand.vmem [shape: f32[4,1,8], index: 8, kind: input, shape index: {}]   ;;  %s2814_s9 = inlined_call_operand.vmem [shape: bf16[4,32,8], index: 9, kind: input, shape index: {}]   ;;  %s2815_s10 = inlined_call_operand.vmem [shape: f32[4,1,8], index: 10, kind: input, shape index: {}]   ;;  %s2816_s11 = inlined_call_operand.vmem [shape: bf16[4,8,32], index: 11, kind: input, shape index: {}]   ;;  %s2817_s12 = inlined_call_operand.vmem [shape: f32[1,32], index: 12, kind: input, shape index: {}]   ;;  %s2818_s13 = inlined_call_operand.vmem [shape: f32[2,6,32], index: 13, kind: output, shape index: {}]  }
   0x1   :  { %s18_s26 = sshll.u32 %s2805_s0, 4  ;;  %s19_s26 = int_to_ptr.vmem [resolvable:$true] %s18_s26 }
   0x2   :  { %s2373_s27 = scalar_lea.vmem %s19_s26, 16  ;;  %p2378_p1 = scmp.lt.s32.totalorder %s19_s26, %s19_s26 }
   0x3   :  { %p2374_p0 = scmp.ne.s32.totalorder %s19_s26, %s2373_s27  ;;  %p2379_p2 = scmp.lt.s32.totalorder %s2373_s27, %s2373_s27 }
   0x5   :  { %p2380_p3 = por %p2379_p2, %p2378_p1 }
   0x7   :  { %p2381_p4 = pnand %p2380_p3, %p2374_p0 }
   0x9   :  { %2384 = shalt.err (!%p2381_p4)  }
   0xa   :  { %s2395_s28 = smov [#allocation3]  }
   0xb   :  { %21 = dma.vmem_to_smem %s19_s26, 16, %s2395_s28, [#allocation2] }
   0xc   :  { %2389 = dma.done.wait [#allocation2], 16 }
   0xd   :  { %2390 = vsyncadd [#allocation2], 4294967280 }
   0xe   :  { %23 = sfence }
   0xf   :  { %s2471_s29 = smov 0  }
  0x10 LB: > { %s2477_s0 = sadd.s32 4294967295, %s2393_s29   ;;  %p1976_p5 = scmp.ge.s32.totalorder %s2393_s29, 1  ;;  %s2393_s29 = sphi %s2471_s29, %s29_s29  }
  0x11   : > { %p377_p6 = scmp.lt.s32.totalorder %s2393_s29, 3 }
  0x13   : > { %p378_p7 = pnand %p1976_p5, %p377_p6 }
  0x14   : > { %p421_p8 = scmp.lt.s32.totalorder (!%p378_p7), %s2477_s0, 1  ;;  %s467_s24 = sld [smem:[#allocation3 + %s2477_s0]] (!%p378_p7) }
  0x15   : > { %381 = sbr.rel (%p378_p7) target bundleno = 4208 (0x1070), region = 68 }
  0x1a   : > { %s2483_s30 = scalar_select %p421_p8, %s2477_s0, 1  ;;  %vm437_vm0 = vcmask 259072   ;;  %v2331_v7 = vld [vmem:[%s2810_s5 + $0x8] sm:$0xff]   ;;  %v2396_v9 = vmov 0.0   ;;  %v2333_v10 = vld [vmem:[%s2810_s5] sm:$0xff]   ;;  %vm2397_vm1 = vmmov 0   ;;  %v468_v47 = vlaneseq }
  0x1b   : > { %v2332_v8 = vld [vmem:[%s2812_s7 + $0x8] sm:$0xff]   ;;  %2152 = vmatprep.subr.bf16.mxu0 %v2396_v9  ;;  %2160 = vmatprep.subr.bf16.mxu1 %v2396_v9  ;;  %v2334_v11 = vld [vmem:[%s2812_s7] sm:$0xff]   ;;  %vm507_vm2 = vcmask 261120   ;;  %vm679_vm3 = vcmask 64512   ;;  %vm747_vm4 = vcmask 1042432   ;;  %v470_v50 = vstv %s467_s24 }
  0x1c   : > { %s1977_s14 = sshll.u32 %s2483_s30, 3  ;;  %2153 = vmatpush3.bf16.msra.mxu0 %v2331_v7  ;;  %2161 = vmatpush3.bf16.msra.mxu1 %v2332_v8  ;;  %v1979_v16 = vld [vmem:[%s2808_s3] ss:$0 sm:$0xff]  ;;  %v2335_v21 = vld [vmem:[%s2814_s9 + $0x8] sm:$0xff]   ;;  %v469_v48 = vand.u32 127, %v468_v47  ;;  %v473_v49 = vshrl.u32 %v468_v47, 7 }
  0x1d   : > { %s424_s16 = scalar_lea.vmem %s2806_s1, %s1977_s14  ;;  %2154 = vmatprep.subr.bf16.mxu0 %v2396_v9  ;;  %2162 = vmatprep.subr.bf16.mxu1 %v2396_v9  ;;  %v1980_v18 = vld [vmem:[%s2809_s4] ss:$0 sm:$0xff]  ;;  %vm728_vm8 = vcmask 46080   ;;  %vm796_vm9 = vcmask 1043456   ;;  %vm743_vm10 = vcmask 48128   ;;  %v2337_v7 = vld [vmem:[%s2810_s5 + $0x18] sm:$0xff]   ;;  %s432_s26 = scalar_lea.vmem %s2818_s13, %s1977_s14 }
  0x1e   : > { %v2491_v0 = vld [vmem:[%s424_s16] sm:$0x3f]  ;;  %2156 = vmatprep.mubr.msk.bf16.mxu0 %vm2397_vm1, %v2396_v9  ;;  %2164 = vmatprep.mubr.msk.bf16.mxu1 %vm2397_vm1, %v2396_v9  ;;  %vm471_vm5 = vcmp.lt.s32.totalorder %v469_v48, %v470_v50  ;;  %vm474_vm6 = vcmp.le.s32.totalorder %v469_v48, %v473_v49 }
  0x1f   : > { %v438_v1 = vsel %vm437_vm0, %v2491_v0, 0.0  ;;  %v2336_v23 = vld [vmem:[%s2814_s9] sm:$0xff]   ;;  %vm2564_vm7 = vmand %vm471_vm5, %vm474_vm6 }
  0x20   : > { %439 = vadd.xlane.f32.xlu0 %v438_v1  ;;  %2155 = vmatpush3.bf16.msra.mxu0 %v2333_v10  ;;  %v1986_v24 = vld [vmem:[%s2813_s8] ss:$0 sm:$0xff]  ;;  %v2338_v10 = vld [vmem:[%s2810_s5 + $0x10] sm:$0xff]  }
  0x21   : > { %2163 = vmatpush3.bf16.msra.mxu1 %v2334_v11  ;;  %2168 = vmatprep.subr.bf16.mxu0 %v2396_v9  ;;  %v1982_v31 = vld [vmem:[%s2811_s6] ss:$0 sm:$0xff]  ;;  %v2339_v11 = vld [vmem:[%s2814_s9 + $0x18] sm:$0xff]  }
  0x22   : > { %2176 = vmatprep.subr.bf16.mxu1 %v2396_v9  ;;  %v1990_v37 = vld [vmem:[%s2815_s10] ss:$0 sm:$0xff] }
  0x23   : > { %v792_v1 = vld [vmem:[%s2816_s11] sm:$0xf] }
  0xa9   : > { %v440_v2 = vpop.xlane.xlu0 %439 }
  0xaa   : > { %v442_v3 = vmul.f32 0.03125, %v440_v2  ;;  %v798_v2 = vsel %vm796_vm9, %v792_v1, 0 }
  0xac   : > { %v443_v4 = vsub.f32 %v2491_v0, %v442_v3 }
  0xae   : > { %v444_v5 = vmul.f32 %v443_v4, %v443_v4 }
  0xb0   : > { %v445_v6 = vsel %vm437_vm0, %v444_v5, 0.0 }
  0xb1   : > { %446 = vadd.xlane.f32.xlu0 %v445_v6 }
 0x13a   : > { %v447_v12 = vpop.xlane.xlu0 %446 }
 0x13b   : > { %v448_v13 = vmul.f32 0.03125, %v447_v12  ;;  %v2340_v12 = vld [vmem:[%s2814_s9 + $0x10] sm:$0xff]  }
 0x13d   : > { %v449_v14 = vadd.f32 1e-12, %v448_v13 }
 0x13f   : > { %2355 = vrsqrt.f32 %v449_v14  ;;  %v2341_v14 = vld [vmem:[%s2812_s7 + $0x18] sm:$0xff]  }
 0x14c   : > { %v2356_v15 = vpop.eup %2355 }
 0x14d   : > { %v451_v17 = vmul.f32 %v2356_v15, %v443_v4 }
 0x14f   : > { %v458_v19 = vmul.f32 %v1979_v16, %v451_v17 }
 0x151   : > { %v465_v20 = vadd.f32 %v1980_v18, %v458_v19  ;;  %v2342_v18 = vld [vmem:[%s2812_s7 + $0x10] sm:$0xff]  }
 0x153   : > { %v2528_v22 = vpack.c.bf16 %v465_v20, %v465_v20 }
 0x155   : > { %2157 = vmatmul.mubr.msk.bf16.vlgmr.msra.gmra.mxu0 %vm507_vm2, %v2528_v22  ;;  %2165 = vmatmul.mubr.msk.bf16.vlgmr.msra.gmra.mxu1 %vm507_vm2, %v2528_v22 }
 0x156   : > { %2169 = vmatpush3.bf16.msra.mxu0 %v2335_v21  ;;  %2172 = vmatprep.mubr.msk.bf16.mxu0 %vm2397_vm1, %v2396_v9 }
 0x157   : > { %2170 = vmatprep.subr.bf16.mxu0 %v2396_v9  ;;  %2178 = vmatprep.mubr.msk.bf16.mxu1 %vm2397_vm1, %v2396_v9 }
 0x15a   : > { %2171 = vmatpush3.bf16.msra.mxu0 %v2336_v23 }
 0x15b   : > { %2182 = vmatprep.subr.bf16.mxu0 %v2396_v9 }
 0x15d   : > { %2173 = vmatmul.mubr.msk.bf16.vlgmr.msra.gmra.mxu0 %vm507_vm2, %v2528_v22 }
 0x15e   : > { %2184 = vmatprep.mubr.msk.bf16.mxu0 %vm2397_vm1, %v2396_v9 }
 0x215   : > { %v545_v25 = vpop.f32.mrf.mxu0  ;;  %v608_v26 = vpop.f32.mrf.mxu1 }
 0x216   : > { %v609_v27 = vadd.f32 %v1986_v24, %v608_v26  ;;  %v546_v38 = vadd.f32 %v1982_v31, %v545_v25  ;;  %v2020_v25 = vld [vmem:[%s2815_s10 + $0x1] ss:$0 sm:$0xff] }
 0x217   : > { %v2158_v28 = vpop.f32.mrf.mxu0  ;;  %v2166_v29 = vpop.f32.mrf.mxu1 }
 0x218   : > { %v678_v30 = vpack.c.bf16 %v609_v27, %v609_v27  ;;  %v677_v42 = vpack.c.bf16 %v546_v38, %v546_v38 }
 0x219   : > { %v548_v32 = vpop.f32.mrf.mxu0  ;;  %v611_v33 = vpop.f32.mrf.mxu1 }
 0x21a   : > { %v684_v34 = vsel %vm679_vm3, %v678_v30, 0 }
 0x21b   : > { %v2159_v35 = vpop.f32.mrf.mxu0  ;;  %v2167_v36 = vpop.f32.mrf.mxu1  ;;  %2177 = vmatpush3.bf16.xpose.msra.mxu1 %v684_v34 }
 0x21c   : > { %2188 = vmatprep.subr.bf16.mxu1 %v2396_v9 }
 0x21d   : > { %v671_v39 = vpop.f32.mrf.mxu0 }
 0x21e   : > { %v672_v40 = vadd.f32 %v1990_v37, %v671_v39  ;;  %v2011_v37 = vld [vmem:[%s2813_s8 + $0x1] ss:$0 sm:$0xff] }
 0x21f   : > { %v2174_v41 = vpop.f32.mrf.mxu0 }
 0x220   : > { %v742_v43 = vpack.c.bf16 %v672_v40, %v672_v40 }
 0x221   : > { %v674_v44 = vpop.f32.mrf.mxu0 }
 0x222   : > { %v749_v45 = vsel %vm747_vm4, %v742_v43, 0  ;;  %2179 = vmatmul.mubr.msk.bf16.vlgmr.msra.gmra.mxu1 %vm679_vm3, %v677_v42  ;;  %v2002_v42 = vld [vmem:[%s2811_s6 + $0x1] ss:$0 sm:$0xff] }
 0x223   : > { %v2175_v46 = vpop.f32.mrf.mxu0  ;;  %2183 = vmatpush3.bf16.msra.mxu0 %v749_v45  ;;  %2190 = vmatprep.mubr.msk.bf16.mxu1 %vm2397_vm1, %v2396_v9 }
 0x224   : > { %2194 = vmatprep.subr.bf16.mxu0 %v2396_v9  ;;  %2189 = vmatpush3.bf16.msra.mxu1 %v798_v2 }
 0x225   : > { %2202 = vmatprep.subr.bf16.mxu1 %v2396_v9 }
 0x2e2   : > { %v720_v51 = vpop.f32.mrf.mxu1 }
 0x2e3   : > { %v726_v53 = vmul.f32 0.35355338, %v720_v51 }
 0x2e4   : > { %v2180_v54 = vpop.f32.mrf.mxu1 }
 0x2e5   : > { %v727_v55 = vsel %vm2564_vm7, %v726_v53, -3.4028235e+38 }
 0x2e6   : > { %v723_v56 = vpop.f32.mrf.mxu1  ;;  %v729_v57 = vsel %vm728_vm8, %v727_v55, -inf }
 0x2e7   : > { %730 = vmax.xlane.f32.xlu1 %v729_v57 }
 0x2e8   : > { %v2181_v58 = vpop.f32.mrf.mxu1 }
 0x370   : > { %v731_v59 = vpop.xlane.xlu1 %730 }
 0x371   : > { %v732_v60 = vsub.f32 %v727_v55, %v731_v59 }
 0x373   : > { %v733_v61 = vmul.f32 1.442695, %v732_v60 }
 0x375   : > { %2357 = vpow2.f32 %v733_v61  ;;  %v2026_v61 = vld [vmem:[%s2816_s11 + $0x4] sm:$0xf] }
 0x382   : > { %v2358_v62 = vpop.eup %2357 }
 0x383   : > { %v735_v63 = vsel %vm728_vm8, %v2358_v62, 0.0 }
 0x384   : > { %736 = vadd.xlane.f32.xlu1 %v735_v63 }
 0x40d   : > { %v737_v3 = vpop.xlane.xlu1 %736 }
 0x40e   : > { %2359 = vrcp.f32 %v737_v3 }
 0x41b   : > { %v2360_v4 = vpop.eup %2359 }
 0x41c   : > { %v739_v5 = vmul.f32 %v2360_v4, %v2358_v62  ;;  %v1153_v62 = vsel %vm796_vm9, %v2026_v61, 0  ;;  %v2343_v4 = vld [vmem:[%s2810_s5 + $0x28] sm:$0xff]  }
 0x41d   : > { %v2057_v61 = vld [vmem:[%s2816_s11 + $0x8] sm:$0xf] }
 0x41e   : > { %v740_v6 = vsel %vm2564_vm7, %v739_v5, 0.0 }
 0x41f   : > { %v741_v8 = vpack.c.bf16 %v740_v6, %v740_v6  ;;  %v2344_v6 = vld [vmem:[%s2810_s5 + $0x20] sm:$0xff]  }
 0x421   : > { %2185 = vmatmul.mubr.msk.bf16.vlgmr.msra.gmra.mxu0 %vm743_vm10, %v741_v8  ;;  %v2346_v8 = vld [vmem:[%s2814_s9 + $0x20] sm:$0xff]  }
 0x422   : > { %2195 = vmatpush3.bf16.msra.mxu0 %v2337_v7  ;;  %2198 = vmatprep.mubr.msk.bf16.mxu0 %vm2397_vm1, %v2396_v9  ;;  %v2345_v7 = vld [vmem:[%s2814_s9 + $0x28] sm:$0xff]  }
 0x423   : > { %2196 = vmatprep.subr.bf16.mxu0 %v2396_v9 }
 0x426   : > { %2197 = vmatpush3.bf16.msra.mxu0 %v2338_v10 }
 0x427   : > { %2210 = vmatprep.subr.bf16.mxu0 %v2396_v9 }
 0x429   : > { %2199 = vmatmul.mubr.msk.bf16.vlgmr.msra.gmra.mxu0 %vm507_vm2, %v2528_v22 }
 0x42a   : > { %2211 = vmatpush3.bf16.msra.mxu0 %v2339_v11  ;;  %2214 = vmatprep.mubr.msk.bf16.mxu0 %vm2397_vm1, %v2396_v9  ;;  %v2347_v11 = vld [vmem:[%s2812_s7 + $0x28] sm:$0xff]  }
 0x42b   : > { %2212 = vmatprep.subr.bf16.mxu0 %v2396_v9 }
 0x42e   : > { %2213 = vmatpush3.bf16.msra.mxu0 %v2340_v12 }
 0x42f   : > { %2224 = vmatprep.subr.bf16.mxu0 %v2396_v9 }
 0x431   : > { %2215 = vmatmul.mubr.msk.bf16.vlgmr.msra.gmra.mxu0 %vm507_vm2, %v2528_v22 }
 0x432   : > { %2226 = vmatprep.mubr.msk.bf16.mxu0 %vm2397_vm1, %v2396_v9 }
 0x4e1   : > { %v785_v13 = vpop.f32.mrf.mxu0 }
 0x4e2   : > { %v791_v15 = vpack.c.bf16 %v785_v13, %v785_v13 }
 0x4e3   : > { %v2186_v16 = vpop.f32.mrf.mxu0 }
 0x4e4   : > { %2191 = vmatmul.mubr.msk.bf16.vlgmr.msra.gmra.mxu1 %vm679_vm3, %v791_v15  ;;  %v2348_v15 = vld [vmem:[%s2812_s7 + $0x20] sm:$0xff]  }
 0x4e5   : > { %v788_v17 = vpop.f32.mrf.mxu0  ;;  %2203 = vmatpush3.bf16.msra.mxu1 %v2341_v14  ;;  %2206 = vmatprep.mubr.msk.bf16.mxu1 %vm2397_vm1, %v2396_v9 }
 0x4e6   : > { %2204 = vmatprep.subr.bf16.mxu1 %v2396_v9 }
 0x4e7   : > { %v2187_v19 = vpop.f32.mrf.mxu0 }
 0x4e9   : > { %v900_v20 = vpop.f32.mrf.mxu0  ;;  %2205 = vmatpush3.bf16.msra.mxu1 %v2342_v18 }
 0x4ea   : > { %2218 = vmatprep.subr.bf16.mxu1 %v2396_v9  ;;  %v901_v46 = vadd.f32 %v2002_v42, %v900_v20 }
 0x4eb   : > { %v2200_v21 = vpop.f32.mrf.mxu0 }
 0x4ec   : > { %2207 = vmatmul.mubr.msk.bf16.vlgmr.msra.gmra.mxu1 %vm507_vm2, %v2528_v22  ;;  %v1036_v47 = vpack.c.bf16 %v901_v46, %v901_v46  ;;  %v2051_v21 = vld [vmem:[%s2815_s10 + $0x2] ss:$0 sm:$0xff] }
 0x4ed   : > { %v903_v23 = vpop.f32.mrf.mxu0  ;;  %2220 = vmatprep.mubr.msk.bf16.mxu1 %vm2397_vm1, %v2396_v9 }
 0x4ef   : > { %v2201_v24 = vpop.f32.mrf.mxu0 }
 0x4f1   : > { %v1030_v26 = vpop.f32.mrf.mxu0 }
 0x4f2   : > { %v1031_v27 = vadd.f32 %v2020_v25, %v1030_v26 }
 0x4f3   : > { %v2216_v28 = vpop.f32.mrf.mxu0 }
 0x4f4   : > { %v1099_v29 = vpack.c.bf16 %v1031_v27, %v1031_v27 }
 0x4f5   : > { %v1033_v30 = vpop.f32.mrf.mxu0 }
 0x4f6   : > { %v1104_v31 = vsel %vm747_vm4, %v1099_v29, 0  ;;  %v1981_v30 = vld [vmem:[%s2817_s12] ss:$0 sm:$0xff] }
 0x4f7   : > { %v2217_v32 = vpop.f32.mrf.mxu0  ;;  %2225 = vmatpush3.bf16.msra.mxu0 %v1104_v31  ;;  %v483_v31 = vadd.f32 %v1981_v30, %v2491_v0  ;;  %v2033_v0 = vld [vmem:[%s2811_s6 + $0x2] ss:$0 sm:$0xff] }
 0x4f8   : > { %2236 = vmatprep.subr.bf16.mxu0 %v2396_v9 }
 0x5a4   : > { %v2626_v33 = vpop.f32.mrf.mxu1 }
 0x5a5   : > { %v840_v32 = vadd.f32 %v2626_v33, %v483_v31 }
 0x5a6   : > { %v2192_v34 = vpop.f32.mrf.mxu1 }
 0x5a8   : > { %v837_v35 = vpop.f32.mrf.mxu1 }
 0x5aa   : > { %v2193_v36 = vpop.f32.mrf.mxu1 }
 0x5ac   : > { %v965_v38 = vpop.f32.mrf.mxu1 }
 0x5ad   : > { %v966_v39 = vadd.f32 %v2011_v37, %v965_v38 }
 0x5ae   : > { %v2208_v40 = vpop.f32.mrf.mxu1 }
 0x5af   : > { %v1037_v41 = vpack.c.bf16 %v966_v39, %v966_v39  ;;  %v2042_v39 = vld [vmem:[%s2813_s8 + $0x2] ss:$0 sm:$0xff] }
 0x5b0   : > { %v968_v43 = vpop.f32.mrf.mxu1 }
 0x5b1   : > { %v1042_v44 = vsel %vm679_vm3, %v1037_v41, 0 }
 0x5b2   : > { %v2209_v45 = vpop.f32.mrf.mxu1  ;;  %2219 = vmatpush3.bf16.xpose.msra.mxu1 %v1042_v44 }
 0x5b3   : > { %2230 = vmatprep.subr.bf16.mxu1 %v2396_v9 }
 0x5b9   : > { %2221 = vmatmul.mubr.msk.bf16.vlgmr.msra.gmra.mxu1 %vm679_vm3, %v1036_v47 }
 0x5ba   : > { %2232 = vmatprep.mubr.msk.bf16.mxu1 %vm2397_vm1, %v2396_v9  ;;  %2231 = vmatpush3.bf16.msra.mxu1 %v1153_v62  ;;  %v1508_v62 = vsel %vm796_vm9, %v2057_v61, 0 }
 0x5bb   : > { %2244 = vmatprep.subr.bf16.mxu1 %v2396_v9 }
 0x679   : > { %v1078_v48 = vpop.f32.mrf.mxu1 }
 0x67a   : > { %v1084_v49 = vmul.f32 0.35355338, %v1078_v48 }
 0x67b   : > { %v2222_v50 = vpop.f32.mrf.mxu1 }
 0x67c   : > { %v1085_v51 = vsel %vm2564_vm7, %v1084_v49, -3.4028235e+38 }
 0x67d   : > { %v1081_v53 = vpop.f32.mrf.mxu1  ;;  %v1086_v54 = vsel %vm728_vm8, %v1085_v51, -inf }
 0x67e   : > { %1087 = vmax.xlane.f32.xlu0 %v1086_v54 }
 0x67f   : > { %v2223_v55 = vpop.f32.mrf.mxu1 }
 0x707   : > { %v1088_v56 = vpop.xlane.xlu0 %1087 }
 0x708   : > { %v1089_v57 = vsub.f32 %v1085_v51, %v1088_v56 }
 0x70a   : > { %v1090_v58 = vmul.f32 1.442695, %v1089_v57 }
 0x70c   : > { %2361 = vpow2.f32 %v1090_v58 }
 0x719   : > { %v2362_v59 = vpop.eup %2361 }
 0x71a   : > { %v1092_v60 = vsel %vm728_vm8, %v2362_v59, 0.0 }
 0x71b   : > { %1093 = vadd.xlane.f32.xlu1 %v1092_v60 }
 0x7a4   : > { %v1094_v63 = vpop.xlane.xlu1 %1093 }
 0x7a5   : > { %2363 = vrcp.f32 %v1094_v63 }
 0x7b2   : > { %v2364_v1 = vpop.eup %2363 }
 0x7b3   : > { %v1096_v2 = vmul.f32 %v2364_v1, %v2362_v59 }
 0x7b5   : > { %v1097_v3 = vsel %vm2564_vm7, %v1096_v2, 0.0 }
 0x7b6   : > { %v1098_v5 = vpack.c.bf16 %v1097_v3, %v1097_v3 }
 0x7b8   : > { %2227 = vmatmul.mubr.msk.bf16.vlgmr.msra.gmra.mxu0 %vm743_vm10, %v1098_v5 }
 0x7b9   : > { %2237 = vmatpush3.bf16.msra.mxu0 %v2343_v4  ;;  %2240 = vmatprep.mubr.msk.bf16.mxu0 %vm2397_vm1, %v2396_v9  ;;  %v2349_v4 = vld [vmem:[%s2810_s5 + $0x38] sm:$0xff]  }
 0x7ba   : > { %2238 = vmatprep.subr.bf16.mxu0 %v2396_v9 }
 0x7bd   : > { %2239 = vmatpush3.bf16.msra.mxu0 %v2344_v6  ;;  %v2350_v6 = vld [vmem:[%s2810_s5 + $0x30] sm:$0xff]  }
 0x7be   : > { %2252 = vmatprep.subr.bf16.mxu0 %v2396_v9 }
 0x7c0   : > { %2241 = vmatmul.mubr.msk.bf16.vlgmr.msra.gmra.mxu0 %vm507_vm2, %v2528_v22 }
 0x7c1   : > { %2253 = vmatpush3.bf16.msra.mxu0 %v2345_v7  ;;  %2256 = vmatprep.mubr.msk.bf16.mxu0 %vm2397_vm1, %v2396_v9  ;;  %v2351_v7 = vld [vmem:[%s2814_s9 + $0x38] sm:$0xff]  }
 0x7c2   : > { %2254 = vmatprep.subr.bf16.mxu0 %v2396_v9 }
 0x7c5   : > { %2255 = vmatpush3.bf16.msra.mxu0 %v2346_v8  ;;  %v2352_v8 = vld [vmem:[%s2814_s9 + $0x30] sm:$0xff]  }
 0x7c6   : > { %2266 = vmatprep.subr.bf16.mxu0 %v2396_v9 }
 0x7c8   : > { %2257 = vmatmul.mubr.msk.bf16.vlgmr.msra.gmra.mxu0 %vm507_vm2, %v2528_v22 }
 0x7c9   : > { %2268 = vmatprep.mubr.msk.bf16.mxu0 %vm2397_vm1, %v2396_v9 }
 0x878   : > { %v1140_v10 = vpop.f32.mrf.mxu0 }
 0x879   : > { %v1146_v12 = vpack.c.bf16 %v1140_v10, %v1140_v10 }
 0x87a   : > { %v2228_v13 = vpop.f32.mrf.mxu0 }
 0x87b   : > { %2233 = vmatmul.mubr.msk.bf16.vlgmr.msra.gmra.mxu1 %vm679_vm3, %v1146_v12 }
 0x87c   : > { %v1143_v14 = vpop.f32.mrf.mxu0  ;;  %2245 = vmatpush3.bf16.msra.mxu1 %v2347_v11  ;;  %2248 = vmatprep.mubr.msk.bf16.mxu1 %vm2397_vm1, %v2396_v9  ;;  %v2353_v11 = vld [vmem:[%s2812_s7 + $0x38] sm:$0xff]  }
 0x87d   : > { %2246 = vmatprep.subr.bf16.mxu1 %v2396_v9 }
 0x87e   : > { %v2229_v16 = vpop.f32.mrf.mxu0 }
 0x880   : > { %v1255_v17 = vpop.f32.mrf.mxu0  ;;  %2247 = vmatpush3.bf16.msra.mxu1 %v2348_v15  ;;  %v2354_v15 = vld [vmem:[%s2812_s7 + $0x30] sm:$0xff]  }
 0x881   : > { %2260 = vmatprep.subr.bf16.mxu1 %v2396_v9  ;;  %v1256_v46 = vadd.f32 %v2033_v0, %v1255_v17 }
 0x882   : > { %v2242_v18 = vpop.f32.mrf.mxu0 }
 0x883   : > { %2249 = vmatmul.mubr.msk.bf16.vlgmr.msra.gmra.mxu1 %vm507_vm2, %v2528_v22  ;;  %v1391_v47 = vpack.c.bf16 %v1256_v46, %v1256_v46 }
 0x884   : > { %v1258_v19 = vpop.f32.mrf.mxu0  ;;  %2262 = vmatprep.mubr.msk.bf16.mxu1 %vm2397_vm1, %v2396_v9 }
 0x886   : > { %v2243_v20 = vpop.f32.mrf.mxu0 }
 0x888   : > { %v1385_v23 = vpop.f32.mrf.mxu0 }
 0x889   : > { %v1386_v24 = vadd.f32 %v2051_v21, %v1385_v23  ;;  %v2082_v21 = vld [vmem:[%s2815_s10 + $0x3] ss:$0 sm:$0xff] }
 0x88a   : > { %v2258_v25 = vpop.f32.mrf.mxu0 }
 0x88b   : > { %v1454_v26 = vpack.c.bf16 %v1386_v24, %v1386_v24 }
 0x88c   : > { %v1388_v27 = vpop.f32.mrf.mxu0 }
 0x88d   : > { %v1459_v28 = vsel %vm747_vm4, %v1454_v26, 0 }
 0x88e   : > { %v2259_v29 = vpop.f32.mrf.mxu0  ;;  %2267 = vmatpush3.bf16.msra.mxu0 %v1459_v28 }
 0x88f   : > { %2278 = vmatprep.subr.bf16.mxu0 %v2396_v9 }
 0x93b   : > { %v1189_v34 = vpop.f32.mrf.mxu1 }
 0x93c   : > { %v2702_v35 = vadd.f32 %v1189_v34, %v840_v32 }
 0x93d   : > { %v2234_v36 = vpop.f32.mrf.mxu1 }
 0x93e   : > { %v2073_v36 = vld [vmem:[%s2813_s8 + $0x3] ss:$0 sm:$0xff] }
 0x93f   : > { %v1192_v37 = vpop.f32.mrf.mxu1 }
 0x941   : > { %v2235_v38 = vpop.f32.mrf.mxu1 }
 0x943   : > { %v1320_v40 = vpop.f32.mrf.mxu1 }
 0x944   : > { %v1321_v41 = vadd.f32 %v2042_v39, %v1320_v40 }
 0x945   : > { %v2250_v42 = vpop.f32.mrf.mxu1 }
 0x946   : > { %v1392_v43 = vpack.c.bf16 %v1321_v41, %v1321_v41  ;;  %v2064_v41 = vld [vmem:[%s2811_s6 + $0x3] ss:$0 sm:$0xff] }
 0x947   : > { %v1323_v44 = vpop.f32.mrf.mxu1 }
 0x948   : > { %v1397_v33 = vsel %vm679_vm3, %v1392_v43, 0 }
 0x949   : > { %v2251_v45 = vpop.f32.mrf.mxu1  ;;  %2261 = vmatpush3.bf16.xpose.msra.mxu1 %v1397_v33 }
 0x94a   : > { %2272 = vmatprep.subr.bf16.mxu1 %v2396_v9 }
 0x950   : > { %2263 = vmatmul.mubr.msk.bf16.vlgmr.msra.gmra.mxu1 %vm679_vm3, %v1391_v47 }
 0x951   : > { %2274 = vmatprep.mubr.msk.bf16.mxu1 %vm2397_vm1, %v2396_v9  ;;  %2273 = vmatpush3.bf16.msra.mxu1 %v1508_v62 }
 0x952   : > { %2286 = vmatprep.subr.bf16.mxu1 %v2396_v9 }
 0xa10   : > { %v1433_v48 = vpop.f32.mrf.mxu1 }
 0xa11   : > { %v1439_v49 = vmul.f32 0.35355338, %v1433_v48 }
 0xa12   : > { %v2264_v50 = vpop.f32.mrf.mxu1 }
 0xa13   : > { %v1440_v51 = vsel %vm2564_vm7, %v1439_v49, -3.4028235e+38 }
 0xa14   : > { %v1436_v53 = vpop.f32.mrf.mxu1  ;;  %v1441_v54 = vsel %vm728_vm8, %v1440_v51, -inf }
 0xa15   : > { %1442 = vmax.xlane.f32.xlu0 %v1441_v54 }
 0xa16   : > { %v2265_v55 = vpop.f32.mrf.mxu1 }
 0xa9e   : > { %v1443_v56 = vpop.xlane.xlu0 %1442 }
 0xa9f   : > { %v1444_v57 = vsub.f32 %v1440_v51, %v1443_v56 }
 0xaa1   : > { %v1445_v58 = vmul.f32 1.442695, %v1444_v57 }
 0xaa3   : > { %2365 = vpow2.f32 %v1445_v58 }
 0xab0   : > { %v2366_v59 = vpop.eup %2365 }
 0xab1   : > { %v1447_v60 = vsel %vm728_vm8, %v2366_v59, 0.0 }
 0xab2   : > { %1448 = vadd.xlane.f32.xlu1 %v1447_v60 }
 0xb3b   : > { %v1449_v63 = vpop.xlane.xlu1 %1448 }
 0xb3c   : > { %2367 = vrcp.f32 %v1449_v63 }
 0xb49   : > { %v2368_v1 = vpop.eup %2367 }
 0xb4a   : > { %v1451_v2 = vmul.f32 %v2368_v1, %v2366_v59 }
 0xb4c   : > { %v1452_v3 = vsel %vm2564_vm7, %v1451_v2, 0.0 }
 0xb4d   : > { %v1453_v5 = vpack.c.bf16 %v1452_v3, %v1452_v3 }
 0xb4f   : > { %2269 = vmatmul.mubr.msk.bf16.vlgmr.msra.gmra.mxu0 %vm743_vm10, %v1453_v5 }
 0xb50   : > { %2279 = vmatpush3.bf16.msra.mxu0 %v2349_v4  ;;  %2282 = vmatprep.mubr.msk.bf16.mxu0 %vm2397_vm1, %v2396_v9 }
 0xb51   : > { %2280 = vmatprep.subr.bf16.mxu0 %v2396_v9 }
 0xb54   : > { %2281 = vmatpush3.bf16.msra.mxu0 %v2350_v6 }
 0xb55   : > { %2294 = vmatprep.subr.bf16.mxu0 %v2396_v9 }
 0xb57   : > { %2283 = vmatmul.mubr.msk.bf16.vlgmr.msra.gmra.mxu0 %vm507_vm2, %v2528_v22 }
 0xb58   : > { %2295 = vmatpush3.bf16.msra.mxu0 %v2351_v7  ;;  %2298 = vmatprep.mubr.msk.bf16.mxu0 %vm2397_vm1, %v2396_v9 }
 0xb59   : > { %2296 = vmatprep.subr.bf16.mxu0 %v2396_v9 }
 0xb5c   : > { %2297 = vmatpush3.bf16.msra.mxu0 %v2352_v8 }
 0xb5d   : > { %2308 = vmatprep.subr.bf16.mxu0 %v2396_v9 }
 0xb5f   : > { %2299 = vmatmul.mubr.msk.bf16.vlgmr.msra.gmra.mxu0 %vm507_vm2, %v2528_v22 }
 0xb60   : > { %2310 = vmatprep.mubr.msk.bf16.mxu0 %vm2397_vm1, %v2396_v9 }
 0xc0f   : > { %v1495_v10 = vpop.f32.mrf.mxu0 }
 0xc10   : > { %v1501_v12 = vpack.c.bf16 %v1495_v10, %v1495_v10 }
 0xc11   : > { %v2270_v13 = vpop.f32.mrf.mxu0 }
 0xc12   : > { %2275 = vmatmul.mubr.msk.bf16.vlgmr.msra.gmra.mxu1 %vm679_vm3, %v1501_v12 }
 0xc13   : > { %v1498_v14 = vpop.f32.mrf.mxu0  ;;  %2287 = vmatpush3.bf16.msra.mxu1 %v2353_v11  ;;  %2290 = vmatprep.mubr.msk.bf16.mxu1 %vm2397_vm1, %v2396_v9 }
 0xc14   : > { %2288 = vmatprep.subr.bf16.mxu1 %v2396_v9 }
 0xc15   : > { %v2271_v16 = vpop.f32.mrf.mxu0 }
 0xc17   : > { %v1610_v17 = vpop.f32.mrf.mxu0  ;;  %2289 = vmatpush3.bf16.msra.mxu1 %v2354_v15 }
 0xc18   : > { %2302 = vmatprep.subr.bf16.mxu1 %v2396_v9 }
 0xc19   : > { %v2284_v18 = vpop.f32.mrf.mxu0 }
 0xc1a   : > { %2291 = vmatmul.mubr.msk.bf16.vlgmr.msra.gmra.mxu1 %vm507_vm2, %v2528_v22 }
 0xc1b   : > { %v1613_v19 = vpop.f32.mrf.mxu0  ;;  %2304 = vmatprep.mubr.msk.bf16.mxu1 %vm2397_vm1, %v2396_v9 }
 0xc1d   : > { %v2285_v20 = vpop.f32.mrf.mxu0 }
 0xc1f   : > { %v1740_v23 = vpop.f32.mrf.mxu0 }
 0xc20   : > { %v1741_v24 = vadd.f32 %v2082_v21, %v1740_v23 }
 0xc21   : > { %v2300_v25 = vpop.f32.mrf.mxu0 }
 0xc22   : > { %v1809_v26 = vpack.c.bf16 %v1741_v24, %v1741_v24 }
 0xc23   : > { %v1743_v27 = vpop.f32.mrf.mxu0 }
 0xc24   : > { %v1814_v28 = vsel %vm747_vm4, %v1809_v26, 0 }
 0xc25   : > { %v2301_v29 = vpop.f32.mrf.mxu0  ;;  %2309 = vmatpush3.bf16.msra.mxu0 %v1814_v28 }
 0xcd2   : > { %v1544_v30 = vpop.f32.mrf.mxu1 }
 0xcd3   : > { %v1550_v22 = vadd.f32 %v1544_v30, %v2702_v35  ;;  %v1611_v35 = vadd.f32 %v2064_v41, %v1610_v17 }
 0xcd4   : > { %v2276_v31 = vpop.f32.mrf.mxu1 }
 0xcd5   : > { %v1746_v44 = vpack.c.bf16 %v1611_v35, %v1611_v35 }
 0xcd6   : > { %v1547_v32 = vpop.f32.mrf.mxu1 }
 0xcd8   : > { %v2277_v34 = vpop.f32.mrf.mxu1 }
 0xcda   : > { %v1675_v37 = vpop.f32.mrf.mxu1 }
 0xcdb   : > { %v1676_v38 = vadd.f32 %v2073_v36, %v1675_v37 }
 0xcdc   : > { %v2292_v39 = vpop.f32.mrf.mxu1 }
 0xcdd   : > { %v1747_v40 = vpack.c.bf16 %v1676_v38, %v1676_v38 }
 0xcde   : > { %v1678_v42 = vpop.f32.mrf.mxu1 }
 0xcdf   : > { %v1752_v43 = vsel %vm679_vm3, %v1747_v40, 0 }
 0xce0   : > { %v2293_v0 = vpop.f32.mrf.mxu1  ;;  %2303 = vmatpush3.bf16.xpose.msra.mxu1 %v1752_v43 }
 0xce1   : > { %2314 = vmatprep.subr.bf16.mxu1 %v2396_v9 }
 0xce7   : > { %2305 = vmatmul.mubr.msk.bf16.vlgmr.msra.gmra.mxu1 %vm679_vm3, %v1746_v44 }
 0xce8   : > { %2316 = vmatprep.mubr.msk.bf16.mxu1 %vm2397_vm1, %v2396_v9  ;;  %v2088_v9 = vld [vmem:[%s2816_s11 + $0xc] sm:$0xf] }
 0xce9   : > { %v1863_v57 = vsel %vm796_vm9, %v2088_v9, 0 }
 0xcea   : > { %2315 = vmatpush3.bf16.msra.mxu1 %v1863_v57 }
 0xda7   : > { %v1788_v33 = vpop.f32.mrf.mxu1 }
 0xda8   : > { %v1794_v45 = vmul.f32 0.35355338, %v1788_v33 }
 0xda9   : > { %v2306_v46 = vpop.f32.mrf.mxu1 }
 0xdaa   : > { %v1795_v47 = vsel %vm2564_vm7, %v1794_v45, -3.4028235e+38 }
 0xdab   : > { %v1791_v48 = vpop.f32.mrf.mxu1  ;;  %v1796_v49 = vsel %vm728_vm8, %v1795_v47, -inf }
 0xdac   : > { %1797 = vmax.xlane.f32.xlu0 %v1796_v49 }
 0xdad   : > { %v2307_v50 = vpop.f32.mrf.mxu1 }
 0xe35   : > { %v1798_v51 = vpop.xlane.xlu0 %1797 }
 0xe36   : > { %v1799_v53 = vsub.f32 %v1795_v47, %v1798_v51 }
 0xe38   : > { %v1800_v54 = vmul.f32 1.442695, %v1799_v53 }
 0xe3a   : > { %2369 = vpow2.f32 %v1800_v54 }
 0xe47   : > { %v2370_v55 = vpop.eup %2369 }
 0xe48   : > { %v1802_v56 = vsel %vm728_vm8, %v2370_v55, 0.0 }
 0xe49   : > { %1803 = vadd.xlane.f32.xlu1 %v1802_v56 }
 0xed2   : > { %v1804_v58 = vpop.xlane.xlu1 %1803 }
 0xed3   : > { %2371 = vrcp.f32 %v1804_v58 }
 0xee0   : > { %v2372_v59 = vpop.eup %2371 }
 0xee1   : > { %v1806_v60 = vmul.f32 %v2372_v59, %v2370_v55 }
 0xee3   : > { %v1807_v61 = vsel %vm2564_vm7, %v1806_v60, 0.0 }
 0xee4   : > { %v1808_v62 = vpack.c.bf16 %v1807_v61, %v1807_v61 }
 0xee6   : > { %2311 = vmatmul.mubr.msk.bf16.vlgmr.msra.gmra.mxu0 %vm743_vm10, %v1808_v62 }
 0xfa6   : > { %v1850_v63 = vpop.f32.mrf.mxu0 }
 0xfa7   : > { %v1856_v1 = vpack.c.bf16 %v1850_v63, %v1850_v63 }
 0xfa8   : > { %v2312_v2 = vpop.f32.mrf.mxu0 }
 0xfa9   : > { %2317 = vmatmul.mubr.msk.bf16.vlgmr.msra.gmra.mxu1 %vm679_vm3, %v1856_v1 }
 0xfaa   : > { %v1853_v3 = vpop.f32.mrf.mxu0 }
 0xfac   : > { %v2313_v4 = vpop.f32.mrf.mxu0 }
0x1069   : > { %v1899_v5 = vpop.f32.mrf.mxu1 }
0x106a   : > { %v1905_v6 = vadd.f32 %v1899_v5, %v1550_v22 }
0x106b   : > { %v2318_v7 = vpop.f32.mrf.mxu1 }
0x106c   : > { %1906 = vst.msk [vmem:[%s432_s26] sm:$0x3f] %vm437_vm0, %v1905_v6 }
0x106d   : > { %v1902_v52 = vpop.f32.mrf.mxu1 }
0x106f   : > { %v2319_v8 = vpop.f32.mrf.mxu1 }
0x1070 PF: > { %s29_s29 = sadd.s32 1, %s2393_s29  }
0x1071   : > { %p26_p9 = scmp.ge.s32.totalorder %s29_s29, 4  }
0x1073   :  { %28 = sbr.rel (!%p26_p9) target bundleno = 16 (0x10), region = 122 }

// kernel: _e2e_device_forward.14
= control target key start
LH: loop header
LB: loop body
LE: loop exit
PB: predicated region body
PF: predicated region fallthrough
CT: control target
= control target key end

     0   :  { %vm181_vm0 = vcmask 261120   ;;  %vm289_vm1 = vcmask 254976   ;;  %s491_s1 = inlined_call_operand.vmem [shape: bf16[288,32], index: 1, kind: input, shape index: {}]   ;;  %s492_s0 = inlined_call_operand.vmem [shape: f32[18,288], index: 0, kind: input, shape index: {}]   ;;  %s493_s2 = inlined_call_operand.vmem [shape: f32[1,32], index: 2, kind: input, shape index: {}]   ;;  %s494_s3 = inlined_call_operand.vmem [shape: f32[18,32], index: 3, kind: output, shape index: {}]  }
   0x1   :  { %v356_v0 = vld [vmem:[%s491_s1 + $0x78] sm:$0xff]   ;;  %v358_v2 = vld [vmem:[%s491_s1 + $0x70] sm:$0xff]   ;;  %v360_v4 = vld [vmem:[%s491_s1 + $0x68] sm:$0xff]  }
   0x2   :  { %v357_v1 = vld [vmem:[%s491_s1 + $0x38] sm:$0xff]   ;;  %316 = vmatprep.subr.bf16.mxu0 %v356_v0  ;;  %v359_v3 = vld [vmem:[%s491_s1 + $0x30] sm:$0xff]   ;;  %v361_v5 = vld [vmem:[%s491_s1 + $0x28] sm:$0xff]  }
   0x3   :  { %317 = vmatpush3.bf16.msra.mxu0 %v357_v1  ;;  %v362_v6 = vld [vmem:[%s491_s1 + $0x60] sm:$0xff]   ;;  %v364_v8 = vld [vmem:[%s491_s1 + $0x58] sm:$0xff]   ;;  %v370_v9 = vld [vmem:[%s491_s1 + $0x88] sm:$0xff]  }
   0x4   :  { %318 = vmatprep.subr.bf16.mxu0 %v358_v2  ;;  %v363_v7 = vld [vmem:[%s491_s1 + $0x20] sm:$0xff]   ;;  %v365_v10 = vld [vmem:[%s491_s1 + $0x18] sm:$0xff]   ;;  %v366_v11 = vld [vmem:[%s491_s1 + $0x50] sm:$0xff]   ;;  %348 = vmatprep.subr.bf16.mxu1 %v370_v9 }
   0x5   :  { %349 = vmatpush3.bf16.msra.mxu1 %v370_v9  ;;  %v373_v12 = vld [vmem:[%s491_s1 + $0x80] sm:$0xff]   ;;  %v16_v13 = vld [vmem:[%s492_s0 + $0x8] sm:$0xff]  ;;  %v367_v15 = vld [vmem:[%s491_s1 + $0x10] sm:$0xff]  }
   0x6   :  { %v19_v14 = vld [vmem:[%s492_s0 + $0x20] sm:$0xff]  ;;  %350 = vmatprep.subr.bf16.mxu1 %v373_v12  ;;  %v17_v17 = vld [vmem:[%s492_s0 + $0x10] sm:$0xff]  ;;  %v20_v18 = vld [vmem:[%s492_s0 + $0x28] sm:$0xff] }
   0x7   :  { %319 = vmatpush3.bf16.msra.mxu0 %v359_v3  ;;  %v25_v16 = vpack.c.bf16 %v19_v14, %v16_v13  ;;  %v368_v19 = vld [vmem:[%s491_s1 + $0x48] sm:$0xff]   ;;  %v26_v20 = vpack.c.bf16 %v20_v18, %v17_v17  ;;  %v23_v21 = vld [vmem:[%s492_s0 + $0x40] sm:$0x3]  ;;  %v18_v27 = vld [vmem:[%s492_s0 + $0x18] sm:$0xff] }
   0x8   :  { %320 = vmatprep.subr.bf16.mxu0 %v360_v4  ;;  %v29_v22 = vpack.c.bf16 %v23_v21, %v23_v21  ;;  %v369_v23 = vld [vmem:[%s491_s1 + $0x8] sm:$0xff]   ;;  %v371_v24 = vld [vmem:[%s491_s1 + $0x40] sm:$0xff]   ;;  %v22_v28 = vld [vmem:[%s492_s0 + $0x38] sm:$0x3] }
   0x9   :  { %220 = vmatprep.mubr.bf16.mxu0 %v25_v16  ;;  %351 = vmatpush3.bf16.msra.mxu1 %v373_v12  ;;  %v372_v25 = vld [vmem:[%s491_s1] sm:$0xff]   ;;  %v28_v30 = vpack.c.bf16 %v22_v28, %v22_v28  ;;  %v21_v31 = vld [vmem:[%s492_s0 + $0x30] sm:$0x3] }
   0xa   :  { %352 = vmatprep.mubr.msk.bf16.mxu1 %vm181_vm0, %v26_v20  ;;  %v15_v26 = vld [vmem:[%s492_s0] sm:$0xff]  ;;  %v27_v32 = vpack.c.bf16 %v21_v31, %v21_v31 }
   0xb   :  { %321 = vmatpush3.bf16.msra.mxu0 %v361_v5  ;;  %v24_v29 = vpack.c.bf16 %v18_v27, %v15_v26  ;;  %v295_v38 = vld [vmem:[%s493_s2] ss:$0 sm:$0xff] }
   0xc   :  { %322 = vmatprep.subr.bf16.mxu0 %v362_v6  ;;  %353 = vmatmul.mubr.msk.bf16.vlgmr.msra.gmra.mxu1 %vm181_vm0, %v29_v22 }
   0xf   :  { %323 = vmatpush3.bf16.msra.mxu0 %v363_v7 }
  0x10   :  { %324 = vmatprep.subr.bf16.mxu0 %v364_v8 }
  0x13   :  { %325 = vmatpush3.bf16.msra.mxu0 %v365_v10 }
  0x14   :  { %326 = vmatprep.subr.bf16.mxu0 %v366_v11 }
  0x17   :  { %327 = vmatpush3.bf16.msra.mxu0 %v367_v15 }
  0x18   :  { %328 = vmatprep.subr.bf16.mxu0 %v368_v19 }
  0x1b   :  { %329 = vmatpush3.bf16.msra.mxu0 %v369_v23 }
  0x1c   :  { %330 = vmatprep.subr.bf16.mxu0 %v371_v24 }
  0x1f   :  { %331 = vmatpush3.bf16.msra.mxu0 %v372_v25 }
  0x22   :  { %221 = vmatmul.mubr.bf16.vlgmr.msra.gmra.mxu0 %v24_v29 }
  0x23   :  { %228 = vmatprep.mubr.bf16.mxu0 %v28_v30 }
  0x2a   :  { %229 = vmatmul.mubr.bf16.gmra.mxu0 %v27_v32 }
  0xcc   :  { %v354_v33 = vpop.f32.mrf.mxu1 }
  0xce   :  { %v270_v34 = vpop.f32.mrf.mxu1 }
  0xd0   :  { %v355_v35 = vpop.f32.mrf.mxu1 }
  0xd2   :  { %v273_v48 = vpop.f32.mrf.mxu1 }
  0xe2   :  { %v332_v36 = vpop.f32.mrf.mxu0 }
  0xe4   :  { %v333_v37 = vpop.f32.mrf.mxu0 }
  0xe5   :  { %v334_v39 = vadd.f32 %v333_v37, %v332_v36 }
  0xe6   :  { %v335_v40 = vpop.f32.mrf.mxu0 }
  0xe7   :  { %v223_v41 = vadd.f32 %v334_v39, %v295_v38 }
  0xe8   :  { %v336_v42 = vpop.f32.mrf.mxu0 }
  0xe9   :  { %v271_v43 = vadd.f32 %v270_v34, %v223_v41  ;;  %v337_v44 = vadd.f32 %v336_v42, %v335_v40 }
  0xea   :  { %v338_v45 = vpop.f32.mrf.mxu0 }
  0xeb   :  { %v284_v46 = vmax.f32 %v271_v43, 0.0  ;;  %v226_v47 = vadd.f32 %v337_v44, %v295_v38 }
  0xec   :  { %v339_v49 = vpop.f32.mrf.mxu0 }
  0xed   :  { %287 = vst.msk [vmem:[%s494_s3] sm:$0xff] %vm181_vm0, %v284_v46  ;;  %v274_v50 = vadd.f32 %v273_v48, %v226_v47  ;;  %v340_v51 = vadd.f32 %v339_v49, %v338_v45 }
  0xee   :  { %v341_v52 = vpop.f32.mrf.mxu0 }
  0xef   :  { %v285_v53 = vmax.f32 %v274_v50, 0.0  ;;  %v231_v54 = vadd.f32 %v340_v51, %v295_v38 }
  0xf0   :  { %v342_v55 = vpop.f32.mrf.mxu0 }
  0xf1   :  { %288 = vst.msk [vmem:[%s494_s3 + $0x8] sm:$0xff] %vm181_vm0, %v285_v53  ;;  %v279_v56 = vadd.f32 %v354_v33, %v231_v54 }
  0xf3   :  { %v286_v57 = vmax.f32 %v279_v56, 0.0 }
  0xf5   :  { %290 = vst.msk [vmem:[%s494_s3 + $0x10] sm:$0x3] %vm289_vm1, %v286_v57 }

// kernel: _e2e_device_forward.15
= control target key start
LH: loop header
LB: loop body
LE: loop exit
PB: predicated region body
PF: predicated region fallthrough
CT: control target
= control target key end

     0   :  { %v161_v0 = vmov 0.0   ;;  %vm162_vm0 = vmmov 0   ;;  %vm72_vm1 = vcmask 785408   ;;  %vm116_vm2 = vcmask 259072   ;;  %s210_s1 = inlined_call_operand.vmem [shape: bf16[96,32], index: 1, kind: input, shape index: {}]   ;;  %s211_s0 = inlined_call_operand.vmem [shape: f32[6,96], index: 0, kind: input, shape index: {}]   ;;  %s212_s2 = inlined_call_operand.vmem [shape: f32[1,32], index: 2, kind: input, shape index: {}]   ;;  %s213_s3 = inlined_call_operand.vmem [shape: f32[6,32], index: 3, kind: output, shape index: {}]  }
   0x1   :  { %137 = vmatprep.subr.bf16.mxu0 %v161_v0  ;;  %v155_v1 = vld [vmem:[%s210_s1 + $0x28] sm:$0xff]   ;;  %149 = vmatprep.mubr.msk.bf16.mxu0 %vm162_vm0, %v161_v0  ;;  %v156_v2 = vld [vmem:[%s210_s1 + $0x20] sm:$0xff]   ;;  %v157_v3 = vld [vmem:[%s210_s1 + $0x18] sm:$0xff]  }
   0x2   :  { %138 = vmatpush3.bf16.msra.mxu0 %v155_v1  ;;  %v158_v4 = vld [vmem:[%s210_s1 + $0x10] sm:$0xff]   ;;  %v159_v5 = vld [vmem:[%s210_s1 + $0x8] sm:$0xff]   ;;  %v160_v6 = vld [vmem:[%s210_s1] sm:$0xff]  }
   0x3   :  { %139 = vmatprep.subr.bf16.mxu0 %v161_v0  ;;  %v15_v7 = vld [vmem:[%s211_s0] sm:$0x3f] }
   0x4   :  { %v16_v8 = vpack.c.bf16 %v15_v7, %v15_v7  ;;  %v122_v9 = vld [vmem:[%s212_s2] ss:$0 sm:$0xff] }
   0x6   :  { %140 = vmatpush3.bf16.msra.mxu0 %v156_v2 }
   0x7   :  { %141 = vmatprep.subr.bf16.mxu0 %v161_v0 }
   0xa   :  { %142 = vmatpush3.bf16.msra.mxu0 %v157_v3 }
   0xb   :  { %143 = vmatprep.subr.bf16.mxu0 %v161_v0 }
   0xe   :  { %144 = vmatpush3.bf16.msra.mxu0 %v158_v4 }
   0xf   :  { %145 = vmatprep.subr.bf16.mxu0 %v161_v0 }
  0x12   :  { %146 = vmatpush3.bf16.msra.mxu0 %v159_v5 }
  0x13   :  { %147 = vmatprep.subr.bf16.mxu0 %v161_v0 }
  0x16   :  { %148 = vmatpush3.bf16.msra.mxu0 %v160_v6 }
  0x19   :  { %150 = vmatmul.mubr.msk.bf16.vlgmr.msra.gmra.mxu0 %vm72_vm1, %v16_v8 }
  0xd9   :  { %v110_v10 = vpop.f32.mrf.mxu0 }
  0xda   :  { %v111_v11 = vadd.f32 %v122_v9, %v110_v10 }
  0xdb   :  { %v151_v12 = vpop.f32.mrf.mxu0 }
  0xdc   :  { %117 = vst.msk [vmem:[%s213_s3] sm:$0x3f] %vm116_vm2, %v111_v11 }
  0xdd   :  { %v113_v13 = vpop.f32.mrf.mxu0 }
  0xdf   :  { %v152_v14 = vpop.f32.mrf.mxu0 }

// kernel: _e2e_device_forward.17
= control target key start
LH: loop header
LB: loop body
LE: loop exit
PB: predicated region body
PF: predicated region fallthrough
CT: control target
= control target key end

     0   :  { %vm30_vm0 = vcmask 259072   ;;  %v255_v7 = vmov 0.0   ;;  %vm256_vm1 = vmmov 0   ;;  %vm83_vm2 = vcmask 261120   ;;  %s333_s0 = inlined_call_operand.vmem [shape: f32[6,32], index: 0, kind: input, shape index: {}]   ;;  %s334_s3 = inlined_call_operand.vmem [shape: bf16[32,48], index: 3, kind: input, shape index: {}]   ;;  %s335_s5 = inlined_call_operand.vmem [shape: bf16[48,32], index: 5, kind: input, shape index: {}]   ;;  %s336_s1 = inlined_call_operand.vmem [shape: f32[1,32], index: 1, kind: input, shape index: {}]   ;;  %s337_s2 = inlined_call_operand.vmem [shape: f32[1,32], index: 2, kind: input, shape index: {}]   ;;  %s338_s4 = inlined_call_operand.vmem [shape: f32[1,48], index: 4, kind: input, shape index: {}]   ;;  %s339_s6 = inlined_call_operand.vmem [shape: f32[1,32], index: 6, kind: input, shape index: {}]   ;;  %s340_s7 = inlined_call_operand.vmem [shape: f32[6,32], index: 7, kind: output, shape index: {}]  }
   0x1   :  { %v27_v0 = vld [vmem:[%s333_s0] sm:$0x3f]  ;;  %228 = vmatprep.subr.bf16.mxu0 %v255_v7  ;;  %v248_v8 = vld [vmem:[%s334_s3 + $0x8] sm:$0xff]   ;;  %232 = vmatprep.mubr.msk.bf16.mxu0 %vm256_vm1, %v255_v7  ;;  %v250_v10 = vld [vmem:[%s335_s5 + $0x10] sm:$0xff]   ;;  %vm160_vm3 = vcmask 392192  }
   0x2   :  { %v31_v1 = vsel %vm30_vm0, %v27_v0, 0.0  ;;  %236 = vmatprep.subr.bf16.mxu1 %v255_v7  ;;  %242 = vmatprep.mubr.msk.bf16.mxu1 %vm256_vm1, %v255_v7  ;;  %v249_v9 = vld [vmem:[%s334_s3] sm:$0xff]   ;;  %v251_v21 = vld [vmem:[%s335_s5 + $0x8] sm:$0xff]  }
   0x3   :  { %32 = vadd.xlane.f32.xlu0 %v31_v1  ;;  %229 = vmatpush3.bf16.msra.mxu0 %v248_v8  ;;  %v210_v15 = vld [vmem:[%s336_s1] ss:$0 sm:$0xff] }
   0x4   :  { %230 = vmatprep.subr.bf16.mxu0 %v255_v7  ;;  %237 = vmatpush3.bf16.msra.mxu1 %v250_v10  ;;  %v211_v17 = vld [vmem:[%s337_s2] ss:$0 sm:$0xff] }
   0x5   :  { %238 = vmatprep.subr.bf16.mxu1 %v255_v7  ;;  %v252_v22 = vld [vmem:[%s335_s5] sm:$0xff]  }
   0x6   :  { %v212_v23 = vld [vmem:[%s338_s4] ss:$0 sm:$0xff] }
   0x7   :  { %231 = vmatpush3.bf16.msra.mxu0 %v249_v9  ;;  %v216_v31 = vld [vmem:[%s339_s6] ss:$0 sm:$0xff] }
   0x8   :  { %239 = vmatpush3.bf16.msra.mxu1 %v251_v21 }
   0x9   :  { %240 = vmatprep.subr.bf16.mxu1 %v255_v7 }
   0xc   :  { %241 = vmatpush3.bf16.msra.mxu1 %v252_v22 }
  0x8c   :  { %v33_v2 = vpop.xlane.xlu0 %32 }
  0x8d   :  { %v35_v3 = vmul.f32 0.03125, %v33_v2 }
  0x8f   :  { %v36_v4 = vsub.f32 %v27_v0, %v35_v3 }
  0x91   :  { %v37_v5 = vmul.f32 %v36_v4, %v36_v4 }
  0x93   :  { %v38_v6 = vsel %vm30_vm0, %v37_v5, 0.0 }
  0x94   :  { %39 = vadd.xlane.f32.xlu0 %v38_v6 }
 0x11d   :  { %v40_v11 = vpop.xlane.xlu0 %39 }
 0x11e   :  { %v41_v12 = vmul.f32 0.03125, %v40_v11 }
 0x120   :  { %v42_v13 = vadd.f32 1e-12, %v41_v12 }
 0x122   :  { %253 = vrsqrt.f32 %v42_v13 }
 0x12f   :  { %v254_v14 = vpop.eup %253 }
 0x130   :  { %v44_v16 = vmul.f32 %v254_v14, %v36_v4 }
 0x132   :  { %v51_v18 = vmul.f32 %v210_v15, %v44_v16 }
 0x134   :  { %v58_v19 = vadd.f32 %v211_v17, %v51_v18 }
 0x136   :  { %v59_v20 = vpack.c.bf16 %v58_v19, %v58_v19 }
 0x138   :  { %233 = vmatmul.mubr.msk.bf16.vlgmr.msra.gmra.mxu0 %vm83_vm2, %v59_v20 }
 0x1f8   :  { %v121_v24 = vpop.f32.mrf.mxu0 }
 0x1f9   :  { %v122_v25 = vadd.f32 %v212_v23, %v121_v24 }
 0x1fa   :  { %v234_v26 = vpop.f32.mrf.mxu0 }
 0x1fb   :  { %v127_v27 = vmax.f32 %v122_v25, 0.0 }
 0x1fc   :  { %v124_v28 = vpop.f32.mrf.mxu0 }
 0x1fd   :  { %v128_v29 = vpack.c.bf16 %v127_v27, %v127_v27 }
 0x1fe   :  { %v235_v30 = vpop.f32.mrf.mxu0 }
 0x1ff   :  { %243 = vmatmul.mubr.msk.bf16.vlgmr.msra.gmra.mxu1 %vm160_vm3, %v128_v29 }
 0x2bf   :  { %v198_v32 = vpop.f32.mrf.mxu1 }
 0x2c0   :  { %v199_v33 = vadd.f32 %v216_v31, %v198_v32 }
 0x2c1   :  { %v244_v34 = vpop.f32.mrf.mxu1 }
 0x2c2   :  { %v204_v35 = vadd.f32 %v199_v33, %v27_v0 }
 0x2c3   :  { %v201_v36 = vpop.f32.mrf.mxu1 }
 0x2c4   :  { %205 = vst.msk [vmem:[%s340_s7] sm:$0x3f] %vm30_vm0, %v204_v35 }
 0x2c5   :  { %v245_v37 = vpop.f32.mrf.mxu1 }

// kernel: _e2e_device_forward.20
= control target key start
LH: loop header
LB: loop body
LE: loop exit
PB: predicated region body
PF: predicated region fallthrough
CT: control target
= control target key end

     0   :  { %vm17_vm0 = vcmask 259072   ;;  %s90_s0 = inlined_call_operand.vmem [shape: f32[6,32], index: 0, kind: input, shape index: {}]   ;;  %s91_s1 = inlined_call_operand.vmem [shape: f32[1,32], index: 1, kind: input, shape index: {}]   ;;  %s92_s2 = inlined_call_operand.vmem [shape: f32[1,32], index: 2, kind: input, shape index: {}]   ;;  %s93_s3 = inlined_call_operand.vmem [shape: f32[6,32], index: 3, kind: output, shape index: {}]  }
   0x1   :  { %v14_v0 = vld [vmem:[%s90_s0] sm:$0x3f] }
   0x2   :  { %v18_v1 = vsel %vm17_vm0, %v14_v0, 0.0  ;;  %v51_v11 = vld [vmem:[%s91_s1] ss:$0 sm:$0xff] }
   0x3   :  { %19 = vadd.xlane.f32.xlu0 %v18_v1  ;;  %v52_v13 = vld [vmem:[%s92_s2] ss:$0 sm:$0xff] }
  0x8c   :  { %v20_v2 = vpop.xlane.xlu0 %19 }
  0x8d   :  { %v22_v3 = vmul.f32 0.03125, %v20_v2 }
  0x8f   :  { %v23_v4 = vsub.f32 %v14_v0, %v22_v3 }
  0x91   :  { %v24_v5 = vmul.f32 %v23_v4, %v23_v4 }
  0x93   :  { %v25_v6 = vsel %vm17_vm0, %v24_v5, 0.0 }
  0x94   :  { %26 = vadd.xlane.f32.xlu0 %v25_v6 }
 0x11d   :  { %v27_v7 = vpop.xlane.xlu0 %26 }
 0x11e   :  { %v28_v8 = vmul.f32 0.03125, %v27_v7 }
 0x120   :  { %v29_v9 = vadd.f32 1e-12, %v28_v8 }
 0x122   :  { %53 = vrsqrt.f32 %v29_v9 }
 0x12f   :  { %v54_v10 = vpop.eup %53 }
 0x130   :  { %v31_v12 = vmul.f32 %v54_v10, %v23_v4 }
 0x132   :  { %v38_v14 = vmul.f32 %v51_v11, %v31_v12 }
 0x134   :  { %v45_v15 = vadd.f32 %v52_v13, %v38_v14 }
 0x136   :  { %46 = vst.msk [vmem:[%s93_s3] sm:$0x3f] %vm17_vm0, %v45_v15 }

// kernel: _e2e_device_forward.23
= control target key start
LH: loop header
LB: loop body
LE: loop exit
PB: predicated region body
PF: predicated region fallthrough
CT: control target
= control target key end

     0   :  { %vm31_vm0 = vcmask 261120   ;;  %vm35_vm1 = vcmask 257024   ;;  %v278_v14 = vmov 0.0   ;;  %vm279_vm2 = vmmov 0   ;;  %s376_s0 = inlined_call_operand.vmem [shape: f32[12,32], index: 0, kind: input, shape index: {}]   ;;  %s377_s3 = inlined_call_operand.vmem [shape: bf16[32,48], index: 3, kind: input, shape index: {}]   ;;  %s378_s1 = inlined_call_operand.vmem [shape: f32[1,32], index: 1, kind: input, shape index: {}]   ;;  %s379_s2 = inlined_call_operand.vmem [shape: f32[1,32], index: 2, kind: input, shape index: {}]   ;;  %s380_s5 = inlined_call_operand.vmem [shape: bf16[48,32], index: 5, kind: input, shape index: {}]   ;;  %s381_s4 = inlined_call_operand.vmem [shape: f32[1,48], index: 4, kind: input, shape index: {}]   ;;  %s382_s6 = inlined_call_operand.vmem [shape: f32[1,32], index: 6, kind: input, shape index: {}]   ;;  %s383_s7 = inlined_call_operand.vmem [shape: f32[12,32], index: 7, kind: output, shape index: {}]  }
   0x1   :  { %v323_v0 = vld [vmem:[%s376_s0] sm:$0xff]  ;;  %v328_v1 = vld [vmem:[%s376_s0 + $0x8] sm:$0xf]  ;;  %249 = vmatprep.subr.bf16.mxu0 %v278_v14  ;;  %253 = vmatprep.mubr.msk.bf16.mxu0 %vm279_vm2, %v278_v14  ;;  %v271_v34 = vld [vmem:[%s380_s5 + $0x10] sm:$0xff]   ;;  %vm178_vm3 = vcmask 392192  }
   0x2   :  { %v32_v2 = vsel %vm31_vm0, %v323_v0, 0.0  ;;  %v36_v3 = vsel %vm35_vm1, %v328_v1, 0.0  ;;  %v269_v15 = vld [vmem:[%s377_s3 + $0x8] sm:$0xff]   ;;  %257 = vmatprep.subr.bf16.mxu1 %v278_v14  ;;  %263 = vmatprep.mubr.msk.bf16.mxu1 %vm279_vm2, %v278_v14  ;;  %v270_v16 = vld [vmem:[%s377_s3] sm:$0xff]  }
   0x3   :  { %33 = vadd.xlane.f32.xlu0 %v32_v2  ;;  %250 = vmatpush3.bf16.msra.mxu0 %v269_v15  ;;  %v231_v25 = vld [vmem:[%s378_s1] ss:$0 sm:$0xff]  ;;  %v272_v35 = vld [vmem:[%s380_s5 + $0x8] sm:$0xff]  }
   0x4   :  { %251 = vmatprep.subr.bf16.mxu0 %v278_v14  ;;  %v232_v29 = vld [vmem:[%s379_s2] ss:$0 sm:$0xff]  ;;  %258 = vmatpush3.bf16.msra.mxu1 %v271_v34 }
   0x5   :  { %259 = vmatprep.subr.bf16.mxu1 %v278_v14  ;;  %v273_v36 = vld [vmem:[%s380_s5] sm:$0xff]  }
   0x6   :  { %v233_v37 = vld [vmem:[%s381_s4] ss:$0 sm:$0xff] }
   0x7   :  { %37 = vadd.xlane.f32.xlu0 %v36_v3  ;;  %252 = vmatpush3.bf16.msra.mxu0 %v270_v16  ;;  %v237_v47 = vld [vmem:[%s382_s6] ss:$0 sm:$0xff] }
   0x8   :  { %260 = vmatpush3.bf16.msra.mxu1 %v272_v35 }
   0x9   :  { %261 = vmatprep.subr.bf16.mxu1 %v278_v14 }
   0xc   :  { %262 = vmatpush3.bf16.msra.mxu1 %v273_v36 }
  0x8c   :  { %v34_v4 = vpop.xlane.xlu0 %33 }
  0x8d   :  { %v40_v5 = vmul.f32 0.03125, %v34_v4 }
  0x8f   :  { %v42_v6 = vsub.f32 %v323_v0, %v40_v5 }
  0x90   :  { %v38_v7 = vpop.xlane.xlu0 %37 }
  0x91   :  { %v41_v8 = vmul.f32 0.03125, %v38_v7  ;;  %v44_v9 = vmul.f32 %v42_v6, %v42_v6 }
  0x93   :  { %v43_v10 = vsub.f32 %v328_v1, %v41_v8  ;;  %v46_v11 = vsel %vm31_vm0, %v44_v9, 0.0 }
  0x94   :  { %47 = vadd.xlane.f32.xlu1 %v46_v11 }
  0x95   :  { %v45_v12 = vmul.f32 %v43_v10, %v43_v10 }
  0x97   :  { %v49_v13 = vsel %vm35_vm1, %v45_v12, 0.0 }
  0x98   :  { %50 = vadd.xlane.f32.xlu1 %v49_v13 }
 0x11d   :  { %v48_v17 = vpop.xlane.xlu1 %47 }
 0x11e   :  { %v52_v18 = vmul.f32 0.03125, %v48_v17 }
 0x120   :  { %v54_v19 = vadd.f32 1e-12, %v52_v18 }
 0x121   :  { %v51_v20 = vpop.xlane.xlu1 %50 }
 0x122   :  { %274 = vrsqrt.f32 %v54_v19  ;;  %v53_v21 = vmul.f32 0.03125, %v51_v20 }
 0x124   :  { %v55_v22 = vadd.f32 1e-12, %v53_v21 }
 0x126   :  { %276 = vrsqrt.f32 %v55_v22 }
 0x12f   :  { %v275_v23 = vpop.eup %274 }
 0x130   :  { %v58_v24 = vmul.f32 %v275_v23, %v42_v6 }
 0x132   :  { %v66_v28 = vmul.f32 %v231_v25, %v58_v24 }
 0x133   :  { %v277_v26 = vpop.eup %276 }
 0x134   :  { %v59_v27 = vmul.f32 %v277_v26, %v43_v10  ;;  %v74_v31 = vadd.f32 %v232_v29, %v66_v28 }
 0x136   :  { %v67_v30 = vmul.f32 %v231_v25, %v59_v27 }
 0x138   :  { %v75_v32 = vadd.f32 %v232_v29, %v67_v30 }
 0x13a   :  { %v76_v33 = vpack.c.bf16 %v75_v32, %v74_v31 }
 0x13c   :  { %254 = vmatmul.mubr.msk.bf16.vlgmr.msra.gmra.mxu0 %vm31_vm0, %v76_v33 }
 0x1fc   :  { %v137_v38 = vpop.f32.mrf.mxu0 }
 0x1fd   :  { %v138_v40 = vadd.f32 %v233_v37, %v137_v38 }
 0x1fe   :  { %v255_v39 = vpop.f32.mrf.mxu0 }
 0x1ff   :  { %v144_v44 = vmax.f32 %v138_v40, 0.0 }
 0x200   :  { %v140_v41 = vpop.f32.mrf.mxu0 }
 0x201   :  { %v141_v42 = vadd.f32 %v233_v37, %v140_v41 }
 0x202   :  { %v256_v43 = vpop.f32.mrf.mxu0 }
 0x203   :  { %v145_v45 = vmax.f32 %v141_v42, 0.0 }
 0x205   :  { %v146_v46 = vpack.c.bf16 %v145_v45, %v144_v44 }
 0x207   :  { %264 = vmatmul.mubr.msk.bf16.vlgmr.msra.gmra.mxu1 %vm178_vm3, %v146_v46 }
 0x2c7   :  { %v216_v48 = vpop.f32.mrf.mxu1 }
 0x2c8   :  { %v217_v49 = vadd.f32 %v237_v47, %v216_v48 }
 0x2c9   :  { %v265_v50 = vpop.f32.mrf.mxu1 }
 0x2ca   :  { %v223_v51 = vadd.f32 %v217_v49, %v323_v0 }
 0x2cb   :  { %v219_v52 = vpop.f32.mrf.mxu1 }
 0x2cc   :  { %225 = vst.msk [vmem:[%s383_s7] sm:$0xff] %vm31_vm0, %v223_v51  ;;  %v220_v53 = vadd.f32 %v237_v47, %v219_v52 }
 0x2cd   :  { %v266_v54 = vpop.f32.mrf.mxu1 }
 0x2ce   :  { %v224_v55 = vadd.f32 %v220_v53, %v328_v1 }
 0x2d0   :  { %226 = vst.msk [vmem:[%s383_s7 + $0x8] sm:$0xf] %vm35_vm1, %v224_v55 }

// kernel: _e2e_device_forward.16
= control target key start
LH: loop header
LB: loop body
LE: loop exit
PB: predicated region body
PF: predicated region fallthrough
CT: control target
= control target key end

     0   :  { %s2808_s0 = inlined_call_operand.vmem [shape: s32[2], index: 0, kind: input, shape index: {}]   ;;  %s2809_s1 = inlined_call_operand.vmem [shape: f32[2,3,32], index: 1, kind: input, shape index: {}, may-alias: {1,2}]   ;;  %s2810_s2 = inlined_call_operand.vmem [shape: f32[2,3,32], index: 2, kind: input, shape index: {}, may-alias: {1,2}]   ;;  %s2811_s3 = inlined_call_operand.vmem [shape: f32[1,32], index: 3, kind: input, shape index: {}]   ;;  %s2812_s4 = inlined_call_operand.vmem [shape: f32[1,32], index: 4, kind: input, shape index: {}]   ;;  %s2813_s5 = inlined_call_operand.vmem [shape: bf16[4,32,8], index: 5, kind: input, shape index: {}]   ;;  %s2814_s6 = inlined_call_operand.vmem [shape: f32[4,1,8], index: 6, kind: input, shape index: {}]   ;;  %s2815_s7 = inlined_call_operand.vmem [shape: bf16[4,32,8], index: 7, kind: input, shape index: {}]   ;;  %s2816_s8 = inlined_call_operand.vmem [shape: f32[4,1,8], index: 8, kind: input, shape index: {}]   ;;  %s2817_s9 = inlined_call_operand.vmem [shape: bf16[4,32,8], index: 9, kind: input, shape index: {}]   ;;  %s2818_s10 = inlined_call_operand.vmem [shape: f32[4,1,8], index: 10, kind: input, shape index: {}]   ;;  %s2819_s11 = inlined_call_operand.vmem [shape: bf16[4,8,32], index: 11, kind: input, shape index: {}]   ;;  %s2820_s12 = inlined_call_operand.vmem [shape: f32[1,32], index: 12, kind: input, shape index: {}]   ;;  %s2821_s13 = inlined_call_operand.vmem [shape: f32[2,3,32], index: 13, kind: output, shape index: {}]  }
   0x1   :  { %s18_s26 = sshll.u32 %s2808_s0, 4  ;;  %s19_s26 = int_to_ptr.vmem [resolvable:$true] %s18_s26 }
   0x2   :  { %s2373_s27 = scalar_lea.vmem %s19_s26, 16  ;;  %p2378_p1 = scmp.lt.s32.totalorder %s19_s26, %s19_s26 }
   0x3   :  { %p2374_p0 = scmp.ne.s32.totalorder %s19_s26, %s2373_s27  ;;  %p2379_p2 = scmp.lt.s32.totalorder %s2373_s27, %s2373_s27 }
   0x5   :  { %p2380_p3 = por %p2379_p2, %p2378_p1 }
   0x7   :  { %p2381_p4 = pnand %p2380_p3, %p2374_p0 }
   0x9   :  { %2384 = shalt.err (!%p2381_p4)  }
   0xa   :  { %s2395_s28 = smov [#allocation3]  }
   0xb   :  { %21 = dma.vmem_to_smem %s19_s26, 16, %s2395_s28, [#allocation2] }
   0xc   :  { %2389 = dma.done.wait [#allocation2], 16 }
   0xd   :  { %2390 = vsyncadd [#allocation2], 4294967280 }
   0xe   :  { %23 = sfence }
   0xf   :  { %s2472_s29 = smov 0  }
  0x10 LB: > { %s2478_s0 = sadd.s32 4294967295, %s2393_s29   ;;  %p1975_p5 = scmp.ge.s32.totalorder %s2393_s29, 1  ;;  %s2393_s29 = sphi %s2472_s29, %s29_s29  }
  0x11   : > { %p377_p6 = scmp.lt.s32.totalorder %s2393_s29, 3 }
  0x13   : > { %p378_p7 = pnand %p1975_p5, %p377_p6 }
  0x14   : > { %p421_p8 = scmp.lt.s32.totalorder (!%p378_p7), %s2478_s0, 1  ;;  %s467_s24 = sld [smem:[#allocation3 + %s2478_s0]] (!%p378_p7) }
  0x15   : > { %381 = sbr.rel (%p378_p7) target bundleno = 4208 (0x1070), region = 68 }
  0x1a   : > { %s2484_s30 = scalar_select %p421_p8, %s2478_s0, 1  ;;  %vm437_vm0 = vcmask 256000   ;;  %v2331_v7 = vld [vmem:[%s2813_s5 + $0x8] sm:$0xff]   ;;  %v2396_v9 = vmov 0.0   ;;  %v2333_v10 = vld [vmem:[%s2813_s5] sm:$0xff]   ;;  %vm2397_vm1 = vmmov 0   ;;  %v468_v50 = vlaneseq }
  0x1b   : > { %v2332_v8 = vld [vmem:[%s2815_s7 + $0x8] sm:$0xff]   ;;  %2151 = vmatprep.subr.bf16.mxu0 %v2396_v9  ;;  %2159 = vmatprep.subr.bf16.mxu1 %v2396_v9  ;;  %v2334_v11 = vld [vmem:[%s2815_s7] sm:$0xff]   ;;  %vm503_vm2 = vcmask 261120   ;;  %vm675_vm3 = vcmask 64512   ;;  %vm743_vm4 = vcmask 1040384   ;;  %vm744_vm5 = vcmask 1041408  }
  0x1c   : > { %s1976_s14 = sshll.u32 %s2484_s30, 2  ;;  %2152 = vmatpush3.bf16.msra.mxu0 %v2331_v7  ;;  %2160 = vmatpush3.bf16.msra.mxu1 %v2332_v8  ;;  %v1978_v16 = vld [vmem:[%s2811_s3] ss:$0 sm:$0xff]  ;;  %v2335_v21 = vld [vmem:[%s2817_s9 + $0x8] sm:$0xff]   ;;  %v2398_v39 = vmov 65535   ;;  %v469_v51 = vand.u32 127, %v468_v50  ;;  %v470_v52 = vstv %s467_s24 }
  0x1d   : > { %s424_s16 = scalar_lea.vmem %s2809_s1, %s1976_s14  ;;  %2153 = vmatprep.subr.bf16.mxu0 %v2396_v9  ;;  %2161 = vmatprep.subr.bf16.mxu1 %v2396_v9  ;;  %v1979_v18 = vld [vmem:[%s2812_s4] ss:$0 sm:$0xff]  ;;  %v745_v40 = vsel %vm743_vm4, 4294967295, %v2398_v39  ;;  %vm724_vm7 = vcmask 18432   ;;  %vm795_vm8 = vcmask 1043456   ;;  %vm739_vm9 = vcmask 23552   ;;  %s432_s26 = scalar_lea.vmem %s2821_s13, %s1976_s14 }
  0x1e   : > { %v2492_v0 = vld [vmem:[%s424_s16] sm:$0x7]  ;;  %2155 = vmatprep.mubr.msk.bf16.mxu0 %vm2397_vm1, %v2396_v9  ;;  %2163 = vmatprep.mubr.msk.bf16.mxu1 %vm2397_vm1, %v2396_v9  ;;  %v2559_v43 = vsel %vm744_vm5, %v745_v40, 0  ;;  %vm2567_vm6 = vcmp.lt.s32.totalorder %v469_v51, %v470_v52 }
  0x1f   : > { %v438_v1 = vsel %vm437_vm0, %v2492_v0, 0.0  ;;  %v2336_v23 = vld [vmem:[%s2817_s9] sm:$0xff]  }
  0x20   : > { %439 = vadd.xlane.f32.xlu0 %v438_v1  ;;  %2154 = vmatpush3.bf16.msra.mxu0 %v2333_v10  ;;  %v1985_v24 = vld [vmem:[%s2816_s8] ss:$0 sm:$0xff]  ;;  %v2337_v10 = vld [vmem:[%s2813_s5 + $0x18] sm:$0xff]   ;;  %v2010_v39 = vld [vmem:[%s2816_s8 + $0x1] ss:$0 sm:$0xff] }
  0x21   : > { %2162 = vmatpush3.bf16.msra.mxu1 %v2334_v11  ;;  %2167 = vmatprep.subr.bf16.mxu0 %v2396_v9  ;;  %v1981_v31 = vld [vmem:[%s2814_s6] ss:$0 sm:$0xff] }
  0x22   : > { %2175 = vmatprep.subr.bf16.mxu1 %v2396_v9  ;;  %v1989_v37 = vld [vmem:[%s2818_s10] ss:$0 sm:$0xff] }
  0xa9   : > { %v440_v2 = vpop.xlane.xlu0 %439 }
  0xaa   : > { %v442_v3 = vmul.f32 0.03125, %v440_v2 }
  0xac   : > { %v443_v4 = vsub.f32 %v2492_v0, %v442_v3  ;;  %v791_v3 = vld [vmem:[%s2819_s11] sm:$0xf] }
  0xae   : > { %v444_v5 = vmul.f32 %v443_v4, %v443_v4 }
  0xb0   : > { %v445_v6 = vsel %vm437_vm0, %v444_v5, 0.0 }
  0xb1   : > { %446 = vadd.xlane.f32.xlu0 %v445_v6 }
 0x13a   : > { %v447_v12 = vpop.xlane.xlu0 %446 }
 0x13b   : > { %v448_v13 = vmul.f32 0.03125, %v447_v12  ;;  %v2338_v12 = vld [vmem:[%s2813_s5 + $0x10] sm:$0xff]  }
 0x13d   : > { %v449_v14 = vadd.f32 1e-12, %v448_v13  ;;  %v2339_v13 = vld [vmem:[%s2817_s9 + $0x18] sm:$0xff]  }
 0x13f   : > { %2355 = vrsqrt.f32 %v449_v14  ;;  %v2340_v14 = vld [vmem:[%s2817_s9 + $0x10] sm:$0xff]  }
 0x14c   : > { %v2356_v15 = vpop.eup %2355 }
 0x14d   : > { %v451_v17 = vmul.f32 %v2356_v15, %v443_v4  ;;  %v797_v4 = vsel %vm795_vm8, %v791_v3, 0 }
 0x14f   : > { %v458_v19 = vmul.f32 %v1978_v16, %v451_v17  ;;  %v2341_v16 = vld [vmem:[%s2815_s7 + $0x18] sm:$0xff]  }
 0x151   : > { %v465_v20 = vadd.f32 %v1979_v18, %v458_v19 }
 0x153   : > { %v2529_v22 = vpack.c.bf16 %v465_v20, %v465_v20  ;;  %v2342_v20 = vld [vmem:[%s2815_s7 + $0x10] sm:$0xff]  }
 0x155   : > { %2156 = vmatmul.mubr.msk.bf16.vlgmr.msra.gmra.mxu0 %vm503_vm2, %v2529_v22  ;;  %2164 = vmatmul.mubr.msk.bf16.vlgmr.msra.gmra.mxu1 %vm503_vm2, %v2529_v22 }
 0x156   : > { %2168 = vmatpush3.bf16.msra.mxu0 %v2335_v21  ;;  %2171 = vmatprep.mubr.msk.bf16.mxu0 %vm2397_vm1, %v2396_v9 }
 0x157   : > { %2169 = vmatprep.subr.bf16.mxu0 %v2396_v9  ;;  %2177 = vmatprep.mubr.msk.bf16.mxu1 %vm2397_vm1, %v2396_v9 }
 0x15a   : > { %2170 = vmatpush3.bf16.msra.mxu0 %v2336_v23 }
 0x15b   : > { %2181 = vmatprep.subr.bf16.mxu0 %v2396_v9 }
 0x15d   : > { %2172 = vmatmul.mubr.msk.bf16.vlgmr.msra.gmra.mxu0 %vm503_vm2, %v2529_v22 }
 0x15e   : > { %2183 = vmatprep.mubr.msk.bf16.mxu0 %vm2397_vm1, %v2396_v9 }
 0x215   : > { %v541_v25 = vpop.f32.mrf.mxu0  ;;  %v604_v26 = vpop.f32.mrf.mxu1 }
 0x216   : > { %v605_v27 = vadd.f32 %v1985_v24, %v604_v26  ;;  %v542_v38 = vadd.f32 %v1981_v31, %v541_v25 }
 0x217   : > { %v2157_v28 = vpop.f32.mrf.mxu0  ;;  %v2165_v29 = vpop.f32.mrf.mxu1 }
 0x218   : > { %v674_v30 = vpack.c.bf16 %v605_v27, %v605_v27  ;;  %v673_v45 = vpack.c.bf16 %v542_v38, %v542_v38  ;;  %v2019_v27 = vld [vmem:[%s2818_s10 + $0x1] ss:$0 sm:$0xff] }
 0x219   : > { %v544_v32 = vpop.f32.mrf.mxu0  ;;  %v607_v33 = vpop.f32.mrf.mxu1 }
 0x21a   : > { %v680_v34 = vsel %vm675_vm3, %v674_v30, 0 }
 0x21b   : > { %v2158_v35 = vpop.f32.mrf.mxu0  ;;  %v2166_v36 = vpop.f32.mrf.mxu1  ;;  %2176 = vmatpush3.bf16.xpose.msra.mxu1 %v680_v34 }
 0x21c   : > { %2187 = vmatprep.subr.bf16.mxu1 %v2396_v9 }
 0x21d   : > { %v667_v41 = vpop.f32.mrf.mxu0 }
 0x21e   : > { %v668_v42 = vadd.f32 %v1989_v37, %v667_v41 }
 0x21f   : > { %v2173_v44 = vpop.f32.mrf.mxu0 }
 0x220   : > { %v738_v46 = vpack.c.bf16 %v668_v42, %v668_v42 }
 0x221   : > { %v670_v47 = vpop.f32.mrf.mxu0 }
 0x222   : > { %v748_v48 = vand.u32 %v2559_v43, %v738_v46  ;;  %2178 = vmatmul.mubr.msk.bf16.vlgmr.msra.gmra.mxu1 %vm675_vm3, %v673_v45  ;;  %v2001_v45 = vld [vmem:[%s2814_s6 + $0x1] ss:$0 sm:$0xff] }
 0x223   : > { %v2174_v49 = vpop.f32.mrf.mxu0  ;;  %2189 = vmatprep.mubr.msk.bf16.mxu1 %vm2397_vm1, %v2396_v9  ;;  %2188 = vmatpush3.bf16.msra.mxu1 %v797_v4 }
 0x224   : > { %2182 = vmatpush3.bf16.msra.mxu0 %v748_v48  ;;  %2201 = vmatprep.subr.bf16.mxu1 %v2396_v9 }
 0x225   : > { %2193 = vmatprep.subr.bf16.mxu0 %v2396_v9 }
 0x2e2   : > { %v716_v53 = vpop.f32.mrf.mxu1 }
 0x2e3   : > { %v722_v55 = vmul.f32 0.35355338, %v716_v53 }
 0x2e4   : > { %v2179_v56 = vpop.f32.mrf.mxu1 }
 0x2e5   : > { %v723_v57 = vsel %vm2567_vm6, %v722_v55, -3.4028235e+38 }
 0x2e6   : > { %v719_v58 = vpop.f32.mrf.mxu1  ;;  %v725_v59 = vsel %vm724_vm7, %v723_v57, -inf }
 0x2e7   : > { %726 = vmax.xlane.f32.xlu1 %v725_v59 }
 0x2e8   : > { %v2180_v60 = vpop.f32.mrf.mxu1 }
 0x370   : > { %v727_v61 = vpop.xlane.xlu1 %726 }
 0x371   : > { %v728_v62 = vsub.f32 %v723_v57, %v727_v61 }
 0x373   : > { %v729_v63 = vmul.f32 1.442695, %v728_v62 }
 0x375   : > { %2357 = vpow2.f32 %v729_v63 }
 0x382   : > { %v2358_v1 = vpop.eup %2357 }
 0x383   : > { %v731_v2 = vsel %vm724_vm7, %v2358_v1, 0.0 }
 0x384   : > { %732 = vadd.xlane.f32.xlu1 %v731_v2 }
 0x40d   : > { %v733_v5 = vpop.xlane.xlu1 %732 }
 0x40e   : > { %2359 = vrcp.f32 %v733_v5 }
 0x41b   : > { %v2360_v6 = vpop.eup %2359 }
 0x41c   : > { %v735_v7 = vmul.f32 %v2360_v6, %v2358_v1  ;;  %v2025_v1 = vld [vmem:[%s2819_s11 + $0x4] sm:$0xf] }
 0x41d   : > { %v1152_v2 = vsel %vm795_vm8, %v2025_v1, 0 }
 0x41e   : > { %v736_v8 = vsel %vm2567_vm6, %v735_v7, 0.0  ;;  %v2343_v7 = vld [vmem:[%s2813_s5 + $0x28] sm:$0xff]  }
 0x41f   : > { %v737_v11 = vpack.c.bf16 %v736_v8, %v736_v8 }
 0x421   : > { %2184 = vmatmul.mubr.msk.bf16.vlgmr.msra.gmra.mxu0 %vm739_vm9, %v737_v11  ;;  %v2345_v11 = vld [vmem:[%s2817_s9 + $0x28] sm:$0xff]  }
 0x422   : > { %2194 = vmatpush3.bf16.msra.mxu0 %v2337_v10  ;;  %2197 = vmatprep.mubr.msk.bf16.mxu0 %vm2397_vm1, %v2396_v9  ;;  %v2344_v10 = vld [vmem:[%s2813_s5 + $0x20] sm:$0xff]  }
 0x423   : > { %2195 = vmatprep.subr.bf16.mxu0 %v2396_v9 }
 0x426   : > { %2196 = vmatpush3.bf16.msra.mxu0 %v2338_v12  ;;  %v2346_v12 = vld [vmem:[%s2817_s9 + $0x20] sm:$0xff]  }
 0x427   : > { %2209 = vmatprep.subr.bf16.mxu0 %v2396_v9 }
 0x429   : > { %2198 = vmatmul.mubr.msk.bf16.vlgmr.msra.gmra.mxu0 %vm503_vm2, %v2529_v22 }
 0x42a   : > { %2210 = vmatpush3.bf16.msra.mxu0 %v2339_v13  ;;  %2213 = vmatprep.mubr.msk.bf16.mxu0 %vm2397_vm1, %v2396_v9 }
 0x42b   : > { %2211 = vmatprep.subr.bf16.mxu0 %v2396_v9 }
 0x42e   : > { %2212 = vmatpush3.bf16.msra.mxu0 %v2340_v14  ;;  %v2347_v14 = vld [vmem:[%s2815_s7 + $0x28] sm:$0xff]  }
 0x42f   : > { %2223 = vmatprep.subr.bf16.mxu0 %v2396_v9 }
 0x431   : > { %2214 = vmatmul.mubr.msk.bf16.vlgmr.msra.gmra.mxu0 %vm503_vm2, %v2529_v22 }
 0x432   : > { %2225 = vmatprep.mubr.msk.bf16.mxu0 %vm2397_vm1, %v2396_v9 }
 0x4e1   : > { %v784_v15 = vpop.f32.mrf.mxu0 }
 0x4e2   : > { %v790_v17 = vpack.c.bf16 %v784_v15, %v784_v15 }
 0x4e3   : > { %v2185_v18 = vpop.f32.mrf.mxu0 }
 0x4e4   : > { %2190 = vmatmul.mubr.msk.bf16.vlgmr.msra.gmra.mxu1 %vm675_vm3, %v790_v17  ;;  %v2348_v18 = vld [vmem:[%s2815_s7 + $0x20] sm:$0xff]  }
 0x4e5   : > { %v787_v19 = vpop.f32.mrf.mxu0  ;;  %2202 = vmatpush3.bf16.msra.mxu1 %v2341_v16  ;;  %2205 = vmatprep.mubr.msk.bf16.mxu1 %vm2397_vm1, %v2396_v9 }
 0x4e6   : > { %2203 = vmatprep.subr.bf16.mxu1 %v2396_v9 }
 0x4e7   : > { %v2186_v21 = vpop.f32.mrf.mxu0 }
 0x4e9   : > { %v899_v23 = vpop.f32.mrf.mxu0  ;;  %2204 = vmatpush3.bf16.msra.mxu1 %v2342_v20 }
 0x4ea   : > { %2217 = vmatprep.subr.bf16.mxu1 %v2396_v9  ;;  %v900_v49 = vadd.f32 %v2001_v45, %v899_v23 }
 0x4eb   : > { %v2199_v24 = vpop.f32.mrf.mxu0 }
 0x4ec   : > { %2206 = vmatmul.mubr.msk.bf16.vlgmr.msra.gmra.mxu1 %vm503_vm2, %v2529_v22  ;;  %v1035_v50 = vpack.c.bf16 %v900_v49, %v900_v49 }
 0x4ed   : > { %v902_v25 = vpop.f32.mrf.mxu0  ;;  %2219 = vmatprep.mubr.msk.bf16.mxu1 %vm2397_vm1, %v2396_v9 }
 0x4ee   : > { %v2050_v25 = vld [vmem:[%s2818_s10 + $0x2] ss:$0 sm:$0xff] }
 0x4ef   : > { %v2200_v26 = vpop.f32.mrf.mxu0 }
 0x4f1   : > { %v1029_v28 = vpop.f32.mrf.mxu0 }
 0x4f2   : > { %v1030_v29 = vadd.f32 %v2019_v27, %v1029_v28 }
 0x4f3   : > { %v2215_v30 = vpop.f32.mrf.mxu0 }
 0x4f4   : > { %v1098_v31 = vpack.c.bf16 %v1030_v29, %v1030_v29 }
 0x4f5   : > { %v1032_v32 = vpop.f32.mrf.mxu0 }
 0x4f6   : > { %v1103_v33 = vand.u32 %v1098_v31, %v2559_v43 }
 0x4f7   : > { %v2216_v34 = vpop.f32.mrf.mxu0 }
 0x4f8   : > { %2224 = vmatpush3.bf16.msra.mxu0 %v1103_v33  ;;  %v1980_v33 = vld [vmem:[%s2820_s12] ss:$0 sm:$0xff] }
 0x4f9   : > { %2235 = vmatprep.subr.bf16.mxu0 %v2396_v9  ;;  %v479_v34 = vadd.f32 %v1980_v33, %v2492_v0  ;;  %v2032_v0 = vld [vmem:[%s2814_s6 + $0x2] ss:$0 sm:$0xff] }
 0x5a4   : > { %v2629_v35 = vpop.f32.mrf.mxu1 }
 0x5a6   : > { %v2191_v36 = vpop.f32.mrf.mxu1 }
 0x5a7   : > { %v839_v36 = vadd.f32 %v2629_v35, %v479_v34 }
 0x5a8   : > { %v836_v37 = vpop.f32.mrf.mxu1 }
 0x5aa   : > { %v2192_v38 = vpop.f32.mrf.mxu1 }
 0x5ac   : > { %v964_v40 = vpop.f32.mrf.mxu1 }
 0x5ad   : > { %v965_v41 = vadd.f32 %v2010_v39, %v964_v40 }
 0x5ae   : > { %v2207_v42 = vpop.f32.mrf.mxu1 }
 0x5af   : > { %v1036_v44 = vpack.c.bf16 %v965_v41, %v965_v41  ;;  %v2041_v42 = vld [vmem:[%s2816_s8 + $0x2] ss:$0 sm:$0xff] }
 0x5b0   : > { %v967_v46 = vpop.f32.mrf.mxu1 }
 0x5b1   : > { %v1041_v47 = vsel %vm675_vm3, %v1036_v44, 0 }
 0x5b2   : > { %v2208_v48 = vpop.f32.mrf.mxu1  ;;  %2218 = vmatpush3.bf16.xpose.msra.mxu1 %v1041_v47 }
 0x5b3   : > { %2229 = vmatprep.subr.bf16.mxu1 %v2396_v9 }
 0x5b9   : > { %2220 = vmatmul.mubr.msk.bf16.vlgmr.msra.gmra.mxu1 %vm675_vm3, %v1035_v50 }
 0x5ba   : > { %2231 = vmatprep.mubr.msk.bf16.mxu1 %vm2397_vm1, %v2396_v9  ;;  %2230 = vmatpush3.bf16.msra.mxu1 %v1152_v2  ;;  %v2056_v2 = vld [vmem:[%s2819_s11 + $0x8] sm:$0xf] }
 0x5bb   : > { %2243 = vmatprep.subr.bf16.mxu1 %v2396_v9 }
 0x679   : > { %v1077_v51 = vpop.f32.mrf.mxu1 }
 0x67a   : > { %v1083_v52 = vmul.f32 0.35355338, %v1077_v51 }
 0x67b   : > { %v2221_v53 = vpop.f32.mrf.mxu1 }
 0x67c   : > { %v1084_v55 = vsel %vm2567_vm6, %v1083_v52, -3.4028235e+38 }
 0x67d   : > { %v1080_v56 = vpop.f32.mrf.mxu1  ;;  %v1085_v57 = vsel %vm724_vm7, %v1084_v55, -inf }
 0x67e   : > { %1086 = vmax.xlane.f32.xlu0 %v1085_v57 }
 0x67f   : > { %v2222_v58 = vpop.f32.mrf.mxu1 }
 0x707   : > { %v1087_v59 = vpop.xlane.xlu0 %1086 }
 0x708   : > { %v1088_v60 = vsub.f32 %v1084_v55, %v1087_v59 }
 0x70a   : > { %v1089_v61 = vmul.f32 1.442695, %v1088_v60 }
 0x70c   : > { %2361 = vpow2.f32 %v1089_v61 }
 0x719   : > { %v2362_v62 = vpop.eup %2361 }
 0x71a   : > { %v1091_v63 = vsel %vm724_vm7, %v2362_v62, 0.0 }
 0x71b   : > { %1092 = vadd.xlane.f32.xlu1 %v1091_v63 }
 0x7a4   : > { %v1093_v3 = vpop.xlane.xlu1 %1092 }
 0x7a5   : > { %2363 = vrcp.f32 %v1093_v3  ;;  %v1507_v3 = vsel %vm795_vm8, %v2056_v2, 0 }
 0x7b2   : > { %v2364_v4 = vpop.eup %2363 }
 0x7b3   : > { %v1095_v5 = vmul.f32 %v2364_v4, %v2362_v62 }
 0x7b5   : > { %v1096_v6 = vsel %vm2567_vm6, %v1095_v5, 0.0 }
 0x7b6   : > { %v1097_v8 = vpack.c.bf16 %v1096_v6, %v1096_v6 }
 0x7b8   : > { %2226 = vmatmul.mubr.msk.bf16.vlgmr.msra.gmra.mxu0 %vm739_vm9, %v1097_v8  ;;  %v2349_v8 = vld [vmem:[%s2813_s5 + $0x38] sm:$0xff]  }
 0x7b9   : > { %2236 = vmatpush3.bf16.msra.mxu0 %v2343_v7  ;;  %2239 = vmatprep.mubr.msk.bf16.mxu0 %vm2397_vm1, %v2396_v9 }
 0x7ba   : > { %2237 = vmatprep.subr.bf16.mxu0 %v2396_v9 }
 0x7bd   : > { %2238 = vmatpush3.bf16.msra.mxu0 %v2344_v10 }
 0x7be   : > { %2251 = vmatprep.subr.bf16.mxu0 %v2396_v9 }
 0x7c0   : > { %2240 = vmatmul.mubr.msk.bf16.vlgmr.msra.gmra.mxu0 %vm503_vm2, %v2529_v22 }
 0x7c1   : > { %2252 = vmatpush3.bf16.msra.mxu0 %v2345_v11  ;;  %2255 = vmatprep.mubr.msk.bf16.mxu0 %vm2397_vm1, %v2396_v9  ;;  %v2350_v11 = vld [vmem:[%s2813_s5 + $0x30] sm:$0xff]  }
 0x7c2   : > { %2253 = vmatprep.subr.bf16.mxu0 %v2396_v9 }
 0x7c5   : > { %2254 = vmatpush3.bf16.msra.mxu0 %v2346_v12  ;;  %v2351_v12 = vld [vmem:[%s2817_s9 + $0x38] sm:$0xff]  }
 0x7c6   : > { %2265 = vmatprep.subr.bf16.mxu0 %v2396_v9 }
 0x7c8   : > { %2256 = vmatmul.mubr.msk.bf16.vlgmr.msra.gmra.mxu0 %vm503_vm2, %v2529_v22 }
 0x7c9   : > { %2267 = vmatprep.mubr.msk.bf16.mxu0 %vm2397_vm1, %v2396_v9 }
 0x878   : > { %v1139_v13 = vpop.f32.mrf.mxu0 }
 0x879   : > { %v1145_v15 = vpack.c.bf16 %v1139_v13, %v1139_v13  ;;  %v2352_v13 = vld [vmem:[%s2817_s9 + $0x30] sm:$0xff]  }
 0x87a   : > { %v2227_v16 = vpop.f32.mrf.mxu0 }
 0x87b   : > { %2232 = vmatmul.mubr.msk.bf16.vlgmr.msra.gmra.mxu1 %vm675_vm3, %v1145_v15  ;;  %v2353_v15 = vld [vmem:[%s2815_s7 + $0x38] sm:$0xff]  }
 0x87c   : > { %v1142_v17 = vpop.f32.mrf.mxu0  ;;  %2244 = vmatpush3.bf16.msra.mxu1 %v2347_v14  ;;  %2247 = vmatprep.mubr.msk.bf16.mxu1 %vm2397_vm1, %v2396_v9 }
 0x87d   : > { %2245 = vmatprep.subr.bf16.mxu1 %v2396_v9 }
 0x87e   : > { %v2228_v19 = vpop.f32.mrf.mxu0 }
 0x87f   : > { %v2354_v19 = vld [vmem:[%s2815_s7 + $0x30] sm:$0xff]  }
 0x880   : > { %v1254_v20 = vpop.f32.mrf.mxu0  ;;  %2246 = vmatpush3.bf16.msra.mxu1 %v2348_v18 }
 0x881   : > { %2259 = vmatprep.subr.bf16.mxu1 %v2396_v9  ;;  %v1255_v50 = vadd.f32 %v2032_v0, %v1254_v20 }
 0x882   : > { %v2241_v21 = vpop.f32.mrf.mxu0 }
 0x883   : > { %2248 = vmatmul.mubr.msk.bf16.vlgmr.msra.gmra.mxu1 %vm503_vm2, %v2529_v22  ;;  %v1390_v51 = vpack.c.bf16 %v1255_v50, %v1255_v50 }
 0x884   : > { %v1257_v23 = vpop.f32.mrf.mxu0  ;;  %2261 = vmatprep.mubr.msk.bf16.mxu1 %vm2397_vm1, %v2396_v9 }
 0x886   : > { %v2242_v24 = vpop.f32.mrf.mxu0 }
 0x888   : > { %v1384_v26 = vpop.f32.mrf.mxu0 }
 0x889   : > { %v1385_v27 = vadd.f32 %v2050_v25, %v1384_v26  ;;  %v2081_v26 = vld [vmem:[%s2818_s10 + $0x3] ss:$0 sm:$0xff] }
 0x88a   : > { %v2257_v28 = vpop.f32.mrf.mxu0 }
 0x88b   : > { %v1453_v29 = vpack.c.bf16 %v1385_v27, %v1385_v27 }
 0x88c   : > { %v1387_v30 = vpop.f32.mrf.mxu0 }
 0x88d   : > { %v1458_v31 = vand.u32 %v1453_v29, %v2559_v43 }
 0x88e   : > { %v2258_v32 = vpop.f32.mrf.mxu0 }
 0x88f   : > { %2266 = vmatpush3.bf16.msra.mxu0 %v1458_v31 }
 0x890   : > { %2277 = vmatprep.subr.bf16.mxu0 %v2396_v9 }
 0x93b   : > { %v1188_v37 = vpop.f32.mrf.mxu1 }
 0x93c   : > { %v2705_v38 = vadd.f32 %v1188_v37, %v839_v36 }
 0x93d   : > { %v2233_v39 = vpop.f32.mrf.mxu1 }
 0x93f   : > { %v1191_v40 = vpop.f32.mrf.mxu1 }
 0x940   : > { %v2072_v40 = vld [vmem:[%s2816_s8 + $0x3] ss:$0 sm:$0xff] }
 0x941   : > { %v2234_v41 = vpop.f32.mrf.mxu1 }
 0x943   : > { %v1319_v44 = vpop.f32.mrf.mxu1 }
 0x944   : > { %v1320_v45 = vadd.f32 %v2041_v42, %v1319_v44 }
 0x945   : > { %v2249_v46 = vpop.f32.mrf.mxu1 }
 0x946   : > { %v1391_v47 = vpack.c.bf16 %v1320_v45, %v1320_v45 }
 0x947   : > { %v1322_v48 = vpop.f32.mrf.mxu1 }
 0x948   : > { %v1396_v35 = vsel %vm675_vm3, %v1391_v47, 0 }
 0x949   : > { %v2250_v49 = vpop.f32.mrf.mxu1  ;;  %2260 = vmatpush3.bf16.xpose.msra.mxu1 %v1396_v35 }
 0x94a   : > { %2271 = vmatprep.subr.bf16.mxu1 %v2396_v9 }
 0x950   : > { %2262 = vmatmul.mubr.msk.bf16.vlgmr.msra.gmra.mxu1 %vm675_vm3, %v1390_v51 }
 0x951   : > { %2273 = vmatprep.mubr.msk.bf16.mxu1 %vm2397_vm1, %v2396_v9  ;;  %2272 = vmatpush3.bf16.msra.mxu1 %v1507_v3 }
 0x952   : > { %2285 = vmatprep.subr.bf16.mxu1 %v2396_v9 }
 0xa10   : > { %v1432_v52 = vpop.f32.mrf.mxu1 }
 0xa11   : > { %v1438_v53 = vmul.f32 0.35355338, %v1432_v52 }
 0xa12   : > { %v2263_v55 = vpop.f32.mrf.mxu1 }
 0xa13   : > { %v1439_v56 = vsel %vm2567_vm6, %v1438_v53, -3.4028235e+38 }
 0xa14   : > { %v1435_v57 = vpop.f32.mrf.mxu1  ;;  %v1440_v58 = vsel %vm724_vm7, %v1439_v56, -inf }
 0xa15   : > { %1441 = vmax.xlane.f32.xlu0 %v1440_v58 }
 0xa16   : > { %v2264_v59 = vpop.f32.mrf.mxu1 }
 0xa9e   : > { %v1442_v60 = vpop.xlane.xlu0 %1441 }
 0xa9f   : > { %v1443_v61 = vsub.f32 %v1439_v56, %v1442_v60 }
 0xaa1   : > { %v1444_v62 = vmul.f32 1.442695, %v1443_v61 }
 0xaa3   : > { %2365 = vpow2.f32 %v1444_v62 }
 0xab0   : > { %v2366_v63 = vpop.eup %2365 }
 0xab1   : > { %v1446_v1 = vsel %vm724_vm7, %v2366_v63, 0.0 }
 0xab2   : > { %1447 = vadd.xlane.f32.xlu1 %v1446_v1 }
 0xb3b   : > { %v1448_v4 = vpop.xlane.xlu1 %1447 }
 0xb3c   : > { %2367 = vrcp.f32 %v1448_v4 }
 0xb49   : > { %v2368_v5 = vpop.eup %2367 }
 0xb4a   : > { %v1450_v6 = vmul.f32 %v2368_v5, %v2366_v63 }
 0xb4c   : > { %v1451_v7 = vsel %vm2567_vm6, %v1450_v6, 0.0 }
 0xb4d   : > { %v1452_v10 = vpack.c.bf16 %v1451_v7, %v1451_v7 }
 0xb4f   : > { %2268 = vmatmul.mubr.msk.bf16.vlgmr.msra.gmra.mxu0 %vm739_vm9, %v1452_v10 }
 0xb50   : > { %2278 = vmatpush3.bf16.msra.mxu0 %v2349_v8  ;;  %2281 = vmatprep.mubr.msk.bf16.mxu0 %vm2397_vm1, %v2396_v9 }
 0xb51   : > { %2279 = vmatprep.subr.bf16.mxu0 %v2396_v9 }
 0xb54   : > { %2280 = vmatpush3.bf16.msra.mxu0 %v2350_v11 }
 0xb55   : > { %2293 = vmatprep.subr.bf16.mxu0 %v2396_v9 }
 0xb57   : > { %2282 = vmatmul.mubr.msk.bf16.vlgmr.msra.gmra.mxu0 %vm503_vm2, %v2529_v22 }
 0xb58   : > { %2294 = vmatpush3.bf16.msra.mxu0 %v2351_v12  ;;  %2297 = vmatprep.mubr.msk.bf16.mxu0 %vm2397_vm1, %v2396_v9 }
 0xb59   : > { %2295 = vmatprep.subr.bf16.mxu0 %v2396_v9 }
 0xb5c   : > { %2296 = vmatpush3.bf16.msra.mxu0 %v2352_v13 }
 0xb5d   : > { %2307 = vmatprep.subr.bf16.mxu0 %v2396_v9 }
 0xb5f   : > { %2298 = vmatmul.mubr.msk.bf16.vlgmr.msra.gmra.mxu0 %vm503_vm2, %v2529_v22 }
 0xb60   : > { %2309 = vmatprep.mubr.msk.bf16.mxu0 %vm2397_vm1, %v2396_v9 }
 0xc0f   : > { %v1494_v14 = vpop.f32.mrf.mxu0 }
 0xc10   : > { %v1500_v16 = vpack.c.bf16 %v1494_v14, %v1494_v14 }
 0xc11   : > { %v2269_v17 = vpop.f32.mrf.mxu0 }
 0xc12   : > { %2274 = vmatmul.mubr.msk.bf16.vlgmr.msra.gmra.mxu1 %vm675_vm3, %v1500_v16 }
 0xc13   : > { %v1497_v18 = vpop.f32.mrf.mxu0  ;;  %2286 = vmatpush3.bf16.msra.mxu1 %v2353_v15  ;;  %2289 = vmatprep.mubr.msk.bf16.mxu1 %vm2397_vm1, %v2396_v9 }
 0xc14   : > { %2287 = vmatprep.subr.bf16.mxu1 %v2396_v9 }
 0xc15   : > { %v2270_v20 = vpop.f32.mrf.mxu0 }
 0xc17   : > { %v1609_v21 = vpop.f32.mrf.mxu0  ;;  %2288 = vmatpush3.bf16.msra.mxu1 %v2354_v19 }
 0xc18   : > { %2301 = vmatprep.subr.bf16.mxu1 %v2396_v9 }
 0xc19   : > { %v2283_v23 = vpop.f32.mrf.mxu0 }
 0xc1a   : > { %2290 = vmatmul.mubr.msk.bf16.vlgmr.msra.gmra.mxu1 %vm503_vm2, %v2529_v22 }
 0xc1b   : > { %v1612_v24 = vpop.f32.mrf.mxu0  ;;  %2303 = vmatprep.mubr.msk.bf16.mxu1 %vm2397_vm1, %v2396_v9 }
 0xc1d   : > { %v2284_v25 = vpop.f32.mrf.mxu0 }
 0xc1f   : > { %v1739_v27 = vpop.f32.mrf.mxu0 }
 0xc20   : > { %v1740_v28 = vadd.f32 %v2081_v26, %v1739_v27 }
 0xc21   : > { %v2299_v29 = vpop.f32.mrf.mxu0 }
 0xc22   : > { %v1808_v30 = vpack.c.bf16 %v1740_v28, %v1740_v28 }
 0xc23   : > { %v1742_v31 = vpop.f32.mrf.mxu0 }
 0xc24   : > { %v1813_v32 = vand.u32 %v1808_v30, %v2559_v43  ;;  %v2063_v43 = vld [vmem:[%s2814_s6 + $0x3] ss:$0 sm:$0xff] }
 0xc25   : > { %v2300_v33 = vpop.f32.mrf.mxu0 }
 0xc26   : > { %2308 = vmatpush3.bf16.msra.mxu0 %v1813_v32 }
 0xcd2   : > { %v1543_v34 = vpop.f32.mrf.mxu1 }
 0xcd3   : > { %v1549_v22 = vadd.f32 %v1543_v34, %v2705_v38  ;;  %v1610_v38 = vadd.f32 %v2063_v43, %v1609_v21 }
 0xcd4   : > { %v2275_v36 = vpop.f32.mrf.mxu1 }
 0xcd5   : > { %v1745_v48 = vpack.c.bf16 %v1610_v38, %v1610_v38 }
 0xcd6   : > { %v1546_v37 = vpop.f32.mrf.mxu1 }
 0xcd8   : > { %v2276_v39 = vpop.f32.mrf.mxu1 }
 0xcda   : > { %v1674_v41 = vpop.f32.mrf.mxu1 }
 0xcdb   : > { %v1675_v42 = vadd.f32 %v2072_v40, %v1674_v41 }
 0xcdc   : > { %v2291_v44 = vpop.f32.mrf.mxu1 }
 0xcdd   : > { %v1746_v45 = vpack.c.bf16 %v1675_v42, %v1675_v42 }
 0xcde   : > { %v1677_v46 = vpop.f32.mrf.mxu1 }
 0xcdf   : > { %v1751_v47 = vsel %vm675_vm3, %v1746_v45, 0 }
 0xce0   : > { %v2292_v0 = vpop.f32.mrf.mxu1  ;;  %2302 = vmatpush3.bf16.xpose.msra.mxu1 %v1751_v47 }
 0xce1   : > { %2313 = vmatprep.subr.bf16.mxu1 %v2396_v9 }
 0xce7   : > { %2304 = vmatmul.mubr.msk.bf16.vlgmr.msra.gmra.mxu1 %vm675_vm3, %v1745_v48 }
 0xce8   : > { %2315 = vmatprep.mubr.msk.bf16.mxu1 %vm2397_vm1, %v2396_v9  ;;  %v2087_v9 = vld [vmem:[%s2819_s11 + $0xc] sm:$0xf] }
 0xce9   : > { %v1862_v61 = vsel %vm795_vm8, %v2087_v9, 0 }
 0xcea   : > { %2314 = vmatpush3.bf16.msra.mxu1 %v1862_v61 }
 0xda7   : > { %v1787_v35 = vpop.f32.mrf.mxu1 }
 0xda8   : > { %v1793_v49 = vmul.f32 0.35355338, %v1787_v35 }
 0xda9   : > { %v2305_v50 = vpop.f32.mrf.mxu1 }
 0xdaa   : > { %v1794_v51 = vsel %vm2567_vm6, %v1793_v49, -3.4028235e+38 }
 0xdab   : > { %v1790_v52 = vpop.f32.mrf.mxu1  ;;  %v1795_v53 = vsel %vm724_vm7, %v1794_v51, -inf }
 0xdac   : > { %1796 = vmax.xlane.f32.xlu0 %v1795_v53 }
 0xdad   : > { %v2306_v55 = vpop.f32.mrf.mxu1 }
 0xe35   : > { %v1797_v56 = vpop.xlane.xlu0 %1796 }
 0xe36   : > { %v1798_v57 = vsub.f32 %v1794_v51, %v1797_v56 }
 0xe38   : > { %v1799_v58 = vmul.f32 1.442695, %v1798_v57 }
 0xe3a   : > { %2369 = vpow2.f32 %v1799_v58 }
 0xe47   : > { %v2370_v59 = vpop.eup %2369 }
 0xe48   : > { %v1801_v60 = vsel %vm724_vm7, %v2370_v59, 0.0 }
 0xe49   : > { %1802 = vadd.xlane.f32.xlu1 %v1801_v60 }
 0xed2   : > { %v1803_v62 = vpop.xlane.xlu1 %1802 }
 0xed3   : > { %2371 = vrcp.f32 %v1803_v62 }
 0xee0   : > { %v2372_v63 = vpop.eup %2371 }
 0xee1   : > { %v1805_v1 = vmul.f32 %v2372_v63, %v2370_v59 }
 0xee3   : > { %v1806_v2 = vsel %vm2567_vm6, %v1805_v1, 0.0 }
 0xee4   : > { %v1807_v3 = vpack.c.bf16 %v1806_v2, %v1806_v2 }
 0xee6   : > { %2310 = vmatmul.mubr.msk.bf16.vlgmr.msra.gmra.mxu0 %vm739_vm9, %v1807_v3 }
 0xfa6   : > { %v1849_v4 = vpop.f32.mrf.mxu0 }
 0xfa7   : > { %v1855_v5 = vpack.c.bf16 %v1849_v4, %v1849_v4 }
 0xfa8   : > { %v2311_v6 = vpop.f32.mrf.mxu0 }
 0xfa9   : > { %2316 = vmatmul.mubr.msk.bf16.vlgmr.msra.gmra.mxu1 %vm675_vm3, %v1855_v5 }
 0xfaa   : > { %v1852_v7 = vpop.f32.mrf.mxu0 }
 0xfac   : > { %v2312_v8 = vpop.f32.mrf.mxu0 }
0x1069   : > { %v1898_v10 = vpop.f32.mrf.mxu1 }
0x106a   : > { %v1904_v11 = vadd.f32 %v1898_v10, %v1549_v22 }
0x106b   : > { %v2317_v12 = vpop.f32.mrf.mxu1 }
0x106c   : > { %1905 = vst.msk [vmem:[%s432_s26] sm:$0x7] %vm437_vm0, %v1904_v11 }
0x106d   : > { %v1901_v54 = vpop.f32.mrf.mxu1 }
0x106f   : > { %v2318_v13 = vpop.f32.mrf.mxu1 }
0x1070 PF: > { %s29_s29 = sadd.s32 1, %s2393_s29  }
0x1071   : > { %p26_p9 = scmp.ge.s32.totalorder %s29_s29, 4  }
0x1073   :  { %28 = sbr.rel (!%p26_p9) target bundleno = 16 (0x10), region = 122 }

// kernel: _e2e_device_forward.24
= control target key start
LH: loop header
LB: loop body
LE: loop exit
PB: predicated region body
PF: predicated region fallthrough
CT: control target
= control target key end

     0   :  { %vm25_vm0 = vcmask 261120   ;;  %vm29_vm1 = vcmask 257024   ;;  %v171_v14 = vmov 0.0   ;;  %vm172_vm2 = vmmov 0   ;;  %s233_s0 = inlined_call_operand.vmem [shape: f32[12,32], index: 0, kind: input, shape index: {}]   ;;  %s234_s3 = inlined_call_operand.vmem [shape: bf16[32,11], index: 3, kind: input, shape index: {}]   ;;  %s235_s1 = inlined_call_operand.vmem [shape: f32[1,32], index: 1, kind: input, shape index: {}]   ;;  %s236_s2 = inlined_call_operand.vmem [shape: f32[1,32], index: 2, kind: input, shape index: {}]   ;;  %s237_s4 = inlined_call_operand.vmem [shape: f32[1,11], index: 4, kind: input, shape index: {}]   ;;  %s238_s5 = inlined_call_operand.vmem [shape: f32[12,11], index: 5, kind: output, shape index: {}]  }
   0x1   :  { %v21_v0 = vld [vmem:[%s233_s0] sm:$0xff]  ;;  %v22_v1 = vld [vmem:[%s233_s0 + $0x8] sm:$0xf]  ;;  %155 = vmatprep.subr.bf16.mxu0 %v171_v14  ;;  %159 = vmatprep.mubr.msk.bf16.mxu0 %vm172_vm2, %v171_v14  ;;  %vm138_vm3 = vcmask 89088   ;;  %vm140_vm4 = vcmask 84992  }
   0x2   :  { %v26_v2 = vsel %vm25_vm0, %v21_v0, 0.0  ;;  %v30_v3 = vsel %vm29_vm1, %v22_v1, 0.0  ;;  %v165_v15 = vld [vmem:[%s234_s3 + $0x8] sm:$0xff]   ;;  %v166_v16 = vld [vmem:[%s234_s3] sm:$0xff]  }
   0x3   :  { %27 = vadd.xlane.f32.xlu0 %v26_v2  ;;  %156 = vmatpush3.bf16.msra.mxu0 %v165_v15  ;;  %v146_v25 = vld [vmem:[%s235_s1] ss:$0 sm:$0xff] }
   0x4   :  { %157 = vmatprep.subr.bf16.mxu0 %v171_v14  ;;  %v147_v29 = vld [vmem:[%s236_s2] ss:$0 sm:$0xff] }
   0x5   :  { %v148_v34 = vld [vmem:[%s237_s4] ss:$0 sm:$0xff] }
   0x7   :  { %31 = vadd.xlane.f32.xlu0 %v30_v3  ;;  %158 = vmatpush3.bf16.msra.mxu0 %v166_v16 }
  0x8c   :  { %v28_v4 = vpop.xlane.xlu0 %27 }
  0x8d   :  { %v34_v5 = vmul.f32 0.03125, %v28_v4 }
  0x8f   :  { %v36_v6 = vsub.f32 %v21_v0, %v34_v5 }
  0x90   :  { %v32_v7 = vpop.xlane.xlu0 %31 }
  0x91   :  { %v35_v8 = vmul.f32 0.03125, %v32_v7  ;;  %v38_v9 = vmul.f32 %v36_v6, %v36_v6 }
  0x93   :  { %v37_v10 = vsub.f32 %v22_v1, %v35_v8  ;;  %v40_v11 = vsel %vm25_vm0, %v38_v9, 0.0 }
  0x94   :  { %41 = vadd.xlane.f32.xlu1 %v40_v11 }
  0x95   :  { %v39_v12 = vmul.f32 %v37_v10, %v37_v10 }
  0x97   :  { %v43_v13 = vsel %vm29_vm1, %v39_v12, 0.0 }
  0x98   :  { %44 = vadd.xlane.f32.xlu1 %v43_v13 }
 0x11d   :  { %v42_v17 = vpop.xlane.xlu1 %41 }
 0x11e   :  { %v46_v18 = vmul.f32 0.03125, %v42_v17 }
 0x120   :  { %v48_v19 = vadd.f32 1e-12, %v46_v18 }
 0x121   :  { %v45_v20 = vpop.xlane.xlu1 %44 }
 0x122   :  { %167 = vrsqrt.f32 %v48_v19  ;;  %v47_v21 = vmul.f32 0.03125, %v45_v20 }
 0x124   :  { %v49_v22 = vadd.f32 1e-12, %v47_v21 }
 0x126   :  { %169 = vrsqrt.f32 %v49_v22 }
 0x12f   :  { %v168_v23 = vpop.eup %167 }
 0x130   :  { %v52_v24 = vmul.f32 %v168_v23, %v36_v6 }
 0x132   :  { %v60_v28 = vmul.f32 %v146_v25, %v52_v24 }
 0x133   :  { %v170_v26 = vpop.eup %169 }
 0x134   :  { %v53_v27 = vmul.f32 %v170_v26, %v37_v10  ;;  %v68_v31 = vadd.f32 %v147_v29, %v60_v28 }
 0x136   :  { %v61_v30 = vmul.f32 %v146_v25, %v53_v27 }
 0x138   :  { %v69_v32 = vadd.f32 %v147_v29, %v61_v30 }
 0x13a   :  { %v70_v33 = vpack.c.bf16 %v69_v32, %v68_v31 }
 0x13c   :  { %160 = vmatmul.mubr.msk.bf16.vlgmr.msra.gmra.mxu0 %vm25_vm0, %v70_v33 }
 0x1fc   :  { %v131_v35 = vpop.f32.mrf.mxu0 }
 0x1fd   :  { %v132_v36 = vadd.f32 %v148_v34, %v131_v35 }
 0x1fe   :  { %v161_v37 = vpop.f32.mrf.mxu0 }
 0x1ff   :  { %139 = vst.msk [vmem:[%s238_s5] sm:$0xff] %vm138_vm3, %v132_v36 }
 0x200   :  { %v134_v38 = vpop.f32.mrf.mxu0 }
 0x201   :  { %v135_v39 = vadd.f32 %v148_v34, %v134_v38 }
 0x202   :  { %v162_v40 = vpop.f32.mrf.mxu0 }
 0x203   :  { %141 = vst.msk [vmem:[%s238_s5 + $0x8] sm:$0xf] %vm140_vm4, %v135_v39 }

// kernel: _e2e_device_forward.22
= control target key start
LH: loop header
LB: loop body
LE: loop exit
PB: predicated region body
PF: predicated region fallthrough
CT: control target
= control target key end

     0   :  { %s2823_s0 = inlined_call_operand.vmem [shape: s32[2], index: 0, kind: input, shape index: {}]   ;;  %s2824_s1 = inlined_call_operand.vmem [shape: f32[2,6,32], index: 1, kind: input, shape index: {}]   ;;  %s2825_s2 = inlined_call_operand.vmem [shape: f32[2,3,32], index: 2, kind: input, shape index: {}]   ;;  %s2826_s3 = inlined_call_operand.vmem [shape: f32[1,32], index: 3, kind: input, shape index: {}]   ;;  %s2827_s4 = inlined_call_operand.vmem [shape: f32[1,32], index: 4, kind: input, shape index: {}]   ;;  %s2828_s5 = inlined_call_operand.vmem [shape: bf16[4,32,8], index: 5, kind: input, shape index: {}]   ;;  %s2829_s6 = inlined_call_operand.vmem [shape: f32[4,1,8], index: 6, kind: input, shape index: {}]   ;;  %s2830_s7 = inlined_call_operand.vmem [shape: bf16[4,32,8], index: 7, kind: input, shape index: {}]   ;;  %s2831_s8 = inlined_call_operand.vmem [shape: f32[4,1,8], index: 8, kind: input, shape index: {}]   ;;  %s2832_s9 = inlined_call_operand.vmem [shape: bf16[4,32,8], index: 9, kind: input, shape index: {}]   ;;  %s2833_s10 = inlined_call_operand.vmem [shape: f32[4,1,8], index: 10, kind: input, shape index: {}]   ;;  %s2834_s11 = inlined_call_operand.vmem [shape: bf16[4,8,32], index: 11, kind: input, shape index: {}]   ;;  %s2835_s12 = inlined_call_operand.vmem [shape: f32[1,32], index: 12, kind: input, shape index: {}]   ;;  %s2836_s13 = inlined_call_operand.vmem [shape: f32[2,6,32], index: 13, kind: output, shape index: {}]  }
   0x1   :  { %s18_s27 = sshll.u32 %s2823_s0, 4  ;;  %s19_s27 = int_to_ptr.vmem [resolvable:$true] %s18_s27 }
   0x2   :  { %s2379_s28 = scalar_lea.vmem %s19_s27, 16  ;;  %p2384_p1 = scmp.lt.s32.totalorder %s19_s27, %s19_s27 }
   0x3   :  { %p2380_p0 = scmp.ne.s32.totalorder %s19_s27, %s2379_s28  ;;  %p2385_p2 = scmp.lt.s32.totalorder %s2379_s28, %s2379_s28 }
   0x5   :  { %p2386_p3 = por %p2385_p2, %p2384_p1 }
   0x7   :  { %p2387_p4 = pnand %p2386_p3, %p2380_p0 }
   0x9   :  { %2390 = shalt.err (!%p2387_p4)  }
   0xa   :  { %s2401_s29 = smov [#allocation3]  }
   0xb   :  { %21 = dma.vmem_to_smem %s19_s27, 16, %s2401_s29, [#allocation2] }
   0xc   :  { %2395 = dma.done.wait [#allocation2], 16 }
   0xd   :  { %2396 = vsyncadd [#allocation2], 4294967280 }
   0xe   :  { %23 = sfence }
   0xf   :  { %s2478_s30 = smov 0  }
  0x10 LB: > { %s2484_s0 = sadd.s32 4294967295, %s2399_s30   ;;  %p1980_p5 = scmp.ge.s32.totalorder %s2399_s30, 1  ;;  %s2399_s30 = sphi %s2478_s30, %s29_s30  }
  0x11   : > { %p377_p6 = scmp.lt.s32.totalorder %s2399_s30, 3 }
  0x13   : > { %p378_p7 = pnand %p1980_p5, %p377_p6 }
  0x14   : > { %p421_p8 = scmp.lt.s32.totalorder (!%p378_p7), %s2484_s0, 1  ;;  %s469_s29 = sld [smem:[#allocation3 + %s2484_s0]] (!%p378_p7) }
  0x15   : > { %381 = sbr.rel (%p378_p7) target bundleno = 4200 (0x1068), region = 68 }
  0x1a   : > { %s2490_s14 = scalar_select %p421_p8, %s2484_s0, 1  ;;  %vm437_vm0 = vcmask 259072   ;;  %v2337_v7 = vld [vmem:[%s2830_s7 + $0x8] sm:$0xff]   ;;  %v2402_v8 = vmov 0.0   ;;  %v2338_v11 = vld [vmem:[%s2830_s7] sm:$0xff]   ;;  %vm2403_vm1 = vmmov 0   ;;  %v470_v41 = vlaneseq }
  0x1b   : > { %2165 = vmatprep.subr.bf16.mxu1 %v2402_v8  ;;  %2157 = vmatprep.subr.bf16.mxu0 %v2402_v8  ;;  %v2339_v9 = vld [vmem:[%s2828_s5 + $0x8] sm:$0xff]   ;;  %v2340_v12 = vld [vmem:[%s2828_s5] sm:$0xff]   ;;  %vm505_vm2 = vcmask 261120   ;;  %vm680_vm3 = vcmask 64512   ;;  %v472_v43 = vstv %s469_s29  ;;  %vm729_vm5 = vcmask 21504  }
  0x1c   : > { %s1981_s15 = sshll.u32 %s2490_s14, 3  ;;  %s1982_s19 = sshll.u32 %s2490_s14, 2  ;;  %2166 = vmatpush3.bf16.msra.mxu1 %v2337_v7  ;;  %2169 = vmatprep.mubr.msk.bf16.mxu1 %vm2403_vm1, %v2402_v8  ;;  %v1984_v18 = vld [vmem:[%s2826_s3] ss:$0 sm:$0xff]  ;;  %v2341_v39 = vld [vmem:[%s2832_s9 + $0x8] sm:$0xff]   ;;  %v471_v42 = vand.u32 127, %v470_v41 }
  0x1d   : > { %s424_s18 = scalar_lea.vmem %s2824_s1, %s1981_s15  ;;  %s428_s22 = scalar_lea.vmem %s2825_s2, %s1982_s19  ;;  %2167 = vmatprep.subr.bf16.mxu1 %v2402_v8  ;;  %2158 = vmatpush3.bf16.msra.mxu0 %v2339_v9  ;;  %v1985_v20 = vld [vmem:[%s2827_s4] ss:$0 sm:$0xff]  ;;  %vm748_vm6 = vcmask 1040384   ;;  %vm749_vm7 = vcmask 1041408   ;;  %v2404_v60 = vmov 65535   ;;  %vm800_vm8 = vcmask 1043456  }
  0x1e   : > { %v2498_v0 = vld [vmem:[%s424_s18] sm:$0x3f]  ;;  %2159 = vmatprep.subr.bf16.mxu0 %v2402_v8  ;;  %2161 = vmatprep.mubr.msk.bf16.mxu0 %vm2403_vm1, %v2402_v8  ;;  %vm2572_vm4 = vcmp.lt.s32.totalorder %v471_v42, %v472_v43  ;;  %v750_v61 = vsel %vm748_vm6, 4294967295, %v2404_v60  ;;  %vm744_vm9 = vcmask 23552   ;;  %v2347_v43 = vld [vmem:[%s2832_s9 + $0x18] sm:$0xff]   ;;  %s432_s23 = scalar_lea.vmem %s2836_s13, %s1981_s15 }
  0x1f   : > { %v438_v1 = vsel %vm437_vm0, %v2498_v0, 0.0  ;;  %v466_v10 = vld [vmem:[%s428_s22] sm:$0x7]  ;;  %v2583_v62 = vsel %vm749_vm7, %v750_v61, 0 }
  0x20   : > { %439 = vadd.xlane.f32.xlu0 %v438_v1  ;;  %v2528_v13 = vpack.c.bf16 %v466_v10, %v466_v10  ;;  %2168 = vmatpush3.bf16.msra.mxu1 %v2338_v11  ;;  %v1991_v24 = vld [vmem:[%s2831_s8] ss:$0 sm:$0xff] }
  0x21   : > { %2160 = vmatpush3.bf16.msra.mxu0 %v2340_v12  ;;  %2181 = vmatprep.subr.bf16.mxu1 %v2402_v8  ;;  %v1987_v32 = vld [vmem:[%s2829_s6] ss:$0 sm:$0xff]  ;;  %v2343_v12 = vld [vmem:[%s2828_s5 + $0x18] sm:$0xff]  }
  0x22   : > { %2173 = vmatprep.subr.bf16.mxu0 %v2402_v8  ;;  %v2342_v40 = vld [vmem:[%s2832_s9] sm:$0xff]  }
  0x23   : > { %2170 = vmatmul.mubr.msk.bf16.vlgmr.msra.gmra.mxu1 %vm505_vm2, %v2528_v13  ;;  %v1995_v57 = vld [vmem:[%s2833_s10] ss:$0 sm:$0xff] }
  0x24   : > { %2183 = vmatprep.mubr.msk.bf16.mxu1 %vm2403_vm1, %v2402_v8 }
  0xa9   : > { %v440_v2 = vpop.xlane.xlu0 %439 }
  0xaa   : > { %v442_v3 = vmul.f32 0.03125, %v440_v2 }
  0xac   : > { %v443_v4 = vsub.f32 %v2498_v0, %v442_v3 }
  0xae   : > { %v444_v5 = vmul.f32 %v443_v4, %v443_v4 }
  0xb0   : > { %v445_v6 = vsel %vm437_vm0, %v444_v5, 0.0  ;;  %v796_v5 = vld [vmem:[%s2834_s11] sm:$0xf] }
  0xb1   : > { %446 = vadd.xlane.f32.xlu0 %v445_v6  ;;  %v802_v6 = vsel %vm800_vm8, %v796_v5, 0 }
  0xe3   : > { %v609_v25 = vpop.f32.mrf.mxu1 }
  0xe4   : > { %v610_v26 = vadd.f32 %v1991_v24, %v609_v25 }
  0xe5   : > { %v2171_v27 = vpop.f32.mrf.mxu1 }
  0xe6   : > { %v679_v28 = vpack.c.bf16 %v610_v26, %v610_v26 }
  0xe7   : > { %v612_v29 = vpop.f32.mrf.mxu1 }
  0xe8   : > { %v685_v30 = vsel %vm680_vm3, %v679_v28, 0 }
  0xe9   : > { %v2172_v31 = vpop.f32.mrf.mxu1  ;;  %2182 = vmatpush3.bf16.xpose.msra.mxu1 %v685_v30 }
  0xea   : > { %2193 = vmatprep.subr.bf16.mxu1 %v2402_v8 }
 0x13a   : > { %v447_v14 = vpop.xlane.xlu0 %446 }
 0x13b   : > { %v448_v15 = vmul.f32 0.03125, %v447_v14 }
 0x13d   : > { %v449_v16 = vadd.f32 1e-12, %v448_v15  ;;  %v2344_v15 = vld [vmem:[%s2828_s5 + $0x10] sm:$0xff]  }
 0x13f   : > { %2361 = vrsqrt.f32 %v449_v16 }
 0x14c   : > { %v2362_v17 = vpop.eup %2361 }
 0x14d   : > { %v451_v19 = vmul.f32 %v2362_v17, %v443_v4  ;;  %v2345_v17 = vld [vmem:[%s2830_s7 + $0x18] sm:$0xff]  }
 0x14f   : > { %v458_v21 = vmul.f32 %v1984_v18, %v451_v19 }
 0x151   : > { %v465_v22 = vadd.f32 %v1985_v20, %v458_v21  ;;  %v2346_v21 = vld [vmem:[%s2830_s7 + $0x10] sm:$0xff]  }
 0x153   : > { %v2542_v23 = vpack.c.bf16 %v465_v22, %v465_v22 }
 0x155   : > { %2162 = vmatmul.mubr.msk.bf16.vlgmr.msra.gmra.mxu0 %vm505_vm2, %v2542_v23 }
 0x156   : > { %2177 = vmatprep.mubr.msk.bf16.mxu0 %vm2403_vm1, %v2402_v8  ;;  %2174 = vmatpush3.bf16.msra.mxu0 %v2341_v39 }
 0x157   : > { %2175 = vmatprep.subr.bf16.mxu0 %v2402_v8 }
 0x15a   : > { %2176 = vmatpush3.bf16.msra.mxu0 %v2342_v40 }
 0x15b   : > { %2187 = vmatprep.subr.bf16.mxu0 %v2402_v8 }
 0x15d   : > { %2178 = vmatmul.mubr.msk.bf16.vlgmr.msra.gmra.mxu0 %vm505_vm2, %v2528_v13 }
 0x15e   : > { %2189 = vmatprep.mubr.msk.bf16.mxu0 %vm2403_vm1, %v2402_v8 }
 0x215   : > { %v543_v33 = vpop.f32.mrf.mxu0 }
 0x216   : > { %v544_v34 = vadd.f32 %v1987_v32, %v543_v33  ;;  %v2016_v32 = vld [vmem:[%s2831_s8 + $0x1] ss:$0 sm:$0xff] }
 0x217   : > { %v2163_v35 = vpop.f32.mrf.mxu0 }
 0x218   : > { %v678_v36 = vpack.c.bf16 %v544_v34, %v544_v34 }
 0x219   : > { %v546_v37 = vpop.f32.mrf.mxu0 }
 0x21a   : > { %2184 = vmatmul.mubr.msk.bf16.vlgmr.msra.gmra.mxu1 %vm680_vm3, %v678_v36  ;;  %v2007_v37 = vld [vmem:[%s2829_s6 + $0x1] ss:$0 sm:$0xff] }
 0x21b   : > { %v2164_v38 = vpop.f32.mrf.mxu0  ;;  %2195 = vmatprep.mubr.msk.bf16.mxu1 %vm2403_vm1, %v2402_v8  ;;  %2194 = vmatpush3.bf16.msra.mxu1 %v802_v6 }
 0x21c   : > { %2207 = vmatprep.subr.bf16.mxu1 %v2402_v8 }
 0x21d   : > { %v672_v58 = vpop.f32.mrf.mxu0 }
 0x21e   : > { %v673_v59 = vadd.f32 %v1995_v57, %v672_v58  ;;  %v2025_v58 = vld [vmem:[%s2833_s10 + $0x1] ss:$0 sm:$0xff] }
 0x21f   : > { %v2179_v63 = vpop.f32.mrf.mxu0 }
 0x220   : > { %v743_v1 = vpack.c.bf16 %v673_v59, %v673_v59 }
 0x221   : > { %v675_v2 = vpop.f32.mrf.mxu0 }
 0x222   : > { %v753_v3 = vand.u32 %v2583_v62, %v743_v1 }
 0x223   : > { %v2180_v4 = vpop.f32.mrf.mxu0 }
 0x224   : > { %2188 = vmatpush3.bf16.msra.mxu0 %v753_v3  ;;  %v2031_v4 = vld [vmem:[%s2834_s11 + $0x4] sm:$0xf] }
 0x225   : > { %2199 = vmatprep.subr.bf16.mxu0 %v2402_v8  ;;  %v1157_v5 = vsel %vm800_vm8, %v2031_v4, 0 }
 0x2da   : > { %v721_v44 = vpop.f32.mrf.mxu1 }
 0x2db   : > { %v727_v46 = vmul.f32 0.35355338, %v721_v44  ;;  %v2348_v44 = vld [vmem:[%s2832_s9 + $0x10] sm:$0xff]  }
 0x2dc   : > { %v2185_v47 = vpop.f32.mrf.mxu1 }
 0x2dd   : > { %v728_v48 = vsel %vm2572_vm4, %v727_v46, -3.4028235e+38 }
 0x2de   : > { %v724_v49 = vpop.f32.mrf.mxu1  ;;  %v730_v50 = vsel %vm729_vm5, %v728_v48, -inf }
 0x2df   : > { %731 = vmax.xlane.f32.xlu1 %v730_v50 }
 0x2e0   : > { %v2186_v51 = vpop.f32.mrf.mxu1 }
 0x368   : > { %v732_v52 = vpop.xlane.xlu1 %731 }
 0x369   : > { %v733_v53 = vsub.f32 %v728_v48, %v732_v52 }
 0x36b   : > { %v734_v54 = vmul.f32 1.442695, %v733_v53 }
 0x36d   : > { %2363 = vpow2.f32 %v734_v54 }
 0x37a   : > { %v2364_v55 = vpop.eup %2363 }
 0x37b   : > { %v736_v56 = vsel %vm729_vm5, %v2364_v55, 0.0 }
 0x37c   : > { %737 = vadd.xlane.f32.xlu1 %v736_v56 }
 0x405   : > { %v738_v7 = vpop.xlane.xlu1 %737 }
 0x406   : > { %2365 = vrcp.f32 %v738_v7 }
 0x413   : > { %v2366_v9 = vpop.eup %2365 }
 0x414   : > { %v740_v10 = vmul.f32 %v2366_v9, %v2364_v55 }
 0x416   : > { %v741_v11 = vsel %vm2572_vm4, %v740_v10, 0.0 }
 0x417   : > { %v742_v14 = vpack.c.bf16 %v741_v11, %v741_v11  ;;  %v2349_v11 = vld [vmem:[%s2828_s5 + $0x28] sm:$0xff]  }
 0x419   : > { %2190 = vmatmul.mubr.msk.bf16.vlgmr.msra.gmra.mxu0 %vm744_vm9, %v742_v14  ;;  %v2350_v14 = vld [vmem:[%s2828_s5 + $0x20] sm:$0xff]  }
 0x41a   : > { %2200 = vmatpush3.bf16.msra.mxu0 %v2343_v12  ;;  %2203 = vmatprep.mubr.msk.bf16.mxu0 %vm2403_vm1, %v2402_v8 }
 0x41b   : > { %2201 = vmatprep.subr.bf16.mxu0 %v2402_v8 }
 0x41e   : > { %2202 = vmatpush3.bf16.msra.mxu0 %v2344_v15 }
 0x41f   : > { %2215 = vmatprep.subr.bf16.mxu0 %v2402_v8 }
 0x421   : > { %2204 = vmatmul.mubr.msk.bf16.vlgmr.msra.gmra.mxu0 %vm505_vm2, %v2542_v23 }
 0x422   : > { %2219 = vmatprep.mubr.msk.bf16.mxu0 %vm2403_vm1, %v2402_v8  ;;  %2216 = vmatpush3.bf16.msra.mxu0 %v2347_v43 }
 0x423   : > { %2217 = vmatprep.subr.bf16.mxu0 %v2402_v8 }
 0x426   : > { %2218 = vmatpush3.bf16.msra.mxu0 %v2348_v44 }
 0x427   : > { %2229 = vmatprep.subr.bf16.mxu0 %v2402_v8 }
 0x429   : > { %2220 = vmatmul.mubr.msk.bf16.vlgmr.msra.gmra.mxu0 %vm505_vm2, %v2528_v13 }
 0x42a   : > { %2231 = vmatprep.mubr.msk.bf16.mxu0 %vm2403_vm1, %v2402_v8 }
 0x4d9   : > { %v789_v16 = vpop.f32.mrf.mxu0 }
 0x4da   : > { %v795_v18 = vpack.c.bf16 %v789_v16, %v789_v16  ;;  %v2351_v16 = vld [vmem:[%s2830_s7 + $0x28] sm:$0xff]  }
 0x4db   : > { %v2191_v19 = vpop.f32.mrf.mxu0 }
 0x4dc   : > { %2196 = vmatmul.mubr.msk.bf16.vlgmr.msra.gmra.mxu1 %vm680_vm3, %v795_v18 }
 0x4dd   : > { %v792_v20 = vpop.f32.mrf.mxu0  ;;  %2208 = vmatpush3.bf16.msra.mxu1 %v2345_v17  ;;  %2211 = vmatprep.mubr.msk.bf16.mxu1 %vm2403_vm1, %v2402_v8 }
 0x4de   : > { %2209 = vmatprep.subr.bf16.mxu1 %v2402_v8  ;;  %v2352_v20 = vld [vmem:[%s2830_s7 + $0x20] sm:$0xff]  }
 0x4df   : > { %v2192_v22 = vpop.f32.mrf.mxu0 }
 0x4e1   : > { %v904_v24 = vpop.f32.mrf.mxu0  ;;  %2210 = vmatpush3.bf16.msra.mxu1 %v2346_v21 }
 0x4e2   : > { %2223 = vmatprep.subr.bf16.mxu1 %v2402_v8  ;;  %v905_v41 = vadd.f32 %v2007_v37, %v904_v24 }
 0x4e3   : > { %v2205_v25 = vpop.f32.mrf.mxu0 }
 0x4e4   : > { %2212 = vmatmul.mubr.msk.bf16.vlgmr.msra.gmra.mxu1 %vm505_vm2, %v2528_v13  ;;  %v1040_v42 = vpack.c.bf16 %v905_v41, %v905_v41 }
 0x4e5   : > { %v907_v26 = vpop.f32.mrf.mxu0  ;;  %2225 = vmatprep.mubr.msk.bf16.mxu1 %vm2403_vm1, %v2402_v8 }
 0x4e7   : > { %v2206_v27 = vpop.f32.mrf.mxu0 }
 0x4e8   : > { %v1986_v27 = vld [vmem:[%s2835_s12] ss:$0 sm:$0xff] }
 0x4e9   : > { %v1034_v59 = vpop.f32.mrf.mxu0 }
 0x4ea   : > { %v1035_v60 = vadd.f32 %v2025_v58, %v1034_v59 }
 0x4eb   : > { %v2221_v61 = vpop.f32.mrf.mxu0 }
 0x4ec   : > { %v1103_v63 = vpack.c.bf16 %v1035_v60, %v1035_v60  ;;  %v2056_v60 = vld [vmem:[%s2833_s10 + $0x2] ss:$0 sm:$0xff] }
 0x4ed   : > { %v1037_v1 = vpop.f32.mrf.mxu0 }
 0x4ee   : > { %v1108_v2 = vand.u32 %v1103_v63, %v2583_v62 }
 0x4ef   : > { %v2222_v3 = vpop.f32.mrf.mxu0 }
 0x4f0   : > { %2230 = vmatpush3.bf16.msra.mxu0 %v1108_v2 }
 0x4f1   : > { %2241 = vmatprep.subr.bf16.mxu0 %v2402_v8 }
 0x59c   : > { %v2624_v28 = vpop.f32.mrf.mxu1 }
 0x59e   : > { %v2197_v29 = vpop.f32.mrf.mxu1 }
 0x59f   : > { %v481_v29 = vadd.f32 %v1986_v27, %v2498_v0  ;;  %v2038_v0 = vld [vmem:[%s2829_s6 + $0x2] ss:$0 sm:$0xff] }
 0x5a0   : > { %v841_v30 = vpop.f32.mrf.mxu1 }
 0x5a1   : > { %v844_v30 = vadd.f32 %v2624_v28, %v481_v29 }
 0x5a2   : > { %v2198_v31 = vpop.f32.mrf.mxu1 }
 0x5a4   : > { %v969_v33 = vpop.f32.mrf.mxu1 }
 0x5a5   : > { %v970_v34 = vadd.f32 %v2016_v32, %v969_v33 }
 0x5a6   : > { %v2213_v35 = vpop.f32.mrf.mxu1 }
 0x5a7   : > { %v1041_v36 = vpack.c.bf16 %v970_v34, %v970_v34 }
 0x5a8   : > { %v972_v38 = vpop.f32.mrf.mxu1 }
 0x5a9   : > { %v1046_v39 = vsel %vm680_vm3, %v1041_v36, 0  ;;  %v2047_v36 = vld [vmem:[%s2831_s8 + $0x2] ss:$0 sm:$0xff] }
 0x5aa   : > { %v2214_v40 = vpop.f32.mrf.mxu1  ;;  %2224 = vmatpush3.bf16.xpose.msra.mxu1 %v1046_v39 }
 0x5ab   : > { %2235 = vmatprep.subr.bf16.mxu1 %v2402_v8 }
 0x5b1   : > { %2226 = vmatmul.mubr.msk.bf16.vlgmr.msra.gmra.mxu1 %vm680_vm3, %v1040_v42 }
 0x5b2   : > { %2237 = vmatprep.mubr.msk.bf16.mxu1 %vm2403_vm1, %v2402_v8  ;;  %2236 = vmatpush3.bf16.msra.mxu1 %v1157_v5 }
 0x5b3   : > { %2249 = vmatprep.subr.bf16.mxu1 %v2402_v8 }
 0x671   : > { %v1082_v46 = vpop.f32.mrf.mxu1 }
 0x672   : > { %v1088_v47 = vmul.f32 0.35355338, %v1082_v46  ;;  %v2353_v46 = vld [vmem:[%s2832_s9 + $0x28] sm:$0xff]  }
 0x673   : > { %v2227_v48 = vpop.f32.mrf.mxu1 }
 0x674   : > { %v1089_v49 = vsel %vm2572_vm4, %v1088_v47, -3.4028235e+38  ;;  %v2354_v47 = vld [vmem:[%s2832_s9 + $0x20] sm:$0xff]  }
 0x675   : > { %v1085_v50 = vpop.f32.mrf.mxu1  ;;  %v1090_v51 = vsel %vm729_vm5, %v1089_v49, -inf }
 0x676   : > { %1091 = vmax.xlane.f32.xlu0 %v1090_v51 }
 0x677   : > { %v2228_v52 = vpop.f32.mrf.mxu1 }
 0x6ff   : > { %v1092_v53 = vpop.xlane.xlu0 %1091 }
 0x700   : > { %v1093_v54 = vsub.f32 %v1089_v49, %v1092_v53 }
 0x702   : > { %v1094_v55 = vmul.f32 1.442695, %v1093_v54 }
 0x704   : > { %2367 = vpow2.f32 %v1094_v55 }
 0x711   : > { %v2368_v56 = vpop.eup %2367 }
 0x712   : > { %v1096_v57 = vsel %vm729_vm5, %v2368_v56, 0.0 }
 0x713   : > { %1097 = vadd.xlane.f32.xlu1 %v1096_v57 }
 0x79c   : > { %v1098_v6 = vpop.xlane.xlu1 %1097 }
 0x79d   : > { %2369 = vrcp.f32 %v1098_v6  ;;  %v2062_v6 = vld [vmem:[%s2834_s11 + $0x8] sm:$0xf] }
 0x7aa   : > { %v2370_v7 = vpop.eup %2369 }
 0x7ab   : > { %v1100_v9 = vmul.f32 %v2370_v7, %v2368_v56  ;;  %v1512_v7 = vsel %vm800_vm8, %v2062_v6, 0 }
 0x7ad   : > { %v1101_v10 = vsel %vm2572_vm4, %v1100_v9, 0.0 }
 0x7ae   : > { %v1102_v12 = vpack.c.bf16 %v1101_v10, %v1101_v10 }
 0x7b0   : > { %2232 = vmatmul.mubr.msk.bf16.vlgmr.msra.gmra.mxu0 %vm744_vm9, %v1102_v12 }
 0x7b1   : > { %2242 = vmatpush3.bf16.msra.mxu0 %v2349_v11  ;;  %2245 = vmatprep.mubr.msk.bf16.mxu0 %vm2403_vm1, %v2402_v8 }
 0x7b2   : > { %2243 = vmatprep.subr.bf16.mxu0 %v2402_v8 }
 0x7b5   : > { %2244 = vmatpush3.bf16.msra.mxu0 %v2350_v14  ;;  %v2355_v14 = vld [vmem:[%s2828_s5 + $0x38] sm:$0xff]  }
 0x7b6   : > { %2257 = vmatprep.subr.bf16.mxu0 %v2402_v8 }
 0x7b8   : > { %2246 = vmatmul.mubr.msk.bf16.vlgmr.msra.gmra.mxu0 %vm505_vm2, %v2542_v23 }
 0x7b9   : > { %2261 = vmatprep.mubr.msk.bf16.mxu0 %vm2403_vm1, %v2402_v8  ;;  %2258 = vmatpush3.bf16.msra.mxu0 %v2353_v46 }
 0x7ba   : > { %2259 = vmatprep.subr.bf16.mxu0 %v2402_v8 }
 0x7bd   : > { %2260 = vmatpush3.bf16.msra.mxu0 %v2354_v47 }
 0x7be   : > { %2271 = vmatprep.subr.bf16.mxu0 %v2402_v8 }
 0x7c0   : > { %2262 = vmatmul.mubr.msk.bf16.vlgmr.msra.gmra.mxu0 %vm505_vm2, %v2528_v13 }
 0x7c1   : > { %2273 = vmatprep.mubr.msk.bf16.mxu0 %vm2403_vm1, %v2402_v8 }
 0x870   : > { %v1144_v15 = vpop.f32.mrf.mxu0 }
 0x871   : > { %v1150_v17 = vpack.c.bf16 %v1144_v15, %v1144_v15 }
 0x872   : > { %v2233_v18 = vpop.f32.mrf.mxu0 }
 0x873   : > { %2238 = vmatmul.mubr.msk.bf16.vlgmr.msra.gmra.mxu1 %vm680_vm3, %v1150_v17  ;;  %v2357_v18 = vld [vmem:[%s2830_s7 + $0x38] sm:$0xff]  }
 0x874   : > { %v1147_v19 = vpop.f32.mrf.mxu0  ;;  %2250 = vmatpush3.bf16.msra.mxu1 %v2351_v16  ;;  %2253 = vmatprep.mubr.msk.bf16.mxu1 %vm2403_vm1, %v2402_v8  ;;  %v2356_v16 = vld [vmem:[%s2828_s5 + $0x30] sm:$0xff]  }
 0x875   : > { %2251 = vmatprep.subr.bf16.mxu1 %v2402_v8 }
 0x876   : > { %v2234_v21 = vpop.f32.mrf.mxu0 }
 0x878   : > { %v1259_v22 = vpop.f32.mrf.mxu0  ;;  %2252 = vmatpush3.bf16.msra.mxu1 %v2352_v20 }
 0x879   : > { %2265 = vmatprep.subr.bf16.mxu1 %v2402_v8  ;;  %v1260_v43 = vadd.f32 %v2038_v0, %v1259_v22  ;;  %v2358_v22 = vld [vmem:[%s2830_s7 + $0x30] sm:$0xff]  }
 0x87a   : > { %v2247_v24 = vpop.f32.mrf.mxu0 }
 0x87b   : > { %2254 = vmatmul.mubr.msk.bf16.vlgmr.msra.gmra.mxu1 %vm505_vm2, %v2528_v13  ;;  %v1395_v44 = vpack.c.bf16 %v1260_v43, %v1260_v43  ;;  %v2359_v43 = vld [vmem:[%s2832_s9 + $0x38] sm:$0xff]  }
 0x87c   : > { %v1262_v25 = vpop.f32.mrf.mxu0  ;;  %2267 = vmatprep.mubr.msk.bf16.mxu1 %vm2403_vm1, %v2402_v8 }
 0x87e   : > { %v2248_v26 = vpop.f32.mrf.mxu0 }
 0x880   : > { %v1389_v61 = vpop.f32.mrf.mxu0 }
 0x881   : > { %v1390_v63 = vadd.f32 %v2056_v60, %v1389_v61 }
 0x882   : > { %v2263_v1 = vpop.f32.mrf.mxu0 }
 0x883   : > { %v1458_v2 = vpack.c.bf16 %v1390_v63, %v1390_v63 }
 0x884   : > { %v1392_v3 = vpop.f32.mrf.mxu0 }
 0x885   : > { %v1463_v4 = vand.u32 %v1458_v2, %v2583_v62  ;;  %v2093_v2 = vld [vmem:[%s2834_s11 + $0xc] sm:$0xf] }
 0x886   : > { %v2264_v5 = vpop.f32.mrf.mxu0  ;;  %v1867_v3 = vsel %vm800_vm8, %v2093_v2, 0 }
 0x887   : > { %2272 = vmatpush3.bf16.msra.mxu0 %v1463_v4 }
 0x888   : > { %2283 = vmatprep.subr.bf16.mxu0 %v2402_v8 }
 0x933   : > { %v1193_v31 = vpop.f32.mrf.mxu1 }
 0x934   : > { %v2700_v32 = vadd.f32 %v1193_v31, %v844_v30 }
 0x935   : > { %v2239_v33 = vpop.f32.mrf.mxu1 }
 0x937   : > { %v1196_v34 = vpop.f32.mrf.mxu1 }
 0x939   : > { %v2240_v35 = vpop.f32.mrf.mxu1 }
 0x93a   : > { %v2078_v35 = vld [vmem:[%s2831_s8 + $0x3] ss:$0 sm:$0xff] }
 0x93b   : > { %v1324_v37 = vpop.f32.mrf.mxu1 }
 0x93c   : > { %v1325_v38 = vadd.f32 %v2047_v36, %v1324_v37 }
 0x93d   : > { %v2255_v39 = vpop.f32.mrf.mxu1 }
 0x93e   : > { %v1396_v40 = vpack.c.bf16 %v1325_v38, %v1325_v38 }
 0x93f   : > { %v1327_v41 = vpop.f32.mrf.mxu1 }
 0x940   : > { %v1401_v28 = vsel %vm680_vm3, %v1396_v40, 0  ;;  %v2069_v40 = vld [vmem:[%s2829_s6 + $0x3] ss:$0 sm:$0xff] }
 0x941   : > { %v2256_v42 = vpop.f32.mrf.mxu1  ;;  %2266 = vmatpush3.bf16.xpose.msra.mxu1 %v1401_v28 }
 0x942   : > { %2277 = vmatprep.subr.bf16.mxu1 %v2402_v8 }
 0x948   : > { %2268 = vmatmul.mubr.msk.bf16.vlgmr.msra.gmra.mxu1 %vm680_vm3, %v1395_v44  ;;  %v2360_v44 = vld [vmem:[%s2832_s9 + $0x30] sm:$0xff]  }
 0x949   : > { %2279 = vmatprep.mubr.msk.bf16.mxu1 %vm2403_vm1, %v2402_v8  ;;  %2278 = vmatpush3.bf16.msra.mxu1 %v1512_v7 }
 0x94a   : > { %2291 = vmatprep.subr.bf16.mxu1 %v2402_v8 }
 0xa08   : > { %v1437_v48 = vpop.f32.mrf.mxu1 }
 0xa09   : > { %v1443_v49 = vmul.f32 0.35355338, %v1437_v48 }
 0xa0a   : > { %v2269_v50 = vpop.f32.mrf.mxu1 }
 0xa0b   : > { %v1444_v51 = vsel %vm2572_vm4, %v1443_v49, -3.4028235e+38 }
 0xa0c   : > { %v1440_v52 = vpop.f32.mrf.mxu1  ;;  %v1445_v53 = vsel %vm729_vm5, %v1444_v51, -inf }
 0xa0d   : > { %1446 = vmax.xlane.f32.xlu0 %v1445_v53 }
 0xa0e   : > { %v2270_v54 = vpop.f32.mrf.mxu1 }
 0xa96   : > { %v1447_v55 = vpop.xlane.xlu0 %1446 }
 0xa97   : > { %v1448_v56 = vsub.f32 %v1444_v51, %v1447_v55 }
 0xa99   : > { %v1449_v57 = vmul.f32 1.442695, %v1448_v56 }
 0xa9b   : > { %2371 = vpow2.f32 %v1449_v57 }
 0xaa8   : > { %v2372_v58 = vpop.eup %2371 }
 0xaa9   : > { %v1451_v59 = vsel %vm729_vm5, %v2372_v58, 0.0 }
 0xaaa   : > { %1452 = vadd.xlane.f32.xlu1 %v1451_v59  ;;  %v2087_v59 = vld [vmem:[%s2833_s10 + $0x3] ss:$0 sm:$0xff] }
 0xb33   : > { %v1453_v9 = vpop.xlane.xlu1 %1452 }
 0xb34   : > { %2373 = vrcp.f32 %v1453_v9 }
 0xb41   : > { %v2374_v10 = vpop.eup %2373 }
 0xb42   : > { %v1455_v11 = vmul.f32 %v2374_v10, %v2372_v58 }
 0xb44   : > { %v1456_v12 = vsel %vm2572_vm4, %v1455_v11, 0.0 }
 0xb45   : > { %v1457_v15 = vpack.c.bf16 %v1456_v12, %v1456_v12 }
 0xb47   : > { %2274 = vmatmul.mubr.msk.bf16.vlgmr.msra.gmra.mxu0 %vm744_vm9, %v1457_v15 }
 0xb48   : > { %2284 = vmatpush3.bf16.msra.mxu0 %v2355_v14  ;;  %2287 = vmatprep.mubr.msk.bf16.mxu0 %vm2403_vm1, %v2402_v8 }
 0xb49   : > { %2285 = vmatprep.subr.bf16.mxu0 %v2402_v8 }
 0xb4c   : > { %2286 = vmatpush3.bf16.msra.mxu0 %v2356_v16 }
 0xb4d   : > { %2299 = vmatprep.subr.bf16.mxu0 %v2402_v8 }
 0xb4f   : > { %2288 = vmatmul.mubr.msk.bf16.vlgmr.msra.gmra.mxu0 %vm505_vm2, %v2542_v23 }
 0xb50   : > { %2303 = vmatprep.mubr.msk.bf16.mxu0 %vm2403_vm1, %v2402_v8  ;;  %2300 = vmatpush3.bf16.msra.mxu0 %v2359_v43 }
 0xb51   : > { %2301 = vmatprep.subr.bf16.mxu0 %v2402_v8 }
 0xb54   : > { %2302 = vmatpush3.bf16.msra.mxu0 %v2360_v44 }
 0xb55   : > { %2313 = vmatprep.subr.bf16.mxu0 %v2402_v8 }
 0xb57   : > { %2304 = vmatmul.mubr.msk.bf16.vlgmr.msra.gmra.mxu0 %vm505_vm2, %v2528_v13 }
 0xb58   : > { %2315 = vmatprep.mubr.msk.bf16.mxu0 %vm2403_vm1, %v2402_v8 }
 0xc07   : > { %v1499_v17 = vpop.f32.mrf.mxu0 }
 0xc08   : > { %v1505_v19 = vpack.c.bf16 %v1499_v17, %v1499_v17 }
 0xc09   : > { %v2275_v20 = vpop.f32.mrf.mxu0 }
 0xc0a   : > { %2280 = vmatmul.mubr.msk.bf16.vlgmr.msra.gmra.mxu1 %vm680_vm3, %v1505_v19 }
 0xc0b   : > { %v1502_v21 = vpop.f32.mrf.mxu0  ;;  %2292 = vmatpush3.bf16.msra.mxu1 %v2357_v18  ;;  %2295 = vmatprep.mubr.msk.bf16.mxu1 %vm2403_vm1, %v2402_v8 }
 0xc0c   : > { %2293 = vmatprep.subr.bf16.mxu1 %v2402_v8 }
 0xc0d   : > { %v2276_v23 = vpop.f32.mrf.mxu0 }
 0xc0f   : > { %v1614_v24 = vpop.f32.mrf.mxu0  ;;  %2294 = vmatpush3.bf16.msra.mxu1 %v2358_v22 }
 0xc10   : > { %2307 = vmatprep.subr.bf16.mxu1 %v2402_v8  ;;  %v1615_v28 = vadd.f32 %v2069_v40, %v1614_v24 }
 0xc11   : > { %v2289_v25 = vpop.f32.mrf.mxu0 }
 0xc12   : > { %2296 = vmatmul.mubr.msk.bf16.vlgmr.msra.gmra.mxu1 %vm505_vm2, %v2528_v13  ;;  %v1750_v42 = vpack.c.bf16 %v1615_v28, %v1615_v28 }
 0xc13   : > { %v1617_v26 = vpop.f32.mrf.mxu0  ;;  %2309 = vmatprep.mubr.msk.bf16.mxu1 %vm2403_vm1, %v2402_v8 }
 0xc15   : > { %v2290_v27 = vpop.f32.mrf.mxu0 }
 0xcca   : > { %v1548_v29 = vpop.f32.mrf.mxu1 }
 0xccb   : > { %v2772_v30 = vadd.f32 %v1548_v29, %v2700_v32 }
 0xccc   : > { %v2281_v31 = vpop.f32.mrf.mxu1 }
 0xcce   : > { %v1551_v33 = vpop.f32.mrf.mxu1 }
 0xcd0   : > { %v2282_v34 = vpop.f32.mrf.mxu1 }
 0xcd2   : > { %v1679_v36 = vpop.f32.mrf.mxu1 }
 0xcd3   : > { %v1680_v37 = vadd.f32 %v2078_v35, %v1679_v36 }
 0xcd4   : > { %v2297_v38 = vpop.f32.mrf.mxu1 }
 0xcd5   : > { %v1751_v39 = vpack.c.bf16 %v1680_v37, %v1680_v37 }
 0xcd6   : > { %v1682_v0 = vpop.f32.mrf.mxu1 }
 0xcd7   : > { %v1756_v41 = vsel %vm680_vm3, %v1751_v39, 0 }
 0xcd8   : > { %v2298_v32 = vpop.f32.mrf.mxu1  ;;  %2308 = vmatpush3.bf16.xpose.msra.mxu1 %v1756_v41 }
 0xcd9   : > { %2319 = vmatprep.subr.bf16.mxu1 %v2402_v8 }
 0xcdf   : > { %2310 = vmatmul.mubr.msk.bf16.vlgmr.msra.gmra.mxu1 %vm680_vm3, %v1750_v42 }
 0xce0   : > { %2321 = vmatprep.mubr.msk.bf16.mxu1 %vm2403_vm1, %v2402_v8  ;;  %v1744_v8 = vpop.f32.mrf.mxu0  ;;  %2320 = vmatpush3.bf16.msra.mxu1 %v1867_v3 }
 0xce1   : > { %v1745_v61 = vadd.f32 %v2087_v59, %v1744_v8 }
 0xce2   : > { %v2305_v57 = vpop.f32.mrf.mxu0 }
 0xce3   : > { %v1813_v63 = vpack.c.bf16 %v1745_v61, %v1745_v61 }
 0xce4   : > { %v1747_v58 = vpop.f32.mrf.mxu0 }
 0xce5   : > { %v1818_v1 = vand.u32 %v1813_v63, %v2583_v62 }
 0xce6   : > { %v2306_v60 = vpop.f32.mrf.mxu0 }
 0xce7   : > { %2314 = vmatpush3.bf16.msra.mxu0 %v1818_v1 }
 0xd9f   : > { %v1792_v46 = vpop.f32.mrf.mxu1 }
 0xda0   : > { %v1798_v47 = vmul.f32 0.35355338, %v1792_v46 }
 0xda1   : > { %v2311_v48 = vpop.f32.mrf.mxu1 }
 0xda2   : > { %v1799_v49 = vsel %vm2572_vm4, %v1798_v47, -3.4028235e+38 }
 0xda3   : > { %v1795_v50 = vpop.f32.mrf.mxu1  ;;  %v1800_v51 = vsel %vm729_vm5, %v1799_v49, -inf }
 0xda4   : > { %1801 = vmax.xlane.f32.xlu0 %v1800_v51 }
 0xda5   : > { %v2312_v52 = vpop.f32.mrf.mxu1 }
 0xe2d   : > { %v1802_v53 = vpop.xlane.xlu0 %1801 }
 0xe2e   : > { %v1803_v54 = vsub.f32 %v1799_v49, %v1802_v53 }
 0xe30   : > { %v1804_v55 = vmul.f32 1.442695, %v1803_v54 }
 0xe32   : > { %2375 = vpow2.f32 %v1804_v55 }
 0xe3f   : > { %v2376_v56 = vpop.eup %2375 }
 0xe40   : > { %v1806_v13 = vsel %vm729_vm5, %v2376_v56, 0.0 }
 0xe41   : > { %1807 = vadd.xlane.f32.xlu1 %v1806_v13 }
 0xeca   : > { %v1808_v4 = vpop.xlane.xlu1 %1807 }
 0xecb   : > { %2377 = vrcp.f32 %v1808_v4 }
 0xed8   : > { %v2378_v5 = vpop.eup %2377 }
 0xed9   : > { %v1810_v6 = vmul.f32 %v2378_v5, %v2376_v56 }
 0xedb   : > { %v1811_v7 = vsel %vm2572_vm4, %v1810_v6, 0.0 }
 0xedc   : > { %v1812_v9 = vpack.c.bf16 %v1811_v7, %v1811_v7 }
 0xede   : > { %2316 = vmatmul.mubr.msk.bf16.vlgmr.msra.gmra.mxu0 %vm744_vm9, %v1812_v9 }
 0xf9e   : > { %v1854_v62 = vpop.f32.mrf.mxu0 }
 0xf9f   : > { %v1860_v10 = vpack.c.bf16 %v1854_v62, %v1854_v62 }
 0xfa0   : > { %v2317_v11 = vpop.f32.mrf.mxu0 }
 0xfa1   : > { %2322 = vmatmul.mubr.msk.bf16.vlgmr.msra.gmra.mxu1 %vm680_vm3, %v1860_v10 }
 0xfa2   : > { %v1857_v12 = vpop.f32.mrf.mxu0 }
 0xfa4   : > { %v2318_v14 = vpop.f32.mrf.mxu0 }
0x1061   : > { %v1903_v15 = vpop.f32.mrf.mxu1 }
0x1062   : > { %v1909_v16 = vadd.f32 %v1903_v15, %v2772_v30 }
0x1063   : > { %v2323_v45 = vpop.f32.mrf.mxu1 }
0x1064   : > { %1910 = vst.msk [vmem:[%s432_s23] sm:$0x3f] %vm437_vm0, %v1909_v16 }
0x1065   : > { %v1906_v17 = vpop.f32.mrf.mxu1 }
0x1067   : > { %v2324_v18 = vpop.f32.mrf.mxu1 }
0x1068 PF: > { %s29_s30 = sadd.s32 1, %s2399_s30  }
0x1069   : > { %p26_p9 = scmp.ge.s32.totalorder %s29_s30, 4  }
0x106b   :  { %28 = sbr.rel (!%p26_p9) target bundleno = 16 (0x10), region = 122 }

// kernel: _e2e_device_forward.25
= control target key start
LH: loop header
LB: loop body
LE: loop exit
PB: predicated region body
PF: predicated region fallthrough
CT: control target
= control target key end

     0   :  { %vm16_vm0 = vcmask 89088   ;;  %vm20_vm1 = vcmask 84992   ;;  %v190_v3 = vmov 0   ;;  %s240_s0 = inlined_call_operand.vmem [shape: f32[12,11], index: 0, kind: input, shape index: {}]   ;;  %s241_s1 = inlined_call_operand.vmem [shape: s32[12,1], index: 1, kind: input, shape index: {}]   ;;  %s242_s2 = inlined_call_operand.hbm [shape: f32[1,1], index: 2, kind: output, shape index: {}]  }
   0x1   :  { %v212_v0 = vld [vmem:[%s240_s0] sm:$0xff]  ;;  %v217_v1 = vld [vmem:[%s240_s0 + $0x8] sm:$0xf]  ;;  %148 = vset.pattern.permute.xlu1 %v190_v3  ;;  %147 = vset.pattern.permute.xlu0 %v190_v3 }
   0x2   :  { %v17_v2 = vsel %vm16_vm0, %v212_v0, -inf  ;;  %v15_v4 = vld [vmem:[%s241_s1 + $0x8] sm:$0xf] }
   0x3   :  { %18 = vmax.xlane.f32.xlu0 %v17_v2  ;;  %50 = vperm.xlu1 %148, %v15_v4  }
   0x4   :  { %7 = vsyncpa [#allocation3], 0  ;;  %v21_v5 = vsel %vm20_vm1, %v217_v1, -inf  ;;  %v14_v6 = vld [vmem:[%s241_s1] sm:$0xff]  ;;  %vm57_vm2 = vcmp.ne.s32.totalorder %v15_v4, 4294967295  ;;  %v191_v7 = vmov 0.0   ;;  %v44_v24 = vlaneseq }
   0x5   :  { %vm56_vm3 = vcmp.ne.s32.totalorder %v14_v6, 4294967295  ;;  %v138_v8 = vsel %vm57_vm2, 1.0, %v191_v7  ;;  %vm90_vm4 = vcmask 7168   ;;  %vm92_vm5 = vcmask 3072   ;;  %s193_s16 = smov [#allocation2]  }
   0x6   :  { %v137_v9 = vsel %vm56_vm3, 1.0, %v191_v7  ;;  %v93_v22 = vsel %vm92_vm5, %v138_v8, 0.0  ;;  %v45_v26 = vand.u32 127, %v44_v24  ;;  %v192_v28 = vmov 0.01   ;;  %s129_s17 = sshll.u32 %s193_s16, 4  ;;  %s130_s17 = int_to_ptr.vmem [resolvable:$true] %s129_s17 }
   0x7   :  { %22 = vmax.xlane.f32.xlu0 %v21_v5  ;;  %v149_v10 = vpack.i.bf16 %v138_v8, %v137_v9  ;;  %v91_v21 = vsel %vm90_vm4, %v137_v9, 0.0  ;;  %vm121_vm10 = vcmask 0   ;;  %s168_s19 = scalar_lea.vmem %s130_s17, 16  ;;  %s172_s20 = scalar_lea.vmem %s130_s17, 32 }
   0x8   :  { %v94_v23 = vadd.f32 %v93_v22, %v91_v21  ;;  %p169_p0 = scmp.ne.s32.totalorder %s130_s17, %s168_s19  ;;  %p173_p1 = scmp.lt.s32.totalorder %s130_s17, %s130_s17 }
   0x9   :  { %p174_p2 = scmp.lt.s32.totalorder %s172_s20, %s168_s19 }
   0xb   :  { %p175_p3 = por %p174_p2, %p173_p1 }
   0xd   :  { %p176_p4 = pnand %p175_p3, %p169_p0 }
  0x1d   :  { %47 = vperm.xlu0 %147, %v14_v6  }
  0x7e   :  { %v51_v27 = vpop.permute.xlu1 %50 }
  0x7f   :  { %vm53_vm7 = vcmp.eq.s32.totalorder %v45_v26, %v51_v27 }
  0x80   :  { %v55_v31 = vsel %vm53_vm7, 0.9, %v192_v28 }
  0x81   :  { %v65_v32 = vmax.f32 %v55_v31, 1e-30  ;;  %vm63_vm9 = vcmp.gt.f32.partialorder %v55_v31, 0.0 }
  0x8c   :  { %v19_v11 = vpop.xlane.xlu0 %18 }
  0x8d   :  { %v24_v12 = vsub.f32 %v212_v0, %v19_v11 }
  0x8f   :  { %v26_v13 = vmul.f32 1.442695, %v24_v12 }
  0x90   :  { %v23_v14 = vpop.xlane.xlu0 %22 }
  0x91   :  { %154 = vpow2.f32 %v26_v13  ;;  %v25_v15 = vsub.f32 %v217_v1, %v23_v14 }
  0x93   :  { %v28_v16 = vmul.f32 1.442695, %v25_v15 }
  0x95   :  { %156 = vpow2.f32 %v28_v16 }
  0x98   :  { %v48_v25 = vpop.permute.xlu0 %47 }
  0x99   :  { %vm52_vm6 = vcmp.eq.s32.totalorder %v45_v26, %v48_v25 }
  0x9a   :  { %v54_v29 = vsel %vm52_vm6, 0.9, %v192_v28 }
  0x9b   :  { %v64_v30 = vmax.f32 %v54_v29, 1e-30  ;;  %vm62_vm8 = vcmp.gt.f32.partialorder %v54_v29, 0.0 }
  0x9d   :  { %158 = vlog2.f32 %v64_v30 }
  0x9e   :  { %v155_v17 = vpop.eup %154 }
  0x9f   :  { %v30_v18 = vsel %vm16_vm0, %v155_v17, 0.0 }
  0xa0   :  { %31 = vadd.xlane.f32.xlu1 %v30_v18 }
  0xa2   :  { %v157_v19 = vpop.eup %156 }
  0xa3   :  { %v33_v20 = vsel %vm20_vm1, %v157_v19, 0.0 }
  0xa4   :  { %34 = vadd.xlane.f32.xlu1 %v33_v20 }
  0xaa   :  { %v159_v35 = vpop.eup %158 }
  0xab   :  { %v67_v37 = vmul.f32 0.6931472, %v159_v35 }
  0xad   :  { %v70_v43 = vmul.f32 %v67_v37, %v54_v29 }
  0xaf   :  { %v72_v49 = vsel %vm62_vm8, %v70_v43, 0.0 }
  0xb5   :  { %150 = vperm.xlu1 %148, %v149_v10  }
  0xd9   :  { %95 = vadd.xlane.f32.xlu1 %v94_v23 }
 0x129   :  { %v32_v33 = vpop.xlane.xlu1 %31 }
 0x12a   :  { %160 = vlog2.f32 %v32_v33 }
 0x12b   :  { %162 = vlog2.f32 %v65_v32 }
 0x12d   :  { %v35_v34 = vpop.xlane.xlu1 %34 }
 0x12e   :  { %164 = vlog2.f32 %v35_v34 }
 0x131   :  { %v151_v50 = vpop.permute.xlu1 %150 }
 0x132   :  { %v152_v54 = vunpack.i.l.bf16 %v151_v50  ;;  %v153_v57 = vunpack.i.h.bf16 %v151_v50 }
 0x137   :  { %v161_v36 = vpop.eup %160 }
 0x138   :  { %v163_v38 = vpop.eup %162  ;;  %v37_v39 = vmul.f32 0.6931472, %v161_v36 }
 0x139   :  { %v69_v42 = vmul.f32 0.6931472, %v163_v38 }
 0x13a   :  { %v40_v40 = vadd.f32 %v37_v39, %v19_v11 }
 0x13b   :  { %v165_v41 = vpop.eup %164  ;;  %v71_v48 = vmul.f32 %v69_v42, %v55_v31 }
 0x13c   :  { %v42_v44 = vsub.f32 %v212_v0, %v40_v40  ;;  %v39_v45 = vmul.f32 0.6931472, %v165_v41 }
 0x13d   :  { %v73_v55 = vsel %vm63_vm9, %v71_v48, 0.0 }
 0x13e   :  { %v41_v46 = vadd.f32 %v39_v45, %v23_v14  ;;  %v74_v47 = vmul.f32 %v54_v29, %v42_v44 }
 0x140   :  { %v43_v51 = vsub.f32 %v217_v1, %v41_v46  ;;  %v76_v52 = vsub.f32 %v72_v49, %v74_v47 }
 0x142   :  { %v75_v53 = vmul.f32 %v55_v31, %v43_v51  ;;  %v88_v58 = vmul.f32 %v152_v54, %v76_v52 }
 0x144   :  { %v77_v56 = vsub.f32 %v73_v55, %v75_v53  ;;  %v106_v60 = vsel %vm16_vm0, %v88_v58, 0.0 }
 0x146   :  { %v89_v59 = vmul.f32 %v153_v57, %v77_v56 }
 0x148   :  { %v107_v61 = vsel %vm20_vm1, %v89_v59, 0.0 }
 0x149   :  { %v108_v62 = vadd.f32 %v107_v61, %v106_v60 }
 0x14b   :  { %109 = vadd.xlane.f32.xlu0 %v108_v62 }
 0x162   :  { %v96_v63 = vpop.xlane.xlu1 %95 }
 0x163   :  { %v97_v0 = vrot.slane %v96_v63, 4 }
 0x165   :  { %v98_v2 = vadd.f32 %v97_v0, %v96_v63 }
 0x167   :  { %v99_v3 = vrot.slane %v98_v2, 2 }
 0x169   :  { %v100_v4 = vadd.f32 %v99_v3, %v98_v2 }
 0x16b   :  { %v101_v1 = vrot.slane %v100_v4, 1 }
 0x16d   :  { %v102_v5 = vadd.f32 %v101_v1, %v100_v4 }
 0x16f   :  { %139 = vpush %v102_v5 }
 0x1a0   :  { %s140_s1 = spop %139 }
 0x1a1   :  { %v104_v13 = vstv %s140_s1 }
 0x1a2   :  { %v105_v14 = vmax.f32 %v104_v13, 1.0 }
 0x1a4   :  { %166 = vrcp.f32 %v105_v14 }
 0x1b1   :  { %v167_v15 = vpop.eup %166 }
 0x1d4   :  { %v110_v6 = vpop.xlane.xlu0 %109 }
 0x1d5   :  { %v111_v7 = vrot.slane %v110_v6, 4 }
 0x1d7   :  { %v112_v8 = vadd.f32 %v111_v7, %v110_v6 }
 0x1d9   :  { %v113_v9 = vrot.slane %v112_v8, 2 }
 0x1db   :  { %v114_v10 = vadd.f32 %v113_v9, %v112_v8 }
 0x1dd   :  { %v115_v11 = vrot.slane %v114_v10, 1 }
 0x1df   :  { %v116_v12 = vadd.f32 %v115_v11, %v114_v10 }
 0x1e1   :  { %141 = vpush %v116_v12 }
 0x212   :  { %s142_s18 = spop %141 }
 0x213   :  { %v118_v16 = vstv %s142_s18 }
 0x214   :  { %v120_v17 = vmul.f32 %v167_v15, %v118_v16 }
 0x216   :  { %122 = vst.msk [vmem:[#allocation2] sm:$0x1] %vm121_vm10, %v120_v17 }
 0x217   :  { %179 = shalt.err (!%p176_p4)
}
 0x218   :  { %132 = dma.vmem_to_hbm [thread:$0]  %s130_s17, 16, %s242_s2, [#allocation3]  }
 0x219   :  { %188 = dma.done.wait [#allocation3], 16  }
 0x21a   :  { %189 = vsyncadd [#allocation3], 4294967280 }
 0x21b   :  { %136 = vsyncpa [#allocation3], 1 }

</bundles_post_ra>
